<compile_context>
chip_gen: v7x
topology: tpu7x:2x2x1
jax: 0.10.0
libtpu: 0.0.40
codegen_flags: <defaults>
</compile_context>

<pallas_src>
import functools

import jax
import jax.numpy as jnp
import numpy as np
from jax.experimental import pallas as pl
from jax.experimental.pallas import tpu as pltpu


_LN_EPS = 1e-6   # OpenNMT LayerNorm default; see TODO above.
_BN_EPS = 1e-5   # PyTorch BatchNorm1d default.
_NUM_HEADS = (16, 16, 8)   # per spec


# ----------------------------------------------------------------------------
# Host-side constant masks (computed once, passed as kernel operands)
# ----------------------------------------------------------------------------

@functools.lru_cache(maxsize=None)
def _attn_masks(t_len, num_heads, d_model):
    """Constant 0/1 matrices for lane-dense all-head attention.

    Blocked row layout: expansion row r = head * t_len + query_time.
      rep[r, i] = 1  iff i == r % t_len          (replicates Q rows per head)
      hm [r, c] = 1  iff feature c belongs to head r // t_len
      col        = rep.T                         (collapses heads back to T)
    """
    hd = d_model // num_heads
    r = np.arange(num_heads * t_len)
    rep = (r[:, None] % t_len == np.arange(t_len)[None, :]).astype(np.float32)
    hm = ((np.arange(d_model)[None, :] // hd) ==
          (r[:, None] // t_len)).astype(np.float32)
    col = np.ascontiguousarray(rep.T)
    return rep, hm, col


# ----------------------------------------------------------------------------
# In-kernel helpers
# ----------------------------------------------------------------------------

def _layer_norm(x, gamma, beta, eps):
    mu = jnp.mean(x, axis=-1, keepdims=True)
    xc = x - mu
    var = jnp.mean(xc * xc, axis=-1, keepdims=True)
    return xc * jax.lax.rsqrt(var + eps) * gamma + beta


def _transformer_block(x, refs, num_heads, eps):
    """Pre-norm transformer encoder layer, all heads computed at once.

    Q is expanded block-diagonally to (nh*T, D) so every score row holds one
    (query, head) pair -> per-head softmax max/sum are simple lane reductions.
    """
    (ln1g, ln1b, wqkv, bqkv, wo, bo, ln2g, ln2b,
     w1, b1, w2, b2, rep, hm, col) = refs
    t_len, d = x.shape
    hd = d // num_heads
    scale = 1.0 / float(hd) ** 0.5

    # ---- LN1 + fused QKV projection --------------------------------------
    h = _layer_norm(x, ln1g[...], ln1b[...], eps)
    qkv = jnp.dot(h, wqkv[...], preferred_element_type=jnp.float32) + bqkv[...]
    q = qkv[:, :d] * scale
    k = qkv[:, d:2 * d]
    v = qkv[:, 2 * d:]

    # ---- block-diagonal Q expansion (precomputed constants) --------------
    mask = hm[...]                                              # (nh*T, D)
    q_exp = jnp.dot(rep[...], q, preferred_element_type=jnp.float32) * mask

    # ---- per-(query, head) scores + exact per-head softmax ---------------
    s = jax.lax.dot_general(q_exp, k, (((1,), (1,)), ((), ())),
                            preferred_element_type=jnp.float32)  # (nh*T, T)
    m = jnp.max(s, axis=-1, keepdims=True)                       # per head!
    p = jnp.exp(s - m)
    inv = 1.0 / jnp.sum(p, axis=-1, keepdims=True)               # exact

    # ---- context: weight V, mask to own head, collapse heads -------------
    pv = jnp.dot(p, v, preferred_element_type=jnp.float32)       # (nh*T, D)
    pv = pv * mask * inv
    ctx = jnp.dot(col[...], pv, preferred_element_type=jnp.float32)  # (T, D)

    # ---- output projection + residual ------------------------------------
    attn = jnp.dot(ctx, wo[...], preferred_element_type=jnp.float32)
    attn = attn + bo[...] + x

    # ---- LN2 + FFN + residual (dropout = identity in eval) ---------------
    h2 = _layer_norm(attn, ln2g[...], ln2b[...], eps)
    inter = jnp.maximum(
        jnp.dot(h2, w1[...], preferred_element_type=jnp.float32) + b1[...], 0.0)
    ff = jnp.dot(inter, w2[...], preferred_element_type=jnp.float32) + b2[...]
    return ff + attn


# ----------------------------------------------------------------------------
# Single fused kernel: whole network for one batch element
# ----------------------------------------------------------------------------

def _net_kernel(*refs, conv_cfg, tf_after, eps_ln):
    n_tf = len(tf_after)
    x_ref = refs[0]
    fcin_w, fcin_b, bnin_s, bnin_t = refs[1:5]
    convw, convb, cbn_s, cbn_t = refs[5:9]
    tf_refs = [refs[9 + 15 * i: 9 + 15 * (i + 1)] for i in range(n_tf)]
    fco_w, fco_b = refs[9 + 15 * n_tf: 11 + 15 * n_tf]
    o_ref = refs[11 + 15 * n_tf]
    tf_map = {l: (i, nh) for i, (l, nh) in enumerate(tf_after)}

    # ---- fc_in -> ReLU -> bn_in (eval affine) -----------------------------
    h = jnp.dot(x_ref[0], fcin_w[...], preferred_element_type=jnp.float32)
    h = jnp.maximum(h + fcin_b[...], 0.0) * bnin_s[...] + bnin_t[...]

    # ---- TDNN stack with interleaved transformer layers -------------------
    for l, (dil, stride) in enumerate(conv_cfg):
        t_full = h.shape[0] - 2 * dil
        # 3-tap conv as a single K=3*nhid matmul: lane-concat shifted slices.
        x_cat = jnp.concatenate(
            [h[kh * dil: kh * dil + t_full, :] for kh in range(3)], axis=1)
        acc = jnp.dot(x_cat, convw[l], preferred_element_type=jnp.float32)
        if stride != 1:
            t_next = (t_full - 1) // stride + 1
            acc = jnp.concatenate(
                [acc[i * stride: i * stride + 1, :] for i in range(t_next)],
                axis=0)
        h = jnp.maximum(acc + convb[l], 0.0) * cbn_s[l] + cbn_t[l]
        if l in tf_map:
            idx, nh = tf_map[l]
            h = _transformer_block(h, tf_refs[idx], nh, eps_ln)

    # ---- bn_final is folded into fc_out weights (prepare_params) ----------
    y = jnp.dot(h, fco_w[...], preferred_element_type=jnp.float32) + fco_b[...]
    o_ref[0] = y.astype(o_ref.dtype)


# ----------------------------------------------------------------------------
# Forward pass wrapper (one pallas_call for the whole network)
# ----------------------------------------------------------------------------

def net_forward(params, x, *, frame_offset=0):
    bsz, t_in, in_dim = x.shape
    nhid = params['fcin_w'].shape[1]
    out_dim = params['fco_w'].shape[1]
    n_layers = params['convw'].shape[0]

    # Static schedule: per-layer (dilation, stride) and transformer inserts.
    conv_cfg, tf_sched = [], []
    t = t_in
    for l in range(n_layers):
        dil = 1 if l < 3 else 3
        stride = 4 if l == n_layers - 1 else 1
        t = (t - 2 * dil - 1) // stride + 1
        conv_cfg.append((dil, stride))
        if (l + 1) % 3 == 0 and (l // 3) < len(params['transformers']):
            tf_sched.append((l, l // 3, _NUM_HEADS[l // 3], t))
    t_out = t

    args = [x, params['fcin_w'], params['fcin_b'],
            params['bnin_s'], params['bnin_t'],
            params['convw'], params['convb'], params['convs'], params['convt']]
    for (_, ti, nh, t_l) in tf_sched:
        tp = params['transformers'][ti]
        rep, hm, col = _attn_masks(t_l, nh, nhid)
        args += [tp['ln1_g'], tp['ln1_b'], tp['wqkv'], tp['bqkv'],
                 tp['wo'], tp['bo'], tp['ln2_g'], tp['ln2_b'],
                 tp['w1'], tp['b1'], tp['w2'], tp['b2'], rep, hm, col]
    args += [params['fco_w'], params['fco_b']]

    def bcast_spec(a):
        zeros = (0,) * a.ndim
        return pl.BlockSpec(a.shape, lambda i, _z=zeros: _z)

    in_specs = ([pl.BlockSpec((1, t_in, in_dim), lambda i: (i, 0, 0))] +
                [bcast_spec(a) for a in args[1:]])

    kernel = functools.partial(
        _net_kernel,
        conv_cfg=tuple(conv_cfg),
        tf_after=tuple((l, nh) for (l, _, nh, _) in tf_sched),
        eps_ln=_LN_EPS)

    y = pl.pallas_call(
        kernel,
        out_shape=jax.ShapeDtypeStruct((bsz, t_out, out_dim), jnp.float32),
        grid=(bsz,),
        in_specs=in_specs,
        out_specs=pl.BlockSpec((1, t_out, out_dim), lambda i: (i, 0, 0)),
        compiler_params=pltpu.CompilerParams(
            dimension_semantics=("parallel",)),
    )(*args)
    return y[:, frame_offset:, :]


# ----------------------------------------------------------------------------
# Parameters: PyTorch-layout init + one-time kernel-layout preparation
# ----------------------------------------------------------------------------

def init_params(key, in_dim, out_dim, nhid, tdnn_layers):
    assert tdnn_layers > 3 + 1
    keys = iter(jax.random.split(key, 512))

    def nrm(shape, scl=0.1):
        return (scl * jax.random.normal(next(keys), shape)).astype(jnp.float32)

    def bn_params():
        return dict(
            gamma=1.0 + nrm((nhid,)),
            beta=nrm((nhid,)),
            mean=nrm((nhid,)),
            var=1.0 + 0.1 * jnp.abs(
                jax.random.normal(next(keys), (nhid,))).astype(jnp.float32),
        )

    p = dict(
        fc_in_w=nrm((nhid, in_dim)), fc_in_b=nrm((nhid,)),
        bn_in=bn_params(),
        convs=[], bns=[], transformers=[],
        bn_final=bn_params(),
        fc_out_w=nrm((out_dim, nhid)), fc_out_b=nrm((out_dim,)),
    )
    for _ in range(tdnn_layers):
        p['convs'].append(dict(w=nrm((nhid, 1, 3, nhid)), b=nrm((nhid,))))
        p['bns'].append(bn_params())
    ff = 4 * nhid
    for _ in range(3):
        p['transformers'].append(dict(
            ln1_g=1.0 + nrm((nhid,)), ln1_b=nrm((nhid,)),
            wq=nrm((nhid, nhid)), bq=nrm((nhid,)),
            wk=nrm((nhid, nhid)), bk=nrm((nhid,)),
            wv=nrm((nhid, nhid)), bv=nrm((nhid,)),
            wo=nrm((nhid, nhid)), bo=nrm((nhid,)),
            ln2_g=1.0 + nrm((nhid,)), ln2_b=nrm((nhid,)),
            w1=nrm((ff, nhid)), b1=nrm((ff,)),
            w2=nrm((nhid, ff)), b2=nrm((nhid,)),
        ))
    return p


def prepare_params(raw, bn_eps=_BN_EPS):
    """One-time weight re-layout: transpose Linear weights to (K, N), merge the
    3 conv taps into one (3*H, nhid) matrix (stacked over layers), concatenate
    Wq/Wk/Wv, fold eval-mode BatchNorms (bn_final folded into fc_out)."""
    def bn_fold(bn):
        s = bn['gamma'] / jnp.sqrt(bn['var'] + bn_eps)
        t = bn['beta'] - bn['mean'] * s
        return s, t

    nhid = raw['fc_in_w'].shape[0]
    s_in, t_in = bn_fold(raw['bn_in'])

    convw, convb, convs, convt = [], [], [], []
    for conv, bn in zip(raw['convs'], raw['bns']):
        # Conv2d weight (nhid, 1, 3, H) -> taps (3, H, nhid) -> (3*H, nhid)
        taps = jnp.transpose(conv['w'][:, 0, :, :], (1, 2, 0))
        convw.append(taps.reshape(3 * taps.shape[1], nhid))
        convb.append(conv['b'].reshape(1, nhid))
        s, t = bn_fold(bn)
        convs.append(s.reshape(1, nhid))
        convt.append(t.reshape(1, nhid))

    transformers = []
    for tp in raw['transformers']:
        wqkv = jnp.concatenate([tp['wq'].T, tp['wk'].T, tp['wv'].T], axis=1)
        bqkv = jnp.concatenate([tp['bq'], tp['bk'], tp['bv']]).reshape(1, -1)
        transformers.append(dict(
            ln1_g=tp['ln1_g'].reshape(1, -1), ln1_b=tp['ln1_b'].reshape(1, -1),
            wqkv=wqkv, bqkv=bqkv,
            wo=tp['wo'].T, bo=tp['bo'].reshape(1, -1),
            ln2_g=tp['ln2_g'].reshape(1, -1), ln2_b=tp['ln2_b'].reshape(1, -1),
            w1=tp['w1'].T, b1=tp['b1'].reshape(1, -1),
            w2=tp['w2'].T, b2=tp['b2'].reshape(1, -1)))

    # bn_final (pure affine in eval) folded into fc_out:
    #   fc_out(h*s + t) = h @ (s[:,None]*W^T) + (b + t @ W^T)
    s_f, t_f = bn_fold(raw['bn_final'])
    w_t = raw['fc_out_w'].T                                     # (nhid, out)
    return dict(
        fcin_w=raw['fc_in_w'].T, fcin_b=raw['fc_in_b'].reshape(1, -1),
        bnin_s=s_in.reshape(1, -1), bnin_t=t_in.reshape(1, -1),
        convw=jnp.stack(convw), convb=jnp.stack(convb),
        convs=jnp.stack(convs), convt=jnp.stack(convt),
        transformers=transformers,
        fco_w=w_t * s_f[:, None],
        fco_b=(raw['fc_out_b'] + t_f @ w_t).reshape(1, -1))


# ----------------------------------------------------------------------------
# Main
# ----------------------------------------------------------------------------

if __name__ == "__main__":
    B, T = 2, 40
    INPUT_DIM, OUTPUT_DIM, TDNN_NHID, TDNN_LAYERS = 16, 16, 32, 7

    raw_params = init_params(jax.random.PRNGKey(42),
                             INPUT_DIM, OUTPUT_DIM, TDNN_NHID, TDNN_LAYERS)
    params = prepare_params(raw_params)
    x = jax.random.normal(jax.random.PRNGKey(0), (B, T, INPUT_DIM),
                          dtype=jnp.float32)

    fwd = jax.jit(net_forward)
    y = fwd(params, x)
    jax.block_until_ready(y)

    # T=40 -> 38 -> 36 -> 34 (tf) -> 28 -> 22 -> 16 (tf) -> strided conv -> 3
    assert y.shape == (B, 3, OUTPUT_DIM), y.shape
    assert bool(jnp.all(jnp.isfinite(y)))
    print("KERNEL_OK")
</pallas_src>

<mosaic_0001>
module attributes {stable_mosaic.version = 11 : i64} {
  func.func @_net_kernel(%arg0: i32, %arg1: memref<1x40x16xf32, #tpu.memory_space<vmem>>, %arg2: memref<16x32xf32, #tpu.memory_space<vmem>>, %arg3: memref<1x32xf32, #tpu.memory_space<vmem>>, %arg4: memref<1x32xf32, #tpu.memory_space<vmem>>, %arg5: memref<1x32xf32, #tpu.memory_space<vmem>>, %arg6: memref<7x96x32xf32, #tpu.memory_space<vmem>>, %arg7: memref<7x1x32xf32, #tpu.memory_space<vmem>>, %arg8: memref<7x1x32xf32, #tpu.memory_space<vmem>>, %arg9: memref<7x1x32xf32, #tpu.memory_space<vmem>>, %arg10: memref<1x32xf32, #tpu.memory_space<vmem>>, %arg11: memref<1x32xf32, #tpu.memory_space<vmem>>, %arg12: memref<32x96xf32, #tpu.memory_space<vmem>>, %arg13: memref<1x96xf32, #tpu.memory_space<vmem>>, %arg14: memref<32x32xf32, #tpu.memory_space<vmem>>, %arg15: memref<1x32xf32, #tpu.memory_space<vmem>>, %arg16: memref<1x32xf32, #tpu.memory_space<vmem>>, %arg17: memref<1x32xf32, #tpu.memory_space<vmem>>, %arg18: memref<32x128xf32, #tpu.memory_space<vmem>>, %arg19: memref<1x128xf32, #tpu.memory_space<vmem>>, %arg20: memref<128x32xf32, #tpu.memory_space<vmem>>, %arg21: memref<1x32xf32, #tpu.memory_space<vmem>>, %arg22: memref<544x34xf32, #tpu.memory_space<vmem>>, %arg23: memref<544x32xf32, #tpu.memory_space<vmem>>, %arg24: memref<34x544xf32, #tpu.memory_space<vmem>>, %arg25: memref<1x32xf32, #tpu.memory_space<vmem>>, %arg26: memref<1x32xf32, #tpu.memory_space<vmem>>, %arg27: memref<32x96xf32, #tpu.memory_space<vmem>>, %arg28: memref<1x96xf32, #tpu.memory_space<vmem>>, %arg29: memref<32x32xf32, #tpu.memory_space<vmem>>, %arg30: memref<1x32xf32, #tpu.memory_space<vmem>>, %arg31: memref<1x32xf32, #tpu.memory_space<vmem>>, %arg32: memref<1x32xf32, #tpu.memory_space<vmem>>, %arg33: memref<32x128xf32, #tpu.memory_space<vmem>>, %arg34: memref<1x128xf32, #tpu.memory_space<vmem>>, %arg35: memref<128x32xf32, #tpu.memory_space<vmem>>, %arg36: memref<1x32xf32, #tpu.memory_space<vmem>>, %arg37: memref<256x16xf32, #tpu.memory_space<vmem>>, %arg38: memref<256x32xf32, #tpu.memory_space<vmem>>, %arg39: memref<16x256xf32, #tpu.memory_space<vmem>>, %arg40: memref<32x16xf32, #tpu.memory_space<vmem>>, %arg41: memref<1x16xf32, #tpu.memory_space<vmem>>, %arg42: memref<1x3x16xf32, #tpu.memory_space<vmem>>) attributes {dimension_semantics = [#tpu.dimension_semantics<parallel>], iteration_bounds = array<i64: 2>, scalar_prefetch = 0 : i64, scratch_operands = 0 : i64, tpu.core_type = #tpu.core_type<tc>, window_params = [{transform_indices = @transform_0, window_bounds = array<i64: 1, 40, 16>}, {pipeline_mode = #tpu.pipeline_mode<synchronous>, transform_indices = @transform_1, window_bounds = array<i64: 16, 32>}, {pipeline_mode = #tpu.pipeline_mode<synchronous>, transform_indices = @transform_2, window_bounds = array<i64: 1, 32>}, {pipeline_mode = #tpu.pipeline_mode<synchronous>, transform_indices = @transform_3, window_bounds = array<i64: 1, 32>}, {pipeline_mode = #tpu.pipeline_mode<synchronous>, transform_indices = @transform_4, window_bounds = array<i64: 1, 32>}, {pipeline_mode = #tpu.pipeline_mode<synchronous>, transform_indices = @transform_5, window_bounds = array<i64: 7, 96, 32>}, {pipeline_mode = #tpu.pipeline_mode<synchronous>, transform_indices = @transform_6, window_bounds = array<i64: 7, 1, 32>}, {pipeline_mode = #tpu.pipeline_mode<synchronous>, transform_indices = @transform_7, window_bounds = array<i64: 7, 1, 32>}, {pipeline_mode = #tpu.pipeline_mode<synchronous>, transform_indices = @transform_8, window_bounds = array<i64: 7, 1, 32>}, {pipeline_mode = #tpu.pipeline_mode<synchronous>, transform_indices = @transform_9, window_bounds = array<i64: 1, 32>}, {pipeline_mode = #tpu.pipeline_mode<synchronous>, transform_indices = @transform_10, window_bounds = array<i64: 1, 32>}, {pipeline_mode = #tpu.pipeline_mode<synchronous>, transform_indices = @transform_11, window_bounds = array<i64: 32, 96>}, {pipeline_mode = #tpu.pipeline_mode<synchronous>, transform_indices = @transform_12, window_bounds = array<i64: 1, 96>}, {pipeline_mode = #tpu.pipeline_mode<synchronous>, transform_indices = @transform_13, window_bounds = array<i64: 32, 32>}, {pipeline_mode = #tpu.pipeline_mode<synchronous>, transform_indices = @transform_14, window_bounds = array<i64: 1, 32>}, {pipeline_mode = #tpu.pipeline_mode<synchronous>, transform_indices = @transform_15, window_bounds = array<i64: 1, 32>}, {pipeline_mode = #tpu.pipeline_mode<synchronous>, transform_indices = @transform_16, window_bounds = array<i64: 1, 32>}, {pipeline_mode = #tpu.pipeline_mode<synchronous>, transform_indices = @transform_17, window_bounds = array<i64: 32, 128>}, {pipeline_mode = #tpu.pipeline_mode<synchronous>, transform_indices = @transform_18, window_bounds = array<i64: 1, 128>}, {pipeline_mode = #tpu.pipeline_mode<synchronous>, transform_indices = @transform_19, window_bounds = array<i64: 128, 32>}, {pipeline_mode = #tpu.pipeline_mode<synchronous>, transform_indices = @transform_20, window_bounds = array<i64: 1, 32>}, {pipeline_mode = #tpu.pipeline_mode<synchronous>, transform_indices = @transform_21, window_bounds = array<i64: 544, 34>}, {pipeline_mode = #tpu.pipeline_mode<synchronous>, transform_indices = @transform_22, window_bounds = array<i64: 544, 32>}, {pipeline_mode = #tpu.pipeline_mode<synchronous>, transform_indices = @transform_23, window_bounds = array<i64: 34, 544>}, {pipeline_mode = #tpu.pipeline_mode<synchronous>, transform_indices = @transform_24, window_bounds = array<i64: 1, 32>}, {pipeline_mode = #tpu.pipeline_mode<synchronous>, transform_indices = @transform_25, window_bounds = array<i64: 1, 32>}, {pipeline_mode = #tpu.pipeline_mode<synchronous>, transform_indices = @transform_26, window_bounds = array<i64: 32, 96>}, {pipeline_mode = #tpu.pipeline_mode<synchronous>, transform_indices = @transform_27, window_bounds = array<i64: 1, 96>}, {pipeline_mode = #tpu.pipeline_mode<synchronous>, transform_indices = @transform_28, window_bounds = array<i64: 32, 32>}, {pipeline_mode = #tpu.pipeline_mode<synchronous>, transform_indices = @transform_29, window_bounds = array<i64: 1, 32>}, {pipeline_mode = #tpu.pipeline_mode<synchronous>, transform_indices = @transform_30, window_bounds = array<i64: 1, 32>}, {pipeline_mode = #tpu.pipeline_mode<synchronous>, transform_indices = @transform_31, window_bounds = array<i64: 1, 32>}, {pipeline_mode = #tpu.pipeline_mode<synchronous>, transform_indices = @transform_32, window_bounds = array<i64: 32, 128>}, {pipeline_mode = #tpu.pipeline_mode<synchronous>, transform_indices = @transform_33, window_bounds = array<i64: 1, 128>}, {pipeline_mode = #tpu.pipeline_mode<synchronous>, transform_indices = @transform_34, window_bounds = array<i64: 128, 32>}, {pipeline_mode = #tpu.pipeline_mode<synchronous>, transform_indices = @transform_35, window_bounds = array<i64: 1, 32>}, {pipeline_mode = #tpu.pipeline_mode<synchronous>, transform_indices = @transform_36, window_bounds = array<i64: 256, 16>}, {pipeline_mode = #tpu.pipeline_mode<synchronous>, transform_indices = @transform_37, window_bounds = array<i64: 256, 32>}, {pipeline_mode = #tpu.pipeline_mode<synchronous>, transform_indices = @transform_38, window_bounds = array<i64: 16, 256>}, {pipeline_mode = #tpu.pipeline_mode<synchronous>, transform_indices = @transform_39, window_bounds = array<i64: 32, 16>}, {pipeline_mode = #tpu.pipeline_mode<synchronous>, transform_indices = @transform_40, window_bounds = array<i64: 1, 16>}, {transform_indices = @transform_41, window_bounds = array<i64: 1, 3, 16>}]} {
    %c0 = arith.constant 0 : index
    %c0_0 = arith.constant 0 : index
    %c0_1 = arith.constant 0 : index
    %0 = vector.load %arg1[%c0, %c0_0, %c0_1] : memref<1x40x16xf32, #tpu.memory_space<vmem>>, vector<1x40x16xf32>
    %1 = vector.shape_cast %0 : vector<1x40x16xf32> to vector<40x16xf32>
    %c0_2 = arith.constant 0 : index
    %c0_3 = arith.constant 0 : index
    %2 = vector.load %arg2[%c0_2, %c0_3] : memref<16x32xf32, #tpu.memory_space<vmem>>, vector<16x32xf32>
    %cst = arith.constant dense<0.000000e+00> : vector<40x32xf32>
    %3 = tpu.matmul %1, %2, %cst {dimension_numbers = #tpu.dot_dimension_numbers<[1], [0], [0], [1], [0, 0, 1, 1], [], []>} : vector<40x16xf32>, vector<16x32xf32>, vector<40x32xf32> -> vector<40x32xf32>
    %c0_4 = arith.constant 0 : index
    %c0_5 = arith.constant 0 : index
    %4 = vector.load %arg3[%c0_4, %c0_5] : memref<1x32xf32, #tpu.memory_space<vmem>>, vector<1x32xf32>
    %5 = vector.broadcast %4 : vector<1x32xf32> to vector<40x32xf32>
    %6 = arith.addf %3, %5 : vector<40x32xf32>
    %cst_6 = arith.constant 0.000000e+00 : f32
    %7 = vector.broadcast %cst_6 : f32 to vector<40x32xf32>
    %8 = arith.maximumf %6, %7 : vector<40x32xf32>
    %c0_7 = arith.constant 0 : index
    %c0_8 = arith.constant 0 : index
    %9 = vector.load %arg4[%c0_7, %c0_8] : memref<1x32xf32, #tpu.memory_space<vmem>>, vector<1x32xf32>
    %10 = vector.broadcast %9 : vector<1x32xf32> to vector<40x32xf32>
    %11 = arith.mulf %8, %10 : vector<40x32xf32>
    %c0_9 = arith.constant 0 : index
    %c0_10 = arith.constant 0 : index
    %12 = vector.load %arg5[%c0_9, %c0_10] : memref<1x32xf32, #tpu.memory_space<vmem>>, vector<1x32xf32>
    %13 = vector.broadcast %12 : vector<1x32xf32> to vector<40x32xf32>
    %14 = arith.addf %11, %13 : vector<40x32xf32>
    %15 = vector.extract_strided_slice %14 {offsets = [0, 0], sizes = [38, 32], strides = [1, 1]} : vector<40x32xf32> to vector<38x32xf32>
    %16 = vector.extract_strided_slice %14 {offsets = [1, 0], sizes = [38, 32], strides = [1, 1]} : vector<40x32xf32> to vector<38x32xf32>
    %17 = vector.extract_strided_slice %14 {offsets = [2, 0], sizes = [38, 32], strides = [1, 1]} : vector<40x32xf32> to vector<38x32xf32>
    %18 = tpu.concatenate %15, %16, %17 in 1 : vector<38x32xf32>, vector<38x32xf32>, vector<38x32xf32> -> vector<38x96xf32>
    %c0_11 = arith.constant 0 : index
    %c0_12 = arith.constant 0 : index
    %c0_13 = arith.constant 0 : index
    %19 = vector.load %arg6[%c0_11, %c0_12, %c0_13] : memref<7x96x32xf32, #tpu.memory_space<vmem>>, vector<1x96x32xf32>
    %20 = vector.shape_cast %19 : vector<1x96x32xf32> to vector<96x32xf32>
    %cst_14 = arith.constant dense<0.000000e+00> : vector<38x32xf32>
    %21 = tpu.matmul %18, %20, %cst_14 {dimension_numbers = #tpu.dot_dimension_numbers<[1], [0], [0], [1], [0, 0, 1, 1], [], []>} : vector<38x96xf32>, vector<96x32xf32>, vector<38x32xf32> -> vector<38x32xf32>
    %c0_15 = arith.constant 0 : index
    %c0_16 = arith.constant 0 : index
    %c0_17 = arith.constant 0 : index
    %22 = vector.load %arg7[%c0_15, %c0_16, %c0_17] : memref<7x1x32xf32, #tpu.memory_space<vmem>>, vector<1x1x32xf32>
    %23 = vector.shape_cast %22 : vector<1x1x32xf32> to vector<1x32xf32>
    %24 = vector.broadcast %23 : vector<1x32xf32> to vector<38x32xf32>
    %25 = arith.addf %21, %24 : vector<38x32xf32>
    %cst_18 = arith.constant 0.000000e+00 : f32
    %26 = vector.broadcast %cst_18 : f32 to vector<38x32xf32>
    %27 = arith.maximumf %25, %26 : vector<38x32xf32>
    %c0_19 = arith.constant 0 : index
    %c0_20 = arith.constant 0 : index
    %c0_21 = arith.constant 0 : index
    %28 = vector.load %arg8[%c0_19, %c0_20, %c0_21] : memref<7x1x32xf32, #tpu.memory_space<vmem>>, vector<1x1x32xf32>
    %29 = vector.shape_cast %28 : vector<1x1x32xf32> to vector<1x32xf32>
    %30 = vector.broadcast %29 : vector<1x32xf32> to vector<38x32xf32>
    %31 = arith.mulf %27, %30 : vector<38x32xf32>
    %c0_22 = arith.constant 0 : index
    %c0_23 = arith.constant 0 : index
    %c0_24 = arith.constant 0 : index
    %32 = vector.load %arg9[%c0_22, %c0_23, %c0_24] : memref<7x1x32xf32, #tpu.memory_space<vmem>>, vector<1x1x32xf32>
    %33 = vector.shape_cast %32 : vector<1x1x32xf32> to vector<1x32xf32>
    %34 = vector.broadcast %33 : vector<1x32xf32> to vector<38x32xf32>
    %35 = arith.addf %31, %34 : vector<38x32xf32>
    %36 = vector.extract_strided_slice %35 {offsets = [0, 0], sizes = [36, 32], strides = [1, 1]} : vector<38x32xf32> to vector<36x32xf32>
    %37 = vector.extract_strided_slice %35 {offsets = [1, 0], sizes = [36, 32], strides = [1, 1]} : vector<38x32xf32> to vector<36x32xf32>
    %38 = vector.extract_strided_slice %35 {offsets = [2, 0], sizes = [36, 32], strides = [1, 1]} : vector<38x32xf32> to vector<36x32xf32>
    %39 = tpu.concatenate %36, %37, %38 in 1 : vector<36x32xf32>, vector<36x32xf32>, vector<36x32xf32> -> vector<36x96xf32>
    %c1 = arith.constant 1 : index
    %c0_25 = arith.constant 0 : index
    %c0_26 = arith.constant 0 : index
    %40 = vector.load %arg6[%c1, %c0_25, %c0_26] : memref<7x96x32xf32, #tpu.memory_space<vmem>>, vector<1x96x32xf32>
    %41 = vector.shape_cast %40 : vector<1x96x32xf32> to vector<96x32xf32>
    %cst_27 = arith.constant dense<0.000000e+00> : vector<36x32xf32>
    %42 = tpu.matmul %39, %41, %cst_27 {dimension_numbers = #tpu.dot_dimension_numbers<[1], [0], [0], [1], [0, 0, 1, 1], [], []>} : vector<36x96xf32>, vector<96x32xf32>, vector<36x32xf32> -> vector<36x32xf32>
    %c1_28 = arith.constant 1 : index
    %c0_29 = arith.constant 0 : index
    %c0_30 = arith.constant 0 : index
    %43 = vector.load %arg7[%c1_28, %c0_29, %c0_30] : memref<7x1x32xf32, #tpu.memory_space<vmem>>, vector<1x1x32xf32>
    %44 = vector.shape_cast %43 : vector<1x1x32xf32> to vector<1x32xf32>
    %45 = vector.broadcast %44 : vector<1x32xf32> to vector<36x32xf32>
    %46 = arith.addf %42, %45 : vector<36x32xf32>
    %cst_31 = arith.constant 0.000000e+00 : f32
    %47 = vector.broadcast %cst_31 : f32 to vector<36x32xf32>
    %48 = arith.maximumf %46, %47 : vector<36x32xf32>
    %c1_32 = arith.constant 1 : index
    %c0_33 = arith.constant 0 : index
    %c0_34 = arith.constant 0 : index
    %49 = vector.load %arg8[%c1_32, %c0_33, %c0_34] : memref<7x1x32xf32, #tpu.memory_space<vmem>>, vector<1x1x32xf32>
    %50 = vector.shape_cast %49 : vector<1x1x32xf32> to vector<1x32xf32>
    %51 = vector.broadcast %50 : vector<1x32xf32> to vector<36x32xf32>
    %52 = arith.mulf %48, %51 : vector<36x32xf32>
    %c1_35 = arith.constant 1 : index
    %c0_36 = arith.constant 0 : index
    %c0_37 = arith.constant 0 : index
    %53 = vector.load %arg9[%c1_35, %c0_36, %c0_37] : memref<7x1x32xf32, #tpu.memory_space<vmem>>, vector<1x1x32xf32>
    %54 = vector.shape_cast %53 : vector<1x1x32xf32> to vector<1x32xf32>
    %55 = vector.broadcast %54 : vector<1x32xf32> to vector<36x32xf32>
    %56 = arith.addf %52, %55 : vector<36x32xf32>
    %57 = vector.extract_strided_slice %56 {offsets = [0, 0], sizes = [34, 32], strides = [1, 1]} : vector<36x32xf32> to vector<34x32xf32>
    %58 = vector.extract_strided_slice %56 {offsets = [1, 0], sizes = [34, 32], strides = [1, 1]} : vector<36x32xf32> to vector<34x32xf32>
    %59 = vector.extract_strided_slice %56 {offsets = [2, 0], sizes = [34, 32], strides = [1, 1]} : vector<36x32xf32> to vector<34x32xf32>
    %60 = tpu.concatenate %57, %58, %59 in 1 : vector<34x32xf32>, vector<34x32xf32>, vector<34x32xf32> -> vector<34x96xf32>
    %c2 = arith.constant 2 : index
    %c0_38 = arith.constant 0 : index
    %c0_39 = arith.constant 0 : index
    %61 = vector.load %arg6[%c2, %c0_38, %c0_39] : memref<7x96x32xf32, #tpu.memory_space<vmem>>, vector<1x96x32xf32>
    %62 = vector.shape_cast %61 : vector<1x96x32xf32> to vector<96x32xf32>
    %cst_40 = arith.constant dense<0.000000e+00> : vector<34x32xf32>
    %63 = tpu.matmul %60, %62, %cst_40 {dimension_numbers = #tpu.dot_dimension_numbers<[1], [0], [0], [1], [0, 0, 1, 1], [], []>} : vector<34x96xf32>, vector<96x32xf32>, vector<34x32xf32> -> vector<34x32xf32>
    %c2_41 = arith.constant 2 : index
    %c0_42 = arith.constant 0 : index
    %c0_43 = arith.constant 0 : index
    %64 = vector.load %arg7[%c2_41, %c0_42, %c0_43] : memref<7x1x32xf32, #tpu.memory_space<vmem>>, vector<1x1x32xf32>
    %65 = vector.shape_cast %64 : vector<1x1x32xf32> to vector<1x32xf32>
    %66 = vector.broadcast %65 : vector<1x32xf32> to vector<34x32xf32>
    %67 = arith.addf %63, %66 : vector<34x32xf32>
    %cst_44 = arith.constant 0.000000e+00 : f32
    %68 = vector.broadcast %cst_44 : f32 to vector<34x32xf32>
    %69 = arith.maximumf %67, %68 : vector<34x32xf32>
    %c2_45 = arith.constant 2 : index
    %c0_46 = arith.constant 0 : index
    %c0_47 = arith.constant 0 : index
    %70 = vector.load %arg8[%c2_45, %c0_46, %c0_47] : memref<7x1x32xf32, #tpu.memory_space<vmem>>, vector<1x1x32xf32>
    %71 = vector.shape_cast %70 : vector<1x1x32xf32> to vector<1x32xf32>
    %72 = vector.broadcast %71 : vector<1x32xf32> to vector<34x32xf32>
    %73 = arith.mulf %69, %72 : vector<34x32xf32>
    %c2_48 = arith.constant 2 : index
    %c0_49 = arith.constant 0 : index
    %c0_50 = arith.constant 0 : index
    %74 = vector.load %arg9[%c2_48, %c0_49, %c0_50] : memref<7x1x32xf32, #tpu.memory_space<vmem>>, vector<1x1x32xf32>
    %75 = vector.shape_cast %74 : vector<1x1x32xf32> to vector<1x32xf32>
    %76 = vector.broadcast %75 : vector<1x32xf32> to vector<34x32xf32>
    %77 = arith.addf %73, %76 : vector<34x32xf32>
    %c0_51 = arith.constant 0 : index
    %c0_52 = arith.constant 0 : index
    %78 = vector.load %arg10[%c0_51, %c0_52] : memref<1x32xf32, #tpu.memory_space<vmem>>, vector<1x32xf32>
    %c0_53 = arith.constant 0 : index
    %c0_54 = arith.constant 0 : index
    %79 = vector.load %arg11[%c0_53, %c0_54] : memref<1x32xf32, #tpu.memory_space<vmem>>, vector<1x32xf32>
    %cst_55 = arith.constant dense<0.000000e+00> : vector<34xf32>
    %80 = vector.multi_reduction <add>, %77, %cst_55 [1] : vector<34x32xf32> to vector<34xf32>
    %81 = vector.shape_cast %80 : vector<34xf32> to vector<34x1xf32>
    %cst_56 = arith.constant 3.200000e+01 : f32
    %82 = vector.broadcast %cst_56 : f32 to vector<34x1xf32>
    %83 = arith.divf %81, %82 : vector<34x1xf32>
    %84 = vector.broadcast %83 : vector<34x1xf32> to vector<34x32xf32>
    %85 = arith.subf %77, %84 : vector<34x32xf32>
    %86 = arith.mulf %85, %85 : vector<34x32xf32>
    %cst_57 = arith.constant dense<0.000000e+00> : vector<34xf32>
    %87 = vector.multi_reduction <add>, %86, %cst_57 [1] : vector<34x32xf32> to vector<34xf32>
    %88 = vector.shape_cast %87 : vector<34xf32> to vector<34x1xf32>
    %cst_58 = arith.constant 3.200000e+01 : f32
    %89 = vector.broadcast %cst_58 : f32 to vector<34x1xf32>
    %90 = arith.divf %88, %89 : vector<34x1xf32>
    %cst_59 = arith.constant 9.99999997E-7 : f32
    %91 = vector.broadcast %cst_59 : f32 to vector<34x1xf32>
    %92 = arith.addf %90, %91 : vector<34x1xf32>
    %93 = math.rsqrt %92 : vector<34x1xf32>
    %94 = vector.broadcast %93 : vector<34x1xf32> to vector<34x32xf32>
    %95 = arith.mulf %85, %94 : vector<34x32xf32>
    %96 = vector.broadcast %78 : vector<1x32xf32> to vector<34x32xf32>
    %97 = arith.mulf %95, %96 : vector<34x32xf32>
    %98 = vector.broadcast %79 : vector<1x32xf32> to vector<34x32xf32>
    %99 = arith.addf %97, %98 : vector<34x32xf32>
    %c0_60 = arith.constant 0 : index
    %c0_61 = arith.constant 0 : index
    %100 = vector.load %arg12[%c0_60, %c0_61] : memref<32x96xf32, #tpu.memory_space<vmem>>, vector<32x96xf32>
    %cst_62 = arith.constant dense<0.000000e+00> : vector<34x96xf32>
    %101 = tpu.matmul %99, %100, %cst_62 {dimension_numbers = #tpu.dot_dimension_numbers<[1], [0], [0], [1], [0, 0, 1, 1], [], []>} : vector<34x32xf32>, vector<32x96xf32>, vector<34x96xf32> -> vector<34x96xf32>
    %c0_63 = arith.constant 0 : index
    %c0_64 = arith.constant 0 : index
    %102 = vector.load %arg13[%c0_63, %c0_64] : memref<1x96xf32, #tpu.memory_space<vmem>>, vector<1x96xf32>
    %103 = vector.broadcast %102 : vector<1x96xf32> to vector<34x96xf32>
    %104 = arith.addf %101, %103 : vector<34x96xf32>
    %105 = vector.extract_strided_slice %104 {offsets = [0, 0], sizes = [34, 32], strides = [1, 1]} : vector<34x96xf32> to vector<34x32xf32>
    %cst_65 = arith.constant 0.707106769 : f32
    %106 = vector.broadcast %cst_65 : f32 to vector<34x32xf32>
    %107 = arith.mulf %105, %106 : vector<34x32xf32>
    %108 = vector.extract_strided_slice %104 {offsets = [0, 32], sizes = [34, 32], strides = [1, 1]} : vector<34x96xf32> to vector<34x32xf32>
    %109 = vector.extract_strided_slice %104 {offsets = [0, 64], sizes = [34, 32], strides = [1, 1]} : vector<34x96xf32> to vector<34x32xf32>
    %c0_66 = arith.constant 0 : index
    %c0_67 = arith.constant 0 : index
    %110 = vector.load %arg23[%c0_66, %c0_67] : memref<544x32xf32, #tpu.memory_space<vmem>>, vector<544x32xf32>
    %c0_68 = arith.constant 0 : index
    %c0_69 = arith.constant 0 : index
    %111 = vector.load %arg22[%c0_68, %c0_69] : memref<544x34xf32, #tpu.memory_space<vmem>>, vector<544x34xf32>
    %cst_70 = arith.constant dense<0.000000e+00> : vector<544x32xf32>
    %112 = tpu.matmul %111, %107, %cst_70 {dimension_numbers = #tpu.dot_dimension_numbers<[1], [0], [0], [1], [0, 0, 1, 1], [], []>} : vector<544x34xf32>, vector<34x32xf32>, vector<544x32xf32> -> vector<544x32xf32>
    %113 = arith.mulf %112, %110 : vector<544x32xf32>
    %cst_71 = arith.constant dense<0.000000e+00> : vector<544x34xf32>
    %114 = tpu.matmul %113, %108, %cst_71 {dimension_numbers = #tpu.dot_dimension_numbers<[1], [1], [0], [0], [0, 0, 1, 0], [], []>} : vector<544x32xf32>, vector<34x32xf32>, vector<544x34xf32> -> vector<544x34xf32>
    %cst_72 = arith.constant dense<0xFF800000> : vector<544xf32>
    %115 = vector.multi_reduction <maximumf>, %114, %cst_72 [1] : vector<544x34xf32> to vector<544xf32>
    %116 = vector.shape_cast %115 : vector<544xf32> to vector<544x1xf32>
    %117 = vector.broadcast %116 : vector<544x1xf32> to vector<544x34xf32>
    %118 = arith.subf %114, %117 : vector<544x34xf32>
    %119 = math.exp %118 : vector<544x34xf32>
    %cst_73 = arith.constant dense<0.000000e+00> : vector<544xf32>
    %120 = vector.multi_reduction <add>, %119, %cst_73 [1] : vector<544x34xf32> to vector<544xf32>
    %121 = vector.shape_cast %120 : vector<544xf32> to vector<544x1xf32>
    %cst_74 = arith.constant 1.000000e+00 : f32
    %122 = vector.broadcast %cst_74 : f32 to vector<544x1xf32>
    %123 = arith.divf %122, %121 : vector<544x1xf32>
    %cst_75 = arith.constant dense<0.000000e+00> : vector<544x32xf32>
    %124 = tpu.matmul %119, %109, %cst_75 {dimension_numbers = #tpu.dot_dimension_numbers<[1], [0], [0], [1], [0, 0, 1, 1], [], []>} : vector<544x34xf32>, vector<34x32xf32>, vector<544x32xf32> -> vector<544x32xf32>
    %125 = arith.mulf %124, %110 : vector<544x32xf32>
    %126 = vector.broadcast %123 : vector<544x1xf32> to vector<544x32xf32>
    %127 = arith.mulf %125, %126 : vector<544x32xf32>
    %c0_76 = arith.constant 0 : index
    %c0_77 = arith.constant 0 : index
    %128 = vector.load %arg24[%c0_76, %c0_77] : memref<34x544xf32, #tpu.memory_space<vmem>>, vector<34x544xf32>
    %cst_78 = arith.constant dense<0.000000e+00> : vector<34x32xf32>
    %129 = tpu.matmul %128, %127, %cst_78 {dimension_numbers = #tpu.dot_dimension_numbers<[1], [0], [0], [1], [0, 0, 1, 1], [], []>} : vector<34x544xf32>, vector<544x32xf32>, vector<34x32xf32> -> vector<34x32xf32>
    %c0_79 = arith.constant 0 : index
    %c0_80 = arith.constant 0 : index
    %130 = vector.load %arg14[%c0_79, %c0_80] : memref<32x32xf32, #tpu.memory_space<vmem>>, vector<32x32xf32>
    %cst_81 = arith.constant dense<0.000000e+00> : vector<34x32xf32>
    %131 = tpu.matmul %129, %130, %cst_81 {dimension_numbers = #tpu.dot_dimension_numbers<[1], [0], [0], [1], [0, 0, 1, 1], [], []>} : vector<34x32xf32>, vector<32x32xf32>, vector<34x32xf32> -> vector<34x32xf32>
    %c0_82 = arith.constant 0 : index
    %c0_83 = arith.constant 0 : index
    %132 = vector.load %arg15[%c0_82, %c0_83] : memref<1x32xf32, #tpu.memory_space<vmem>>, vector<1x32xf32>
    %133 = vector.broadcast %132 : vector<1x32xf32> to vector<34x32xf32>
    %134 = arith.addf %131, %133 : vector<34x32xf32>
    %135 = arith.addf %134, %77 : vector<34x32xf32>
    %c0_84 = arith.constant 0 : index
    %c0_85 = arith.constant 0 : index
    %136 = vector.load %arg16[%c0_84, %c0_85] : memref<1x32xf32, #tpu.memory_space<vmem>>, vector<1x32xf32>
    %c0_86 = arith.constant 0 : index
    %c0_87 = arith.constant 0 : index
    %137 = vector.load %arg17[%c0_86, %c0_87] : memref<1x32xf32, #tpu.memory_space<vmem>>, vector<1x32xf32>
    %cst_88 = arith.constant dense<0.000000e+00> : vector<34xf32>
    %138 = vector.multi_reduction <add>, %135, %cst_88 [1] : vector<34x32xf32> to vector<34xf32>
    %139 = vector.shape_cast %138 : vector<34xf32> to vector<34x1xf32>
    %cst_89 = arith.constant 3.200000e+01 : f32
    %140 = vector.broadcast %cst_89 : f32 to vector<34x1xf32>
    %141 = arith.divf %139, %140 : vector<34x1xf32>
    %142 = vector.broadcast %141 : vector<34x1xf32> to vector<34x32xf32>
    %143 = arith.subf %135, %142 : vector<34x32xf32>
    %144 = arith.mulf %143, %143 : vector<34x32xf32>
    %cst_90 = arith.constant dense<0.000000e+00> : vector<34xf32>
    %145 = vector.multi_reduction <add>, %144, %cst_90 [1] : vector<34x32xf32> to vector<34xf32>
    %146 = vector.shape_cast %145 : vector<34xf32> to vector<34x1xf32>
    %cst_91 = arith.constant 3.200000e+01 : f32
    %147 = vector.broadcast %cst_91 : f32 to vector<34x1xf32>
    %148 = arith.divf %146, %147 : vector<34x1xf32>
    %cst_92 = arith.constant 9.99999997E-7 : f32
    %149 = vector.broadcast %cst_92 : f32 to vector<34x1xf32>
    %150 = arith.addf %148, %149 : vector<34x1xf32>
    %151 = math.rsqrt %150 : vector<34x1xf32>
    %152 = vector.broadcast %151 : vector<34x1xf32> to vector<34x32xf32>
    %153 = arith.mulf %143, %152 : vector<34x32xf32>
    %154 = vector.broadcast %136 : vector<1x32xf32> to vector<34x32xf32>
    %155 = arith.mulf %153, %154 : vector<34x32xf32>
    %156 = vector.broadcast %137 : vector<1x32xf32> to vector<34x32xf32>
    %157 = arith.addf %155, %156 : vector<34x32xf32>
    %c0_93 = arith.constant 0 : index
    %c0_94 = arith.constant 0 : index
    %158 = vector.load %arg18[%c0_93, %c0_94] : memref<32x128xf32, #tpu.memory_space<vmem>>, vector<32x128xf32>
    %cst_95 = arith.constant dense<0.000000e+00> : vector<34x128xf32>
    %159 = tpu.matmul %157, %158, %cst_95 {dimension_numbers = #tpu.dot_dimension_numbers<[1], [0], [0], [1], [0, 0, 1, 1], [], []>} : vector<34x32xf32>, vector<32x128xf32>, vector<34x128xf32> -> vector<34x128xf32>
    %c0_96 = arith.constant 0 : index
    %c0_97 = arith.constant 0 : index
    %160 = vector.load %arg19[%c0_96, %c0_97] : memref<1x128xf32, #tpu.memory_space<vmem>>, vector<1x128xf32>
    %161 = vector.broadcast %160 : vector<1x128xf32> to vector<34x128xf32>
    %162 = arith.addf %159, %161 : vector<34x128xf32>
    %cst_98 = arith.constant 0.000000e+00 : f32
    %163 = vector.broadcast %cst_98 : f32 to vector<34x128xf32>
    %164 = arith.maximumf %162, %163 : vector<34x128xf32>
    %c0_99 = arith.constant 0 : index
    %c0_100 = arith.constant 0 : index
    %165 = vector.load %arg20[%c0_99, %c0_100] : memref<128x32xf32, #tpu.memory_space<vmem>>, vector<128x32xf32>
    %cst_101 = arith.constant dense<0.000000e+00> : vector<34x32xf32>
    %166 = tpu.matmul %164, %165, %cst_101 {dimension_numbers = #tpu.dot_dimension_numbers<[1], [0], [0], [1], [0, 0, 1, 1], [], []>} : vector<34x128xf32>, vector<128x32xf32>, vector<34x32xf32> -> vector<34x32xf32>
    %c0_102 = arith.constant 0 : index
    %c0_103 = arith.constant 0 : index
    %167 = vector.load %arg21[%c0_102, %c0_103] : memref<1x32xf32, #tpu.memory_space<vmem>>, vector<1x32xf32>
    %168 = vector.broadcast %167 : vector<1x32xf32> to vector<34x32xf32>
    %169 = arith.addf %166, %168 : vector<34x32xf32>
    %170 = arith.addf %169, %135 : vector<34x32xf32>
    %171 = vector.extract_strided_slice %170 {offsets = [0, 0], sizes = [28, 32], strides = [1, 1]} : vector<34x32xf32> to vector<28x32xf32>
    %172 = vector.extract_strided_slice %170 {offsets = [3, 0], sizes = [28, 32], strides = [1, 1]} : vector<34x32xf32> to vector<28x32xf32>
    %173 = vector.extract_strided_slice %170 {offsets = [6, 0], sizes = [28, 32], strides = [1, 1]} : vector<34x32xf32> to vector<28x32xf32>
    %174 = tpu.concatenate %171, %172, %173 in 1 : vector<28x32xf32>, vector<28x32xf32>, vector<28x32xf32> -> vector<28x96xf32>
    %c3 = arith.constant 3 : index
    %c0_104 = arith.constant 0 : index
    %c0_105 = arith.constant 0 : index
    %175 = vector.load %arg6[%c3, %c0_104, %c0_105] : memref<7x96x32xf32, #tpu.memory_space<vmem>>, vector<1x96x32xf32>
    %176 = vector.shape_cast %175 : vector<1x96x32xf32> to vector<96x32xf32>
    %cst_106 = arith.constant dense<0.000000e+00> : vector<28x32xf32>
    %177 = tpu.matmul %174, %176, %cst_106 {dimension_numbers = #tpu.dot_dimension_numbers<[1], [0], [0], [1], [0, 0, 1, 1], [], []>} : vector<28x96xf32>, vector<96x32xf32>, vector<28x32xf32> -> vector<28x32xf32>
    %c3_107 = arith.constant 3 : index
    %c0_108 = arith.constant 0 : index
    %c0_109 = arith.constant 0 : index
    %178 = vector.load %arg7[%c3_107, %c0_108, %c0_109] : memref<7x1x32xf32, #tpu.memory_space<vmem>>, vector<1x1x32xf32>
    %179 = vector.shape_cast %178 : vector<1x1x32xf32> to vector<1x32xf32>
    %180 = vector.broadcast %179 : vector<1x32xf32> to vector<28x32xf32>
    %181 = arith.addf %177, %180 : vector<28x32xf32>
    %cst_110 = arith.constant 0.000000e+00 : f32
    %182 = vector.broadcast %cst_110 : f32 to vector<28x32xf32>
    %183 = arith.maximumf %181, %182 : vector<28x32xf32>
    %c3_111 = arith.constant 3 : index
    %c0_112 = arith.constant 0 : index
    %c0_113 = arith.constant 0 : index
    %184 = vector.load %arg8[%c3_111, %c0_112, %c0_113] : memref<7x1x32xf32, #tpu.memory_space<vmem>>, vector<1x1x32xf32>
    %185 = vector.shape_cast %184 : vector<1x1x32xf32> to vector<1x32xf32>
    %186 = vector.broadcast %185 : vector<1x32xf32> to vector<28x32xf32>
    %187 = arith.mulf %183, %186 : vector<28x32xf32>
    %c3_114 = arith.constant 3 : index
    %c0_115 = arith.constant 0 : index
    %c0_116 = arith.constant 0 : index
    %188 = vector.load %arg9[%c3_114, %c0_115, %c0_116] : memref<7x1x32xf32, #tpu.memory_space<vmem>>, vector<1x1x32xf32>
    %189 = vector.shape_cast %188 : vector<1x1x32xf32> to vector<1x32xf32>
    %190 = vector.broadcast %189 : vector<1x32xf32> to vector<28x32xf32>
    %191 = arith.addf %187, %190 : vector<28x32xf32>
    %192 = vector.extract_strided_slice %191 {offsets = [0, 0], sizes = [22, 32], strides = [1, 1]} : vector<28x32xf32> to vector<22x32xf32>
    %193 = vector.extract_strided_slice %191 {offsets = [3, 0], sizes = [22, 32], strides = [1, 1]} : vector<28x32xf32> to vector<22x32xf32>
    %194 = vector.extract_strided_slice %191 {offsets = [6, 0], sizes = [22, 32], strides = [1, 1]} : vector<28x32xf32> to vector<22x32xf32>
    %195 = tpu.concatenate %192, %193, %194 in 1 : vector<22x32xf32>, vector<22x32xf32>, vector<22x32xf32> -> vector<22x96xf32>
    %c4 = arith.constant 4 : index
    %c0_117 = arith.constant 0 : index
    %c0_118 = arith.constant 0 : index
    %196 = vector.load %arg6[%c4, %c0_117, %c0_118] : memref<7x96x32xf32, #tpu.memory_space<vmem>>, vector<1x96x32xf32>
    %197 = vector.shape_cast %196 : vector<1x96x32xf32> to vector<96x32xf32>
    %cst_119 = arith.constant dense<0.000000e+00> : vector<22x32xf32>
    %198 = tpu.matmul %195, %197, %cst_119 {dimension_numbers = #tpu.dot_dimension_numbers<[1], [0], [0], [1], [0, 0, 1, 1], [], []>} : vector<22x96xf32>, vector<96x32xf32>, vector<22x32xf32> -> vector<22x32xf32>
    %c4_120 = arith.constant 4 : index
    %c0_121 = arith.constant 0 : index
    %c0_122 = arith.constant 0 : index
    %199 = vector.load %arg7[%c4_120, %c0_121, %c0_122] : memref<7x1x32xf32, #tpu.memory_space<vmem>>, vector<1x1x32xf32>
    %200 = vector.shape_cast %199 : vector<1x1x32xf32> to vector<1x32xf32>
    %201 = vector.broadcast %200 : vector<1x32xf32> to vector<22x32xf32>
    %202 = arith.addf %198, %201 : vector<22x32xf32>
    %cst_123 = arith.constant 0.000000e+00 : f32
    %203 = vector.broadcast %cst_123 : f32 to vector<22x32xf32>
    %204 = arith.maximumf %202, %203 : vector<22x32xf32>
    %c4_124 = arith.constant 4 : index
    %c0_125 = arith.constant 0 : index
    %c0_126 = arith.constant 0 : index
    %205 = vector.load %arg8[%c4_124, %c0_125, %c0_126] : memref<7x1x32xf32, #tpu.memory_space<vmem>>, vector<1x1x32xf32>
    %206 = vector.shape_cast %205 : vector<1x1x32xf32> to vector<1x32xf32>
    %207 = vector.broadcast %206 : vector<1x32xf32> to vector<22x32xf32>
    %208 = arith.mulf %204, %207 : vector<22x32xf32>
    %c4_127 = arith.constant 4 : index
    %c0_128 = arith.constant 0 : index
    %c0_129 = arith.constant 0 : index
    %209 = vector.load %arg9[%c4_127, %c0_128, %c0_129] : memref<7x1x32xf32, #tpu.memory_space<vmem>>, vector<1x1x32xf32>
    %210 = vector.shape_cast %209 : vector<1x1x32xf32> to vector<1x32xf32>
    %211 = vector.broadcast %210 : vector<1x32xf32> to vector<22x32xf32>
    %212 = arith.addf %208, %211 : vector<22x32xf32>
    %213 = vector.extract_strided_slice %212 {offsets = [0, 0], sizes = [16, 32], strides = [1, 1]} : vector<22x32xf32> to vector<16x32xf32>
    %214 = vector.extract_strided_slice %212 {offsets = [3, 0], sizes = [16, 32], strides = [1, 1]} : vector<22x32xf32> to vector<16x32xf32>
    %215 = vector.extract_strided_slice %212 {offsets = [6, 0], sizes = [16, 32], strides = [1, 1]} : vector<22x32xf32> to vector<16x32xf32>
    %216 = tpu.concatenate %213, %214, %215 in 1 : vector<16x32xf32>, vector<16x32xf32>, vector<16x32xf32> -> vector<16x96xf32>
    %c5 = arith.constant 5 : index
    %c0_130 = arith.constant 0 : index
    %c0_131 = arith.constant 0 : index
    %217 = vector.load %arg6[%c5, %c0_130, %c0_131] : memref<7x96x32xf32, #tpu.memory_space<vmem>>, vector<1x96x32xf32>
    %218 = vector.shape_cast %217 : vector<1x96x32xf32> to vector<96x32xf32>
    %cst_132 = arith.constant dense<0.000000e+00> : vector<16x32xf32>
    %219 = tpu.matmul %216, %218, %cst_132 {dimension_numbers = #tpu.dot_dimension_numbers<[1], [0], [0], [1], [0, 0, 1, 1], [], []>} : vector<16x96xf32>, vector<96x32xf32>, vector<16x32xf32> -> vector<16x32xf32>
    %c5_133 = arith.constant 5 : index
    %c0_134 = arith.constant 0 : index
    %c0_135 = arith.constant 0 : index
    %220 = vector.load %arg7[%c5_133, %c0_134, %c0_135] : memref<7x1x32xf32, #tpu.memory_space<vmem>>, vector<1x1x32xf32>
    %221 = vector.shape_cast %220 : vector<1x1x32xf32> to vector<1x32xf32>
    %222 = vector.broadcast %221 : vector<1x32xf32> to vector<16x32xf32>
    %223 = arith.addf %219, %222 : vector<16x32xf32>
    %cst_136 = arith.constant 0.000000e+00 : f32
    %224 = vector.broadcast %cst_136 : f32 to vector<16x32xf32>
    %225 = arith.maximumf %223, %224 : vector<16x32xf32>
    %c5_137 = arith.constant 5 : index
    %c0_138 = arith.constant 0 : index
    %c0_139 = arith.constant 0 : index
    %226 = vector.load %arg8[%c5_137, %c0_138, %c0_139] : memref<7x1x32xf32, #tpu.memory_space<vmem>>, vector<1x1x32xf32>
    %227 = vector.shape_cast %226 : vector<1x1x32xf32> to vector<1x32xf32>
    %228 = vector.broadcast %227 : vector<1x32xf32> to vector<16x32xf32>
    %229 = arith.mulf %225, %228 : vector<16x32xf32>
    %c5_140 = arith.constant 5 : index
    %c0_141 = arith.constant 0 : index
    %c0_142 = arith.constant 0 : index
    %230 = vector.load %arg9[%c5_140, %c0_141, %c0_142] : memref<7x1x32xf32, #tpu.memory_space<vmem>>, vector<1x1x32xf32>
    %231 = vector.shape_cast %230 : vector<1x1x32xf32> to vector<1x32xf32>
    %232 = vector.broadcast %231 : vector<1x32xf32> to vector<16x32xf32>
    %233 = arith.addf %229, %232 : vector<16x32xf32>
    %c0_143 = arith.constant 0 : index
    %c0_144 = arith.constant 0 : index
    %234 = vector.load %arg25[%c0_143, %c0_144] : memref<1x32xf32, #tpu.memory_space<vmem>>, vector<1x32xf32>
    %c0_145 = arith.constant 0 : index
    %c0_146 = arith.constant 0 : index
    %235 = vector.load %arg26[%c0_145, %c0_146] : memref<1x32xf32, #tpu.memory_space<vmem>>, vector<1x32xf32>
    %cst_147 = arith.constant dense<0.000000e+00> : vector<16xf32>
    %236 = vector.multi_reduction <add>, %233, %cst_147 [1] : vector<16x32xf32> to vector<16xf32>
    %237 = vector.shape_cast %236 : vector<16xf32> to vector<16x1xf32>
    %cst_148 = arith.constant 3.200000e+01 : f32
    %238 = vector.broadcast %cst_148 : f32 to vector<16x1xf32>
    %239 = arith.divf %237, %238 : vector<16x1xf32>
    %240 = vector.broadcast %239 : vector<16x1xf32> to vector<16x32xf32>
    %241 = arith.subf %233, %240 : vector<16x32xf32>
    %242 = arith.mulf %241, %241 : vector<16x32xf32>
    %cst_149 = arith.constant dense<0.000000e+00> : vector<16xf32>
    %243 = vector.multi_reduction <add>, %242, %cst_149 [1] : vector<16x32xf32> to vector<16xf32>
    %244 = vector.shape_cast %243 : vector<16xf32> to vector<16x1xf32>
    %cst_150 = arith.constant 3.200000e+01 : f32
    %245 = vector.broadcast %cst_150 : f32 to vector<16x1xf32>
    %246 = arith.divf %244, %245 : vector<16x1xf32>
    %cst_151 = arith.constant 9.99999997E-7 : f32
    %247 = vector.broadcast %cst_151 : f32 to vector<16x1xf32>
    %248 = arith.addf %246, %247 : vector<16x1xf32>
    %249 = math.rsqrt %248 : vector<16x1xf32>
    %250 = vector.broadcast %249 : vector<16x1xf32> to vector<16x32xf32>
    %251 = arith.mulf %241, %250 : vector<16x32xf32>
    %252 = vector.broadcast %234 : vector<1x32xf32> to vector<16x32xf32>
    %253 = arith.mulf %251, %252 : vector<16x32xf32>
    %254 = vector.broadcast %235 : vector<1x32xf32> to vector<16x32xf32>
    %255 = arith.addf %253, %254 : vector<16x32xf32>
    %c0_152 = arith.constant 0 : index
    %c0_153 = arith.constant 0 : index
    %256 = vector.load %arg27[%c0_152, %c0_153] : memref<32x96xf32, #tpu.memory_space<vmem>>, vector<32x96xf32>
    %cst_154 = arith.constant dense<0.000000e+00> : vector<16x96xf32>
    %257 = tpu.matmul %255, %256, %cst_154 {dimension_numbers = #tpu.dot_dimension_numbers<[1], [0], [0], [1], [0, 0, 1, 1], [], []>} : vector<16x32xf32>, vector<32x96xf32>, vector<16x96xf32> -> vector<16x96xf32>
    %c0_155 = arith.constant 0 : index
    %c0_156 = arith.constant 0 : index
    %258 = vector.load %arg28[%c0_155, %c0_156] : memref<1x96xf32, #tpu.memory_space<vmem>>, vector<1x96xf32>
    %259 = vector.broadcast %258 : vector<1x96xf32> to vector<16x96xf32>
    %260 = arith.addf %257, %259 : vector<16x96xf32>
    %261 = vector.extract_strided_slice %260 {offsets = [0, 0], sizes = [16, 32], strides = [1, 1]} : vector<16x96xf32> to vector<16x32xf32>
    %cst_157 = arith.constant 0.707106769 : f32
    %262 = vector.broadcast %cst_157 : f32 to vector<16x32xf32>
    %263 = arith.mulf %261, %262 : vector<16x32xf32>
    %264 = vector.extract_strided_slice %260 {offsets = [0, 32], sizes = [16, 32], strides = [1, 1]} : vector<16x96xf32> to vector<16x32xf32>
    %265 = vector.extract_strided_slice %260 {offsets = [0, 64], sizes = [16, 32], strides = [1, 1]} : vector<16x96xf32> to vector<16x32xf32>
    %c0_158 = arith.constant 0 : index
    %c0_159 = arith.constant 0 : index
    %266 = vector.load %arg38[%c0_158, %c0_159] : memref<256x32xf32, #tpu.memory_space<vmem>>, vector<256x32xf32>
    %c0_160 = arith.constant 0 : index
    %c0_161 = arith.constant 0 : index
    %267 = vector.load %arg37[%c0_160, %c0_161] : memref<256x16xf32, #tpu.memory_space<vmem>>, vector<256x16xf32>
    %cst_162 = arith.constant dense<0.000000e+00> : vector<256x32xf32>
    %268 = tpu.matmul %267, %263, %cst_162 {dimension_numbers = #tpu.dot_dimension_numbers<[1], [0], [0], [1], [0, 0, 1, 1], [], []>} : vector<256x16xf32>, vector<16x32xf32>, vector<256x32xf32> -> vector<256x32xf32>
    %269 = arith.mulf %268, %266 : vector<256x32xf32>
    %cst_163 = arith.constant dense<0.000000e+00> : vector<256x16xf32>
    %270 = tpu.matmul %269, %264, %cst_163 {dimension_numbers = #tpu.dot_dimension_numbers<[1], [1], [0], [0], [0, 0, 1, 0], [], []>} : vector<256x32xf32>, vector<16x32xf32>, vector<256x16xf32> -> vector<256x16xf32>
    %cst_164 = arith.constant dense<0xFF800000> : vector<256xf32>
    %271 = vector.multi_reduction <maximumf>, %270, %cst_164 [1] : vector<256x16xf32> to vector<256xf32>
    %272 = vector.shape_cast %271 : vector<256xf32> to vector<256x1xf32>
    %273 = vector.broadcast %272 : vector<256x1xf32> to vector<256x16xf32>
    %274 = arith.subf %270, %273 : vector<256x16xf32>
    %275 = math.exp %274 : vector<256x16xf32>
    %cst_165 = arith.constant dense<0.000000e+00> : vector<256xf32>
    %276 = vector.multi_reduction <add>, %275, %cst_165 [1] : vector<256x16xf32> to vector<256xf32>
    %277 = vector.shape_cast %276 : vector<256xf32> to vector<256x1xf32>
    %cst_166 = arith.constant 1.000000e+00 : f32
    %278 = vector.broadcast %cst_166 : f32 to vector<256x1xf32>
    %279 = arith.divf %278, %277 : vector<256x1xf32>
    %cst_167 = arith.constant dense<0.000000e+00> : vector<256x32xf32>
    %280 = tpu.matmul %275, %265, %cst_167 {dimension_numbers = #tpu.dot_dimension_numbers<[1], [0], [0], [1], [0, 0, 1, 1], [], []>} : vector<256x16xf32>, vector<16x32xf32>, vector<256x32xf32> -> vector<256x32xf32>
    %281 = arith.mulf %280, %266 : vector<256x32xf32>
    %282 = vector.broadcast %279 : vector<256x1xf32> to vector<256x32xf32>
    %283 = arith.mulf %281, %282 : vector<256x32xf32>
    %c0_168 = arith.constant 0 : index
    %c0_169 = arith.constant 0 : index
    %284 = vector.load %arg39[%c0_168, %c0_169] : memref<16x256xf32, #tpu.memory_space<vmem>>, vector<16x256xf32>
    %cst_170 = arith.constant dense<0.000000e+00> : vector<16x32xf32>
    %285 = tpu.matmul %284, %283, %cst_170 {dimension_numbers = #tpu.dot_dimension_numbers<[1], [0], [0], [1], [0, 0, 1, 1], [], []>} : vector<16x256xf32>, vector<256x32xf32>, vector<16x32xf32> -> vector<16x32xf32>
    %c0_171 = arith.constant 0 : index
    %c0_172 = arith.constant 0 : index
    %286 = vector.load %arg29[%c0_171, %c0_172] : memref<32x32xf32, #tpu.memory_space<vmem>>, vector<32x32xf32>
    %cst_173 = arith.constant dense<0.000000e+00> : vector<16x32xf32>
    %287 = tpu.matmul %285, %286, %cst_173 {dimension_numbers = #tpu.dot_dimension_numbers<[1], [0], [0], [1], [0, 0, 1, 1], [], []>} : vector<16x32xf32>, vector<32x32xf32>, vector<16x32xf32> -> vector<16x32xf32>
    %c0_174 = arith.constant 0 : index
    %c0_175 = arith.constant 0 : index
    %288 = vector.load %arg30[%c0_174, %c0_175] : memref<1x32xf32, #tpu.memory_space<vmem>>, vector<1x32xf32>
    %289 = vector.broadcast %288 : vector<1x32xf32> to vector<16x32xf32>
    %290 = arith.addf %287, %289 : vector<16x32xf32>
    %291 = arith.addf %290, %233 : vector<16x32xf32>
    %c0_176 = arith.constant 0 : index
    %c0_177 = arith.constant 0 : index
    %292 = vector.load %arg31[%c0_176, %c0_177] : memref<1x32xf32, #tpu.memory_space<vmem>>, vector<1x32xf32>
    %c0_178 = arith.constant 0 : index
    %c0_179 = arith.constant 0 : index
    %293 = vector.load %arg32[%c0_178, %c0_179] : memref<1x32xf32, #tpu.memory_space<vmem>>, vector<1x32xf32>
    %cst_180 = arith.constant dense<0.000000e+00> : vector<16xf32>
    %294 = vector.multi_reduction <add>, %291, %cst_180 [1] : vector<16x32xf32> to vector<16xf32>
    %295 = vector.shape_cast %294 : vector<16xf32> to vector<16x1xf32>
    %cst_181 = arith.constant 3.200000e+01 : f32
    %296 = vector.broadcast %cst_181 : f32 to vector<16x1xf32>
    %297 = arith.divf %295, %296 : vector<16x1xf32>
    %298 = vector.broadcast %297 : vector<16x1xf32> to vector<16x32xf32>
    %299 = arith.subf %291, %298 : vector<16x32xf32>
    %300 = arith.mulf %299, %299 : vector<16x32xf32>
    %cst_182 = arith.constant dense<0.000000e+00> : vector<16xf32>
    %301 = vector.multi_reduction <add>, %300, %cst_182 [1] : vector<16x32xf32> to vector<16xf32>
    %302 = vector.shape_cast %301 : vector<16xf32> to vector<16x1xf32>
    %cst_183 = arith.constant 3.200000e+01 : f32
    %303 = vector.broadcast %cst_183 : f32 to vector<16x1xf32>
    %304 = arith.divf %302, %303 : vector<16x1xf32>
    %cst_184 = arith.constant 9.99999997E-7 : f32
    %305 = vector.broadcast %cst_184 : f32 to vector<16x1xf32>
    %306 = arith.addf %304, %305 : vector<16x1xf32>
    %307 = math.rsqrt %306 : vector<16x1xf32>
    %308 = vector.broadcast %307 : vector<16x1xf32> to vector<16x32xf32>
    %309 = arith.mulf %299, %308 : vector<16x32xf32>
    %310 = vector.broadcast %292 : vector<1x32xf32> to vector<16x32xf32>
    %311 = arith.mulf %309, %310 : vector<16x32xf32>
    %312 = vector.broadcast %293 : vector<1x32xf32> to vector<16x32xf32>
    %313 = arith.addf %311, %312 : vector<16x32xf32>
    %c0_185 = arith.constant 0 : index
    %c0_186 = arith.constant 0 : index
    %314 = vector.load %arg33[%c0_185, %c0_186] : memref<32x128xf32, #tpu.memory_space<vmem>>, vector<32x128xf32>
    %cst_187 = arith.constant dense<0.000000e+00> : vector<16x128xf32>
    %315 = tpu.matmul %313, %314, %cst_187 {dimension_numbers = #tpu.dot_dimension_numbers<[1], [0], [0], [1], [0, 0, 1, 1], [], []>} : vector<16x32xf32>, vector<32x128xf32>, vector<16x128xf32> -> vector<16x128xf32>
    %c0_188 = arith.constant 0 : index
    %c0_189 = arith.constant 0 : index
    %316 = vector.load %arg34[%c0_188, %c0_189] : memref<1x128xf32, #tpu.memory_space<vmem>>, vector<1x128xf32>
    %317 = vector.broadcast %316 : vector<1x128xf32> to vector<16x128xf32>
    %318 = arith.addf %315, %317 : vector<16x128xf32>
    %cst_190 = arith.constant 0.000000e+00 : f32
    %319 = vector.broadcast %cst_190 : f32 to vector<16x128xf32>
    %320 = arith.maximumf %318, %319 : vector<16x128xf32>
    %c0_191 = arith.constant 0 : index
    %c0_192 = arith.constant 0 : index
    %321 = vector.load %arg35[%c0_191, %c0_192] : memref<128x32xf32, #tpu.memory_space<vmem>>, vector<128x32xf32>
    %cst_193 = arith.constant dense<0.000000e+00> : vector<16x32xf32>
    %322 = tpu.matmul %320, %321, %cst_193 {dimension_numbers = #tpu.dot_dimension_numbers<[1], [0], [0], [1], [0, 0, 1, 1], [], []>} : vector<16x128xf32>, vector<128x32xf32>, vector<16x32xf32> -> vector<16x32xf32>
    %c0_194 = arith.constant 0 : index
    %c0_195 = arith.constant 0 : index
    %323 = vector.load %arg36[%c0_194, %c0_195] : memref<1x32xf32, #tpu.memory_space<vmem>>, vector<1x32xf32>
    %324 = vector.broadcast %323 : vector<1x32xf32> to vector<16x32xf32>
    %325 = arith.addf %322, %324 : vector<16x32xf32>
    %326 = arith.addf %325, %291 : vector<16x32xf32>
    %327 = vector.extract_strided_slice %326 {offsets = [0, 0], sizes = [10, 32], strides = [1, 1]} : vector<16x32xf32> to vector<10x32xf32>
    %328 = vector.extract_strided_slice %326 {offsets = [3, 0], sizes = [10, 32], strides = [1, 1]} : vector<16x32xf32> to vector<10x32xf32>
    %329 = vector.extract_strided_slice %326 {offsets = [6, 0], sizes = [10, 32], strides = [1, 1]} : vector<16x32xf32> to vector<10x32xf32>
    %330 = tpu.concatenate %327, %328, %329 in 1 : vector<10x32xf32>, vector<10x32xf32>, vector<10x32xf32> -> vector<10x96xf32>
    %c6 = arith.constant 6 : index
    %c0_196 = arith.constant 0 : index
    %c0_197 = arith.constant 0 : index
    %331 = vector.load %arg6[%c6, %c0_196, %c0_197] : memref<7x96x32xf32, #tpu.memory_space<vmem>>, vector<1x96x32xf32>
    %332 = vector.shape_cast %331 : vector<1x96x32xf32> to vector<96x32xf32>
    %cst_198 = arith.constant dense<0.000000e+00> : vector<10x32xf32>
    %333 = tpu.matmul %330, %332, %cst_198 {dimension_numbers = #tpu.dot_dimension_numbers<[1], [0], [0], [1], [0, 0, 1, 1], [], []>} : vector<10x96xf32>, vector<96x32xf32>, vector<10x32xf32> -> vector<10x32xf32>
    %334 = vector.extract_strided_slice %333 {offsets = [0, 0], sizes = [1, 32], strides = [1, 1]} : vector<10x32xf32> to vector<1x32xf32>
    %335 = vector.extract_strided_slice %333 {offsets = [4, 0], sizes = [1, 32], strides = [1, 1]} : vector<10x32xf32> to vector<1x32xf32>
    %336 = vector.extract_strided_slice %333 {offsets = [8, 0], sizes = [1, 32], strides = [1, 1]} : vector<10x32xf32> to vector<1x32xf32>
    %337 = tpu.concatenate %334, %335, %336 in 0 : vector<1x32xf32>, vector<1x32xf32>, vector<1x32xf32> -> vector<3x32xf32>
    %c6_199 = arith.constant 6 : index
    %c0_200 = arith.constant 0 : index
    %c0_201 = arith.constant 0 : index
    %338 = vector.load %arg7[%c6_199, %c0_200, %c0_201] : memref<7x1x32xf32, #tpu.memory_space<vmem>>, vector<1x1x32xf32>
    %339 = vector.shape_cast %338 : vector<1x1x32xf32> to vector<1x32xf32>
    %340 = vector.broadcast %339 : vector<1x32xf32> to vector<3x32xf32>
    %341 = arith.addf %337, %340 : vector<3x32xf32>
    %cst_202 = arith.constant 0.000000e+00 : f32
    %342 = vector.broadcast %cst_202 : f32 to vector<3x32xf32>
    %343 = arith.maximumf %341, %342 : vector<3x32xf32>
    %c6_203 = arith.constant 6 : index
    %c0_204 = arith.constant 0 : index
    %c0_205 = arith.constant 0 : index
    %344 = vector.load %arg8[%c6_203, %c0_204, %c0_205] : memref<7x1x32xf32, #tpu.memory_space<vmem>>, vector<1x1x32xf32>
    %345 = vector.shape_cast %344 : vector<1x1x32xf32> to vector<1x32xf32>
    %346 = vector.broadcast %345 : vector<1x32xf32> to vector<3x32xf32>
    %347 = arith.mulf %343, %346 : vector<3x32xf32>
    %c6_206 = arith.constant 6 : index
    %c0_207 = arith.constant 0 : index
    %c0_208 = arith.constant 0 : index
    %348 = vector.load %arg9[%c6_206, %c0_207, %c0_208] : memref<7x1x32xf32, #tpu.memory_space<vmem>>, vector<1x1x32xf32>
    %349 = vector.shape_cast %348 : vector<1x1x32xf32> to vector<1x32xf32>
    %350 = vector.broadcast %349 : vector<1x32xf32> to vector<3x32xf32>
    %351 = arith.addf %347, %350 : vector<3x32xf32>
    %c0_209 = arith.constant 0 : index
    %c0_210 = arith.constant 0 : index
    %352 = vector.load %arg40[%c0_209, %c0_210] : memref<32x16xf32, #tpu.memory_space<vmem>>, vector<32x16xf32>
    %cst_211 = arith.constant dense<0.000000e+00> : vector<3x16xf32>
    %353 = tpu.matmul %351, %352, %cst_211 {dimension_numbers = #tpu.dot_dimension_numbers<[1], [0], [0], [1], [0, 0, 1, 1], [], []>} : vector<3x32xf32>, vector<32x16xf32>, vector<3x16xf32> -> vector<3x16xf32>
    %c0_212 = arith.constant 0 : index
    %c0_213 = arith.constant 0 : index
    %354 = vector.load %arg41[%c0_212, %c0_213] : memref<1x16xf32, #tpu.memory_space<vmem>>, vector<1x16xf32>
    %355 = vector.broadcast %354 : vector<1x16xf32> to vector<3x16xf32>
    %356 = arith.addf %353, %355 : vector<3x16xf32>
    %c0_214 = arith.constant 0 : index
    %c0_215 = arith.constant 0 : index
    %c0_216 = arith.constant 0 : index
    %357 = vector.load %arg42[%c0_214, %c0_215, %c0_216] : memref<1x3x16xf32, #tpu.memory_space<vmem>>, vector<1x3x16xf32>
    %358 = vector.shape_cast %357 : vector<1x3x16xf32> to vector<3x16xf32>
    %359 = vector.shape_cast %356 : vector<3x16xf32> to vector<1x3x16xf32>
    tpu.vector_store %arg42[%c0_214, %c0_215, %c0_216], %359 {strides = array<i32>} : memref<1x3x16xf32, #tpu.memory_space<vmem>>, vector<1x3x16xf32>,
    return
  }
  func.func @transform_0(%arg0: i32) -> (i32, i32, i32) {
    %c0_i32 = arith.constant 0 : i32
    %c0_i32_0 = arith.constant 0 : i32
    %c0_i32_1 = arith.constant 0 : i32
    return %arg0, %c0_i32, %c0_i32_0 : i32, i32, i32
  }
  func.func @transform_1(%arg0: i32) -> (i32, i32) {
    %c0_i32 = arith.constant 0 : i32
    %c0_i32_0 = arith.constant 0 : i32
    %c0_i32_1 = arith.constant 0 : i32
    return %c0_i32, %c0_i32_0 : i32, i32
  }
  func.func @transform_2(%arg0: i32) -> (i32, i32) {
    %c0_i32 = arith.constant 0 : i32
    %c0_i32_0 = arith.constant 0 : i32
    %c0_i32_1 = arith.constant 0 : i32
    return %c0_i32, %c0_i32_0 : i32, i32
  }
  func.func @transform_3(%arg0: i32) -> (i32, i32) {
    %c0_i32 = arith.constant 0 : i32
    %c0_i32_0 = arith.constant 0 : i32
    %c0_i32_1 = arith.constant 0 : i32
    return %c0_i32, %c0_i32_0 : i32, i32
  }
  func.func @transform_4(%arg0: i32) -> (i32, i32) {
    %c0_i32 = arith.constant 0 : i32
    %c0_i32_0 = arith.constant 0 : i32
    %c0_i32_1 = arith.constant 0 : i32
    return %c0_i32, %c0_i32_0 : i32, i32
  }
  func.func @transform_5(%arg0: i32) -> (i32, i32, i32) {
    %c0_i32 = arith.constant 0 : i32
    %c0_i32_0 = arith.constant 0 : i32
    %c0_i32_1 = arith.constant 0 : i32
    %c0_i32_2 = arith.constant 0 : i32
    return %c0_i32, %c0_i32_0, %c0_i32_1 : i32, i32, i32
  }
  func.func @transform_6(%arg0: i32) -> (i32, i32, i32) {
    %c0_i32 = arith.constant 0 : i32
    %c0_i32_0 = arith.constant 0 : i32
    %c0_i32_1 = arith.constant 0 : i32
    %c0_i32_2 = arith.constant 0 : i32
    return %c0_i32, %c0_i32_0, %c0_i32_1 : i32, i32, i32
  }
  func.func @transform_7(%arg0: i32) -> (i32, i32, i32) {
    %c0_i32 = arith.constant 0 : i32
    %c0_i32_0 = arith.constant 0 : i32
    %c0_i32_1 = arith.constant 0 : i32
    %c0_i32_2 = arith.constant 0 : i32
    return %c0_i32, %c0_i32_0, %c0_i32_1 : i32, i32, i32
  }
  func.func @transform_8(%arg0: i32) -> (i32, i32, i32) {
    %c0_i32 = arith.constant 0 : i32
    %c0_i32_0 = arith.constant 0 : i32
    %c0_i32_1 = arith.constant 0 : i32
    %c0_i32_2 = arith.constant 0 : i32
    return %c0_i32, %c0_i32_0, %c0_i32_1 : i32, i32, i32
  }
  func.func @transform_9(%arg0: i32) -> (i32, i32) {
    %c0_i32 = arith.constant 0 : i32
    %c0_i32_0 = arith.constant 0 : i32
    %c0_i32_1 = arith.constant 0 : i32
    return %c0_i32, %c0_i32_0 : i32, i32
  }
  func.func @transform_10(%arg0: i32) -> (i32, i32) {
    %c0_i32 = arith.constant 0 : i32
    %c0_i32_0 = arith.constant 0 : i32
    %c0_i32_1 = arith.constant 0 : i32
    return %c0_i32, %c0_i32_0 : i32, i32
  }
  func.func @transform_11(%arg0: i32) -> (i32, i32) {
    %c0_i32 = arith.constant 0 : i32
    %c0_i32_0 = arith.constant 0 : i32
    %c0_i32_1 = arith.constant 0 : i32
    return %c0_i32, %c0_i32_0 : i32, i32
  }
  func.func @transform_12(%arg0: i32) -> (i32, i32) {
    %c0_i32 = arith.constant 0 : i32
    %c0_i32_0 = arith.constant 0 : i32
    %c0_i32_1 = arith.constant 0 : i32
    return %c0_i32, %c0_i32_0 : i32, i32
  }
  func.func @transform_13(%arg0: i32) -> (i32, i32) {
    %c0_i32 = arith.constant 0 : i32
    %c0_i32_0 = arith.constant 0 : i32
    %c0_i32_1 = arith.constant 0 : i32
    return %c0_i32, %c0_i32_0 : i32, i32
  }
  func.func @transform_14(%arg0: i32) -> (i32, i32) {
    %c0_i32 = arith.constant 0 : i32
    %c0_i32_0 = arith.constant 0 : i32
    %c0_i32_1 = arith.constant 0 : i32
    return %c0_i32, %c0_i32_0 : i32, i32
  }
  func.func @transform_15(%arg0: i32) -> (i32, i32) {
    %c0_i32 = arith.constant 0 : i32
    %c0_i32_0 = arith.constant 0 : i32
    %c0_i32_1 = arith.constant 0 : i32
    return %c0_i32, %c0_i32_0 : i32, i32
  }
  func.func @transform_16(%arg0: i32) -> (i32, i32) {
    %c0_i32 = arith.constant 0 : i32
    %c0_i32_0 = arith.constant 0 : i32
    %c0_i32_1 = arith.constant 0 : i32
    return %c0_i32, %c0_i32_0 : i32, i32
  }
  func.func @transform_17(%arg0: i32) -> (i32, i32) {
    %c0_i32 = arith.constant 0 : i32
    %c0_i32_0 = arith.constant 0 : i32
    %c0_i32_1 = arith.constant 0 : i32
    return %c0_i32, %c0_i32_0 : i32, i32
  }
  func.func @transform_18(%arg0: i32) -> (i32, i32) {
    %c0_i32 = arith.constant 0 : i32
    %c0_i32_0 = arith.constant 0 : i32
    %c0_i32_1 = arith.constant 0 : i32
    return %c0_i32, %c0_i32_0 : i32, i32
  }
  func.func @transform_19(%arg0: i32) -> (i32, i32) {
    %c0_i32 = arith.constant 0 : i32
    %c0_i32_0 = arith.constant 0 : i32
    %c0_i32_1 = arith.constant 0 : i32
    return %c0_i32, %c0_i32_0 : i32, i32
  }
  func.func @transform_20(%arg0: i32) -> (i32, i32) {
    %c0_i32 = arith.constant 0 : i32
    %c0_i32_0 = arith.constant 0 : i32
    %c0_i32_1 = arith.constant 0 : i32
    return %c0_i32, %c0_i32_0 : i32, i32
  }
  func.func @transform_21(%arg0: i32) -> (i32, i32) {
    %c0_i32 = arith.constant 0 : i32
    %c0_i32_0 = arith.constant 0 : i32
    %c0_i32_1 = arith.constant 0 : i32
    return %c0_i32, %c0_i32_0 : i32, i32
  }
  func.func @transform_22(%arg0: i32) -> (i32, i32) {
    %c0_i32 = arith.constant 0 : i32
    %c0_i32_0 = arith.constant 0 : i32
    %c0_i32_1 = arith.constant 0 : i32
    return %c0_i32, %c0_i32_0 : i32, i32
  }
  func.func @transform_23(%arg0: i32) -> (i32, i32) {
    %c0_i32 = arith.constant 0 : i32
    %c0_i32_0 = arith.constant 0 : i32
    %c0_i32_1 = arith.constant 0 : i32
    return %c0_i32, %c0_i32_0 : i32, i32
  }
  func.func @transform_24(%arg0: i32) -> (i32, i32) {
    %c0_i32 = arith.constant 0 : i32
    %c0_i32_0 = arith.constant 0 : i32
    %c0_i32_1 = arith.constant 0 : i32
    return %c0_i32, %c0_i32_0 : i32, i32
  }
  func.func @transform_25(%arg0: i32) -> (i32, i32) {
    %c0_i32 = arith.constant 0 : i32
    %c0_i32_0 = arith.constant 0 : i32
    %c0_i32_1 = arith.constant 0 : i32
    return %c0_i32, %c0_i32_0 : i32, i32
  }
  func.func @transform_26(%arg0: i32) -> (i32, i32) {
    %c0_i32 = arith.constant 0 : i32
    %c0_i32_0 = arith.constant 0 : i32
    %c0_i32_1 = arith.constant 0 : i32
    return %c0_i32, %c0_i32_0 : i32, i32
  }
  func.func @transform_27(%arg0: i32) -> (i32, i32) {
    %c0_i32 = arith.constant 0 : i32
    %c0_i32_0 = arith.constant 0 : i32
    %c0_i32_1 = arith.constant 0 : i32
    return %c0_i32, %c0_i32_0 : i32, i32
  }
  func.func @transform_28(%arg0: i32) -> (i32, i32) {
    %c0_i32 = arith.constant 0 : i32
    %c0_i32_0 = arith.constant 0 : i32
    %c0_i32_1 = arith.constant 0 : i32
    return %c0_i32, %c0_i32_0 : i32, i32
  }
  func.func @transform_29(%arg0: i32) -> (i32, i32) {
    %c0_i32 = arith.constant 0 : i32
    %c0_i32_0 = arith.constant 0 : i32
    %c0_i32_1 = arith.constant 0 : i32
    return %c0_i32, %c0_i32_0 : i32, i32
  }
  func.func @transform_30(%arg0: i32) -> (i32, i32) {
    %c0_i32 = arith.constant 0 : i32
    %c0_i32_0 = arith.constant 0 : i32
    %c0_i32_1 = arith.constant 0 : i32
    return %c0_i32, %c0_i32_0 : i32, i32
  }
  func.func @transform_31(%arg0: i32) -> (i32, i32) {
    %c0_i32 = arith.constant 0 : i32
    %c0_i32_0 = arith.constant 0 : i32
    %c0_i32_1 = arith.constant 0 : i32
    return %c0_i32, %c0_i32_0 : i32, i32
  }
  func.func @transform_32(%arg0: i32) -> (i32, i32) {
    %c0_i32 = arith.constant 0 : i32
    %c0_i32_0 = arith.constant 0 : i32
    %c0_i32_1 = arith.constant 0 : i32
    return %c0_i32, %c0_i32_0 : i32, i32
  }
  func.func @transform_33(%arg0: i32) -> (i32, i32) {
    %c0_i32 = arith.constant 0 : i32
    %c0_i32_0 = arith.constant 0 : i32
    %c0_i32_1 = arith.constant 0 : i32
    return %c0_i32, %c0_i32_0 : i32, i32
  }
  func.func @transform_34(%arg0: i32) -> (i32, i32) {
    %c0_i32 = arith.constant 0 : i32
    %c0_i32_0 = arith.constant 0 : i32
    %c0_i32_1 = arith.constant 0 : i32
    return %c0_i32, %c0_i32_0 : i32, i32
  }
  func.func @transform_35(%arg0: i32) -> (i32, i32) {
    %c0_i32 = arith.constant 0 : i32
    %c0_i32_0 = arith.constant 0 : i32
    %c0_i32_1 = arith.constant 0 : i32
    return %c0_i32, %c0_i32_0 : i32, i32
  }
  func.func @transform_36(%arg0: i32) -> (i32, i32) {
    %c0_i32 = arith.constant 0 : i32
    %c0_i32_0 = arith.constant 0 : i32
    %c0_i32_1 = arith.constant 0 : i32
    return %c0_i32, %c0_i32_0 : i32, i32
  }
  func.func @transform_37(%arg0: i32) -> (i32, i32) {
    %c0_i32 = arith.constant 0 : i32
    %c0_i32_0 = arith.constant 0 : i32
    %c0_i32_1 = arith.constant 0 : i32
    return %c0_i32, %c0_i32_0 : i32, i32
  }
  func.func @transform_38(%arg0: i32) -> (i32, i32) {
    %c0_i32 = arith.constant 0 : i32
    %c0_i32_0 = arith.constant 0 : i32
    %c0_i32_1 = arith.constant 0 : i32
    return %c0_i32, %c0_i32_0 : i32, i32
  }
  func.func @transform_39(%arg0: i32) -> (i32, i32) {
    %c0_i32 = arith.constant 0 : i32
    %c0_i32_0 = arith.constant 0 : i32
    %c0_i32_1 = arith.constant 0 : i32
    return %c0_i32, %c0_i32_0 : i32, i32
  }
  func.func @transform_40(%arg0: i32) -> (i32, i32) {
    %c0_i32 = arith.constant 0 : i32
    %c0_i32_0 = arith.constant 0 : i32
    %c0_i32_1 = arith.constant 0 : i32
    return %c0_i32, %c0_i32_0 : i32, i32
  }
  func.func @transform_41(%arg0: i32) -> (i32, i32, i32) {
    %c0_i32 = arith.constant 0 : i32
    %c0_i32_0 = arith.constant 0 : i32
    %c0_i32_1 = arith.constant 0 : i32
    return %arg0, %c0_i32, %c0_i32_0 : i32, i32, i32
  }
}

</mosaic_0001>

<bundles_post_ra>
// kernel: net_forward.1
= control target key start
LH: loop header
LB: loop body
LE: loop exit
PB: predicated region body
PF: predicated region fallthrough
CT: control target
= control target key end

     0   :  { %s13588_s6 = smov 1   ;;  %s13589_s10 = smov 2   ;;  %s16702_s0 = inlined_call_operand.smem [shape: u32[42], index: -1, kind: input, shape index: {}] }
   0x1   :  { %s13673_s5 = sld [smem:[%s16702_s0]]   ;;  %s13590_s14 = smov 3  }
   0x2   :  { %s13678_s9 = sld [smem:[%s16702_s0 + %s13588_s6]]   ;;  %s13591_s18 = smov 4  }
   0x3   :  { %s13683_s13 = sld [smem:[%s16702_s0 + %s13589_s10]]   ;;  %s13592_s22 = smov 5  }
   0x4   :  { %s13688_s17 = sld [smem:[%s16702_s0 + %s13590_s14]]   ;;  %s13593_s26 = smov 6  }
   0x5   :  { %s13693_s21 = sld [smem:[%s16702_s0 + %s13591_s18]]   ;;  %s13594_s30 = smov 7  }
   0x6   :  { %s13698_s25 = sld [smem:[%s16702_s0 + %s13592_s22]]   ;;  %s13595_s4 = smov 8  }
   0x7   :  { %16769 = sst [smem:[#allocation52_spill]] %s13673_s5  ;;  %s13596_s10 = smov 9  }
   0x8   :  { %16770 = sst [smem:[#allocation53_spill]] %s13678_s9  ;;  %s13597_s15 = smov 10  }
   0x9   :  { %16771 = sst [smem:[#allocation54_spill]] %s13683_s13  ;;  %s13598_s20 = smov 11  }
   0xa   :  { %16772 = sst [smem:[#allocation55_spill]] %s13688_s17  ;;  %s13600_s1 = smov 13  }
   0xb   :  { %16773 = sst [smem:[#allocation56_spill]] %s13693_s21  ;;  %s13601_s7 = smov 14  }
   0xc   :  { %16774 = sst [smem:[#allocation57_spill]] %s13698_s25  ;;  %s13603_s22 = smov 16  }
   0xd   :  { %s13703_s29 = sld [smem:[%s16702_s0 + %s13593_s26]]   ;;  %s13599_s26 = smov 12  }
   0xe   :  { %s13708_s3 = sld [smem:[%s16702_s0 + %s13594_s30]]   ;;  %s13604_s28 = smov 17  }
   0xf   :  { %s13713_s8 = sld [smem:[%s16702_s0 + %s13595_s4]]  }
  0x10   :  { %s13718_s14 = sld [smem:[%s16702_s0 + %s13596_s10]]  }
  0x11   :  { %s13723_s19 = sld [smem:[%s16702_s0 + %s13597_s15]]   ;;  %s13602_s15 = smov 15  }
  0x12   :  { %s13728_s24 = sld [smem:[%s16702_s0 + %s13598_s20]]  }
  0x13   :  { %s13733_s30 = sld [smem:[%s16702_s0 + %s13599_s26]]  }
  0x14   :  { %16775 = sst [smem:[#allocation58_spill]] %s13708_s3 }
  0x15   :  { %16776 = sst [smem:[#allocation59_spill]] %s13713_s8 }
  0x16   :  { %16777 = sst [smem:[#allocation60_spill]] %s13718_s14 }
  0x17   :  { %s13738_s6 = sld [smem:[%s16702_s0 + %s13600_s1]]  }
  0x18   :  { %16778 = sst [smem:[#allocation61_spill]] %s13728_s24 }
  0x19   :  { %s13743_s12 = sld [smem:[%s16702_s0 + %s13601_s7]]   ;;  %s13605_s7 = smov 18  }
  0x1a   :  { %s13748_s20 = sld [smem:[%s16702_s0 + %s13602_s15]]   ;;  %s13606_s15 = smov 19  }
  0x1b   :  { %s13753_s27 = sld [smem:[%s16702_s0 + %s13603_s22]]   ;;  %s13607_s22 = smov 20  }
  0x1c   :  { %s13758_s4 = sld [smem:[%s16702_s0 + %s13604_s28]]   ;;  %s13608_s28 = smov 21  }
  0x1d   :  { %16779 = sst [smem:[#allocation62_spill]] %s13738_s6 }
  0x1e   :  { %s13763_s6 = sld [smem:[%s16702_s0 + %s13605_s7]]   ;;  %s13609_s7 = smov 22  }
  0x1f   :  { %16780 = sst [smem:[#allocation63_spill]] %s13743_s12 }
  0x20   :  { %s13768_s14 = sld [smem:[%s16702_s0 + %s13606_s15]]   ;;  %s13610_s15 = smov 23  }
  0x21   :  { %16781 = sst [smem:[#allocation64_spill]] %s13753_s27 }
  0x22   :  { %16782 = sst [smem:[#allocation65_spill]] %s13758_s4 }
  0x23   :  { %s13773_s24 = sld [smem:[%s16702_s0 + %s13607_s22]]   ;;  %s13611_s22 = smov 24  }
  0x24   :  { %16783 = sst [smem:[#allocation66_spill]] %s13763_s6 }
  0x25   :  { %s13778_s21 = sld [smem:[%s16702_s0 + %s13608_s28]]   ;;  %s13612_s28 = smov 25  }
  0x26   :  { %16784 = sst [smem:[#allocation67_spill]] %s13768_s14 }
  0x27   :  { %s13783_s17 = sld [smem:[%s16702_s0 + %s13609_s7]]   ;;  %s13613_s7 = smov 26  }
  0x28   :  { %s13788_s14 = sld [smem:[%s16702_s0 + %s13610_s15]]   ;;  %s13614_s15 = smov 27  }
  0x29   :  { %s13793_s13 = sld [smem:[%s16702_s0 + %s13611_s22]]   ;;  %s13615_s22 = smov 28  }
  0x2a   :  { %s13808_s25 = sld [smem:[%s16702_s0 + %s13614_s15]]   ;;  %s13618_s15 = smov 31  }
  0x2b   :  { %16785 = sst [smem:[#allocation68_spill]] %s13778_s21 }
  0x2c   :  { %s13798_s21 = sld [smem:[%s16702_s0 + %s13612_s28]]   ;;  %s13616_s28 = smov 29  }
  0x2d   :  { %16786 = sst [smem:[#allocation69_spill]] %s13783_s17 }
  0x2e   :  { %16787 = sst [smem:[#allocation70_spill]] %s13788_s14 }
  0x2f   :  { %s13803_s17 = sld [smem:[%s16702_s0 + %s13613_s7]]   ;;  %s13617_s7 = smov 30  }
  0x30   :  { %s13813_s5 = sld [smem:[%s16702_s0 + %s13615_s22]]   ;;  %s13619_s22 = smov 32  }
  0x31   :  { %s13828_s14 = sld [smem:[%s16702_s0 + %s13618_s15]]   ;;  %s13622_s15 = smov 35  }
  0x32   :  { %16788 = sst [smem:[#allocation71_spill]] %s13798_s21 }
  0x33   :  { %s13818_s21 = sld [smem:[%s16702_s0 + %s13616_s28]]   ;;  %s13620_s28 = smov 33  }
  0x35   :  { %16789 = sst [smem:[#allocation72_spill]] %s13803_s17 }
  0x36   :  { %16790 = sst [smem:[#allocation73_spill]] %s13813_s5 }
  0x37   :  { %s13823_s17 = sld [smem:[%s16702_s0 + %s13617_s7]]   ;;  %s13621_s7 = smov 34  }
  0x38   :  { %16792 = sst [smem:[#allocation75_spill]] %s13828_s14 }
  0x39   :  { %16791 = sst [smem:[#allocation74_spill]] %s13818_s21 }
  0x3a   :  { %s13833_s5 = sld [smem:[%s16702_s0 + %s13619_s22]]   ;;  %s13623_s22 = smov 36  }
  0x3b   :  { %s13838_s21 = sld [smem:[%s16702_s0 + %s13620_s28]]   ;;  %s13624_s28 = smov 37  }
  0x3c   :  { %s13843_s6 = sld [smem:[%s16702_s0 + %s13621_s7]]   ;;  %s13625_s7 = smov 38  }
  0x3d   :  { %s13848_s14 = sld [smem:[%s16702_s0 + %s13622_s15]]   ;;  %s13626_s15 = smov 39  }
  0x3e   :  { %s13853_s27 = sld [smem:[%s16702_s0 + %s13623_s22]]   ;;  %s13627_s22 = smov 40  }
  0x3f   :  { %s13868_s12 = sld [smem:[%s16702_s0 + %s13626_s15]]  }
  0x40   :  { %16793 = sst [smem:[#allocation76_spill]] %s13833_s5 }
  0x41   :  { %16794 = sst [smem:[#allocation77_spill]] %s13838_s21 }
  0x42   :  { %16795 = sst [smem:[#allocation78_spill]] %s13843_s6 }
  0x43   :  { %s13858_s21 = sld [smem:[%s16702_s0 + %s13624_s28]]   ;;  %s13628_s28 = smov 41  }
  0x44   :  { %16796 = sst [smem:[#allocation79_spill]] %s13853_s27 }
  0x45   :  { %s13863_s6 = sld [smem:[%s16702_s0 + %s13625_s7]]  }
  0x46   :  { %s13873_s27 = sld [smem:[%s16702_s0 + %s13627_s22]]  }
  0x49   :  { %16797 = sst [smem:[#allocation80_spill]] %s13858_s21 }
  0x4a   :  { %s13878_s21 = sld [smem:[%s16702_s0 + %s13628_s28]]  }
  0x4b   :  { %88 = vsyncpa [#allocation3], 0 }
  0x4c   :  { %89 = vsyncpa [#allocation5], 0 }
  0x4d   :  { %90 = vsyncpa [#allocation8], 0 }
  0x4e   :  { %91 = vsyncpa [#allocation11], 0 }
  0x4f   :  { %92 = vsyncpa [#allocation14], 0 }
  0x50   :  { %93 = vsyncpa [#allocation17], 0 }
  0x51   :  { %94 = vsyncpa [#allocation20], 0 }
  0x52   :  { %95 = vsyncpa [#allocation23], 0 }
  0x53   :  { %96 = vsyncpa [#allocation26], 0 }
  0x54   :  { %97 = vsyncpa [#allocation29], 0 }
  0x55   :  { %98 = vsyncpa [#allocation32], 0 }
  0x56   :  { %99 = vsyncpa [#allocation35], 0 }
  0x57   :  { %100 = vsyncpa [#allocation38], 0  ;;  %s13880_s7 = smov 0  }
  0x58 LB: > { %s16798_s9 = sld [smem:[#allocation53_spill]]  ;;  %s16799_s8 = sld [smem:[#allocation59_spill]]  ;;  %s13586_s7 = sphi %s13880_s7, %s106_s7  }
  0x59   : > { %s16800_s5 = sld [smem:[#allocation76_spill]]  ;;  %s16801_s4 = sld [smem:[#allocation65_spill]] }
  0x5a   : > { %s16802_s3 = sld [smem:[#allocation58_spill]]  ;;  %16803 = sst [smem:[#allocation81_spill]] %s13586_s7 }
  0x5b   : > { %s13629_s0 = smov [#allocation4]   ;;  %s13886_s11 = sadd.s32 4294967295, %s13586_s7  }
  0x5c   : > { %s1040_s10 = sshll.u32 %s13629_s0, 4  ;;  %p9434_p0 = scmp.ge.s32.totalorder %s13586_s7, 1  ;;  %s13891_s10 = int_to_ptr.vmem [resolvable:$true] %s1040_s10 }
  0x5d   : > { %p1003_p1 = scmp.lt.s32.totalorder %s13586_s7, 3  ;;  %p16722_p2 = scmp.eq.s32.totalorder %s13886_s11, 0 }
  0x5e   : > { %s13630_s16 = smov [#allocation7]   ;;  %s13631_s23 = smov [#allocation10]  }
  0x5f   : > { %p13893_p3 = pnand %p9434_p0, %p1003_p1  ;;  %s1066_s18 = sshll.u32 %s13630_s16, 4  ;;  %s13899_s18 = int_to_ptr.vmem [resolvable:$true] %s1066_s18 }
  0x60   : > { %s1097_s26 = sshll.u32 %s13631_s23, 4  ;;  %s13632_s28 = smov [#allocation13]   ;;  %s13907_s26 = int_to_ptr.vmem [resolvable:$true] %s1097_s26 }
  0x61   : > { %s16804_s15 = scalar_select %p13893_p3, 1, 0 }
  0x62   : > { %p12092_p4 = pneg %p13893_p3  ;;  %s13909_s1 = sshll.u32 %s13632_s28, 4  ;;  %s1123_s1 = int_to_ptr.vmem [resolvable:$true] %s13909_s1 }
  0x63   : > { %s12856_s2 = scalar_lea.hbm %s13703_s29, 112 }
  0x64   : > { %p13903_p5 = pnand %p16722_p2, %p12092_p4  ;;  %p12857_p6 = scmp.ne.s32.totalorder %s13703_s29, %s12856_s2 }
  0x65   : > { %p12863_p10 = scmp.lt.u32.totalorder %s12856_s2, %s13703_s29 }
  0x66   : > { %p13915_p7 = pneg %p13903_p5 }
  0x68   : > { %p12859_p8 = pnand %p13915_p7, %p12857_p6 }
  0x6a   : > { %p12860_p9 = pneg %p12859_p8 }
  0x6c   : > { %p12865_p11 = pnand %p12863_p10, %p12860_p9 }
  0x6e   : > { %12868 = shalt.err (!%p12865_p11)
}
  0x6f   : > { %s12869_s16 = scalar_lea.vmem %s13891_s10, 112  ;;  %s12876_s23 = scalar_lea.vmem %s13891_s10, 128 }
  0x70   : > { %p12870_p12 = scmp.ne.s32.totalorder %s13891_s10, %s12869_s16  ;;  %p12877_p1 = scmp.lt.s32.totalorder %s13891_s10, %s13891_s10 }
  0x71   : > { %p12878_p4 = scmp.lt.s32.totalorder %s12876_s23, %s12869_s16 }
  0x72   : > { %p12872_p13 = pnand %p12870_p12, %p13915_p7 }
  0x73   : > { %p12879_p2 = por %p12878_p4, %p12877_p1 }
  0x74   : > { %p12873_p0 = pneg %p12872_p13 }
  0x76   : > { %p12880_p6 = pnand %p12879_p2, %p12873_p0 }
  0x78   : > { %12883 = shalt.err (!%p12880_p6)
}
  0x79   : > { %s16725_s28 = smov 16   ;;  %s16726_s2 = smov 1  }
  0x7a   : > { %12098 = dma.hbm_to_vmem [thread:$0]  (!%p13903_p5), %s13703_s29, 112, %s13891_s10, [#allocation5], %s16725_s28, %s16725_s28, %s16726_s2  }
  0x7b   : > { %s12884_s7 = scalar_lea.hbm %s16799_s8, 112 }
  0x7c   : > { %p12885_p8 = scmp.ne.s32.totalorder %s16799_s8, %s12884_s7  ;;  %p12891_p10 = scmp.lt.u32.totalorder %s12884_s7, %s16799_s8 }
  0x7e   : > { %p12887_p9 = pnand %p12885_p8, %p13915_p7 }
  0x80   : > { %p12888_p2 = pneg %p12887_p9 }
  0x82   : > { %p12893_p11 = pnand %p12891_p10, %p12888_p2 }
  0x84   : > { %12896 = shalt.err (!%p12893_p11)
}
  0x85   : > { %s12897_s16 = scalar_lea.vmem %s13899_s18, 112  ;;  %s12904_s23 = scalar_lea.vmem %s13899_s18, 128 }
  0x86   : > { %p12898_p12 = scmp.ne.s32.totalorder %s13899_s18, %s12897_s16  ;;  %p12905_p1 = scmp.lt.s32.totalorder %s13899_s18, %s13899_s18 }
  0x87   : > { %p12906_p4 = scmp.lt.s32.totalorder %s12904_s23, %s12897_s16 }
  0x88   : > { %p12900_p13 = pnand %p12898_p12, %p13915_p7 }
  0x89   : > { %p12907_p6 = por %p12906_p4, %p12905_p1 }
  0x8a   : > { %p12901_p0 = pneg %p12900_p13 }
  0x8c   : > { %p12908_p8 = pnand %p12907_p6, %p12901_p0 }
  0x8e   : > { %12911 = shalt.err (!%p12908_p8)
}
  0x8f   : > { %12104 = dma.hbm_to_vmem [thread:$0]  (!%p13903_p5), %s16799_s8, 112, %s13899_s18, [#allocation8], %s16725_s28, %s16725_s28, %s16726_s2  }
  0x90   : > { %s12912_s7 = scalar_lea.hbm %s13733_s30, 16 }
  0x91   : > { %p12913_p9 = scmp.ne.s32.totalorder %s13733_s30, %s12912_s7  ;;  %p12919_p11 = scmp.lt.u32.totalorder %s12912_s7, %s13733_s30 }
  0x93   : > { %p12915_p2 = pnand %p12913_p9, %p13915_p7 }
  0x95   : > { %p12916_p10 = pneg %p12915_p2 }
  0x97   : > { %p12921_p12 = pnand %p12919_p11, %p12916_p10 }
  0x99   : > { %12924 = shalt.err (!%p12921_p12)
}
  0x9a   : > { %s12925_s10 = scalar_lea.vmem %s13907_s26, 16  ;;  %s12932_s16 = scalar_lea.vmem %s13907_s26, 32 }
  0x9b   : > { %p12926_p13 = scmp.ne.s32.totalorder %s13907_s26, %s12925_s10  ;;  %p12933_p4 = scmp.lt.s32.totalorder %s13907_s26, %s13907_s26 }
  0x9c   : > { %p12934_p6 = scmp.lt.s32.totalorder %s12932_s16, %s12925_s10 }
  0x9d   : > { %p12928_p0 = pnand %p12926_p13, %p13915_p7 }
  0x9e   : > { %p12935_p8 = por %p12934_p6, %p12933_p4 }
  0x9f   : > { %p12929_p1 = pneg %p12928_p0 }
  0xa1   : > { %p12936_p9 = pnand %p12935_p8, %p12929_p1 }
  0xa3   : > { %12939 = shalt.err (!%p12936_p9)
}
  0xa4   : > { %12110 = dma.hbm_to_vmem [thread:$0]  (!%p13903_p5), %s13733_s30, 16, %s13907_s26, [#allocation11]  }
  0xa5   : > { %s12940_s18 = scalar_lea.hbm %s13748_s20, 16 }
  0xa6   : > { %p12941_p2 = scmp.ne.s32.totalorder %s13748_s20, %s12940_s18  ;;  %p12947_p12 = scmp.lt.u32.totalorder %s12940_s18, %s13748_s20 }
  0xa8   : > { %p12943_p10 = pnand %p12941_p2, %p13915_p7 }
  0xaa   : > { %p12944_p11 = pneg %p12943_p10 }
  0xac   : > { %p12949_p13 = pnand %p12947_p12, %p12944_p11 }
  0xae   : > { %12952 = shalt.err (!%p12949_p13)
}
  0xaf   : > { %s12953_s23 = scalar_lea.vmem %s1123_s1, 16  ;;  %s12960_s7 = scalar_lea.vmem %s1123_s1, 32 }
  0xb0   : > { %p12954_p0 = scmp.ne.s32.totalorder %s1123_s1, %s12953_s23  ;;  %p12961_p6 = scmp.lt.s32.totalorder %s1123_s1, %s1123_s1 }
  0xb1   : > { %p12962_p8 = scmp.lt.s32.totalorder %s12960_s7, %s12953_s23 }
  0xb2   : > { %p12956_p1 = pnand %p12954_p0, %p13915_p7 }
  0xb3   : > { %p12963_p9 = por %p12962_p8, %p12961_p6 }
  0xb4   : > { %p12957_p4 = pneg %p12956_p1 }
  0xb6   : > { %p12964_p3 = pnand %p12963_p9, %p12957_p4 }
  0xb8   : > { %12967 = shalt.err (!%p12964_p3)
}
  0xb9   : > { %12116 = dma.hbm_to_vmem [thread:$0]  (!%p13903_p5), %s13748_s20, 16, %s1123_s1, [#allocation14]  }
  0xba   : > { %s13635_s26 = smov [#allocation16]   ;;  %s13636_s16 = smov [#allocation19]  }
  0xbb   : > { %s1143_s10 = sshll.u32 %s13635_s26, 4  ;;  %s1171_s18 = sshll.u32 %s13636_s16, 4  ;;  %s1144_s10 = int_to_ptr.vmem [resolvable:$true] %s1143_s10  ;;  %s1172_s18 = int_to_ptr.vmem [resolvable:$true] %s1171_s18 }
  0xbc   : > { %s12968_s28 = scalar_lea.hbm %s16801_s4, 512 }
  0xbd   : > { %p12969_p2 = scmp.ne.s32.totalorder %s16801_s4, %s12968_s28  ;;  %p12975_p12 = scmp.lt.u32.totalorder %s12968_s28, %s16801_s4 }
  0xbf   : > { %p12971_p10 = pnand %p12969_p2, %p13915_p7 }
  0xc1   : > { %p12972_p11 = pneg %p12971_p10 }
  0xc3   : > { %p12977_p3 = pnand %p12975_p12, %p12972_p11 }
  0xc5   : > { %12980 = shalt.err (!%p12977_p3)
}
  0xc6   : > { %s12981_s23 = scalar_lea.vmem %s1144_s10, 512  ;;  %p12989_p4 = scmp.lt.s32.totalorder %s1144_s10, %s1144_s10 }
  0xc7   : > { %p12982_p13 = scmp.ne.s32.totalorder %s1144_s10, %s12981_s23  ;;  %p12990_p6 = scmp.lt.s32.totalorder %s12981_s23, %s12981_s23 }
  0xc9   : > { %p12984_p0 = pnand %p12982_p13, %p13915_p7  ;;  %p12991_p8 = por %p12990_p6, %p12989_p4 }
  0xcb   : > { %p12985_p1 = pneg %p12984_p0 }
  0xcd   : > { %p12992_p9 = pnand %p12991_p8, %p12985_p1 }
  0xcf   : > { %12995 = shalt.err (!%p12992_p9)
}
  0xd0   : > { %s16727_s1 = smov 128   ;;  %s16729_s28 = smov 8  }
  0xd1   : > { %12122 = dma.hbm_to_vmem [thread:$0]  (!%p13903_p5), %s16801_s4, 512, %s1144_s10, [#allocation17], %s16727_s1, %s16727_s1, %s16729_s28  }
  0xd2   : > { %s12996_s7 = scalar_lea.hbm %s13773_s24, 16 }
  0xd3   : > { %p12997_p2 = scmp.ne.s32.totalorder %s13773_s24, %s12996_s7  ;;  %p13003_p12 = scmp.lt.u32.totalorder %s12996_s7, %s13773_s24 }
  0xd5   : > { %p12999_p10 = pnand %p12997_p2, %p13915_p7 }
  0xd7   : > { %p13000_p11 = pneg %p12999_p10 }
  0xd9   : > { %p13005_p3 = pnand %p13003_p12, %p13000_p11 }
  0xdb   : > { %13008 = shalt.err (!%p13005_p3)
}
  0xdc   : > { %s13009_s26 = scalar_lea.vmem %s1172_s18, 16  ;;  %s13016_s16 = scalar_lea.vmem %s1172_s18, 32 }
  0xdd   : > { %p13010_p13 = scmp.ne.s32.totalorder %s1172_s18, %s13009_s26  ;;  %p13017_p4 = scmp.lt.s32.totalorder %s1172_s18, %s1172_s18 }
  0xde   : > { %p13018_p6 = scmp.lt.s32.totalorder %s13016_s16, %s13009_s26 }
  0xdf   : > { %p13012_p0 = pnand %p13010_p13, %p13915_p7 }
  0xe0   : > { %p13019_p8 = por %p13018_p6, %p13017_p4 }
  0xe1   : > { %p13013_p1 = pneg %p13012_p0 }
  0xe3   : > { %p13020_p9 = pnand %p13019_p8, %p13013_p1 }
  0xe5   : > { %13023 = shalt.err (!%p13020_p9)
}
  0xe6   : > { %12128 = dma.hbm_to_vmem [thread:$0]  (!%p13903_p5), %s13773_s24, 16, %s1172_s18, [#allocation20]  }
  0xe7   : > { %s13639_s10 = smov [#allocation22]   ;;  %s13640_s7 = smov [#allocation25]  }
  0xe8   : > { %s1201_s23 = sshll.u32 %s13639_s10, 4  ;;  %s1226_s2 = sshll.u32 %s13640_s7, 4  ;;  %s1202_s23 = int_to_ptr.vmem [resolvable:$true] %s1201_s23  ;;  %s1227_s2 = int_to_ptr.vmem [resolvable:$true] %s1226_s2 }
  0xe9   : > { %s13024_s1 = scalar_lea.hbm %s13793_s13, 16 }
  0xea   : > { %p13025_p2 = scmp.ne.s32.totalorder %s13793_s13, %s13024_s1  ;;  %p13031_p12 = scmp.lt.u32.totalorder %s13024_s1, %s13793_s13 }
  0xec   : > { %p13027_p10 = pnand %p13025_p2, %p13915_p7 }
  0xee   : > { %p13028_p11 = pneg %p13027_p10 }
  0xf0   : > { %p13033_p3 = pnand %p13031_p12, %p13028_p11 }
  0xf2   : > { %13036 = shalt.err (!%p13033_p3)
}
  0xf3   : > { %s13037_s26 = scalar_lea.vmem %s1202_s23, 16  ;;  %s13044_s18 = scalar_lea.vmem %s1202_s23, 32 }
  0xf4   : > { %p13038_p13 = scmp.ne.s32.totalorder %s1202_s23, %s13037_s26  ;;  %p13045_p4 = scmp.lt.s32.totalorder %s1202_s23, %s1202_s23 }
  0xf5   : > { %p13046_p6 = scmp.lt.s32.totalorder %s13044_s18, %s13037_s26 }
  0xf6   : > { %p13040_p0 = pnand %p13038_p13, %p13915_p7 }
  0xf7   : > { %p13047_p8 = por %p13046_p6, %p13045_p4 }
  0xf8   : > { %p13041_p1 = pneg %p13040_p0 }
  0xfa   : > { %p13048_p9 = pnand %p13047_p8, %p13041_p1 }
  0xfc   : > { %13051 = shalt.err (!%p13048_p9)
}
  0xfd   : > { %12134 = dma.hbm_to_vmem [thread:$0]  (!%p13903_p5), %s13793_s13, 16, %s1202_s23, [#allocation23]  }
  0xfe   : > { %s13052_s1 = scalar_lea.hbm %s13808_s25, 16 }
  0xff   : > { %p13053_p2 = scmp.ne.s32.totalorder %s13808_s25, %s13052_s1  ;;  %p13059_p12 = scmp.lt.u32.totalorder %s13052_s1, %s13808_s25 }
 0x101   : > { %p13055_p10 = pnand %p13053_p2, %p13915_p7 }
 0x103   : > { %p13056_p11 = pneg %p13055_p10 }
 0x105   : > { %p13061_p3 = pnand %p13059_p12, %p13056_p11 }
 0x107   : > { %13064 = shalt.err (!%p13061_p3)
}
 0x108   : > { %s13065_s16 = scalar_lea.vmem %s1227_s2, 16  ;;  %s13072_s10 = scalar_lea.vmem %s1227_s2, 32 }
 0x109   : > { %p13066_p13 = scmp.ne.s32.totalorder %s1227_s2, %s13065_s16  ;;  %p13073_p4 = scmp.lt.s32.totalorder %s1227_s2, %s1227_s2 }
 0x10a   : > { %p13074_p6 = scmp.lt.s32.totalorder %s13072_s10, %s13065_s16 }
 0x10b   : > { %p13068_p0 = pnand %p13066_p13, %p13915_p7 }
 0x10c   : > { %p13075_p8 = por %p13074_p6, %p13073_p4 }
 0x10d   : > { %p13069_p1 = pneg %p13068_p0 }
 0x10f   : > { %p13076_p9 = pnand %p13075_p8, %p13069_p1 }
 0x111   : > { %13079 = shalt.err (!%p13076_p9)
}
 0x112   : > { %12140 = dma.hbm_to_vmem [thread:$0]  (!%p13903_p5), %s13808_s25, 16, %s1227_s2, [#allocation26]  }
 0x113   : > { %s13641_s23 = smov [#allocation28]   ;;  %s13642_s26 = smov [#allocation31]  }
 0x114   : > { %s1251_s7 = sshll.u32 %s13641_s23, 4  ;;  %s1272_s18 = sshll.u32 %s13642_s26, 4  ;;  %s1252_s7 = int_to_ptr.vmem [resolvable:$true] %s1251_s7  ;;  %s1273_s18 = int_to_ptr.vmem [resolvable:$true] %s1272_s18 }
 0x115   : > { %s13080_s1 = scalar_lea.hbm %s13823_s17, 16 }
 0x116   : > { %p13081_p2 = scmp.ne.s32.totalorder %s13823_s17, %s13080_s1  ;;  %p13087_p12 = scmp.lt.u32.totalorder %s13080_s1, %s13823_s17 }
 0x118   : > { %p13083_p10 = pnand %p13081_p2, %p13915_p7 }
 0x11a   : > { %p13084_p11 = pneg %p13083_p10 }
 0x11c   : > { %p13089_p3 = pnand %p13087_p12, %p13084_p11 }
 0x11e   : > { %13092 = shalt.err (!%p13089_p3)
}
 0x11f   : > { %s13093_s16 = scalar_lea.vmem %s1252_s7, 16  ;;  %s13100_s2 = scalar_lea.vmem %s1252_s7, 32 }
 0x120   : > { %p13094_p13 = scmp.ne.s32.totalorder %s1252_s7, %s13093_s16  ;;  %p13101_p4 = scmp.lt.s32.totalorder %s1252_s7, %s1252_s7 }
 0x121   : > { %p13102_p6 = scmp.lt.s32.totalorder %s13100_s2, %s13093_s16 }
 0x122   : > { %p13096_p0 = pnand %p13094_p13, %p13915_p7 }
 0x123   : > { %p13103_p8 = por %p13102_p6, %p13101_p4 }
 0x124   : > { %p13097_p1 = pneg %p13096_p0 }
 0x126   : > { %p13104_p9 = pnand %p13103_p8, %p13097_p1 }
 0x128   : > { %13107 = shalt.err (!%p13104_p9)
}
 0x129   : > { %12146 = dma.hbm_to_vmem [thread:$0]  (!%p13903_p5), %s13823_s17, 16, %s1252_s7, [#allocation29]  }
 0x12a   : > { %s13108_s10 = scalar_lea.hbm %s16800_s5, 512 }
 0x12b   : > { %p13109_p2 = scmp.ne.s32.totalorder %s16800_s5, %s13108_s10  ;;  %p13115_p12 = scmp.lt.u32.totalorder %s13108_s10, %s16800_s5 }
 0x12d   : > { %p13111_p10 = pnand %p13109_p2, %p13915_p7 }
 0x12f   : > { %p13112_p11 = pneg %p13111_p10 }
 0x131   : > { %p13117_p3 = pnand %p13115_p12, %p13112_p11 }
 0x133   : > { %13120 = shalt.err (!%p13117_p3)
}
 0x134   : > { %s13121_s23 = scalar_lea.vmem %s1273_s18, 512  ;;  %p13129_p4 = scmp.lt.s32.totalorder %s1273_s18, %s1273_s18 }
 0x135   : > { %p13122_p13 = scmp.ne.s32.totalorder %s1273_s18, %s13121_s23  ;;  %p13130_p6 = scmp.lt.s32.totalorder %s13121_s23, %s13121_s23 }
 0x137   : > { %p13124_p0 = pnand %p13122_p13, %p13915_p7  ;;  %p13131_p8 = por %p13130_p6, %p13129_p4 }
 0x139   : > { %p13125_p1 = pneg %p13124_p0 }
 0x13b   : > { %p13132_p9 = pnand %p13131_p8, %p13125_p1 }
 0x13d   : > { %13135 = shalt.err (!%p13132_p9)
}
 0x13e   : > { %s16807_s7 = smov 128   ;;  %s13643_s26 = smov [#allocation34]  }
 0x13f   : > { %12152 = dma.hbm_to_vmem [thread:$0]  (!%p13903_p5), %s16800_s5, 512, %s1273_s18, [#allocation32], %s16807_s7, %s16807_s7, %s16729_s28  }
 0x140   : > { %s1300_s1 = sshll.u32 %s13643_s26, 4  ;;  %s13644_s16 = smov [#allocation2]   ;;  %s1301_s1 = int_to_ptr.vmem [resolvable:$true] %s1300_s1 }
 0x141   : > { %s1015_s2 = sshll.u32 %s13644_s16, 4  ;;  %s13136_s10 = scalar_lea.hbm %s13848_s14, 16  ;;  %s1016_s2 = int_to_ptr.vmem [resolvable:$true] %s1015_s2 }
 0x142   : > { %p13137_p2 = scmp.ne.s32.totalorder %s13848_s14, %s13136_s10  ;;  %p13143_p12 = scmp.lt.u32.totalorder %s13136_s10, %s13848_s14 }
 0x144   : > { %p13139_p10 = pnand %p13137_p2, %p13915_p7 }
 0x146   : > { %p13140_p11 = pneg %p13139_p10 }
 0x148   : > { %p13145_p3 = pnand %p13143_p12, %p13140_p11 }
 0x14a   : > { %13148 = shalt.err (!%p13145_p3)
}
 0x14b   : > { %s13149_s23 = scalar_lea.vmem %s1301_s1, 16  ;;  %s13156_s18 = scalar_lea.vmem %s1301_s1, 32 }
 0x14c   : > { %p13150_p13 = scmp.ne.s32.totalorder %s1301_s1, %s13149_s23  ;;  %p13157_p4 = scmp.lt.s32.totalorder %s1301_s1, %s1301_s1 }
 0x14d   : > { %p13158_p6 = scmp.lt.s32.totalorder %s13156_s18, %s13149_s23 }
 0x14e   : > { %p13152_p0 = pnand %p13150_p13, %p13915_p7 }
 0x14f   : > { %p13159_p8 = por %p13158_p6, %p13157_p4 }
 0x150   : > { %p13153_p1 = pneg %p13152_p0 }
 0x152   : > { %p13160_p9 = pnand %p13159_p8, %p13153_p1 }
 0x154   : > { %13163 = shalt.err (!%p13160_p9)
}
 0x155   : > { %12158 = dma.hbm_to_vmem [thread:$0]  (!%p13903_p5), %s13848_s14, 16, %s1301_s1, [#allocation35]  }
 0x156   : > { %s13164_s26 = scalar_lea.hbm %s16798_s9, 256 }
 0x157   : > { %p13165_p2 = scmp.ne.s32.totalorder %s16798_s9, %s13164_s26  ;;  %p13171_p12 = scmp.lt.u32.totalorder %s13164_s26, %s16798_s9 }
 0x159   : > { %p13167_p10 = pnand %p13165_p2, %p13915_p7 }
 0x15b   : > { %p13168_p11 = pneg %p13167_p10 }
 0x15d   : > { %p13173_p3 = pnand %p13171_p12, %p13168_p11 }
 0x15f   : > { %13176 = shalt.err (!%p13173_p3)
}
 0x160   : > { %s13177_s16 = scalar_lea.vmem %s1016_s2, 256  ;;  %p13185_p4 = scmp.lt.s32.totalorder %s1016_s2, %s1016_s2 }
 0x161   : > { %p13178_p13 = scmp.ne.s32.totalorder %s1016_s2, %s13177_s16  ;;  %p13186_p6 = scmp.lt.s32.totalorder %s13177_s16, %s13177_s16 }
 0x163   : > { %p13180_p0 = pnand %p13178_p13, %p13915_p7  ;;  %p13187_p8 = por %p13186_p6, %p13185_p4 }
 0x165   : > { %p13181_p1 = pneg %p13180_p0 }
 0x167   : > { %p13188_p9 = pnand %p13187_p8, %p13181_p1 }
 0x169   : > { %13191 = shalt.err (!%p13188_p9)
}
 0x16a   : > { %12095 = dma.hbm_to_vmem [thread:$0]  (!%p13903_p5), %s16798_s9, 256, %s1016_s2, [#allocation3], %s16807_s7, %s16807_s7, %s16729_s28  }
 0x16b   : > { %s13645_s1 = smov [#allocation6]   ;;  %s13646_s23 = smov [#allocation9]  }
 0x16c   : > { %s1053_s10 = sshll.u32 %s13645_s1, 4  ;;  %s1083_s18 = sshll.u32 %s13646_s23, 4  ;;  %s1054_s10 = int_to_ptr.vmem [resolvable:$true] %s1053_s10  ;;  %s1084_s18 = int_to_ptr.vmem [resolvable:$true] %s1083_s18 }
 0x16d   : > { %s13192_s26 = scalar_lea.hbm %s16802_s3, 112 }
 0x16e   : > { %p13193_p2 = scmp.ne.s32.totalorder %s16802_s3, %s13192_s26  ;;  %p13199_p12 = scmp.lt.u32.totalorder %s13192_s26, %s16802_s3 }
 0x170   : > { %p13195_p10 = pnand %p13193_p2, %p13915_p7 }
 0x172   : > { %p13196_p11 = pneg %p13195_p10 }
 0x174   : > { %p13201_p3 = pnand %p13199_p12, %p13196_p11 }
 0x176   : > { %13204 = shalt.err (!%p13201_p3)
}
 0x177   : > { %s13205_s16 = scalar_lea.vmem %s1054_s10, 112  ;;  %s13212_s2 = scalar_lea.vmem %s1054_s10, 128 }
 0x178   : > { %p13206_p13 = scmp.ne.s32.totalorder %s1054_s10, %s13205_s16  ;;  %p13213_p4 = scmp.lt.s32.totalorder %s1054_s10, %s1054_s10 }
 0x179   : > { %p13214_p6 = scmp.lt.s32.totalorder %s13212_s2, %s13205_s16 }
 0x17a   : > { %p13208_p0 = pnand %p13206_p13, %p13915_p7 }
 0x17b   : > { %p13215_p8 = por %p13214_p6, %p13213_p4 }
 0x17c   : > { %p13209_p1 = pneg %p13208_p0 }
 0x17e   : > { %p13216_p9 = pnand %p13215_p8, %p13209_p1 }
 0x180   : > { %13219 = shalt.err (!%p13216_p9)
}
 0x181   : > { %s16808_s1 = smov 1   ;;  %s16809_s23 = smov 16  }
 0x182   : > { %12101 = dma.hbm_to_vmem [thread:$0]  (!%p13903_p5), %s16802_s3, 112, %s1054_s10, [#allocation5], %s16809_s23, %s16809_s23, %s16808_s1  }
 0x183   : > { %s13220_s26 = scalar_lea.hbm %s13723_s19, 16 }
 0x184   : > { %p13221_p2 = scmp.ne.s32.totalorder %s13723_s19, %s13220_s26  ;;  %p13227_p12 = scmp.lt.u32.totalorder %s13220_s26, %s13723_s19 }
 0x186   : > { %p13223_p10 = pnand %p13221_p2, %p13915_p7 }
 0x188   : > { %p13224_p11 = pneg %p13223_p10 }
 0x18a   : > { %p13229_p3 = pnand %p13227_p12, %p13224_p11 }
 0x18c   : > { %13232 = shalt.err (!%p13229_p3)
}
 0x18d   : > { %s13233_s16 = scalar_lea.vmem %s1084_s18, 16  ;;  %s13240_s2 = scalar_lea.vmem %s1084_s18, 32 }
 0x18e   : > { %p13234_p13 = scmp.ne.s32.totalorder %s1084_s18, %s13233_s16  ;;  %p13241_p4 = scmp.lt.s32.totalorder %s1084_s18, %s1084_s18 }
 0x18f   : > { %p13242_p6 = scmp.lt.s32.totalorder %s13240_s2, %s13233_s16 }
 0x190   : > { %p13236_p0 = pnand %p13234_p13, %p13915_p7 }
 0x191   : > { %p13243_p8 = por %p13242_p6, %p13241_p4 }
 0x192   : > { %p13237_p1 = pneg %p13236_p0 }
 0x194   : > { %p13244_p9 = pnand %p13243_p8, %p13237_p1 }
 0x196   : > { %13247 = shalt.err (!%p13244_p9)
}
 0x197   : > { %s16810_s10 = sld [smem:[#allocation63_spill]]  ;;  %s13647_s1 = smov [#allocation12]  }
 0x198   : > { %12107 = dma.hbm_to_vmem [thread:$0]  (!%p13903_p5), %s13723_s19, 16, %s1084_s18, [#allocation8]  }
 0x199   : > { %s1111_s23 = sshll.u32 %s13647_s1, 4  ;;  %s13648_s26 = smov [#allocation15]   ;;  %s1112_s23 = int_to_ptr.vmem [resolvable:$true] %s1111_s23 }
 0x19a   : > { %s1133_s28 = sshll.u32 %s13648_s26, 4  ;;  %s1134_s28 = int_to_ptr.vmem [resolvable:$true] %s1133_s28 }
 0x19d   : > { %s13248_s3 = scalar_lea.hbm %s16810_s10, 16 }
 0x19e   : > { %p13249_p2 = scmp.ne.s32.totalorder %s16810_s10, %s13248_s3  ;;  %p13255_p12 = scmp.lt.u32.totalorder %s13248_s3, %s16810_s10 }
 0x1a0   : > { %p13251_p10 = pnand %p13249_p2, %p13915_p7 }
 0x1a2   : > { %p13252_p11 = pneg %p13251_p10 }
 0x1a4   : > { %p13257_p3 = pnand %p13255_p12, %p13252_p11 }
 0x1a6   : > { %13260 = shalt.err (!%p13257_p3)
}
 0x1a7   : > { %s13261_s16 = scalar_lea.vmem %s1112_s23, 16  ;;  %s13268_s18 = scalar_lea.vmem %s1112_s23, 32 }
 0x1a8   : > { %p13262_p13 = scmp.ne.s32.totalorder %s1112_s23, %s13261_s16  ;;  %p13269_p4 = scmp.lt.s32.totalorder %s1112_s23, %s1112_s23 }
 0x1a9   : > { %p13270_p6 = scmp.lt.s32.totalorder %s13268_s18, %s13261_s16 }
 0x1aa   : > { %p13264_p0 = pnand %p13262_p13, %p13915_p7 }
 0x1ab   : > { %p13271_p8 = por %p13270_p6, %p13269_p4 }
 0x1ac   : > { %p13265_p1 = pneg %p13264_p0 }
 0x1ae   : > { %p13272_p9 = pnand %p13271_p8, %p13265_p1 }
 0x1b0   : > { %13275 = shalt.err (!%p13272_p9)
}
 0x1b1   : > { %s16811_s2 = sld [smem:[#allocation64_spill]] }
 0x1b2   : > { %12113 = dma.hbm_to_vmem [thread:$0]  (!%p13903_p5), %s16810_s10, 16, %s1112_s23, [#allocation11]  }
 0x1b7   : > { %s13276_s3 = scalar_lea.hbm %s16811_s2, 16 }
 0x1b8   : > { %p13277_p2 = scmp.ne.s32.totalorder %s16811_s2, %s13276_s3  ;;  %p13283_p12 = scmp.lt.u32.totalorder %s13276_s3, %s16811_s2 }
 0x1ba   : > { %p13279_p10 = pnand %p13277_p2, %p13915_p7 }
 0x1bc   : > { %p13280_p11 = pneg %p13279_p10 }
 0x1be   : > { %p13285_p3 = pnand %p13283_p12, %p13280_p11 }
 0x1c0   : > { %13288 = shalt.err (!%p13285_p3)
}
 0x1c1   : > { %s13289_s1 = scalar_lea.vmem %s1134_s28, 16  ;;  %s13296_s26 = scalar_lea.vmem %s1134_s28, 32 }
 0x1c2   : > { %p13290_p13 = scmp.ne.s32.totalorder %s1134_s28, %s13289_s1  ;;  %p13297_p4 = scmp.lt.s32.totalorder %s1134_s28, %s1134_s28 }
 0x1c3   : > { %p13298_p6 = scmp.lt.s32.totalorder %s13296_s26, %s13289_s1 }
 0x1c4   : > { %p13292_p0 = pnand %p13290_p13, %p13915_p7 }
 0x1c5   : > { %p13299_p8 = por %p13298_p6, %p13297_p4 }
 0x1c6   : > { %p13293_p1 = pneg %p13292_p0 }
 0x1c8   : > { %p13300_p9 = pnand %p13299_p8, %p13293_p1 }
 0x1ca   : > { %13303 = shalt.err (!%p13300_p9)
}
 0x1cb   : > { %s16812_s23 = sld [smem:[#allocation66_spill]]  ;;  %s13649_s16 = smov [#allocation18]  }
 0x1cc   : > { %12119 = dma.hbm_to_vmem [thread:$0]  (!%p13903_p5), %s16811_s2, 16, %s1134_s28, [#allocation14]  }
 0x1cd   : > { %s1157_s18 = sshll.u32 %s13649_s16, 4  ;;  %s13650_s3 = smov [#allocation21]   ;;  %s1158_s18 = int_to_ptr.vmem [resolvable:$true] %s1157_s18 }
 0x1ce   : > { %s1187_s4 = sshll.u32 %s13650_s3, 4  ;;  %s1188_s4 = int_to_ptr.vmem [resolvable:$true] %s1187_s4 }
 0x1d1   : > { %s13304_s5 = scalar_lea.hbm %s16812_s23, 16 }
 0x1d2   : > { %p13305_p2 = scmp.ne.s32.totalorder %s16812_s23, %s13304_s5  ;;  %p13311_p12 = scmp.lt.u32.totalorder %s13304_s5, %s16812_s23 }
 0x1d4   : > { %p13307_p10 = pnand %p13305_p2, %p13915_p7 }
 0x1d6   : > { %p13308_p11 = pneg %p13307_p10 }
 0x1d8   : > { %p13313_p3 = pnand %p13311_p12, %p13308_p11 }
 0x1da   : > { %13316 = shalt.err (!%p13313_p3)
}
 0x1db   : > { %s13317_s1 = scalar_lea.vmem %s1158_s18, 16  ;;  %s13324_s28 = scalar_lea.vmem %s1158_s18, 32 }
 0x1dc   : > { %p13318_p13 = scmp.ne.s32.totalorder %s1158_s18, %s13317_s1  ;;  %p13325_p4 = scmp.lt.s32.totalorder %s1158_s18, %s1158_s18 }
 0x1dd   : > { %p13326_p6 = scmp.lt.s32.totalorder %s13324_s28, %s13317_s1 }
 0x1de   : > { %p13320_p0 = pnand %p13318_p13, %p13915_p7 }
 0x1df   : > { %p13327_p8 = por %p13326_p6, %p13325_p4 }
 0x1e0   : > { %p13321_p1 = pneg %p13320_p0 }
 0x1e2   : > { %p13328_p9 = pnand %p13327_p8, %p13321_p1 }
 0x1e4   : > { %13331 = shalt.err (!%p13328_p9)
}
 0x1e5   : > { %s16813_s26 = sld [smem:[#allocation70_spill]] }
 0x1e6   : > { %12125 = dma.hbm_to_vmem [thread:$0]  (!%p13903_p5), %s16812_s23, 16, %s1158_s18, [#allocation17]  }
 0x1eb   : > { %s13332_s5 = scalar_lea.hbm %s16813_s26, 3200 }
 0x1ec   : > { %p13333_p2 = scmp.ne.s32.totalorder %s16813_s26, %s13332_s5  ;;  %p13339_p12 = scmp.lt.u32.totalorder %s13332_s5, %s16813_s26 }
 0x1ee   : > { %p13335_p10 = pnand %p13333_p2, %p13915_p7 }
 0x1f0   : > { %p13336_p11 = pneg %p13335_p10 }
 0x1f2   : > { %p13341_p3 = pnand %p13339_p12, %p13336_p11 }
 0x1f4   : > { %13344 = shalt.err (!%p13341_p3)
}
 0x1f5   : > { %s13345_s16 = scalar_lea.vmem %s1188_s4, 3200  ;;  %p13353_p4 = scmp.lt.s32.totalorder %s1188_s4, %s1188_s4 }
 0x1f6   : > { %p13346_p13 = scmp.ne.s32.totalorder %s1188_s4, %s13345_s16  ;;  %p13354_p6 = scmp.lt.s32.totalorder %s13345_s16, %s13345_s16 }
 0x1f8   : > { %p13348_p0 = pnand %p13346_p13, %p13915_p7  ;;  %p13355_p8 = por %p13354_p6, %p13353_p4 }
 0x1fa   : > { %p13349_p1 = pneg %p13348_p0 }
 0x1fc   : > { %p13356_p9 = pnand %p13355_p8, %p13349_p1 }
 0x1fe   : > { %13359 = shalt.err (!%p13356_p9)
}
 0x1ff   : > { %s13651_s18 = smov 640   ;;  %s16814_s3 = sld [smem:[#allocation71_spill]] }
 0x200   : > { %s13652_s1 = smov 40   ;;  %s13653_s28 = smov [#allocation24]  }
 0x201   : > { %12131 = dma.hbm_to_vmem [thread:$0]  (!%p13903_p5), %s16813_s26, 3200, %s1188_s4, [#allocation20], %s13651_s18, %s13651_s18, %s13652_s1  }
 0x202   : > { %s1212_s5 = sshll.u32 %s13653_s28, 4  ;;  %s13654_s2 = smov [#allocation27]   ;;  %s1213_s5 = int_to_ptr.vmem [resolvable:$true] %s1212_s5 }
 0x203   : > { %s1240_s8 = sshll.u32 %s13654_s2, 4  ;;  %s1241_s8 = int_to_ptr.vmem [resolvable:$true] %s1240_s8 }
 0x205   : > { %s13360_s9 = scalar_lea.hbm %s16814_s3, 16 }
 0x206   : > { %p13361_p2 = scmp.ne.s32.totalorder %s16814_s3, %s13360_s9  ;;  %p13367_p12 = scmp.lt.u32.totalorder %s13360_s9, %s16814_s3 }
 0x208   : > { %p13363_p10 = pnand %p13361_p2, %p13915_p7 }
 0x20a   : > { %p13364_p11 = pneg %p13363_p10 }
 0x20c   : > { %p13369_p3 = pnand %p13367_p12, %p13364_p11 }
 0x20e   : > { %13372 = shalt.err (!%p13369_p3)
}
 0x20f   : > { %s13373_s16 = scalar_lea.vmem %s1213_s5, 16  ;;  %s13380_s4 = scalar_lea.vmem %s1213_s5, 32 }
 0x210   : > { %p13374_p13 = scmp.ne.s32.totalorder %s1213_s5, %s13373_s16  ;;  %p13381_p4 = scmp.lt.s32.totalorder %s1213_s5, %s1213_s5 }
 0x211   : > { %p13382_p6 = scmp.lt.s32.totalorder %s13380_s4, %s13373_s16 }
 0x212   : > { %p13376_p0 = pnand %p13374_p13, %p13915_p7 }
 0x213   : > { %p13383_p8 = por %p13382_p6, %p13381_p4 }
 0x214   : > { %p13377_p1 = pneg %p13376_p0 }
 0x216   : > { %p13384_p9 = pnand %p13383_p8, %p13377_p1 }
 0x218   : > { %13387 = shalt.err (!%p13384_p9)
}
 0x219   : > { %s16815_s2 = sld [smem:[#allocation74_spill]] }
 0x21a   : > { %12137 = dma.hbm_to_vmem [thread:$0]  (!%p13903_p5), %s16814_s3, 16, %s1213_s5, [#allocation23]  }
 0x21f   : > { %s13388_s9 = scalar_lea.hbm %s16815_s2, 16 }
 0x220   : > { %p13389_p2 = scmp.ne.s32.totalorder %s16815_s2, %s13388_s9  ;;  %p13395_p12 = scmp.lt.u32.totalorder %s13388_s9, %s16815_s2 }
 0x222   : > { %p13391_p10 = pnand %p13389_p2, %p13915_p7 }
 0x224   : > { %p13392_p11 = pneg %p13391_p10 }
 0x226   : > { %p13397_p3 = pnand %p13395_p12, %p13392_p11 }
 0x228   : > { %13400 = shalt.err (!%p13397_p3)
}
 0x229   : > { %s13401_s18 = scalar_lea.vmem %s1241_s8, 16  ;;  %s13408_s1 = scalar_lea.vmem %s1241_s8, 32 }
 0x22a   : > { %p13402_p13 = scmp.ne.s32.totalorder %s1241_s8, %s13401_s18  ;;  %p13409_p4 = scmp.lt.s32.totalorder %s1241_s8, %s1241_s8 }
 0x22b   : > { %p13410_p6 = scmp.lt.s32.totalorder %s13408_s1, %s13401_s18 }
 0x22c   : > { %p13404_p0 = pnand %p13402_p13, %p13915_p7 }
 0x22d   : > { %p13411_p8 = por %p13410_p6, %p13409_p4 }
 0x22e   : > { %p13405_p1 = pneg %p13404_p0 }
 0x230   : > { %p13412_p9 = pnand %p13411_p8, %p13405_p1 }
 0x232   : > { %13415 = shalt.err (!%p13412_p9)
}
 0x233   : > { %s16816_s28 = sld [smem:[#allocation75_spill]]  ;;  %s13655_s5 = smov [#allocation30]  }
 0x234   : > { %12143 = dma.hbm_to_vmem [thread:$0]  (!%p13903_p5), %s16815_s2, 16, %s1241_s8, [#allocation26]  }
 0x235   : > { %s1262_s16 = sshll.u32 %s13655_s5, 4  ;;  %s13656_s4 = smov [#allocation33]   ;;  %s1263_s16 = int_to_ptr.vmem [resolvable:$true] %s1262_s16 }
 0x236   : > { %s1286_s9 = sshll.u32 %s13656_s4, 4  ;;  %s1287_s9 = int_to_ptr.vmem [resolvable:$true] %s1286_s9 }
 0x239   : > { %s13416_s3 = scalar_lea.hbm %s16816_s28, 16 }
 0x23a   : > { %p13417_p2 = scmp.ne.s32.totalorder %s16816_s28, %s13416_s3  ;;  %p13423_p12 = scmp.lt.u32.totalorder %s13416_s3, %s16816_s28 }
 0x23c   : > { %p13419_p10 = pnand %p13417_p2, %p13915_p7 }
 0x23e   : > { %p13420_p11 = pneg %p13419_p10 }
 0x240   : > { %p13425_p3 = pnand %p13423_p12, %p13420_p11 }
 0x242   : > { %13428 = shalt.err (!%p13425_p3)
}
 0x243   : > { %s13429_s18 = scalar_lea.vmem %s1263_s16, 16  ;;  %s13436_s8 = scalar_lea.vmem %s1263_s16, 32 }
 0x244   : > { %p13430_p13 = scmp.ne.s32.totalorder %s1263_s16, %s13429_s18  ;;  %p13437_p4 = scmp.lt.s32.totalorder %s1263_s16, %s1263_s16 }
 0x245   : > { %p13438_p6 = scmp.lt.s32.totalorder %s13436_s8, %s13429_s18 }
 0x246   : > { %p13432_p0 = pnand %p13430_p13, %p13915_p7 }
 0x247   : > { %p13439_p8 = por %p13438_p6, %p13437_p4 }
 0x248   : > { %p13433_p1 = pneg %p13432_p0 }
 0x24a   : > { %p13440_p9 = pnand %p13439_p8, %p13433_p1 }
 0x24c   : > { %13443 = shalt.err (!%p13440_p9)
}
 0x24d   : > { %s16817_s1 = sld [smem:[#allocation77_spill]] }
 0x24e   : > { %12149 = dma.hbm_to_vmem [thread:$0]  (!%p13903_p5), %s16816_s28, 16, %s1263_s16, [#allocation29]  }
 0x253   : > { %s13444_s3 = scalar_lea.hbm %s16817_s1, 16 }
 0x254   : > { %p13445_p2 = scmp.ne.s32.totalorder %s16817_s1, %s13444_s3  ;;  %p13451_p12 = scmp.lt.u32.totalorder %s13444_s3, %s16817_s1 }
 0x256   : > { %p13447_p10 = pnand %p13445_p2, %p13915_p7 }
 0x258   : > { %p13448_p11 = pneg %p13447_p10 }
 0x25a   : > { %p13453_p3 = pnand %p13451_p12, %p13448_p11 }
 0x25c   : > { %13456 = shalt.err (!%p13453_p3)
}
 0x25d   : > { %s13457_s5 = scalar_lea.vmem %s1287_s9, 16  ;;  %s13464_s4 = scalar_lea.vmem %s1287_s9, 32 }
 0x25e   : > { %p13458_p13 = scmp.ne.s32.totalorder %s1287_s9, %s13457_s5  ;;  %p13465_p4 = scmp.lt.s32.totalorder %s1287_s9, %s1287_s9 }
 0x25f   : > { %p13466_p6 = scmp.lt.s32.totalorder %s13464_s4, %s13457_s5 }
 0x260   : > { %p13460_p0 = pnand %p13458_p13, %p13915_p7 }
 0x261   : > { %p13467_p8 = por %p13466_p6, %p13465_p4 }
 0x262   : > { %p13461_p1 = pneg %p13460_p0 }
 0x264   : > { %p13468_p9 = pnand %p13467_p8, %p13461_p1 }
 0x266   : > { %13471 = shalt.err (!%p13468_p9)
}
 0x267   : > { %s16818_s16 = sld [smem:[#allocation79_spill]]  ;;  %s13657_s18 = smov [#allocation36]  }
 0x268   : > { %12155 = dma.hbm_to_vmem [thread:$0]  (!%p13903_p5), %s16817_s1, 16, %s1287_s9, [#allocation32]  }
 0x269   : > { %s1310_s8 = sshll.u32 %s13657_s18, 4  ;;  %s13658_s3 = smov [#allocation37]   ;;  %s1311_s8 = int_to_ptr.vmem [resolvable:$true] %s1310_s8 }
 0x26a   : > { %s1333_s2 = sshll.u32 %s13658_s3, 4  ;;  %s1334_s2 = int_to_ptr.vmem [resolvable:$true] %s1333_s2 }
 0x26d   : > { %s13472_s10 = scalar_lea.hbm %s16818_s16, 4096 }
 0x26e   : > { %p13473_p2 = scmp.ne.s32.totalorder %s16818_s16, %s13472_s10  ;;  %p13479_p12 = scmp.lt.u32.totalorder %s13472_s10, %s16818_s16 }
 0x270   : > { %p13475_p10 = pnand %p13473_p2, %p13915_p7 }
 0x272   : > { %p13476_p11 = pneg %p13475_p10 }
 0x274   : > { %p13481_p3 = pnand %p13479_p12, %p13476_p11 }
 0x276   : > { %13484 = shalt.err (!%p13481_p3)
}
 0x277   : > { %s13485_s5 = scalar_lea.vmem %s1311_s8, 4096  ;;  %p13493_p4 = scmp.lt.s32.totalorder %s1311_s8, %s1311_s8 }
 0x278   : > { %p13486_p13 = scmp.ne.s32.totalorder %s1311_s8, %s13485_s5  ;;  %p13494_p6 = scmp.lt.s32.totalorder %s13485_s5, %s13485_s5 }
 0x27a   : > { %p13488_p0 = pnand %p13486_p13, %p13915_p7  ;;  %p13495_p8 = por %p13494_p6, %p13493_p4 }
 0x27c   : > { %p13489_p1 = pneg %p13488_p0 }
 0x27e   : > { %p13496_p9 = pnand %p13495_p8, %p13489_p1 }
 0x280   : > { %13499 = shalt.err (!%p13496_p9)
}
 0x281   : > { %s16819_s9 = smov 8   ;;  %s13500_s10 = scalar_lea.hbm %s13873_s27, 16 }
 0x282   : > { %12161 = dma.hbm_to_vmem [thread:$0]  (!%p13903_p5), %s16818_s16, 4096, %s1311_s8, [#allocation35], %s16807_s7, %s16807_s7, %s16819_s9  }
 0x283   : > { %p13501_p2 = scmp.ne.s32.totalorder %s13873_s27, %s13500_s10  ;;  %p13507_p12 = scmp.lt.u32.totalorder %s13500_s10, %s13873_s27 }
 0x285   : > { %p13503_p10 = pnand %p13501_p2, %p13915_p7 }
 0x287   : > { %p13504_p11 = pneg %p13503_p10 }
 0x289   : > { %p13509_p3 = pnand %p13507_p12, %p13504_p11 }
 0x28b   : > { %13512 = shalt.err (!%p13509_p3)
}
 0x28c   : > { %s13513_s4 = scalar_lea.vmem %s1334_s2, 16  ;;  %s13520_s18 = scalar_lea.vmem %s1334_s2, 32 }
 0x28d   : > { %p13514_p13 = scmp.ne.s32.totalorder %s1334_s2, %s13513_s4  ;;  %p13521_p4 = scmp.lt.s32.totalorder %s1334_s2, %s1334_s2 }
 0x28e   : > { %p13522_p6 = scmp.lt.s32.totalorder %s13520_s18, %s13513_s4 }
 0x28f   : > { %p13516_p0 = pnand %p13514_p13, %p13915_p7 }
 0x290   : > { %p13523_p8 = por %p13522_p6, %p13521_p4 }
 0x291   : > { %p13517_p1 = pneg %p13516_p0 }
 0x293   : > { %p13524_p9 = pnand %p13523_p8, %p13517_p1 }
 0x295   : > { %13527 = shalt.err (!%p13524_p9)
}
 0x296   : > { %12164 = dma.hbm_to_vmem [thread:$0]  (!%p13903_p5), %s13873_s27, 16, %s1334_s2, [#allocation38]  }
 0x297   : > { %p16820_p2 = scmp.ne.s32.totalorder %s16804_s15, 0 }
 0x299   : > { %1354 = sbr.rel (%p16820_p2) target bundleno = 8967 (0x2307), region = 184 }
 0x2a0   : > { %p16821_p10 = scmp.eq.s32.totalorder %s13886_s11, 0 }
 0x2a2   : > { %13533 = dma.done.wait (%p16821_p10), [#allocation3], 256   ;;  %p16822_p11 = pmov %p16821_p10 }
 0x2a3   : > { %p16823_p7 = pmov %p16821_p10 }
 0x2a4   : > { %13535 = vsyncadd (%p16822_p11), [#allocation3], 4294967040 }
 0x2a5   : > { %13537 = dma.done.wait (%p16823_p7), [#allocation5], 224   ;;  %p16824_p12 = pmov %p16823_p7 }
 0x2a6   : > { %p16825_p3 = pmov %p16823_p7 }
 0x2a7   : > { %13539 = vsyncadd (%p16824_p12), [#allocation5], 4294967072 }
 0x2a8   : > { %13541 = dma.done.wait (%p16825_p3), [#allocation8], 128   ;;  %p16826_p5 = pmov %p16825_p3 }
 0x2a9   : > { %p16827_p13 = pmov %p16825_p3 }
 0x2aa   : > { %13543 = vsyncadd (%p16826_p5), [#allocation8], 4294967168 }
 0x2ab   : > { %13545 = dma.done.wait (%p16827_p13), [#allocation11], 32   ;;  %p16828_p0 = pmov %p16825_p3 }
 0x2ad   : > { %13547 = vsyncadd (%p16828_p0), [#allocation11], 4294967264  ;;  %p16829_p1 = pmov %p16828_p0 }
 0x2ae   : > { %p16830_p4 = pmov %p16828_p0 }
 0x2af   : > { %13549 = dma.done.wait (%p16829_p1), [#allocation14], 32  }
 0x2b0   : > { %13551 = vsyncadd (%p16830_p4), [#allocation14], 4294967264  ;;  %p16831_p6 = pmov %p16828_p0 }
 0x2b1   : > { %p16832_p8 = pmov %p16828_p0 }
 0x2b2   : > { %13553 = dma.done.wait (%p16831_p6), [#allocation17], 528  }
 0x2b3   : > { %13555 = vsyncadd (%p16832_p8), [#allocation17], 4294966768  ;;  %p16833_p9 = pmov %p16828_p0 }
 0x2b4   : > { %p16834_p2 = pmov %p16828_p0 }
 0x2b5   : > { %13557 = dma.done.wait (%p16833_p9), [#allocation20], 3216  }
 0x2b6   : > { %13559 = vsyncadd (%p16834_p2), [#allocation20], 4294964080  ;;  %p16835_p10 = pmov %p16828_p0 }
 0x2b7   : > { %p16836_p11 = pmov %p16828_p0 }
 0x2b8   : > { %13561 = dma.done.wait (%p16835_p10), [#allocation23], 32  }
 0x2b9   : > { %13563 = vsyncadd (%p16836_p11), [#allocation23], 4294967264  ;;  %p16837_p7 = pmov %p16828_p0 }
 0x2ba   : > { %p16838_p12 = pmov %p16828_p0 }
 0x2bb   : > { %13565 = dma.done.wait (%p16837_p7), [#allocation26], 32  }
 0x2bc   : > { %13567 = vsyncadd (%p16838_p12), [#allocation26], 4294967264  ;;  %p16839_p3 = pmov %p16828_p0 }
 0x2bd   : > { %p16840_p5 = pmov %p16828_p0 }
 0x2be   : > { %13569 = dma.done.wait (%p16839_p3), [#allocation29], 32  }
 0x2bf   : > { %13571 = vsyncadd (%p16840_p5), [#allocation29], 4294967264  ;;  %p16841_p13 = pmov %p16828_p0 }
 0x2c1   : > { %13573 = dma.done.wait (%p16841_p13), [#allocation32], 528  }
 0x2c2   : > { %13575 = vsyncadd (%p16828_p0), [#allocation32], 4294966768  ;;  %p16842_p1 = pmov %p16828_p0 }
 0x2c3   : > { %p16843_p4 = pmov %p16828_p0 }
 0x2c4   : > { %13577 = dma.done.wait (%p16842_p1), [#allocation35], 4112  }
 0x2c5   : > { %13579 = vsyncadd (%p16843_p4), [#allocation35], 4294963184  ;;  %p16844_p6 = pmov %p16828_p0 }
 0x2c6   : > { %p16845_p8 = pmov %p16828_p0 }
 0x2c7   : > { %13581 = dma.done.wait (%p16844_p6), [#allocation38], 16  }
 0x2c8   : > { %13583 = vsyncadd (%p16845_p8), [#allocation38], 4294967280  ;;  %s16846_s15 = sld [smem:[#allocation52_spill]]  ;;  %p1545_p9 = scmp.lt.s32.totalorder %s13886_s11, 1  ;;  %v16741_v0 = vmov 0.0|0.0   ;;  %vm13660_vm0 = vmmov 0  }
 0x2c9   : > { %11600 = vmatprep.subr.bf16.mxu0 %v16741_v0  ;;  %v16739_v1 = vmov 0.0   ;;  %11603 = vmatprep.subr.bf16.mxu1 %v16741_v0  ;;  %v1559_v2 = vld [vmem:[#allocation2] sm:$0xff]  ;;  %v1560_v3 = vld [vmem:[#allocation2 + $0x8] sm:$0xff]  ;;  %vm1568_vm1 = vcmask 130048   ;;  %s16847_s7 = sld [smem:[#allocation57_spill]]  ;;  %s16849_s8 = sld [smem:[#allocation54_spill]] }
 0x2ca   : > { %10641 = vmatprep.mubr.msk.f32.mxu0 %vm13660_vm0, %v16739_v1  ;;  %s16916_s11 = smov (!%p1545_p9, %s13886_s11), 1  ;;  %10680 = vmatprep.mubr.msk.f32.mxu1 %vm13660_vm0, %v16739_v1  ;;  %v11601_v4 = vpack.c.bf16 %v1560_v3, %v1559_v2  ;;  %s16850_s3 = sld [smem:[#allocation55_spill]]  ;;  %vm1708_vm2 = vcmask 1046528   ;;  %vm1733_vm3 = vcmask 1045504   ;;  %vm1758_vm4 = vcmask 261120  }
 0x2cb   : > { %s11995_s22 = smul.u32 40, %s16916_s11  ;;  %s16851_s5 = sld [smem:[#allocation56_spill]]  ;;  %vm1764_vm5 = vcmask 523264   ;;  %vm1789_vm6 = vcmask 785408   ;;  %vm2378_vm7 = vcmask 254976   ;;  %vm2712_vm8 = vcmask 277504   ;;  %vm14628_vm10 = vmpackc.low %vm1758_vm4, %vm1758_vm4 }
 0x2cc   : > { %11602 = vmatpush3.bf16.msra.mxu0 %v11601_v4  ;;  %s13662_s9 = smov 32   ;;  %s16766_s10 = smov 64   ;;  %vm2917_vm9 = vcmask 1041408   ;;  %vm6300_vm11 = vcmask 1044480   ;;  %vm8990_vm12 = vcmask 1040384   ;;  %vm9105_vm13 = vcmask 124928  }
 0x2cd   : > { %11621 = vmatprep.subr.bf16.mxu0 %v16741_v0  ;;  %s16857_s4 = sld [smem:[#allocation61_spill]]  ;;  %s16858_s18 = sld [smem:[#allocation60_spill]] }
 0x2ce   : > { %s1549_s0 = scalar_lea.vmem %s16846_s15, %s11995_s22  ;;  %s16859_s15 = sld [smem:[#allocation68_spill]] }
 0x2cf   : > { %v1554_v5 = vld [vmem:[%s1549_s0] sm:$0xff]  ;;  %s16848_s2 = smov %s16847_s7  ;;  %v1555_v6 = vld [vmem:[%s1549_s0 + $0x8] sm:$0xff]  ;;  %v1556_v7 = vld [vmem:[%s1549_s0 + $0x10] sm:$0xff]  ;;  %s13664_s22 = smov 96  }
 0x2d0   : > { %10642 = vmatmul.mubr.msk.f32.vlgmr.msra.gmra.mrb[0].mxu0 %vm1568_vm1, %v1554_v5  ;;  %v1557_v8 = vld [vmem:[%s1549_s0 + $0x18] sm:$0xff]  ;;  %v1558_v9 = vld [vmem:[%s1549_s0 + $0x20] sm:$0xff]  ;;  %v1771_v11 = vld [vmem:[%s16848_s2 + $0x8] sm:$0xff]  ;;  %s16863_s0 = sld [smem:[#allocation69_spill]] }
 0x2d1   : > { %10644 = vmatprep.mubr.msk.f32.mxu0 %vm13660_vm0, %v16739_v1  ;;  %v1770_v10 = vld [vmem:[%s16847_s7] sm:$0xff]  ;;  %v1772_v12 = vld [vmem:[%s16848_s2 + $0x10] sm:$0xff]  ;;  %v1773_v14 = vld [vmem:[%s16848_s2 + $0x18] sm:$0xff]  ;;  %s16899_s7 = sld [smem:[#allocation62_spill]] }
 0x2d2   : > { %v11604_v13 = vpack.c.bf16 %v1771_v11, %v1770_v10  ;;  %v11607_v15 = vpack.c.bf16 %v1773_v14, %v1772_v12  ;;  %v1774_v16 = vld [vmem:[%s16848_s2 + $0x20] sm:$0xff]  ;;  %v1775_v17 = vld [vmem:[%s16848_s2 + $0x28] sm:$0xff]  ;;  %v1776_v19 = vld [vmem:[%s16848_s2 + $0x30] sm:$0xff] }
 0x2d3   : > { %v11610_v18 = vpack.c.bf16 %v1775_v17, %v1774_v16  ;;  %v1777_v20 = vld [vmem:[%s16848_s2 + $0x38] sm:$0xff]  ;;  %v1778_v22 = vld [vmem:[%s16848_s2 + $0x40] sm:$0xff]  ;;  %v1779_v23 = vld [vmem:[%s16848_s2 + $0x48] sm:$0xff] }
 0x2d4   : > { %10645 = vmatmul.mubr.msk.f32.gmra.mrb[2].mxu0 %vm1568_vm1, %v1555_v6  ;;  %11605 = vmatpush3.bf16.msra.mxu1 %v11604_v13  ;;  %v11613_v21 = vpack.c.bf16 %v1777_v20, %v1776_v19  ;;  %v11616_v24 = vpack.c.bf16 %v1779_v23, %v1778_v22  ;;  %v9487_v25 = vld [vmem:[%s16849_s8] ss:$0 sm:$0xff]  ;;  %v1780_v30 = vld [vmem:[%s16848_s2 + $0x50] sm:$0xff]  ;;  %v1781_v31 = vld [vmem:[%s16848_s2 + $0x58] sm:$0xff] }
 0x2d5   : > { %10647 = vmatprep.mubr.msk.f32.mxu0 %vm13660_vm0, %v16739_v1  ;;  %11606 = vmatprep.subr.bf16.mxu1 %v16741_v0  ;;  %v9493_v29 = vld [vmem:[%s16850_s3] ss:$0 sm:$0xff]  ;;  %v11619_v33 = vpack.c.bf16 %v1781_v31, %v1780_v30  ;;  %s16906_s3 = sld [smem:[#allocation67_spill]] }
 0x2d6   : > { %v9494_v38 = vld [vmem:[%s16851_s5] ss:$0 sm:$0xff]  ;;  %s16907_s5 = sld [smem:[#allocation72_spill]] }
 0x2d7   : > { %s16900_s8 = smov %s16899_s7 }
 0x2d8   : > { %10648 = vmatmul.mubr.msk.f32.gmra.mrb[4].mxu0 %vm1568_vm1, %v1556_v7  ;;  %11608 = vmatpush3.bf16.msra.mxu1 %v11607_v15 }
 0x2d9   : > { %10650 = vmatprep.mubr.msk.f32.mxu0 %vm13660_vm0, %v16739_v1  ;;  %11609 = vmatprep.subr.bf16.mxu1 %v16741_v0 }
 0x2dc   : > { %10651 = vmatmul.mubr.msk.f32.gmra.mrb[6].mxu0 %vm1568_vm1, %v1557_v8  ;;  %11611 = vmatpush3.bf16.msra.mxu1 %v11610_v18 }
 0x2dd   : > { %10653 = vmatprep.mubr.msk.f32.mxu0 %vm13660_vm0, %v16739_v1  ;;  %11612 = vmatprep.subr.bf16.mxu1 %v16741_v0 }
 0x2e0   : > { %10654 = vmatmul.mubr.msk.f32.gmra.mrb[8].mxu0 %vm1568_vm1, %v1558_v9  ;;  %11614 = vmatpush3.bf16.msra.mxu1 %v11613_v21 }
 0x2e1   : > { %10719 = vmatprep.mubr.msk.f32.mxu0 %vm13660_vm0, %v16739_v1  ;;  %11615 = vmatprep.subr.bf16.mxu1 %v16741_v0 }
 0x2e4   : > { %11617 = vmatpush3.bf16.msra.mxu1 %v11616_v24 }
 0x2e5   : > { %11618 = vmatprep.subr.bf16.mxu1 %v16741_v0 }
 0x2e8   : > { %11620 = vmatpush3.bf16.msra.mxu1 %v11619_v33 }
 0x2e9   : > { %11639 = vmatprep.subr.bf16.mxu1 %v16741_v0 }
 0x3a3   : > { %v1650_v26 = vpop.f32.mrb[0].mxu0 }
 0x3a4   : > { %v1651_v27 = vadd.f32 %v9487_v25, %v1650_v26  ;;  %v10643_v28 = vpop.f32.mrb[1].mxu0 }
 0x3a6   : > { %v1674_v32 = vmax.f32 %v1651_v27, 0.0 }
 0x3a7   : > { %v1655_v34 = vpop.f32.mrb[2].mxu0 }
 0x3a8   : > { %v1686_v35 = vmul.f32 %v9493_v29, %v1674_v32  ;;  %v1656_v36 = vadd.f32 %v9487_v25, %v1655_v34  ;;  %v10646_v37 = vpop.f32.mrb[3].mxu0 }
 0x3a9   : > { %v9503_v37 = vld [vmem:[%s16848_s2 + $0x60] sm:$0xff] }
 0x3aa   : > { %v1675_v39 = vmax.f32 %v1656_v36, 0.0  ;;  %v1698_v41 = vadd.f32 %v9494_v38, %v1686_v35 }
 0x3ab   : > { %v1660_v40 = vpop.f32.mrb[4].mxu0 }
 0x3ac   : > { %v1687_v42 = vmul.f32 %v9493_v29, %v1675_v39  ;;  %v1661_v43 = vadd.f32 %v9487_v25, %v1660_v40  ;;  %v10649_v44 = vpop.f32.mrb[5].mxu0  ;;  %v1709_v51 = vrot.slane %v1698_v41, 1  ;;  %v1734_v58 = vrot.slane %v1698_v41, 2  ;;  %v9505_v39 = vld [vmem:[%s16848_s2 + $0x70] sm:$0xff] }
 0x3ad   : > { %v9508_v44 = vld [vmem:[%s16848_s2 + $0x88] sm:$0xff] }
 0x3ae   : > { %v1699_v45 = vadd.f32 %v9494_v38, %v1687_v42  ;;  %v1676_v46 = vmax.f32 %v1661_v43, 0.0  ;;  %v9507_v43 = vld [vmem:[%s16848_s2 + $0x80] sm:$0xff] }
 0x3af   : > { %v1665_v47 = vpop.f32.mrb[6].mxu0 }
 0x3b0   : > { %v1688_v48 = vmul.f32 %v9493_v29, %v1676_v46  ;;  %v1666_v49 = vadd.f32 %v9487_v25, %v1665_v47  ;;  %v10652_v50 = vpop.f32.mrb[7].mxu0  ;;  %v1710_v52 = vrot.slane %v1699_v45, 1  ;;  %v1735_v53 = vrot.slane %v1699_v45, 2  ;;  %v9509_v46 = vld [vmem:[%s16848_s2 + $0x90] sm:$0xff]  ;;  %v9510_v47 = vld [vmem:[%s16848_s2 + $0x98] sm:$0xff] }
 0x3b1   : > { %v9512_v50 = vld [vmem:[%s16848_s2 + $0xa8] sm:$0xff] }
 0x3b2   : > { %v1700_v54 = vadd.f32 %v9494_v38, %v1688_v48  ;;  %v1677_v55 = vmax.f32 %v1666_v49, 0.0  ;;  %v1711_v56 = vsel %vm1708_vm2, %v1709_v51, %v1710_v52  ;;  %v1736_v63 = vsel %vm1733_vm3, %v1734_v58, %v1735_v53  ;;  %v9511_v49 = vld [vmem:[%s16848_s2 + $0xa0] sm:$0xff] }
 0x3b3   : > { %1718 = vrot.lane.b32.xlu0 %v1711_v56, %s13662_s9  ;;  %v1670_v57 = vpop.f32.mrb[8].mxu0  ;;  %v11631_v48 = vpack.c.bf16 %v9510_v47, %v9509_v46  ;;  %v11634_v51 = vpack.c.bf16 %v9512_v50, %v9511_v49 }
 0x3b4   : > { %v1689_v59 = vmul.f32 %v9493_v29, %v1677_v55  ;;  %v1671_v60 = vadd.f32 %v9487_v25, %v1670_v57  ;;  %v10655_v61 = vpop.f32.mrb[9].mxu0  ;;  %v1712_v62 = vrot.slane %v1700_v54, 1  ;;  %v1737_v5 = vrot.slane %v1700_v54, 2  ;;  %v9495_v55 = vld [vmem:[#allocation4] ss:$0 sm:$0xff] }
 0x3b6   : > { %v1701_v2 = vadd.f32 %v9494_v38, %v1689_v59  ;;  %v1678_v3 = vmax.f32 %v1671_v60, 0.0  ;;  %v1713_v4 = vsel %vm1708_vm2, %v1710_v52, %v1712_v62  ;;  %v1738_v9 = vsel %vm1733_vm3, %v1735_v53, %v1737_v5  ;;  %v9513_v52 = vld [vmem:[%s16848_s2 + $0xb0] sm:$0xff]  ;;  %v9514_v53 = vld [vmem:[%s16848_s2 + $0xb8] sm:$0xff] }
 0x3b7   : > { %1743 = vrot.lane.b32.xlu0 %v1736_v63, %s16766_s10  ;;  %1720 = vrot.lane.b32.xlu1 %v1713_v4, %s13662_s9  ;;  %v9501_v59 = vld [vmem:[#allocation6] ss:$0 sm:$0xff]  ;;  %v9502_v63 = vld [vmem:[#allocation7] ss:$0 sm:$0xff] }
 0x3b8   : > { %v1690_v6 = vmul.f32 %v9493_v29, %v1678_v3  ;;  %v1714_v7 = vrot.slane %v1701_v2, 1  ;;  %v1739_v11 = vrot.slane %v1701_v2, 2 }
 0x3ba   : > { %v1702_v8 = vadd.f32 %v9494_v38, %v1690_v6  ;;  %v1715_v10 = vsel %vm1708_vm2, %v1712_v62, %v1714_v7  ;;  %v1740_v13 = vsel %vm1733_vm3, %v1737_v5, %v1739_v11  ;;  %v9504_v38 = vld [vmem:[%s16848_s2 + $0x68] sm:$0xff] }
 0x3bb   : > { %1745 = vrot.lane.b32.xlu1 %v1738_v9, %s16766_s10  ;;  %1722 = vrot.lane.b32.xlu0 %v1715_v10, %s13662_s9  ;;  %v11622_v40 = vpack.c.bf16 %v9504_v38, %v9503_v37 }
 0x3bc   : > { %v1716_v12 = vrot.slane %v1702_v8, 1  ;;  %v1741_v15 = vrot.slane %v1702_v8, 2 }
 0x3bd   : > { %11623 = vmatpush3.bf16.msra.mxu0 %v11622_v40 }
 0x3be   : > { %v1717_v14 = vsel %vm1708_vm2, %v1714_v7, %v1716_v12  ;;  %v1742_v16 = vsel %vm1733_vm3, %v1739_v11, %v1741_v15  ;;  %11624 = vmatprep.subr.bf16.mxu0 %v16741_v0 }
 0x3bf   : > { %1747 = vrot.lane.b32.xlu1 %v1740_v13, %s16766_s10  ;;  %1724 = vrot.lane.b32.xlu0 %v1717_v14, %s13662_s9 }
 0x3c3   : > { %1749 = vrot.lane.b32.xlu1 %v1742_v16, %s16766_s10  ;;  %1726 = vrot.lane.b32.xlu0 %v1716_v12, %s13662_s9 }
 0x3c7   : > { %1751 = vrot.lane.b32.xlu1 %v1741_v15, %s16766_s10 }
 0x425   : > { %v1719_v17 = vpop.permute.xlu0 %1718 }
 0x426   : > { %v1759_v18 = vsel %vm1758_vm4, %v1698_v41, %v1719_v17  ;;  %v9506_v41 = vld [vmem:[%s16848_s2 + $0x78] sm:$0xff] }
 0x427   : > { %v11625_v42 = vpack.c.bf16 %v9506_v41, %v9505_v39 }
 0x429   : > { %v1744_v19 = vpop.permute.xlu0 %1743  ;;  %v1721_v20 = vpop.permute.xlu1 %1720  ;;  %11626 = vmatpush3.bf16.msra.mxu0 %v11625_v42 }
 0x42a   : > { %v1765_v21 = vsel %vm1764_vm5, %v1759_v18, %v1744_v19  ;;  %v1760_v22 = vsel %vm1758_vm4, %v1699_v45, %v1721_v20  ;;  %v11628_v45 = vpack.c.bf16 %v9508_v44, %v9507_v43  ;;  %11627 = vmatprep.subr.bf16.mxu0 %v16741_v0 }
 0x42b   : > { %10681 = vmatmul.mubr.msk.f32.vlgmr.msra.gmra.mrb[0].mxu1 %vm1789_vm6, %v1765_v21 }
 0x42c   : > { %10683 = vmatprep.mubr.msk.f32.mxu1 %vm13660_vm0, %v16739_v1 }
 0x42d   : > { %v1746_v23 = vpop.permute.xlu1 %1745  ;;  %v1723_v24 = vpop.permute.xlu0 %1722  ;;  %11629 = vmatpush3.bf16.msra.mxu0 %v11628_v45 }
 0x42e   : > { %v1766_v25 = vsel %vm1764_vm5, %v1760_v22, %v1746_v23  ;;  %v1761_v26 = vsel %vm1758_vm4, %v1700_v54, %v1723_v24  ;;  %11630 = vmatprep.subr.bf16.mxu0 %v16741_v0  ;;  %v11637_v54 = vpack.c.bf16 %v9514_v53, %v9513_v52 }
 0x42f   : > { %10684 = vmatmul.mubr.msk.f32.gmra.mrb[2].mxu1 %vm1789_vm6, %v1766_v25 }
 0x430   : > { %10686 = vmatprep.mubr.msk.f32.mxu1 %vm13660_vm0, %v16739_v1 }
 0x431   : > { %v1748_v27 = vpop.permute.xlu1 %1747  ;;  %v1725_v28 = vpop.permute.xlu0 %1724  ;;  %11632 = vmatpush3.bf16.msra.mxu0 %v11631_v48 }
 0x432   : > { %v1767_v29 = vsel %vm1764_vm5, %v1761_v26, %v1748_v27  ;;  %v1762_v30 = vsel %vm1758_vm4, %v1701_v2, %v1725_v28  ;;  %11633 = vmatprep.subr.bf16.mxu0 %v16741_v0 }
 0x433   : > { %10687 = vmatmul.mubr.msk.f32.gmra.mrb[4].mxu1 %vm1789_vm6, %v1767_v29 }
 0x434   : > { %10689 = vmatprep.mubr.msk.f32.mxu1 %vm13660_vm0, %v16739_v1 }
 0x435   : > { %v1750_v31 = vpop.permute.xlu1 %1749  ;;  %v1727_v33 = vpop.permute.xlu0 %1726  ;;  %11635 = vmatpush3.bf16.msra.mxu0 %v11634_v51 }
 0x436   : > { %v1768_v32 = vsel %vm1764_vm5, %v1762_v30, %v1750_v31  ;;  %v1763_v34 = vsel %vm1758_vm4, %v1702_v8, %v1727_v33  ;;  %11636 = vmatprep.subr.bf16.mxu0 %v16741_v0 }
 0x437   : > { %10690 = vmatmul.mubr.msk.f32.gmra.mrb[6].mxu1 %vm1789_vm6, %v1768_v32 }
 0x438   : > { %10692 = vmatprep.mubr.msk.f32.mxu1 %vm13660_vm0, %v16739_v1 }
 0x439   : > { %v1752_v35 = vpop.permute.xlu1 %1751  ;;  %11638 = vmatpush3.bf16.msra.mxu0 %v11637_v54 }
 0x43a   : > { %v1769_v36 = vsel %vm1764_vm5, %v1763_v34, %v1752_v35  ;;  %11657 = vmatprep.subr.bf16.mxu0 %v16741_v0 }
 0x43b   : > { %10693 = vmatmul.mubr.msk.f32.gmra.mrb[8].mxu1 %vm1789_vm6, %v1769_v36 }
 0x43c   : > { %10758 = vmatprep.mubr.msk.f32.mxu1 %vm13660_vm0, %v16739_v1 }
 0x4fe   : > { %v1871_v56 = vpop.f32.mrb[0].mxu1 }
 0x4ff   : > { %v1872_v57 = vadd.f32 %v9495_v55, %v1871_v56  ;;  %v10682_v58 = vpop.f32.mrb[1].mxu1 }
 0x501   : > { %v1895_v60 = vmax.f32 %v1872_v57, 0.0 }
 0x502   : > { %v1876_v61 = vpop.f32.mrb[2].mxu1 }
 0x503   : > { %v1907_v62 = vmul.f32 %v9501_v59, %v1895_v60  ;;  %v1877_v2 = vadd.f32 %v9495_v55, %v1876_v61  ;;  %v10685_v3 = vpop.f32.mrb[3].mxu1 }
 0x504   : > { %v9524_v3 = vld [vmem:[%s16848_s2 + $0xc8] sm:$0xff] }
 0x505   : > { %v1896_v4 = vmax.f32 %v1877_v2, 0.0  ;;  %v1919_v5 = vadd.f32 %v9502_v63, %v1907_v62  ;;  %v9523_v2 = vld [vmem:[%s16848_s2 + $0xc0] sm:$0xff] }
 0x506   : > { %v1881_v6 = vpop.f32.mrb[4].mxu1 }
 0x507   : > { %v1908_v7 = vmul.f32 %v9501_v59, %v1896_v4  ;;  %v1882_v8 = vadd.f32 %v9495_v55, %v1881_v6  ;;  %v10688_v9 = vpop.f32.mrb[5].mxu1  ;;  %v1953_v13 = vrot.slane %v1919_v5, 2  ;;  %v1929_v14 = vrot.slane %v1919_v5, 1  ;;  %v9525_v4 = vld [vmem:[%s16848_s2 + $0xd0] sm:$0xff]  ;;  %v9526_v6 = vld [vmem:[%s16848_s2 + $0xd8] sm:$0xff] }
 0x508   : > { %v9528_v9 = vld [vmem:[%s16848_s2 + $0xe8] sm:$0xff] }
 0x509   : > { %v1920_v10 = vadd.f32 %v9502_v63, %v1908_v7  ;;  %v1897_v11 = vmax.f32 %v1882_v8, 0.0  ;;  %v11643_v7 = vpack.c.bf16 %v9526_v6, %v9525_v4  ;;  %v9527_v8 = vld [vmem:[%s16848_s2 + $0xe0] sm:$0xff] }
 0x50a   : > { %v1886_v12 = vpop.f32.mrb[6].mxu1 }
 0x50b   : > { %v1909_v15 = vmul.f32 %v9501_v59, %v1897_v11  ;;  %v1887_v16 = vadd.f32 %v9495_v55, %v1886_v12  ;;  %v10691_v17 = vpop.f32.mrb[7].mxu1  ;;  %v1954_v18 = vrot.slane %v1920_v10, 2  ;;  %v1930_v19 = vrot.slane %v1920_v10, 1  ;;  %v9529_v11 = vld [vmem:[%s16848_s2 + $0xf0] sm:$0xff]  ;;  %v9530_v12 = vld [vmem:[%s16848_s2 + $0xf8] sm:$0xff] }
 0x50c   : > { %v9533_v17 = vld [vmem:[%s16848_s2 + $0x110] sm:$0xff] }
 0x50d   : > { %v1921_v20 = vadd.f32 %v9502_v63, %v1909_v15  ;;  %v1898_v21 = vmax.f32 %v1887_v16, 0.0  ;;  %v1955_v22 = vsel %vm1733_vm3, %v1953_v13, %v1954_v18  ;;  %v1931_v23 = vsel %vm1708_vm2, %v1929_v14, %v1930_v19  ;;  %v9531_v14 = vld [vmem:[%s16848_s2 + $0x100] sm:$0xff]  ;;  %v9532_v15 = vld [vmem:[%s16848_s2 + $0x108] sm:$0xff] }
 0x50e   : > { %1962 = vrot.lane.b32.xlu1 %v1955_v22, %s16766_s10  ;;  %1938 = vrot.lane.b32.xlu0 %v1931_v23, %s13662_s9  ;;  %v1891_v24 = vpop.f32.mrb[8].mxu1  ;;  %v11649_v13 = vpack.c.bf16 %v9530_v12, %v9529_v11  ;;  %v11652_v16 = vpack.c.bf16 %v9532_v15, %v9531_v14 }
 0x50f   : > { %v1910_v25 = vmul.f32 %v9501_v59, %v1898_v21  ;;  %v1892_v26 = vadd.f32 %v9495_v55, %v1891_v24  ;;  %v10694_v27 = vpop.f32.mrb[9].mxu1  ;;  %v1956_v28 = vrot.slane %v1921_v20, 2  ;;  %v1932_v29 = vrot.slane %v1921_v20, 1  ;;  %v9521_v24 = vld [vmem:[#allocation6 + $0x1] ss:$0 sm:$0xff] }
 0x511   : > { %v1922_v30 = vadd.f32 %v9502_v63, %v1910_v25  ;;  %v1899_v31 = vmax.f32 %v1892_v26, 0.0  ;;  %v1957_v32 = vsel %vm1733_vm3, %v1954_v18, %v1956_v28  ;;  %v1933_v33 = vsel %vm1708_vm2, %v1930_v19, %v1932_v29  ;;  %v9534_v18 = vld [vmem:[%s16848_s2 + $0x118] sm:$0xff] }
 0x512   : > { %1964 = vrot.lane.b32.xlu1 %v1957_v32, %s16766_s10  ;;  %1940 = vrot.lane.b32.xlu0 %v1933_v33, %s13662_s9  ;;  %v11655_v19 = vpack.c.bf16 %v9534_v18, %v9533_v17 }
 0x513   : > { %v1911_v34 = vmul.f32 %v9501_v59, %v1899_v31  ;;  %v1958_v35 = vrot.slane %v1922_v30, 2  ;;  %v1934_v36 = vrot.slane %v1922_v30, 1 }
 0x515   : > { %v1923_v37 = vadd.f32 %v9502_v63, %v1911_v34  ;;  %v1959_v38 = vsel %vm1733_vm3, %v1956_v28, %v1958_v35  ;;  %v1935_v39 = vsel %vm1708_vm2, %v1932_v29, %v1934_v36  ;;  %v9522_v28 = vld [vmem:[#allocation7 + $0x1] ss:$0 sm:$0xff] }
 0x516   : > { %1966 = vrot.lane.b32.xlu1 %v1959_v38, %s16766_s10  ;;  %1942 = vrot.lane.b32.xlu0 %v1935_v39, %s13662_s9 }
 0x517   : > { %v1960_v40 = vrot.slane %v1923_v37, 2  ;;  %v1936_v41 = vrot.slane %v1923_v37, 1 }
 0x519   : > { %v1961_v42 = vsel %vm1733_vm3, %v1958_v35, %v1960_v40  ;;  %v1937_v43 = vsel %vm1708_vm2, %v1934_v36, %v1936_v41 }
 0x51a   : > { %1968 = vrot.lane.b32.xlu1 %v1961_v42, %s16766_s10  ;;  %1944 = vrot.lane.b32.xlu0 %v1937_v43, %s13662_s9 }
 0x51e   : > { %1970 = vrot.lane.b32.xlu1 %v1960_v40, %s16766_s10  ;;  %1946 = vrot.lane.b32.xlu0 %v1936_v41, %s13662_s9 }
 0x580   : > { %v1963_v44 = vpop.permute.xlu1 %1962  ;;  %v1939_v45 = vpop.permute.xlu0 %1938 }
 0x581   : > { %v1977_v46 = vsel %vm1758_vm4, %v1919_v5, %v1939_v45  ;;  %v11640_v5 = vpack.c.bf16 %v9524_v3, %v9523_v2 }
 0x582   : > { %v1982_v47 = vsel %vm1764_vm5, %v1977_v46, %v1963_v44 }
 0x583   : > { %10720 = vmatmul.mubr.msk.f32.vlgmr.msra.gmra.mrb[10].mxu0 %vm1789_vm6, %v1982_v47  ;;  %11641 = vmatpush3.bf16.msra.mxu1 %v11640_v5 }
 0x584   : > { %v1965_v48 = vpop.permute.xlu1 %1964  ;;  %v1941_v49 = vpop.permute.xlu0 %1940  ;;  %10722 = vmatprep.mubr.msk.f32.mxu0 %vm13660_vm0, %v16739_v1  ;;  %11642 = vmatprep.subr.bf16.mxu1 %v16741_v0 }
 0x585   : > { %v1978_v50 = vsel %vm1758_vm4, %v1920_v10, %v1941_v49  ;;  %v11646_v10 = vpack.c.bf16 %v9528_v9, %v9527_v8 }
 0x586   : > { %v1983_v51 = vsel %vm1764_vm5, %v1978_v50, %v1965_v48 }
 0x587   : > { %10723 = vmatmul.mubr.msk.f32.gmra.mrb[12].mxu0 %vm1789_vm6, %v1983_v51  ;;  %11644 = vmatpush3.bf16.msra.mxu1 %v11643_v7 }
 0x588   : > { %v1967_v52 = vpop.permute.xlu1 %1966  ;;  %v1943_v53 = vpop.permute.xlu0 %1942  ;;  %10725 = vmatprep.mubr.msk.f32.mxu0 %vm13660_vm0, %v16739_v1  ;;  %11645 = vmatprep.subr.bf16.mxu1 %v16741_v0 }
 0x589   : > { %v1979_v54 = vsel %vm1758_vm4, %v1921_v20, %v1943_v53  ;;  %v9515_v20 = vld [vmem:[#allocation4 + $0x1] ss:$0 sm:$0xff] }
 0x58a   : > { %v1984_v55 = vsel %vm1764_vm5, %v1979_v54, %v1967_v52 }
 0x58b   : > { %10726 = vmatmul.mubr.msk.f32.gmra.mrb[14].mxu0 %vm1789_vm6, %v1984_v55  ;;  %11647 = vmatpush3.bf16.msra.mxu1 %v11646_v10 }
 0x58c   : > { %v1969_v56 = vpop.permute.xlu1 %1968  ;;  %v1945_v57 = vpop.permute.xlu0 %1944  ;;  %10728 = vmatprep.mubr.msk.f32.mxu0 %vm13660_vm0, %v16739_v1  ;;  %11648 = vmatprep.subr.bf16.mxu1 %v16741_v0 }
 0x58d   : > { %v1980_v58 = vsel %vm1758_vm4, %v1922_v30, %v1945_v57 }
 0x58e   : > { %v1985_v59 = vsel %vm1764_vm5, %v1980_v58, %v1969_v56 }
 0x58f   : > { %10729 = vmatmul.mubr.msk.f32.gmra.mrb[16].mxu0 %vm1789_vm6, %v1985_v59  ;;  %11650 = vmatpush3.bf16.msra.mxu1 %v11649_v13 }
 0x590   : > { %v1971_v60 = vpop.permute.xlu1 %1970  ;;  %v1947_v61 = vpop.permute.xlu0 %1946  ;;  %10731 = vmatprep.mubr.msk.f32.mxu0 %vm13660_vm0, %v16739_v1  ;;  %11651 = vmatprep.subr.bf16.mxu1 %v16741_v0 }
 0x591   : > { %v1981_v62 = vsel %vm1758_vm4, %v1923_v37, %v1947_v61 }
 0x592   : > { %v1986_v63 = vsel %vm1764_vm5, %v1981_v62, %v1971_v60 }
 0x593   : > { %10732 = vmatmul.mubr.msk.f32.gmra.mrb[18].mxu0 %vm1789_vm6, %v1986_v63  ;;  %11653 = vmatpush3.bf16.msra.mxu1 %v11652_v16 }
 0x594   : > { %10781 = vmatprep.mubr.msk.f32.mxu0 %vm13660_vm0, %v16739_v1  ;;  %11654 = vmatprep.subr.bf16.mxu1 %v16741_v0 }
 0x597   : > { %11656 = vmatpush3.bf16.msra.mxu1 %v11655_v19 }
 0x656   : > { %v2089_v21 = vpop.f32.mrb[10].mxu0 }
 0x657   : > { %v2090_v22 = vadd.f32 %v9515_v20, %v2089_v21  ;;  %v10721_v23 = vpop.f32.mrb[11].mxu0 }
 0x659   : > { %v2113_v25 = vmax.f32 %v2090_v22, 0.0 }
 0x65a   : > { %v2094_v26 = vpop.f32.mrb[12].mxu0 }
 0x65b   : > { %v2126_v27 = vmul.f32 %v9521_v24, %v2113_v25  ;;  %v2095_v29 = vadd.f32 %v9515_v20, %v2094_v26  ;;  %v10724_v30 = vpop.f32.mrb[13].mxu0 }
 0x65d   : > { %v2114_v31 = vmax.f32 %v2095_v29, 0.0  ;;  %v2139_v32 = vadd.f32 %v9522_v28, %v2126_v27  ;;  %v9535_v29 = vld [vmem:[#allocation4 + $0x2] ss:$0 sm:$0xff] }
 0x65e   : > { %v2099_v33 = vpop.f32.mrb[14].mxu0 }
 0x65f   : > { %v2127_v34 = vmul.f32 %v9521_v24, %v2114_v31  ;;  %v2100_v35 = vadd.f32 %v9515_v20, %v2099_v33  ;;  %v10727_v36 = vpop.f32.mrb[15].mxu0  ;;  %v2173_v40 = vrot.slane %v2139_v32, 2  ;;  %v2149_v41 = vrot.slane %v2139_v32, 1  ;;  %v9541_v33 = vld [vmem:[#allocation6 + $0x2] ss:$0 sm:$0xff] }
 0x660   : > { %v9542_v36 = vld [vmem:[#allocation7 + $0x2] ss:$0 sm:$0xff] }
 0x661   : > { %v2140_v37 = vadd.f32 %v9522_v28, %v2127_v34  ;;  %v2115_v38 = vmax.f32 %v2100_v35, 0.0 }
 0x662   : > { %v2104_v39 = vpop.f32.mrb[16].mxu0 }
 0x663   : > { %v2128_v42 = vmul.f32 %v9521_v24, %v2115_v38  ;;  %v2105_v43 = vadd.f32 %v9515_v20, %v2104_v39  ;;  %v10730_v44 = vpop.f32.mrb[17].mxu0  ;;  %v2174_v45 = vrot.slane %v2140_v37, 2  ;;  %v2150_v46 = vrot.slane %v2140_v37, 1 }
 0x665   : > { %v2141_v47 = vadd.f32 %v9522_v28, %v2128_v42  ;;  %v2116_v48 = vmax.f32 %v2105_v43, 0.0  ;;  %v2175_v49 = vsel %vm1733_vm3, %v2173_v40, %v2174_v45  ;;  %v2151_v50 = vsel %vm1708_vm2, %v2149_v41, %v2150_v46 }
 0x666   : > { %2182 = vrot.lane.b32.xlu1 %v2175_v49, %s16766_s10  ;;  %2158 = vrot.lane.b32.xlu0 %v2151_v50, %s13662_s9  ;;  %v2109_v51 = vpop.f32.mrb[18].mxu0 }
 0x667   : > { %v2129_v52 = vmul.f32 %v9521_v24, %v2116_v48  ;;  %v2110_v53 = vadd.f32 %v9515_v20, %v2109_v51  ;;  %v10733_v54 = vpop.f32.mrb[19].mxu0  ;;  %v2176_v55 = vrot.slane %v2141_v47, 2  ;;  %v2152_v56 = vrot.slane %v2141_v47, 1 }
 0x669   : > { %v2142_v57 = vadd.f32 %v9522_v28, %v2129_v52  ;;  %v2117_v58 = vmax.f32 %v2110_v53, 0.0  ;;  %v2177_v59 = vsel %vm1733_vm3, %v2174_v45, %v2176_v55  ;;  %v2153_v60 = vsel %vm1708_vm2, %v2150_v46, %v2152_v56 }
 0x66a   : > { %2184 = vrot.lane.b32.xlu1 %v2177_v59, %s16766_s10  ;;  %2160 = vrot.lane.b32.xlu0 %v2153_v60, %s13662_s9 }
 0x66b   : > { %v2130_v61 = vmul.f32 %v9521_v24, %v2117_v58  ;;  %v2178_v62 = vrot.slane %v2142_v57, 2  ;;  %v2154_v63 = vrot.slane %v2142_v57, 1 }
 0x66d   : > { %v2143_v2 = vadd.f32 %v9522_v28, %v2130_v61  ;;  %v2179_v3 = vsel %vm1733_vm3, %v2176_v55, %v2178_v62  ;;  %v2155_v4 = vsel %vm1708_vm2, %v2152_v56, %v2154_v63 }
 0x66e   : > { %2186 = vrot.lane.b32.xlu1 %v2179_v3, %s16766_s10  ;;  %2162 = vrot.lane.b32.xlu0 %v2155_v4, %s13662_s9 }
 0x66f   : > { %v2180_v5 = vrot.slane %v2143_v2, 2  ;;  %v2156_v6 = vrot.slane %v2143_v2, 1 }
 0x671   : > { %v2181_v7 = vsel %vm1733_vm3, %v2178_v62, %v2180_v5  ;;  %v2157_v8 = vsel %vm1708_vm2, %v2154_v63, %v2156_v6 }
 0x672   : > { %2188 = vrot.lane.b32.xlu1 %v2181_v7, %s16766_s10  ;;  %2164 = vrot.lane.b32.xlu0 %v2157_v8, %s13662_s9 }
 0x676   : > { %2190 = vrot.lane.b32.xlu1 %v2180_v5, %s16766_s10  ;;  %2166 = vrot.lane.b32.xlu0 %v2156_v6, %s13662_s9 }
 0x6d8   : > { %v2183_v9 = vpop.permute.xlu1 %2182  ;;  %v2159_v10 = vpop.permute.xlu0 %2158 }
 0x6d9   : > { %v2197_v11 = vsel %vm1758_vm4, %v2139_v32, %v2159_v10 }
 0x6da   : > { %v2202_v12 = vsel %vm1764_vm5, %v2197_v11, %v2183_v9 }
 0x6db   : > { %10759 = vmatmul.mubr.msk.f32.vlgmr.msra.gmra.mrb[10].mxu1 %vm1789_vm6, %v2202_v12 }
 0x6dc   : > { %v2185_v13 = vpop.permute.xlu1 %2184  ;;  %v2161_v14 = vpop.permute.xlu0 %2160  ;;  %10761 = vmatprep.mubr.msk.f32.mxu1 %vm13660_vm0, %v16739_v1 }
 0x6dd   : > { %v2198_v15 = vsel %vm1758_vm4, %v2140_v37, %v2161_v14 }
 0x6de   : > { %v2203_v16 = vsel %vm1764_vm5, %v2198_v15, %v2185_v13 }
 0x6df   : > { %10762 = vmatmul.mubr.msk.f32.gmra.mrb[12].mxu1 %vm1789_vm6, %v2203_v16 }
 0x6e0   : > { %v2187_v17 = vpop.permute.xlu1 %2186  ;;  %v2163_v18 = vpop.permute.xlu0 %2162  ;;  %10764 = vmatprep.mubr.msk.f32.mxu1 %vm13660_vm0, %v16739_v1 }
 0x6e1   : > { %v2199_v19 = vsel %vm1758_vm4, %v2141_v47, %v2163_v18 }
 0x6e2   : > { %v2204_v20 = vsel %vm1764_vm5, %v2199_v19, %v2187_v17 }
 0x6e3   : > { %10765 = vmatmul.mubr.msk.f32.gmra.mrb[14].mxu1 %vm1789_vm6, %v2204_v20 }
 0x6e4   : > { %v2189_v21 = vpop.permute.xlu1 %2188  ;;  %v2165_v22 = vpop.permute.xlu0 %2164  ;;  %10767 = vmatprep.mubr.msk.f32.mxu1 %vm13660_vm0, %v16739_v1 }
 0x6e5   : > { %v2200_v23 = vsel %vm1758_vm4, %v2142_v57, %v2165_v22 }
 0x6e6   : > { %v2205_v24 = vsel %vm1764_vm5, %v2200_v23, %v2189_v21 }
 0x6e7   : > { %10768 = vmatmul.mubr.msk.f32.gmra.mrb[16].mxu1 %vm1789_vm6, %v2205_v24 }
 0x6e8   : > { %v2191_v25 = vpop.permute.xlu1 %2190  ;;  %v2167_v26 = vpop.permute.xlu0 %2166  ;;  %10770 = vmatprep.mubr.msk.f32.mxu1 %vm13660_vm0, %v16739_v1 }
 0x6e9   : > { %v2201_v27 = vsel %vm1758_vm4, %v2143_v2, %v2167_v26 }
 0x6ea   : > { %v2206_v28 = vsel %vm1764_vm5, %v2201_v27, %v2191_v25 }
 0x6eb   : > { %10771 = vmatmul.mubr.msk.f32.gmra.mrb[18].mxu1 %vm1789_vm6, %v2206_v28 }
 0x7ae   : > { %v2309_v30 = vpop.f32.mrb[10].mxu1 }
 0x7af   : > { %v2310_v31 = vadd.f32 %v9535_v29, %v2309_v30  ;;  %v10760_v32 = vpop.f32.mrb[11].mxu1  ;;  %v2455_v30 = vld [vmem:[%s16857_s4] sm:$0xff] }
 0x7b1   : > { %v2333_v34 = vmax.f32 %v2310_v31, 0.0  ;;  %v2456_v31 = vld [vmem:[%s16857_s4 + $0x8] sm:$0xff] }
 0x7b2   : > { %v2314_v35 = vpop.f32.mrb[12].mxu1  ;;  %v11658_v32 = vpack.c.bf16 %v2456_v31, %v2455_v30 }
 0x7b3   : > { %v2346_v37 = vmul.f32 %v9541_v33, %v2333_v34  ;;  %v2315_v38 = vadd.f32 %v9535_v29, %v2314_v35  ;;  %v10763_v39 = vpop.f32.mrb[13].mxu1  ;;  %v2458_v34 = vld [vmem:[%s16857_s4 + $0x18] sm:$0xff] }
 0x7b4   : > { %11659 = vmatpush3.bf16.msra.mxu0 %v11658_v32 }
 0x7b5   : > { %v2334_v40 = vmax.f32 %v2315_v38, 0.0  ;;  %v14462_v41 = vadd.f32 %v9542_v36, %v2346_v37  ;;  %11660 = vmatprep.subr.bf16.mxu0 %v16741_v0 }
 0x7b6   : > { %v2319_v42 = vpop.f32.mrb[14].mxu1 }
 0x7b7   : > { %16852 = vst [vmem:[#allocation82_spill] sm:$0xff] %v14462_v41  ;;  %v2347_v43 = vmul.f32 %v9541_v33, %v2334_v40  ;;  %v2320_v44 = vadd.f32 %v9535_v29, %v2319_v42  ;;  %v10766_v45 = vpop.f32.mrb[15].mxu1  ;;  %v2366_v46 = vsel %vm1758_vm4, %v14462_v41, 0.0 }
 0x7b8   : > { %2367 = vadd.xlane.f32.xlu0 %v2366_v46 }
 0x7b9   : > { %v2335_v47 = vmax.f32 %v2320_v44, 0.0  ;;  %v14466_v48 = vadd.f32 %v9542_v36, %v2347_v43 }
 0x7ba   : > { %v2324_v49 = vpop.f32.mrb[16].mxu1 }
 0x7bb   : > { %16853 = vst [vmem:[#allocation83_spill] sm:$0xff] %v14466_v48  ;;  %v2348_v50 = vmul.f32 %v9541_v33, %v2335_v47  ;;  %v2325_v51 = vadd.f32 %v9535_v29, %v2324_v49  ;;  %v10769_v52 = vpop.f32.mrb[17].mxu1  ;;  %v2369_v53 = vsel %vm1758_vm4, %v14466_v48, 0.0 }
 0x7bc   : > { %2370 = vadd.xlane.f32.xlu1 %v2369_v53 }
 0x7bd   : > { %v2336_v54 = vmax.f32 %v2325_v51, 0.0  ;;  %v14470_v55 = vadd.f32 %v9542_v36, %v2348_v50  ;;  %v9543_v50 = vld [vmem:[%s16858_s18] ss:$0 sm:$0xff]  ;;  %s16908_s18 = sld [smem:[#allocation80_spill]] }
 0x7be   : > { %v2329_v56 = vpop.f32.mrb[18].mxu1 }
 0x7bf   : > { %16854 = vst [vmem:[#allocation84_spill] sm:$0xff] %v14470_v55  ;;  %v2349_v57 = vmul.f32 %v9541_v33, %v2336_v54  ;;  %v2330_v58 = vadd.f32 %v9535_v29, %v2329_v56  ;;  %v10772_v59 = vpop.f32.mrb[19].mxu1  ;;  %v2372_v60 = vsel %vm1758_vm4, %v14470_v55, 0.0  ;;  %v9544_v56 = vld [vmem:[#allocation9] ss:$0 sm:$0xff] }
 0x7c0   : > { %2373 = vadd.xlane.f32.xlu0 %v2372_v60 }
 0x7c1   : > { %v2337_v61 = vmax.f32 %v2330_v58, 0.0  ;;  %v14474_v62 = vadd.f32 %v9542_v36, %v2349_v57 }
 0x7c3   : > { %16855 = vst [vmem:[#allocation85_spill] sm:$0xff] %v14474_v62  ;;  %v2350_v63 = vmul.f32 %v9541_v33, %v2337_v61  ;;  %v2375_v2 = vsel %vm1758_vm4, %v14474_v62, 0.0  ;;  %v2457_v33 = vld [vmem:[%s16857_s4 + $0x10] sm:$0xff] }
 0x7c4   : > { %2376 = vadd.xlane.f32.xlu0 %v2375_v2  ;;  %v11661_v35 = vpack.c.bf16 %v2458_v34, %v2457_v33 }
 0x7c5   : > { %v14478_v3 = vadd.f32 %v9542_v36, %v2350_v63 }
 0x7c6   : > { %11662 = vmatpush3.bf16.msra.mxu0 %v11661_v35 }
 0x7c7   : > { %16856 = vst [vmem:[#allocation86_spill] sm:$0xff] %v14478_v3  ;;  %v2379_v4 = vsel %vm2378_vm7, %v14478_v3, 0.0 }
 0x7c8   : > { %2380 = vadd.xlane.f32.xlu1 %v2379_v4 }
 0x845   : > { %v2368_v5 = vpop.xlane.xlu0 %2367 }
 0x846   : > { %v2383_v6 = vmul.f32 0.03125, %v2368_v5 }
 0x848   : > { %v2388_v7 = vsub.f32 %v14462_v41, %v2383_v6 }
 0x849   : > { %v2371_v8 = vpop.xlane.xlu1 %2370 }
 0x84a   : > { %v2384_v9 = vmul.f32 0.03125, %v2371_v8  ;;  %v2393_v10 = vmul.f32 %v2388_v7, %v2388_v7 }
 0x84c   : > { %v2389_v11 = vsub.f32 %v14466_v48, %v2384_v9  ;;  %v2398_v12 = vsel %vm1758_vm4, %v2393_v10, 0.0 }
 0x84d   : > { %2399 = vadd.xlane.f32.xlu0 %v2398_v12  ;;  %v2374_v13 = vpop.xlane.xlu0 %2373 }
 0x84e   : > { %v2385_v14 = vmul.f32 0.03125, %v2374_v13  ;;  %v2394_v15 = vmul.f32 %v2389_v11, %v2389_v11 }
 0x850   : > { %v2390_v16 = vsub.f32 %v14470_v55, %v2385_v14  ;;  %v2401_v17 = vsel %vm1758_vm4, %v2394_v15, 0.0 }
 0x851   : > { %2402 = vadd.xlane.f32.xlu1 %v2401_v17  ;;  %v2377_v18 = vpop.xlane.xlu0 %2376  ;;  %v9545_v17 = vld [vmem:[#allocation10] ss:$0 sm:$0xff] }
 0x852   : > { %v2386_v19 = vmul.f32 0.03125, %v2377_v18  ;;  %v2395_v20 = vmul.f32 %v2390_v16, %v2390_v16 }
 0x854   : > { %v2391_v21 = vsub.f32 %v14474_v62, %v2386_v19  ;;  %v2404_v22 = vsel %vm1758_vm4, %v2395_v20, 0.0 }
 0x855   : > { %v2381_v23 = vpop.xlane.xlu1 %2380  ;;  %2405 = vadd.xlane.f32.xlu0 %v2404_v22 }
 0x856   : > { %v2387_v24 = vmul.f32 0.03125, %v2381_v23  ;;  %v2396_v25 = vmul.f32 %v2391_v21, %v2391_v21 }
 0x858   : > { %v2392_v26 = vsub.f32 %v14478_v3, %v2387_v24  ;;  %v2407_v27 = vsel %vm1758_vm4, %v2396_v25, 0.0 }
 0x859   : > { %2408 = vadd.xlane.f32.xlu1 %v2407_v27 }
 0x85a   : > { %v2397_v28 = vmul.f32 %v2392_v26, %v2392_v26 }
 0x85c   : > { %v2410_v29 = vsel %vm2378_vm7, %v2397_v28, 0.0 }
 0x85d   : > { %2411 = vadd.xlane.f32.xlu0 %v2410_v29 }
 0x8da   : > { %v2400_v36 = vpop.xlane.xlu0 %2399 }
 0x8db   : > { %v2413_v37 = vmul.f32 0.03125, %v2400_v36 }
 0x8dd   : > { %v2418_v38 = vadd.f32 1e-06, %v2413_v37 }
 0x8de   : > { %v2403_v39 = vpop.xlane.xlu1 %2402 }
 0x8df   : > { %12328 = vrsqrt.f32 %v2418_v38  ;;  %v2414_v40 = vmul.f32 0.03125, %v2403_v39 }
 0x8e1   : > { %v2419_v42 = vadd.f32 1e-06, %v2414_v40 }
 0x8e2   : > { %v2406_v43 = vpop.xlane.xlu0 %2405 }
 0x8e3   : > { %12330 = vrsqrt.f32 %v2419_v42  ;;  %v2415_v44 = vmul.f32 0.03125, %v2406_v43  ;;  %v2645_v43 = vld [vmem:[%s16859_s15 + $0x8] sm:$0xff] }
 0x8e5   : > { %v2420_v45 = vadd.f32 1e-06, %v2415_v44  ;;  %v2646_v44 = vld [vmem:[%s16859_s15 + $0x10] sm:$0xff] }
 0x8e6   : > { %v2409_v46 = vpop.xlane.xlu1 %2408 }
 0x8e7   : > { %12332 = vrsqrt.f32 %v2420_v45  ;;  %v2416_v47 = vmul.f32 0.03125, %v2409_v46  ;;  %v2647_v45 = vld [vmem:[%s16859_s15 + $0x18] sm:$0xff]  ;;  %v2648_v46 = vld [vmem:[%s16859_s15 + $0x20] sm:$0xff] }
 0x8e9   : > { %v12329_v49 = vpop.eup %12328  ;;  %v2421_v51 = vadd.f32 1e-06, %v2416_v47  ;;  %v2649_v47 = vld [vmem:[%s16859_s15 + $0x28] sm:$0xff] }
 0x8ea   : > { %v2428_v52 = vmul.f32 %v12329_v49, %v2388_v7  ;;  %v2412_v53 = vpop.xlane.xlu0 %2411  ;;  %v2650_v49 = vld [vmem:[%s16859_s15 + $0x30] sm:$0xff] }
 0x8eb   : > { %12334 = vrsqrt.f32 %v2421_v51  ;;  %v2417_v54 = vmul.f32 0.03125, %v2412_v53  ;;  %v2652_v51 = vld [vmem:[%s16859_s15 + $0x40] sm:$0xff]  ;;  %v2654_v53 = vld [vmem:[%s16859_s15 + $0x50] sm:$0xff] }
 0x8ec   : > { %v2439_v57 = vmul.f32 %v9543_v50, %v2428_v52  ;;  %v2653_v52 = vld [vmem:[%s16859_s15 + $0x48] sm:$0xff] }
 0x8ed   : > { %v12331_v58 = vpop.eup %12330  ;;  %v2422_v59 = vadd.f32 1e-06, %v2417_v54  ;;  %v2655_v54 = vld [vmem:[%s16859_s15 + $0x58] sm:$0xff] }
 0x8ee   : > { %v2450_v60 = vadd.f32 %v9544_v56, %v2439_v57  ;;  %v2429_v61 = vmul.f32 %v12331_v58, %v2389_v11  ;;  %v2657_v57 = vld [vmem:[%s16859_s15 + $0x68] sm:$0xff]  ;;  %v2658_v58 = vld [vmem:[%s16859_s15 + $0x70] sm:$0xff] }
 0x8ef   : > { %12336 = vrsqrt.f32 %v2422_v59  ;;  %v2659_v59 = vld [vmem:[%s16859_s15 + $0x78] sm:$0xff] }
 0x8f0   : > { %10782 = vmatmul.mubr.msk.f32.vlgmr.msra.gmra.mrb[20].mxu0 %vm1758_vm4, %v2450_v60  ;;  %v2440_v63 = vmul.f32 %v9543_v50, %v2429_v61  ;;  %v2660_v60 = vld [vmem:[%s16859_s15 + $0x80] sm:$0xff]  ;;  %v2661_v61 = vld [vmem:[%s16859_s15 + $0x88] sm:$0xff] }
 0x8f1   : > { %v12333_v2 = vpop.eup %12332  ;;  %10784 = vmatprep.mubr.msk.f32.mxu0 %vm13660_vm0, %v16739_v1 }
 0x8f2   : > { %v2451_v4 = vadd.f32 %v9544_v56, %v2440_v63  ;;  %v2430_v5 = vmul.f32 %v12333_v2, %v2390_v16  ;;  %v2644_v16 = vld [vmem:[%s16859_s15] sm:$0xff]  ;;  %v2662_v63 = vld [vmem:[%s16859_s15 + $0x90] sm:$0xff]  ;;  %v2663_v2 = vld [vmem:[%s16859_s15 + $0x98] sm:$0xff] }
 0x8f4   : > { %10785 = vmatmul.mubr.msk.f32.gmra.mrb[22].mxu0 %vm1758_vm4, %v2451_v4  ;;  %v2441_v6 = vmul.f32 %v9543_v50, %v2430_v5  ;;  %v2664_v4 = vld [vmem:[%s16859_s15 + $0xa0] sm:$0xff]  ;;  %v2665_v5 = vld [vmem:[%s16859_s15 + $0xa8] sm:$0xff] }
 0x8f5   : > { %v12335_v7 = vpop.eup %12334  ;;  %10787 = vmatprep.mubr.msk.f32.mxu0 %vm13660_vm0, %v16739_v1 }
 0x8f6   : > { %v2452_v8 = vadd.f32 %v9544_v56, %v2441_v6  ;;  %v2431_v9 = vmul.f32 %v12335_v7, %v2391_v21  ;;  %v2666_v6 = vld [vmem:[%s16859_s15 + $0xb0] sm:$0xff]  ;;  %v2667_v7 = vld [vmem:[%s16859_s15 + $0xb8] sm:$0xff] }
 0x8f8   : > { %10788 = vmatmul.mubr.msk.f32.gmra.mrb[24].mxu0 %vm1758_vm4, %v2452_v8  ;;  %v2442_v10 = vmul.f32 %v9543_v50, %v2431_v9  ;;  %v2668_v8 = vld [vmem:[%s16859_s15 + $0xc0] sm:$0xff]  ;;  %v2669_v9 = vld [vmem:[%s16859_s15 + $0xc8] sm:$0xff] }
 0x8f9   : > { %v12337_v11 = vpop.eup %12336  ;;  %10790 = vmatprep.mubr.msk.f32.mxu0 %vm13660_vm0, %v16739_v1 }
 0x8fa   : > { %v2453_v12 = vadd.f32 %v9544_v56, %v2442_v10  ;;  %v2432_v13 = vmul.f32 %v12337_v11, %v2392_v26  ;;  %v2670_v10 = vld [vmem:[%s16859_s15 + $0xd0] sm:$0xff]  ;;  %v2671_v11 = vld [vmem:[%s16859_s15 + $0xd8] sm:$0xff] }
 0x8fc   : > { %10791 = vmatmul.mubr.msk.f32.gmra.mrb[26].mxu0 %vm1758_vm4, %v2453_v12  ;;  %v2443_v14 = vmul.f32 %v9543_v50, %v2432_v13  ;;  %v2651_v50 = vld [vmem:[%s16859_s15 + $0x38] sm:$0xff]  ;;  %v2672_v12 = vld [vmem:[%s16859_s15 + $0xe0] sm:$0xff]  ;;  %v2673_v13 = vld [vmem:[%s16859_s15 + $0xe8] sm:$0xff] }
 0x8fd   : > { %10793 = vmatprep.mubr.msk.f32.mxu0 %vm13660_vm0, %v16739_v1 }
 0x8fe   : > { %v2454_v15 = vadd.f32 %v9544_v56, %v2443_v14  ;;  %v2656_v56 = vld [vmem:[%s16859_s15 + $0x60] sm:$0xff]  ;;  %v2674_v14 = vld [vmem:[%s16859_s15 + $0xf0] sm:$0xff] }
 0x900   : > { %10794 = vmatmul.mubr.msk.f32.gmra.mrb[28].mxu0 %vm1758_vm4, %v2454_v15  ;;  %v2675_v15 = vld [vmem:[%s16859_s15 + $0xf8] sm:$0xff] }
 0x901   : > { %10806 = vmatprep.mubr.msk.f32.mxu0 %vm2712_vm8, %v2644_v16  ;;  %v2676_v16 = vld [vmem:[%s16859_s15 + $0x100] sm:$0xff] }
 0x9c3   : > { %v2547_v18 = vpop.f32.mrb[20].mxu0 }
 0x9c4   : > { %v10783_v19 = vpop.f32.mrb[21].mxu0  ;;  %v2548_v20 = vadd.f32 %v9545_v17, %v2547_v18  ;;  %v2678_v18 = vld [vmem:[%s16859_s15 + $0x110] sm:$0xff] }
 0x9c5   : > { %v2679_v19 = vld [vmem:[%s16859_s15 + $0x118] sm:$0xff] }
 0x9c6   : > { %v2571_v24 = vmul.f32 0.70710677, %v2548_v20 }
 0x9c7   : > { %v2552_v21 = vpop.f32.mrb[22].mxu0 }
 0x9c8   : > { %v2553_v22 = vadd.f32 %v9545_v17, %v2552_v21  ;;  %v10786_v23 = vpop.f32.mrb[23].mxu0  ;;  %v2681_v21 = vld [vmem:[%s16859_s15 + $0x128] sm:$0xff] }
 0x9c9   : > { %v2683_v23 = vld [vmem:[%s16859_s15 + $0x138] sm:$0xff] }
 0x9ca   : > { %v2572_v25 = vmul.f32 0.70710677, %v2553_v22  ;;  %v12298_v26 = vpack.i.bf16 %v2553_v22, %v2548_v20  ;;  %v2680_v20 = vld [vmem:[%s16859_s15 + $0x120] sm:$0xff]  ;;  %v2682_v22 = vld [vmem:[%s16859_s15 + $0x130] sm:$0xff] }
 0x9cb   : > { %v2557_v27 = vpop.f32.mrb[24].mxu0 }
 0x9cc   : > { %12299 = vrot.lane.b32.xlu1 %v12298_v26, %s13664_s22  ;;  %v10789_v28 = vpop.f32.mrb[25].mxu0  ;;  %v11663_v29 = vpack.c.bf16 %v2572_v25, %v2571_v24  ;;  %v2558_v30 = vadd.f32 %v9545_v17, %v2557_v27  ;;  %v2684_v24 = vld [vmem:[%s16859_s15 + $0x140] sm:$0xff]  ;;  %v2685_v25 = vld [vmem:[%s16859_s15 + $0x148] sm:$0xff]  ;;  %v2687_v27 = vld [vmem:[%s16859_s15 + $0x158] sm:$0xff] }
 0x9cd   : > { %v2688_v28 = vld [vmem:[%s16859_s15 + $0x160] sm:$0xff] }
 0x9ce   : > { %11664 = vmatprep.subr.bf16.mxu0 %v11663_v29  ;;  %v2573_v34 = vmul.f32 0.70710677, %v2558_v30 }
 0x9cf   : > { %v2562_v31 = vpop.f32.mrb[26].mxu0  ;;  %11666 = vmatpush3.bf16.msra.mxu0 %v11663_v29  ;;  %v2689_v29 = vld [vmem:[%s16859_s15 + $0x168] sm:$0xff] }
 0x9d0   : > { %v2563_v32 = vadd.f32 %v9545_v17, %v2562_v31  ;;  %v10792_v33 = vpop.f32.mrb[27].mxu0  ;;  %v2691_v31 = vld [vmem:[%s16859_s15 + $0x178] sm:$0xff] }
 0x9d1   : > { %v2693_v33 = vld [vmem:[%s16859_s15 + $0x188] sm:$0xff] }
 0x9d2   : > { %v2574_v35 = vmul.f32 0.70710677, %v2563_v32  ;;  %v12303_v36 = vpack.i.bf16 %v2563_v32, %v2558_v30  ;;  %v2690_v30 = vld [vmem:[%s16859_s15 + $0x170] sm:$0xff]  ;;  %v2692_v32 = vld [vmem:[%s16859_s15 + $0x180] sm:$0xff] }
 0x9d3   : > { %v2567_v37 = vpop.f32.mrb[28].mxu0 }
 0x9d4   : > { %v14514_v38 = vadd.f32 %v9545_v17, %v2567_v37  ;;  %12304 = vrot.lane.b32.xlu0 %v12303_v36, %s13664_s22  ;;  %v10795_v39 = vpop.f32.mrb[29].mxu0  ;;  %v11667_v40 = vpack.c.bf16 %v2574_v35, %v2573_v34  ;;  %v2677_v17 = vld [vmem:[%s16859_s15 + $0x108] sm:$0xff]  ;;  %v2694_v34 = vld [vmem:[%s16859_s15 + $0x190] sm:$0xff]  ;;  %v2695_v35 = vld [vmem:[%s16859_s15 + $0x198] sm:$0xff] }
 0x9d5   : > { %v2696_v37 = vld [vmem:[%s16859_s15 + $0x1a0] sm:$0xff] }
 0x9d6   : > { %v2575_v42 = vmul.f32 0.70710677, %v14514_v38  ;;  %11668 = vmatprep.subr.bf16.mxu0 %v11667_v40  ;;  %3407 = vrot.lane.b32.xlu1 %v14514_v38, %s13664_s22 }
 0x9d7   : > { %11670 = vmatpush3.bf16.msra.mxu0 %v11667_v40 }
 0x9d8   : > { %12309 = vrot.lane.b32.xlu0 %v12298_v26, %s16766_s10  ;;  %10804 = vmatprep.subr.msk.mxu0 %vm2917_vm9, %v2575_v42  ;;  %v2686_v26 = vld [vmem:[%s16859_s15 + $0x150] sm:$0xff] }
 0x9da   : > { %12314 = vrot.lane.b32.xlu1 %v12303_v36, %s16766_s10 }
 0x9db   : > { %10805 = vmatpush3.msk.msra.mxu0 %vm2917_vm9, %v2575_v42  ;;  %v16860_v42 = vmov 0 }
 0x9dc   : > { %10807 = vmatmul.mubr.msk.f32.vlgmr.msra.gmra.mrb[30].mxu0 %vm2712_vm8, %v2645_v43  ;;  %v16861_v42 = vsel %vm14628_vm10, 4294967295, %v16860_v42 }
 0x9dd   : > { %10809 = vmatprep.mubr.msk.f32.mxu0 %vm2712_vm8, %v2646_v44  ;;  %16862 = vst [vmem:[#allocation87_spill] sm:$0xff] %v16861_v42  ;;  %v2697_v44 = vld [vmem:[%s16859_s15 + $0x1a8] sm:$0xff] }
 0x9e0   : > { %10810 = vmatmul.mubr.msk.f32.gmra.mrb[32].mxu0 %vm2712_vm8, %v2647_v45  ;;  %v2698_v45 = vld [vmem:[%s16859_s15 + $0x1b0] sm:$0xff] }
 0x9e1   : > { %10812 = vmatprep.mubr.msk.f32.mxu0 %vm2712_vm8, %v2648_v46  ;;  %v2699_v46 = vld [vmem:[%s16859_s15 + $0x1b8] sm:$0xff] }
 0x9e4   : > { %10813 = vmatmul.mubr.msk.f32.gmra.mrb[34].mxu0 %vm2712_vm8, %v2649_v47 }
 0x9e5   : > { %10815 = vmatprep.mubr.msk.f32.mxu0 %vm2712_vm8, %v2650_v49  ;;  %v2700_v49 = vld [vmem:[%s16859_s15 + $0x1c0] sm:$0xff] }
 0x9e8   : > { %10816 = vmatmul.mubr.msk.f32.gmra.mrb[36].mxu0 %vm2712_vm8, %v2651_v50 }
 0x9e9   : > { %10818 = vmatprep.mubr.msk.f32.mxu0 %vm2712_vm8, %v2652_v51 }
 0x9ec   : > { %10819 = vmatmul.mubr.msk.f32.gmra.mrb[38].mxu0 %vm2712_vm8, %v2653_v52 }
 0x9ed   : > { %10821 = vmatprep.mubr.msk.f32.mxu0 %vm2712_vm8, %v2654_v53 }
 0x9f0   : > { %10822 = vmatmul.mubr.msk.f32.gmra.mrb[40].mxu0 %vm2712_vm8, %v2655_v54  ;;  %v2701_v54 = vld [vmem:[%s16859_s15 + $0x1c8] sm:$0xff] }
 0x9f1   : > { %10824 = vmatprep.mubr.msk.f32.mxu0 %vm2712_vm8, %v2656_v56 }
 0x9f4   : > { %10825 = vmatmul.mubr.msk.f32.gmra.mrb[42].mxu0 %vm2712_vm8, %v2657_v57  ;;  %v2702_v57 = vld [vmem:[%s16859_s15 + $0x1d0] sm:$0xff] }
 0x9f5   : > { %10827 = vmatprep.mubr.msk.f32.mxu0 %vm2712_vm8, %v2658_v58 }
 0x9f8   : > { %10828 = vmatmul.mubr.msk.f32.gmra.mrb[44].mxu0 %vm2712_vm8, %v2659_v59 }
 0x9f9   : > { %10830 = vmatprep.mubr.msk.f32.mxu0 %vm2712_vm8, %v2660_v60 }
 0x9fc   : > { %10831 = vmatmul.mubr.msk.f32.gmra.mrb[46].mxu0 %vm2712_vm8, %v2661_v61 }
 0x9fd   : > { %10833 = vmatprep.mubr.msk.f32.mxu0 %vm2712_vm8, %v2662_v63 }
 0xa00   : > { %10834 = vmatmul.mubr.msk.f32.gmra.mrb[48].mxu0 %vm2712_vm8, %v2663_v2 }
 0xa01   : > { %10836 = vmatprep.mubr.msk.f32.mxu0 %vm2712_vm8, %v2664_v4  ;;  %v2703_v4 = vld [vmem:[%s16859_s15 + $0x1d8] sm:$0xff] }
 0xa04   : > { %10837 = vmatmul.mubr.msk.f32.gmra.mrb[50].mxu0 %vm2712_vm8, %v2665_v5 }
 0xa05   : > { %10839 = vmatprep.mubr.msk.f32.mxu0 %vm2712_vm8, %v2666_v6  ;;  %v2704_v6 = vld [vmem:[%s16859_s15 + $0x1e0] sm:$0xff] }
 0xa08   : > { %10840 = vmatmul.mubr.msk.f32.gmra.mrb[52].mxu0 %vm2712_vm8, %v2667_v7  ;;  %v2705_v7 = vld [vmem:[%s16859_s15 + $0x1e8] sm:$0xff] }
 0xa09   : > { %10842 = vmatprep.mubr.msk.f32.mxu0 %vm2712_vm8, %v2668_v8  ;;  %v2706_v8 = vld [vmem:[%s16859_s15 + $0x1f0] sm:$0xff] }
 0xa0c   : > { %10843 = vmatmul.mubr.msk.f32.gmra.mrb[54].mxu0 %vm2712_vm8, %v2669_v9  ;;  %v2707_v9 = vld [vmem:[%s16859_s15 + $0x1f8] sm:$0xff] }
 0xa0d   : > { %10845 = vmatprep.mubr.msk.f32.mxu0 %vm2712_vm8, %v2670_v10  ;;  %v2708_v10 = vld [vmem:[%s16859_s15 + $0x200] sm:$0xff] }
 0xa10   : > { %10846 = vmatmul.mubr.msk.f32.gmra.mrb[56].mxu0 %vm2712_vm8, %v2671_v11  ;;  %v2709_v11 = vld [vmem:[%s16859_s15 + $0x208] sm:$0xff] }
 0xa11   : > { %10848 = vmatprep.mubr.msk.f32.mxu0 %vm2712_vm8, %v2672_v12  ;;  %v2710_v12 = vld [vmem:[%s16859_s15 + $0x210] sm:$0xff] }
 0xa14   : > { %10849 = vmatmul.mubr.msk.f32.gmra.mrb[58].mxu0 %vm2712_vm8, %v2673_v13  ;;  %v2711_v13 = vld [vmem:[%s16859_s15 + $0x218] sm:$0xff] }
 0xa15   : > { %10851 = vmatprep.mubr.msk.f32.mxu0 %vm2712_vm8, %v2674_v14  ;;  %v2576_v14 = vld [vmem:[%s16863_s0] sm:$0xff] }
 0xa18   : > { %10852 = vmatmul.mubr.msk.f32.gmra.mrb[60].mxu0 %vm2712_vm8, %v2675_v15  ;;  %v2577_v15 = vld [vmem:[%s16863_s0 + $0x8] sm:$0xff] }
 0xa19   : > { %10854 = vmatprep.mubr.msk.f32.mxu0 %vm2712_vm8, %v2676_v16 }
 0xa1c   : > { %10855 = vmatmul.mubr.msk.f32.gmra.mrb[62].mxu0 %vm2712_vm8, %v2677_v17 }
 0xa1d   : > { %10857 = vmatprep.mubr.msk.f32.mxu0 %vm2712_vm8, %v2678_v18 }
 0xa20   : > { %10858 = vmatmul.mubr.msk.f32.gmra.mrb[64].mxu0 %vm2712_vm8, %v2679_v19 }
 0xa21   : > { %10860 = vmatprep.mubr.msk.f32.mxu0 %vm2712_vm8, %v2680_v20  ;;  %v2578_v20 = vld [vmem:[%s16863_s0 + $0x10] sm:$0xff] }
 0xa24   : > { %10861 = vmatmul.mubr.msk.f32.gmra.mrb[66].mxu0 %vm2712_vm8, %v2681_v21  ;;  %v2579_v21 = vld [vmem:[%s16863_s0 + $0x18] sm:$0xff] }
 0xa25   : > { %10863 = vmatprep.mubr.msk.f32.mxu0 %vm2712_vm8, %v2682_v22 }
 0xa28   : > { %10864 = vmatmul.mubr.msk.f32.gmra.mrb[68].mxu0 %vm2712_vm8, %v2683_v23 }
 0xa29   : > { %10866 = vmatprep.mubr.msk.f32.mxu0 %vm2712_vm8, %v2684_v24 }
 0xa2c   : > { %10867 = vmatmul.mubr.msk.f32.gmra.mrb[70].mxu0 %vm2712_vm8, %v2685_v25 }
 0xa2d   : > { %10869 = vmatprep.mubr.msk.f32.mxu0 %vm2712_vm8, %v2686_v26  ;;  %v2580_v26 = vld [vmem:[%s16863_s0 + $0x20] sm:$0xff] }
 0xa30   : > { %10870 = vmatmul.mubr.msk.f32.gmra.mrb[72].mxu0 %vm2712_vm8, %v2687_v27  ;;  %v2581_v27 = vld [vmem:[%s16863_s0 + $0x28] sm:$0xff] }
 0xa31   : > { %10872 = vmatprep.mubr.msk.f32.mxu0 %vm2712_vm8, %v2688_v28 }
 0xa34   : > { %10873 = vmatmul.mubr.msk.f32.gmra.mrb[74].mxu0 %vm2712_vm8, %v2689_v29 }
 0xa35   : > { %10875 = vmatprep.mubr.msk.f32.mxu0 %vm2712_vm8, %v2690_v30 }
 0xa38   : > { %10876 = vmatmul.mubr.msk.f32.gmra.mrb[76].mxu0 %vm2712_vm8, %v2691_v31 }
 0xa39   : > { %10878 = vmatprep.mubr.msk.f32.mxu0 %vm2712_vm8, %v2692_v32  ;;  %v2582_v32 = vld [vmem:[%s16863_s0 + $0x30] sm:$0xff] }
 0xa3c   : > { %10879 = vmatmul.mubr.msk.f32.gmra.mrb[78].mxu0 %vm2712_vm8, %v2693_v33  ;;  %v2583_v33 = vld [vmem:[%s16863_s0 + $0x38] sm:$0xff] }
 0xa3d   : > { %10881 = vmatprep.mubr.msk.f32.mxu0 %vm2712_vm8, %v2694_v34 }
 0xa3e   : > { %v12300_v36 = vpop.permute.xlu1 %12299 }
 0xa3f   : > { %v12302_v39 = vunpack.i.h.bf16 %v12300_v36  ;;  %v12301_v40 = vunpack.i.l.bf16 %v12300_v36 }
 0xa40   : > { %10882 = vmatmul.mubr.msk.f32.gmra.mrb[80].mxu0 %vm2712_vm8, %v2695_v35 }
 0xa41   : > { %v11671_v43 = vpack.c.bf16 %v12302_v39, %v12301_v40  ;;  %10884 = vmatprep.mubr.msk.f32.mxu0 %vm2712_vm8, %v2696_v37  ;;  %v2584_v39 = vld [vmem:[%s16863_s0 + $0x40] sm:$0xff]  ;;  %v2585_v40 = vld [vmem:[%s16863_s0 + $0x48] sm:$0xff] }
 0xa43   : > { %11673 = vmatprep.subr.msk.bf16.mxu1 %vm14628_vm10, %v11671_v43 }
 0xa44   : > { %11676 = vmatpush3.bf16.xpose.msk.msra.mxu1 %vm14628_vm10, %v11671_v43  ;;  %10885 = vmatmul.mubr.msk.f32.gmra.mrb[82].mxu0 %vm2712_vm8, %v2697_v44 }
 0xa45   : > { %10887 = vmatprep.mubr.msk.f32.mxu0 %vm2712_vm8, %v2698_v45 }
 0xa46   : > { %v12305_v47 = vpop.permute.xlu0 %12304 }
 0xa47   : > { %v12307_v50 = vunpack.i.h.bf16 %v12305_v47  ;;  %v12306_v51 = vunpack.i.l.bf16 %v12305_v47  ;;  %v2586_v47 = vld [vmem:[%s16863_s0 + $0x50] sm:$0xff] }
 0xa48   : > { %v3408_v52 = vpop.permute.xlu1 %3407  ;;  %10888 = vmatmul.mubr.msk.f32.gmra.mrb[84].mxu0 %vm2712_vm8, %v2699_v46 }
 0xa49   : > { %v11677_v53 = vpack.c.bf16 %v12307_v50, %v12306_v51  ;;  %10890 = vmatprep.mubr.msk.f32.mxu0 %vm2712_vm8, %v2700_v49  ;;  %v2587_v49 = vld [vmem:[%s16863_s0 + $0x58] sm:$0xff] }
 0xa4a   : > { %v12310_v56 = vpop.permute.xlu0 %12309 }
 0xa4b   : > { %v12312_v58 = vunpack.i.h.bf16 %v12310_v56  ;;  %v12311_v59 = vunpack.i.l.bf16 %v12310_v56  ;;  %11679 = vmatprep.subr.msk.bf16.mxu1 %vm14628_vm10, %v11677_v53  ;;  %v2589_v56 = vld [vmem:[%s16863_s0 + $0x68] sm:$0xff] }
 0xa4c   : > { %11682 = vmatpush3.bf16.xpose.msk.msra.mxu1 %vm14628_vm10, %v11677_v53  ;;  %v12315_v60 = vpop.permute.xlu1 %12314  ;;  %10891 = vmatmul.mubr.msk.f32.gmra.mrb[86].mxu0 %vm2712_vm8, %v2701_v54  ;;  %v2588_v54 = vld [vmem:[%s16863_s0 + $0x60] sm:$0xff] }
 0xa4d   : > { %v12317_v61 = vunpack.i.h.bf16 %v12315_v60  ;;  %v12316_v63 = vunpack.i.l.bf16 %v12315_v60  ;;  %10916 = vmatprep.subr.msk.mxu1 %vm1758_vm4, %v3408_v52  ;;  %v11683_v2 = vpack.c.bf16 %v12312_v58, %v12311_v59  ;;  %10893 = vmatprep.mubr.msk.f32.mxu0 %vm2712_vm8, %v2702_v57 }
 0xa4f   : > { %11684 = vmatprep.subr.bf16.mxu0 %v11683_v2  ;;  %v11687_v5 = vpack.c.bf16 %v12317_v61, %v12316_v63  ;;  %v2590_v61 = vld [vmem:[%s16863_s0 + $0x70] sm:$0xff]  ;;  %v2591_v63 = vld [vmem:[%s16863_s0 + $0x78] sm:$0xff] }
 0xa50   : > { %11686 = vmatpush3.bf16.msra.mxu0 %v11683_v2 }
 0xa51   : > { %11688 = vmatprep.subr.bf16.mxu0 %v11687_v5  ;;  %10894 = vmatmul.mubr.msk.f32.gmra.mrb[88].mxu0 %vm2712_vm8, %v2703_v4 }
 0xa52   : > { %10896 = vmatprep.mubr.msk.f32.mxu0 %vm2712_vm8, %v2704_v6  ;;  %v2593_v6 = vld [vmem:[%s16863_s0 + $0x88] sm:$0xff] }
 0xa54   : > { %10917 = vmatpush3.xpose.msk.msra.mxu1 %vm1758_vm4, %v3408_v52  ;;  %11690 = vmatpush3.bf16.msra.mxu0 %v11687_v5 }
 0xa55   : > { %10897 = vmatmul.mubr.msk.f32.gmra.mrb[90].mxu0 %vm2712_vm8, %v2705_v7 }
 0xa56   : > { %10899 = vmatprep.mubr.msk.f32.mxu0 %vm2712_vm8, %v2706_v8  ;;  %v2592_v8 = vld [vmem:[%s16863_s0 + $0x80] sm:$0xff] }
 0xa59   : > { %10900 = vmatmul.mubr.msk.f32.gmra.mrb[92].mxu0 %vm2712_vm8, %v2707_v9 }
 0xa5a   : > { %10902 = vmatprep.mubr.msk.f32.mxu0 %vm2712_vm8, %v2708_v10 }
 0xa5d   : > { %10903 = vmatmul.mubr.msk.f32.gmra.mrb[94].mxu0 %vm2712_vm8, %v2709_v11 }
 0xa5e   : > { %10905 = vmatprep.mubr.msk.f32.mxu0 %vm2712_vm8, %v2710_v12 }
 0xa61   : > { %10906 = vmatmul.mubr.msk.f32.gmra.mrb[96].mxu0 %vm2712_vm8, %v2711_v13  ;;  %v2595_v13 = vld [vmem:[%s16863_s0 + $0x98] sm:$0xff] }
 0xaaf   : > { %v10808_v16 = vpop.f32.mrb[30].mxu0 }
 0xab0   : > { %v2987_v17 = vpop.f32.mrb[31].mxu0  ;;  %v3327_v19 = vmul.f32 %v10808_v16, %v2577_v15 }
 0xab1   : > { %v3326_v18 = vmul.f32 %v2987_v17, %v2576_v14  ;;  %v2594_v14 = vld [vmem:[%s16863_s0 + $0x90] sm:$0xff] }
 0xab3   : > { %v10811_v22 = vpop.f32.mrb[32].mxu0  ;;  %10918 = vmatprep.mubr.msk.f32.mxu1 %vm1758_vm4, %v3326_v18 }
 0xab4   : > { %v2997_v23 = vpop.f32.mrb[33].mxu0  ;;  %10919 = vmatmul.mubr.msk.f32.vlgmr.msra.gmra.mrb[20].mxu1 %vm1758_vm4, %v3327_v19  ;;  %v3329_v25 = vmul.f32 %v10811_v22, %v2579_v21  ;;  %v2597_v19 = vld [vmem:[%s16863_s0 + $0xa8] sm:$0xff] }
 0xab5   : > { %v3328_v24 = vmul.f32 %v2997_v23, %v2578_v20  ;;  %v2596_v20 = vld [vmem:[%s16863_s0 + $0xa0] sm:$0xff] }
 0xab7   : > { %v10814_v28 = vpop.f32.mrb[34].mxu0  ;;  %10921 = vmatprep.mubr.msk.f32.mxu1 %vm1758_vm4, %v3328_v24 }
 0xab8   : > { %v3007_v29 = vpop.f32.mrb[35].mxu0  ;;  %10922 = vmatmul.mubr.msk.f32.gmra.mrb[22].mxu1 %vm1758_vm4, %v3329_v25  ;;  %v3331_v31 = vmul.f32 %v10814_v28, %v2581_v27  ;;  %v2599_v25 = vld [vmem:[%s16863_s0 + $0xb8] sm:$0xff] }
 0xab9   : > { %v3330_v30 = vmul.f32 %v3007_v29, %v2580_v26  ;;  %v2598_v26 = vld [vmem:[%s16863_s0 + $0xb0] sm:$0xff] }
 0xabb   : > { %v10817_v34 = vpop.f32.mrb[36].mxu0  ;;  %10924 = vmatprep.mubr.msk.f32.mxu1 %vm1758_vm4, %v3330_v30 }
 0xabc   : > { %v3017_v35 = vpop.f32.mrb[37].mxu0  ;;  %10925 = vmatmul.mubr.msk.f32.gmra.mrb[24].mxu1 %vm1758_vm4, %v3331_v31  ;;  %v3333_v37 = vmul.f32 %v10817_v34, %v2583_v33  ;;  %v2601_v31 = vld [vmem:[%s16863_s0 + $0xc8] sm:$0xff] }
 0xabd   : > { %v3332_v36 = vmul.f32 %v3017_v35, %v2582_v32  ;;  %v2600_v32 = vld [vmem:[%s16863_s0 + $0xc0] sm:$0xff] }
 0xabf   : > { %v10820_v43 = vpop.f32.mrb[38].mxu0  ;;  %10927 = vmatprep.mubr.msk.f32.mxu1 %vm1758_vm4, %v3332_v36 }
 0xac0   : > { %v3027_v44 = vpop.f32.mrb[39].mxu0  ;;  %10928 = vmatmul.mubr.msk.f32.gmra.mrb[26].mxu1 %vm1758_vm4, %v3333_v37  ;;  %v3335_v46 = vmul.f32 %v10820_v43, %v2585_v40  ;;  %v2603_v37 = vld [vmem:[%s16863_s0 + $0xd8] sm:$0xff] }
 0xac1   : > { %v3334_v45 = vmul.f32 %v3027_v44, %v2584_v39  ;;  %v2602_v39 = vld [vmem:[%s16863_s0 + $0xd0] sm:$0xff] }
 0xac3   : > { %v10823_v50 = vpop.f32.mrb[40].mxu0  ;;  %10930 = vmatprep.mubr.msk.f32.mxu1 %vm1758_vm4, %v3334_v45 }
 0xac4   : > { %v3037_v51 = vpop.f32.mrb[41].mxu0  ;;  %10931 = vmatmul.mubr.msk.f32.gmra.mrb[28].mxu1 %vm1758_vm4, %v3335_v46  ;;  %v3337_v53 = vmul.f32 %v10823_v50, %v2587_v49  ;;  %v2605_v46 = vld [vmem:[%s16863_s0 + $0xe8] sm:$0xff] }
 0xac5   : > { %v3336_v52 = vmul.f32 %v3037_v51, %v2586_v47  ;;  %v2604_v47 = vld [vmem:[%s16863_s0 + $0xe0] sm:$0xff] }
 0xac7   : > { %v10826_v57 = vpop.f32.mrb[42].mxu0  ;;  %10933 = vmatprep.mubr.msk.f32.mxu1 %vm1758_vm4, %v3336_v52 }
 0xac8   : > { %v3047_v58 = vpop.f32.mrb[43].mxu0  ;;  %10934 = vmatmul.mubr.msk.f32.gmra.mrb[30].mxu1 %vm1758_vm4, %v3337_v53  ;;  %v3339_v60 = vmul.f32 %v10826_v57, %v2589_v56  ;;  %v2607_v53 = vld [vmem:[%s16863_s0 + $0xf8] sm:$0xff] }
 0xac9   : > { %v3338_v59 = vmul.f32 %v3047_v58, %v2588_v54  ;;  %v2606_v54 = vld [vmem:[%s16863_s0 + $0xf0] sm:$0xff] }
 0xacb   : > { %v10829_v2 = vpop.f32.mrb[44].mxu0  ;;  %10936 = vmatprep.mubr.msk.f32.mxu1 %vm1758_vm4, %v3338_v59 }
 0xacc   : > { %v3057_v4 = vpop.f32.mrb[45].mxu0  ;;  %10937 = vmatmul.mubr.msk.f32.gmra.mrb[32].mxu1 %vm1758_vm4, %v3339_v60  ;;  %v3341_v7 = vmul.f32 %v10829_v2, %v2591_v63  ;;  %v2609_v60 = vld [vmem:[%s16863_s0 + $0x108] sm:$0xff] }
 0xacd   : > { %v3340_v5 = vmul.f32 %v3057_v4, %v2590_v61  ;;  %v2608_v61 = vld [vmem:[%s16863_s0 + $0x100] sm:$0xff] }
 0xacf   : > { %10939 = vmatprep.mubr.msk.f32.mxu1 %vm1758_vm4, %v3340_v5  ;;  %v10832_v9 = vpop.f32.mrb[46].mxu0 }
 0xad0   : > { %10940 = vmatmul.mubr.msk.f32.gmra.mrb[34].mxu1 %vm1758_vm4, %v3341_v7  ;;  %v3343_v10 = vmul.f32 %v10832_v9, %v2593_v6  ;;  %v3067_v11 = vpop.f32.mrb[47].mxu0  ;;  %v2611_v6 = vld [vmem:[%s16863_s0 + $0x118] sm:$0xff]  ;;  %v2610_v7 = vld [vmem:[%s16863_s0 + $0x110] sm:$0xff] }
 0xad1   : > { %v3342_v12 = vmul.f32 %v3067_v11, %v2592_v8 }
 0xad3   : > { %10942 = vmatprep.mubr.msk.f32.mxu1 %vm1758_vm4, %v3342_v12  ;;  %v10835_v15 = vpop.f32.mrb[48].mxu0  ;;  %v2613_v12 = vld [vmem:[%s16863_s0 + $0x128] sm:$0xff] }
 0xad4   : > { %10943 = vmatmul.mubr.msk.f32.gmra.mrb[36].mxu1 %vm1758_vm4, %v3343_v10  ;;  %v3345_v16 = vmul.f32 %v10835_v15, %v2595_v13  ;;  %v3077_v17 = vpop.f32.mrb[49].mxu0  ;;  %v2612_v13 = vld [vmem:[%s16863_s0 + $0x120] sm:$0xff] }
 0xad5   : > { %v3344_v18 = vmul.f32 %v3077_v17, %v2594_v14 }
 0xad7   : > { %10945 = vmatprep.mubr.msk.f32.mxu1 %vm1758_vm4, %v3344_v18  ;;  %v10838_v21 = vpop.f32.mrb[50].mxu0  ;;  %v2615_v18 = vld [vmem:[%s16863_s0 + $0x138] sm:$0xff] }
 0xad8   : > { %10946 = vmatmul.mubr.msk.f32.gmra.mrb[38].mxu1 %vm1758_vm4, %v3345_v16  ;;  %v3347_v22 = vmul.f32 %v10838_v21, %v2597_v19  ;;  %v3087_v23 = vpop.f32.mrb[51].mxu0  ;;  %v2614_v19 = vld [vmem:[%s16863_s0 + $0x130] sm:$0xff] }
 0xad9   : > { %v3346_v24 = vmul.f32 %v3087_v23, %v2596_v20 }
 0xadb   : > { %v10841_v27 = vpop.f32.mrb[52].mxu0  ;;  %10948 = vmatprep.mubr.msk.f32.mxu1 %vm1758_vm4, %v3346_v24  ;;  %v2617_v24 = vld [vmem:[%s16863_s0 + $0x148] sm:$0xff] }
 0xadc   : > { %v3349_v28 = vmul.f32 %v10841_v27, %v2599_v25  ;;  %v3097_v29 = vpop.f32.mrb[53].mxu0  ;;  %10949 = vmatmul.mubr.msk.f32.gmra.mrb[40].mxu1 %vm1758_vm4, %v3347_v22  ;;  %v2616_v25 = vld [vmem:[%s16863_s0 + $0x140] sm:$0xff] }
 0xadd   : > { %v3348_v30 = vmul.f32 %v3097_v29, %v2598_v26 }
 0xadf   : > { %10951 = vmatprep.mubr.msk.f32.mxu1 %vm1758_vm4, %v3348_v30  ;;  %v10844_v33 = vpop.f32.mrb[54].mxu0  ;;  %v2619_v30 = vld [vmem:[%s16863_s0 + $0x158] sm:$0xff] }
 0xae0   : > { %10952 = vmatmul.mubr.msk.f32.gmra.mrb[42].mxu1 %vm1758_vm4, %v3349_v28  ;;  %v3351_v34 = vmul.f32 %v10844_v33, %v2601_v31  ;;  %v3107_v35 = vpop.f32.mrb[55].mxu0  ;;  %v2618_v31 = vld [vmem:[%s16863_s0 + $0x150] sm:$0xff] }
 0xae1   : > { %v3350_v36 = vmul.f32 %v3107_v35, %v2600_v32 }
 0xae3   : > { %10954 = vmatprep.mubr.msk.f32.mxu1 %vm1758_vm4, %v3350_v36  ;;  %v10847_v40 = vpop.f32.mrb[56].mxu0  ;;  %v2621_v36 = vld [vmem:[%s16863_s0 + $0x168] sm:$0xff] }
 0xae4   : > { %10955 = vmatmul.mubr.msk.f32.gmra.mrb[44].mxu1 %vm1758_vm4, %v3351_v34  ;;  %v3353_v43 = vmul.f32 %v10847_v40, %v2603_v37  ;;  %v3117_v44 = vpop.f32.mrb[57].mxu0  ;;  %v2620_v37 = vld [vmem:[%s16863_s0 + $0x160] sm:$0xff] }
 0xae5   : > { %v3352_v45 = vmul.f32 %v3117_v44, %v2602_v39 }
 0xae7   : > { %10957 = vmatprep.mubr.msk.f32.mxu1 %vm1758_vm4, %v3352_v45  ;;  %v10850_v49 = vpop.f32.mrb[58].mxu0  ;;  %v2623_v45 = vld [vmem:[%s16863_s0 + $0x178] sm:$0xff] }
 0xae8   : > { %10958 = vmatmul.mubr.msk.f32.gmra.mrb[46].mxu1 %vm1758_vm4, %v3353_v43  ;;  %v3355_v50 = vmul.f32 %v10850_v49, %v2605_v46  ;;  %v3127_v51 = vpop.f32.mrb[59].mxu0  ;;  %v2622_v46 = vld [vmem:[%s16863_s0 + $0x170] sm:$0xff] }
 0xae9   : > { %v3354_v52 = vmul.f32 %v3127_v51, %v2604_v47 }
 0xaeb   : > { %v10853_v56 = vpop.f32.mrb[60].mxu0  ;;  %10960 = vmatprep.mubr.msk.f32.mxu1 %vm1758_vm4, %v3354_v52  ;;  %v2625_v52 = vld [vmem:[%s16863_s0 + $0x188] sm:$0xff] }
 0xaec   : > { %v3357_v57 = vmul.f32 %v10853_v56, %v2607_v53  ;;  %v3137_v58 = vpop.f32.mrb[61].mxu0  ;;  %10961 = vmatmul.mubr.msk.f32.gmra.mrb[48].mxu1 %vm1758_vm4, %v3355_v50  ;;  %v2624_v53 = vld [vmem:[%s16863_s0 + $0x180] sm:$0xff] }
 0xaed   : > { %v3356_v59 = vmul.f32 %v3137_v58, %v2606_v54 }
 0xaef   : > { %v10856_v63 = vpop.f32.mrb[62].mxu0  ;;  %10963 = vmatprep.mubr.msk.f32.mxu1 %vm1758_vm4, %v3356_v59  ;;  %v2627_v59 = vld [vmem:[%s16863_s0 + $0x198] sm:$0xff] }
 0xaf0   : > { %v3359_v2 = vmul.f32 %v10856_v63, %v2609_v60  ;;  %v3147_v4 = vpop.f32.mrb[63].mxu0  ;;  %10964 = vmatmul.mubr.msk.f32.gmra.mrb[50].mxu1 %vm1758_vm4, %v3357_v57  ;;  %v2626_v60 = vld [vmem:[%s16863_s0 + $0x190] sm:$0xff] }
 0xaf1   : > { %v3358_v5 = vmul.f32 %v3147_v4, %v2608_v61 }
 0xaf3   : > { %v10859_v8 = vpop.f32.mrb[64].mxu0  ;;  %10966 = vmatprep.mubr.msk.f32.mxu1 %vm1758_vm4, %v3358_v5  ;;  %v2629_v5 = vld [vmem:[%s16863_s0 + $0x1a8] sm:$0xff] }
 0xaf4   : > { %v3361_v9 = vmul.f32 %v10859_v8, %v2611_v6  ;;  %v3157_v10 = vpop.f32.mrb[65].mxu0  ;;  %10967 = vmatmul.mubr.msk.f32.gmra.mrb[52].mxu1 %vm1758_vm4, %v3359_v2  ;;  %v2628_v6 = vld [vmem:[%s16863_s0 + $0x1a0] sm:$0xff] }
 0xaf5   : > { %v3360_v11 = vmul.f32 %v3157_v10, %v2610_v7 }
 0xaf7   : > { %v10862_v14 = vpop.f32.mrb[66].mxu0  ;;  %10969 = vmatprep.mubr.msk.f32.mxu1 %vm1758_vm4, %v3360_v11  ;;  %v2631_v11 = vld [vmem:[%s16863_s0 + $0x1b8] sm:$0xff] }
 0xaf8   : > { %v3363_v15 = vmul.f32 %v10862_v14, %v2613_v12  ;;  %v3167_v16 = vpop.f32.mrb[67].mxu0  ;;  %10970 = vmatmul.mubr.msk.f32.gmra.mrb[54].mxu1 %vm1758_vm4, %v3361_v9  ;;  %v2630_v12 = vld [vmem:[%s16863_s0 + $0x1b0] sm:$0xff] }
 0xaf9   : > { %v3362_v17 = vmul.f32 %v3167_v16, %v2612_v13 }
 0xafb   : > { %v10865_v20 = vpop.f32.mrb[68].mxu0  ;;  %10972 = vmatprep.mubr.msk.f32.mxu1 %vm1758_vm4, %v3362_v17  ;;  %v2633_v17 = vld [vmem:[%s16863_s0 + $0x1c8] sm:$0xff] }
 0xafc   : > { %v3365_v21 = vmul.f32 %v10865_v20, %v2615_v18  ;;  %v3177_v22 = vpop.f32.mrb[69].mxu0  ;;  %10973 = vmatmul.mubr.msk.f32.gmra.mrb[56].mxu1 %vm1758_vm4, %v3363_v15  ;;  %v2632_v18 = vld [vmem:[%s16863_s0 + $0x1c0] sm:$0xff] }
 0xafd   : > { %v3364_v23 = vmul.f32 %v3177_v22, %v2614_v19 }
 0xaff   : > { %v10868_v26 = vpop.f32.mrb[70].mxu0  ;;  %10975 = vmatprep.mubr.msk.f32.mxu1 %vm1758_vm4, %v3364_v23  ;;  %v2635_v23 = vld [vmem:[%s16863_s0 + $0x1d8] sm:$0xff] }
 0xb00   : > { %v3367_v27 = vmul.f32 %v10868_v26, %v2617_v24  ;;  %v3187_v28 = vpop.f32.mrb[71].mxu0  ;;  %10976 = vmatmul.mubr.msk.f32.gmra.mrb[58].mxu1 %vm1758_vm4, %v3365_v21  ;;  %v2634_v24 = vld [vmem:[%s16863_s0 + $0x1d0] sm:$0xff] }
 0xb01   : > { %v3366_v29 = vmul.f32 %v3187_v28, %v2616_v25 }
 0xb03   : > { %v10871_v32 = vpop.f32.mrb[72].mxu0  ;;  %10978 = vmatprep.mubr.msk.f32.mxu1 %vm1758_vm4, %v3366_v29  ;;  %v2637_v29 = vld [vmem:[%s16863_s0 + $0x1e8] sm:$0xff] }
 0xb04   : > { %v3369_v33 = vmul.f32 %v10871_v32, %v2619_v30  ;;  %v3197_v34 = vpop.f32.mrb[73].mxu0  ;;  %10979 = vmatmul.mubr.msk.f32.gmra.mrb[60].mxu1 %vm1758_vm4, %v3367_v27  ;;  %v2636_v30 = vld [vmem:[%s16863_s0 + $0x1e0] sm:$0xff] }
 0xb05   : > { %v3368_v35 = vmul.f32 %v3197_v34, %v2618_v31 }
 0xb07   : > { %v10874_v39 = vpop.f32.mrb[74].mxu0  ;;  %10981 = vmatprep.mubr.msk.f32.mxu1 %vm1758_vm4, %v3368_v35  ;;  %v2639_v35 = vld [vmem:[%s16863_s0 + $0x1f8] sm:$0xff] }
 0xb08   : > { %v3371_v40 = vmul.f32 %v10874_v39, %v2621_v36  ;;  %v3207_v43 = vpop.f32.mrb[75].mxu0  ;;  %10982 = vmatmul.mubr.msk.f32.gmra.mrb[62].mxu1 %vm1758_vm4, %v3369_v33  ;;  %v2638_v36 = vld [vmem:[%s16863_s0 + $0x1f0] sm:$0xff] }
 0xb09   : > { %v3370_v44 = vmul.f32 %v3207_v43, %v2620_v37 }
 0xb0b   : > { %v10877_v47 = vpop.f32.mrb[76].mxu0  ;;  %10984 = vmatprep.mubr.msk.f32.mxu1 %vm1758_vm4, %v3370_v44  ;;  %v2641_v44 = vld [vmem:[%s16863_s0 + $0x208] sm:$0xff] }
 0xb0c   : > { %v3373_v49 = vmul.f32 %v10877_v47, %v2623_v45  ;;  %v3217_v50 = vpop.f32.mrb[77].mxu0  ;;  %10985 = vmatmul.mubr.msk.f32.gmra.mrb[64].mxu1 %vm1758_vm4, %v3371_v40  ;;  %v2640_v45 = vld [vmem:[%s16863_s0 + $0x200] sm:$0xff] }
 0xb0d   : > { %v3372_v51 = vmul.f32 %v3217_v50, %v2622_v46 }
 0xb0f   : > { %v10880_v54 = vpop.f32.mrb[78].mxu0  ;;  %10987 = vmatprep.mubr.msk.f32.mxu1 %vm1758_vm4, %v3372_v51  ;;  %v2643_v51 = vld [vmem:[%s16863_s0 + $0x218] sm:$0xff] }
 0xb10   : > { %v3375_v56 = vmul.f32 %v10880_v54, %v2625_v52  ;;  %v3227_v57 = vpop.f32.mrb[79].mxu0  ;;  %10988 = vmatmul.mubr.msk.f32.gmra.mrb[66].mxu1 %vm1758_vm4, %v3373_v49  ;;  %v2642_v52 = vld [vmem:[%s16863_s0 + $0x210] sm:$0xff] }
 0xb11   : > { %v3374_v58 = vmul.f32 %v3227_v57, %v2624_v53 }
 0xb13   : > { %v10883_v61 = vpop.f32.mrb[80].mxu0  ;;  %10990 = vmatprep.mubr.msk.f32.mxu1 %vm1758_vm4, %v3374_v58 }
 0xb14   : > { %v3377_v63 = vmul.f32 %v10883_v61, %v2627_v59  ;;  %v3237_v2 = vpop.f32.mrb[81].mxu0  ;;  %10991 = vmatmul.mubr.msk.f32.gmra.mrb[68].mxu1 %vm1758_vm4, %v3375_v56 }
 0xb15   : > { %v3376_v4 = vmul.f32 %v3237_v2, %v2626_v60 }
 0xb17   : > { %v10886_v7 = vpop.f32.mrb[82].mxu0  ;;  %10993 = vmatprep.mubr.msk.f32.mxu1 %vm1758_vm4, %v3376_v4 }
 0xb18   : > { %v3379_v8 = vmul.f32 %v10886_v7, %v2629_v5  ;;  %v3247_v9 = vpop.f32.mrb[83].mxu0  ;;  %10994 = vmatmul.mubr.msk.f32.gmra.mrb[70].mxu1 %vm1758_vm4, %v3377_v63 }
 0xb19   : > { %v3378_v10 = vmul.f32 %v3247_v9, %v2628_v6 }
 0xb1b   : > { %v10889_v13 = vpop.f32.mrb[84].mxu0  ;;  %10996 = vmatprep.mubr.msk.f32.mxu1 %vm1758_vm4, %v3378_v10 }
 0xb1c   : > { %v3381_v14 = vmul.f32 %v10889_v13, %v2631_v11  ;;  %v3257_v15 = vpop.f32.mrb[85].mxu0  ;;  %10997 = vmatmul.mubr.msk.f32.gmra.mrb[72].mxu1 %vm1758_vm4, %v3379_v8 }
 0xb1d   : > { %v3380_v16 = vmul.f32 %v3257_v15, %v2630_v12 }
 0xb1f   : > { %v10892_v19 = vpop.f32.mrb[86].mxu0  ;;  %10999 = vmatprep.mubr.msk.f32.mxu1 %vm1758_vm4, %v3380_v16 }
 0xb20   : > { %v3383_v20 = vmul.f32 %v10892_v19, %v2633_v17  ;;  %v3267_v21 = vpop.f32.mrb[87].mxu0  ;;  %11000 = vmatmul.mubr.msk.f32.gmra.mrb[74].mxu1 %vm1758_vm4, %v3381_v14 }
 0xb21   : > { %v3382_v22 = vmul.f32 %v3267_v21, %v2632_v18 }
 0xb23   : > { %11002 = vmatprep.mubr.msk.f32.mxu1 %vm1758_vm4, %v3382_v22 }
 0xb24   : > { %v10895_v25 = vpop.f32.mrb[88].mxu0  ;;  %11003 = vmatmul.mubr.msk.f32.gmra.mrb[76].mxu1 %vm1758_vm4, %v3383_v20 }
 0xb25   : > { %v3385_v26 = vmul.f32 %v10895_v25, %v2635_v23  ;;  %v3277_v27 = vpop.f32.mrb[89].mxu0 }
 0xb26   : > { %v3384_v28 = vmul.f32 %v3277_v27, %v2634_v24 }
 0xb28   : > { %v10898_v31 = vpop.f32.mrb[90].mxu0  ;;  %11005 = vmatprep.mubr.msk.f32.mxu1 %vm1758_vm4, %v3384_v28 }
 0xb29   : > { %v3387_v32 = vmul.f32 %v10898_v31, %v2637_v29  ;;  %v3287_v33 = vpop.f32.mrb[91].mxu0  ;;  %11006 = vmatmul.mubr.msk.f32.gmra.mrb[78].mxu1 %vm1758_vm4, %v3385_v26 }
 0xb2a   : > { %v3386_v34 = vmul.f32 %v3287_v33, %v2636_v30 }
 0xb2c   : > { %v10901_v37 = vpop.f32.mrb[92].mxu0  ;;  %11008 = vmatprep.mubr.msk.f32.mxu1 %vm1758_vm4, %v3386_v34 }
 0xb2d   : > { %v3389_v39 = vmul.f32 %v10901_v37, %v2639_v35  ;;  %v3297_v40 = vpop.f32.mrb[93].mxu0  ;;  %11009 = vmatmul.mubr.msk.f32.gmra.mrb[80].mxu1 %vm1758_vm4, %v3387_v32 }
 0xb2e   : > { %v3388_v43 = vmul.f32 %v3297_v40, %v2638_v36 }
 0xb30   : > { %v10904_v46 = vpop.f32.mrb[94].mxu0  ;;  %11011 = vmatprep.mubr.msk.f32.mxu1 %vm1758_vm4, %v3388_v43 }
 0xb31   : > { %v3391_v47 = vmul.f32 %v10904_v46, %v2641_v44  ;;  %v3307_v49 = vpop.f32.mrb[95].mxu0  ;;  %11012 = vmatmul.mubr.msk.f32.gmra.mrb[82].mxu1 %vm1758_vm4, %v3389_v39 }
 0xb32   : > { %v3390_v50 = vmul.f32 %v3307_v49, %v2640_v45 }
 0xb34   : > { %v10907_v53 = vpop.f32.mrb[96].mxu0  ;;  %11014 = vmatprep.mubr.msk.f32.mxu1 %vm1758_vm4, %v3390_v50 }
 0xb35   : > { %v3393_v54 = vmul.f32 %v10907_v53, %v2643_v51  ;;  %v3317_v56 = vpop.f32.mrb[97].mxu0  ;;  %11015 = vmatmul.mubr.msk.f32.gmra.mrb[84].mxu1 %vm1758_vm4, %v3391_v47 }
 0xb36   : > { %v3392_v57 = vmul.f32 %v3317_v56, %v2642_v52 }
 0xb38   : > { %11017 = vmatprep.mubr.msk.f32.mxu1 %vm1758_vm4, %v3392_v57 }
 0xb39   : > { %11018 = vmatmul.mubr.msk.f32.gmra.mrb[86].mxu1 %vm1758_vm4, %v3393_v54 }
 0xb87   : > { %v14810_v58 = vpop.f32.mrb[20].mxu1 }
 0xb88   : > { %v14812_v59 = vpop.f32.mrb[21].mxu1  ;;  %v4031_v60 = vsel %vm2712_vm8, %v14810_v58, -inf }
 0xb89   : > { %4032 = vmax.xlane.f32.xlu0 %v4031_v60  ;;  %v4028_v61 = vsel %vm2712_vm8, %v14812_v59, -inf }
 0xb8a   : > { %4029 = vmax.xlane.f32.xlu1 %v4028_v61 }
 0xb8b   : > { %v14818_v63 = vpop.f32.mrb[22].mxu1 }
 0xb8c   : > { %v14820_v2 = vpop.f32.mrb[23].mxu1  ;;  %v4037_v4 = vsel %vm2712_vm8, %v14818_v63, -inf }
 0xb8d   : > { %v4034_v5 = vsel %vm2712_vm8, %v14820_v2, -inf }
 0xb8e   : > { %4038 = vmax.xlane.f32.xlu1 %v4037_v4  ;;  %4035 = vmax.xlane.f32.xlu0 %v4034_v5 }
 0xb8f   : > { %v14826_v6 = vpop.f32.mrb[24].mxu1 }
 0xb90   : > { %v14828_v7 = vpop.f32.mrb[25].mxu1  ;;  %v4043_v8 = vsel %vm2712_vm8, %v14826_v6, -inf }
 0xb91   : > { %v4040_v9 = vsel %vm2712_vm8, %v14828_v7, -inf }
 0xb92   : > { %4044 = vmax.xlane.f32.xlu1 %v4043_v8  ;;  %4041 = vmax.xlane.f32.xlu0 %v4040_v9 }
 0xb93   : > { %v14834_v10 = vpop.f32.mrb[26].mxu1 }
 0xb94   : > { %v14836_v11 = vpop.f32.mrb[27].mxu1  ;;  %v4049_v12 = vsel %vm2712_vm8, %v14834_v10, -inf }
 0xb95   : > { %v4046_v13 = vsel %vm2712_vm8, %v14836_v11, -inf }
 0xb96   : > { %4050 = vmax.xlane.f32.xlu1 %v4049_v12  ;;  %4047 = vmax.xlane.f32.xlu0 %v4046_v13 }
 0xb97   : > { %v14842_v14 = vpop.f32.mrb[28].mxu1 }
 0xb98   : > { %v14844_v15 = vpop.f32.mrb[29].mxu1  ;;  %v4055_v16 = vsel %vm2712_vm8, %v14842_v14, -inf }
 0xb99   : > { %v4052_v17 = vsel %vm2712_vm8, %v14844_v15, -inf }
 0xb9a   : > { %4056 = vmax.xlane.f32.xlu1 %v4055_v16  ;;  %4053 = vmax.xlane.f32.xlu0 %v4052_v17 }
 0xb9b   : > { %v14850_v18 = vpop.f32.mrb[30].mxu1 }
 0xb9c   : > { %v14852_v19 = vpop.f32.mrb[31].mxu1  ;;  %v4061_v20 = vsel %vm2712_vm8, %v14850_v18, -inf }
 0xb9d   : > { %v4058_v23 = vsel %vm2712_vm8, %v14852_v19, -inf }
 0xb9e   : > { %4062 = vmax.xlane.f32.xlu1 %v4061_v20 }
 0xb9f   : > { %v14856_v21 = vpop.f32.mrb[32].mxu1 }
 0xba0   : > { %v14858_v22 = vpop.f32.mrb[33].mxu1  ;;  %v4067_v27 = vsel %vm2712_vm8, %v14856_v21, -inf }
 0xba1   : > { %v4064_v24 = vsel %vm2712_vm8, %v14858_v22, -inf }
 0xba2   : > { %4059 = vmax.xlane.f32.xlu1 %v4058_v23  ;;  %4065 = vmax.xlane.f32.xlu0 %v4064_v24 }
 0xba3   : > { %v14864_v25 = vpop.f32.mrb[34].mxu1 }
 0xba4   : > { %v14866_v26 = vpop.f32.mrb[35].mxu1  ;;  %v4073_v31 = vsel %vm2712_vm8, %v14864_v25, -inf }
 0xba5   : > { %v4070_v28 = vsel %vm2712_vm8, %v14866_v26, -inf }
 0xba6   : > { %4068 = vmax.xlane.f32.xlu1 %v4067_v27  ;;  %4071 = vmax.xlane.f32.xlu0 %v4070_v28 }
 0xba7   : > { %v14872_v29 = vpop.f32.mrb[36].mxu1 }
 0xba8   : > { %v14874_v30 = vpop.f32.mrb[37].mxu1  ;;  %v4079_v32 = vsel %vm2712_vm8, %v14872_v29, -inf }
 0xba9   : > { %v4076_v35 = vsel %vm2712_vm8, %v14874_v30, -inf }
 0xbaa   : > { %4074 = vmax.xlane.f32.xlu1 %v4073_v31 }
 0xbab   : > { %v14880_v33 = vpop.f32.mrb[38].mxu1 }
 0xbac   : > { %v14882_v34 = vpop.f32.mrb[39].mxu1  ;;  %v4085_v39 = vsel %vm2712_vm8, %v14880_v33, -inf }
 0xbad   : > { %v4082_v44 = vsel %vm2712_vm8, %v14882_v34, -inf }
 0xbae   : > { %4080 = vmax.xlane.f32.xlu1 %v4079_v32 }
 0xbaf   : > { %v14886_v36 = vpop.f32.mrb[40].mxu1 }
 0xbb0   : > { %v14888_v37 = vpop.f32.mrb[41].mxu1  ;;  %v4091_v47 = vsel %vm2712_vm8, %v14886_v36, -inf }
 0xbb1   : > { %v4088_v28 = vsel %vm2712_vm8, %v14888_v37, -inf }
 0xbb2   : > { %4077 = vmax.xlane.f32.xlu1 %v4076_v35 }
 0xbb3   : > { %v14892_v40 = vpop.f32.mrb[42].mxu1 }
 0xbb4   : > { %v14894_v43 = vpop.f32.mrb[43].mxu1  ;;  %v4097_v51 = vsel %vm2712_vm8, %v14892_v40, -inf }
 0xbb5   : > { %v4094_v54 = vsel %vm2712_vm8, %v14894_v43, -inf }
 0xbb6   : > { %4086 = vmax.xlane.f32.xlu1 %v4085_v39 }
 0xbb7   : > { %v14898_v45 = vpop.f32.mrb[44].mxu1 }
 0xbb8   : > { %v14900_v46 = vpop.f32.mrb[45].mxu1 }
 0xbb9   : > { %v4100_v4 = vsel %vm2712_vm8, %v14900_v46, -inf }
 0xbba   : > { %4083 = vmax.xlane.f32.xlu1 %v4082_v44 }
 0xbbb   : > { %v14904_v49 = vpop.f32.mrb[46].mxu1 }
 0xbbc   : > { %4784 = vrot.lane.b32.xlu0 %v14514_v38, %s16766_s10  ;;  %v14908_v50 = vpop.f32.mrb[47].mxu1  ;;  %v4103_v38 = vsel %vm2712_vm8, %v14898_v45, -inf  ;;  %v4109_v16 = vsel %vm2712_vm8, %v14904_v49, -inf }
 0xbbd   : > { %v4106_v9 = vsel %vm2712_vm8, %v14908_v50, -inf }
 0xbbe   : > { %4092 = vmax.xlane.f32.xlu1 %v4091_v47 }
 0xbbf   : > { %v14912_v52 = vpop.f32.mrb[48].mxu1 }
 0xbc0   : > { %v14914_v53 = vpop.f32.mrb[49].mxu1  ;;  %v4115_v23 = vsel %vm2712_vm8, %v14912_v52, -inf }
 0xbc1   : > { %v4112_v35 = vsel %vm2712_vm8, %v14914_v53, -inf }
 0xbc2   : > { %4098 = vmax.xlane.f32.xlu1 %v4097_v51 }
 0xbc3   : > { %v14918_v56 = vpop.f32.mrb[50].mxu1 }
 0xbc4   : > { %v14920_v57 = vpop.f32.mrb[51].mxu1  ;;  %v4121_v31 = vsel %vm2712_vm8, %v14918_v56, -inf }
 0xbc5   : > { %v4118_v51 = vsel %vm2712_vm8, %v14920_v57, -inf }
 0xbc6   : > { %4095 = vmax.xlane.f32.xlu1 %v4094_v54 }
 0xbc7   : > { %v14924_v60 = vpop.f32.mrb[52].mxu1 }
 0xbc8   : > { %v14926_v61 = vpop.f32.mrb[53].mxu1  ;;  %v4127_v44 = vsel %vm2712_vm8, %v14924_v60, -inf }
 0xbca   : > { %4104 = vmax.xlane.f32.xlu1 %v4103_v38 }
 0xbcb   : > { %v14930_v5 = vpop.f32.mrb[54].mxu1 }
 0xbcc   : > { %v14932_v8 = vpop.f32.mrb[55].mxu1  ;;  %v4133_v38 = vsel %vm2712_vm8, %v14930_v5, -inf }
 0xbce   : > { %4101 = vmax.xlane.f32.xlu1 %v4100_v4 }
 0xbcf   : > { %v14936_v12 = vpop.f32.mrb[56].mxu1 }
 0xbd0   : > { %v14938_v13 = vpop.f32.mrb[57].mxu1 }
 0xbd2   : > { %4107 = vmax.xlane.f32.xlu1 %v4106_v9  ;;  %v4124_v9 = vsel %vm2712_vm8, %v14926_v61, -inf }
 0xbd3   : > { %v14942_v17 = vpop.f32.mrb[58].mxu1 }
 0xbd4   : > { %v14944_v20 = vpop.f32.mrb[59].mxu1 }
 0xbd6   : > { %4110 = vmax.xlane.f32.xlu1 %v4109_v16 }
 0xbd7   : > { %v14948_v24 = vpop.f32.mrb[60].mxu1 }
 0xbd8   : > { %v14950_v27 = vpop.f32.mrb[61].mxu1  ;;  %v4151_v1 = vsel %vm2712_vm8, %v14948_v24, -inf }
 0xbd9   : > { %16864 = vst [vmem:[#allocation88_spill] sm:$0xff] %v14950_v27 }
 0xbda   : > { %4116 = vmax.xlane.f32.xlu1 %v4115_v23  ;;  %v4139_v23 = vsel %vm2712_vm8, %v14936_v12, -inf }
 0xbdb   : > { %4089 = vmax.xlane.f32.xlu0 %v4088_v28  ;;  %v14956_v32 = vpop.f32.mrb[62].mxu1 }
 0xbdc   : > { %v14960_v39 = vpop.f32.mrb[63].mxu1  ;;  %v4157_v42 = vsel %vm2712_vm8, %v14956_v32, -inf }
 0xbdd   : > { %16865 = vst [vmem:[#allocation89_spill] sm:$0xff] %v14960_v39 }
 0xbde   : > { %4122 = vmax.xlane.f32.xlu1 %v4121_v31  ;;  %v4130_v31 = vsel %vm2712_vm8, %v14932_v8, -inf }
 0xbdf   : > { %4113 = vmax.xlane.f32.xlu0 %v4112_v35  ;;  %v14964_v47 = vpop.f32.mrb[64].mxu1 }
 0xbe0   : > { %v14968_v54 = vpop.f32.mrb[65].mxu1  ;;  %v4163_v62 = vsel %vm2712_vm8, %v14964_v47, -inf }
 0xbe1   : > { %16866 = vst [vmem:[#allocation90_spill] sm:$0xff] %v14968_v54  ;;  %v4160_v41 = vsel %vm2712_vm8, %v14968_v54, -inf }
 0xbe2   : > { %4128 = vmax.xlane.f32.xlu1 %v4127_v44  ;;  %v4145_v44 = vsel %vm2712_vm8, %v14942_v17, -inf }
 0xbe3   : > { %4119 = vmax.xlane.f32.xlu0 %v4118_v51  ;;  %v14972_v4 = vpop.f32.mrb[66].mxu1 }
 0xbe4   : > { %16867 = vst [vmem:[#allocation91_spill] sm:$0xff] %v14972_v4  ;;  %v14976_v16 = vpop.f32.mrb[67].mxu1  ;;  %v4169_v48 = vsel %vm2712_vm8, %v14972_v4, -inf }
 0xbe5   : > { %16868 = vst [vmem:[#allocation92_spill] sm:$0xff] %v14976_v16 }
 0xbe6   : > { %4134 = vmax.xlane.f32.xlu1 %v4133_v38  ;;  %v4136_v38 = vsel %vm2712_vm8, %v14938_v13, -inf }
 0xbe7   : > { %4125 = vmax.xlane.f32.xlu0 %v4124_v9  ;;  %v14980_v28 = vpop.f32.mrb[68].mxu1 }
 0xbe8   : > { %16869 = vst [vmem:[#allocation93_spill] sm:$0xff] %v14980_v28  ;;  %v14984_v35 = vpop.f32.mrb[69].mxu1 }
 0xbe9   : > { %16870 = vst [vmem:[#allocation94_spill] sm:$0xff] %v14984_v35  ;;  %v4172_v54 = vsel %vm2712_vm8, %v14984_v35, -inf }
 0xbea   : > { %4140 = vmax.xlane.f32.xlu1 %v4139_v23  ;;  %v4142_v23 = vsel %vm2712_vm8, %v14944_v20, -inf }
 0xbeb   : > { %4131 = vmax.xlane.f32.xlu0 %v4130_v31  ;;  %v14988_v51 = vpop.f32.mrb[70].mxu1 }
 0xbec   : > { %16871 = vst [vmem:[#allocation95_spill] sm:$0xff] %v14988_v51  ;;  %v14992_v9 = vpop.f32.mrb[71].mxu1  ;;  %v4181_v4 = vsel %vm2712_vm8, %v14988_v51, -inf }
 0xbed   : > { %16872 = vst [vmem:[#allocation96_spill] sm:$0xff] %v14992_v9 }
 0xbee   : > { %4146 = vmax.xlane.f32.xlu1 %v4145_v44  ;;  %v4148_v44 = vsel %vm2712_vm8, %v14950_v27, -inf  ;;  %v4175_v27 = vsel %vm2712_vm8, %v14980_v28, -inf  ;;  %v4178_v28 = vsel %vm2712_vm8, %v14992_v9, -inf }
 0xbef   : > { %4137 = vmax.xlane.f32.xlu0 %v4136_v38  ;;  %v14996_v0 = vpop.f32.mrb[72].mxu1 }
 0xbf0   : > { %16873 = vst [vmem:[#allocation97_spill] sm:$0xff] %v14996_v0  ;;  %v15000_v31 = vpop.f32.mrb[73].mxu1 }
 0xbf1   : > { %16874 = vst [vmem:[#allocation98_spill] sm:$0xff] %v15000_v31  ;;  %v4184_v51 = vsel %vm2712_vm8, %v15000_v31, -inf }
 0xbf2   : > { %4152 = vmax.xlane.f32.xlu1 %v4151_v1  ;;  %v4154_v1 = vsel %vm2712_vm8, %v14960_v39, -inf  ;;  %v4166_v39 = vsel %vm2712_vm8, %v14976_v16, -inf  ;;  %v4187_v16 = vsel %vm2712_vm8, %v14996_v0, -inf }
 0xbf3   : > { %4143 = vmax.xlane.f32.xlu0 %v4142_v23  ;;  %v15004_v3 = vpop.f32.mrb[74].mxu1 }
 0xbf4   : > { %16875 = vst [vmem:[#allocation99_spill] sm:$0xff] %v15004_v3  ;;  %v15008_v38 = vpop.f32.mrb[75].mxu1  ;;  %v4193_v35 = vsel %vm2712_vm8, %v15004_v3, -inf }
 0xbf5   : > { %16876 = vst [vmem:[#allocation100_spill] sm:$0xff] %v15008_v38  ;;  %v4190_v0 = vsel %vm2712_vm8, %v15008_v38, -inf }
 0xbf6   : > { %4158 = vmax.xlane.f32.xlu1 %v4157_v42 }
 0xbf7   : > { %4149 = vmax.xlane.f32.xlu0 %v4148_v44  ;;  %v15012_v55 = vpop.f32.mrb[76].mxu1 }
 0xbf8   : > { %16877 = vst [vmem:[#allocation101_spill] sm:$0xff] %v15012_v55  ;;  %v15016_v23 = vpop.f32.mrb[77].mxu1  ;;  %v4199_v9 = vsel %vm2712_vm8, %v15012_v55, -inf }
 0xbf9   : > { %16878 = vst [vmem:[#allocation102_spill] sm:$0xff] %v15016_v23 }
 0xbfa   : > { %4164 = vmax.xlane.f32.xlu1 %v4163_v62 }
 0xbfb   : > { %4155 = vmax.xlane.f32.xlu0 %v4154_v1 }
 0xbfc   : > { %v15022_v42 = vpop.f32.mrb[78].mxu1 }
 0xbfd   : > { %16879 = vst [vmem:[#allocation103_spill] sm:$0xff] %v15022_v42  ;;  %v15024_v44 = vpop.f32.mrb[79].mxu1 }
 0xbfe   : > { %4170 = vmax.xlane.f32.xlu1 %v4169_v48 }
 0xbff   : > { %4161 = vmax.xlane.f32.xlu0 %v4160_v41 }
 0xc00   : > { %v15030_v62 = vpop.f32.mrb[80].mxu1 }
 0xc01   : > { %v15032_v1 = vpop.f32.mrb[81].mxu1 }
 0xc02   : > { %4176 = vmax.xlane.f32.xlu1 %v4175_v27 }
 0xc03   : > { %4167 = vmax.xlane.f32.xlu0 %v4166_v39 }
 0xc04   : > { %v15038_v48 = vpop.f32.mrb[82].mxu1 }
 0xc05   : > { %v15040_v41 = vpop.f32.mrb[83].mxu1 }
 0xc06   : > { %4182 = vmax.xlane.f32.xlu1 %v4181_v4 }
 0xc07   : > { %4173 = vmax.xlane.f32.xlu0 %v4172_v54 }
 0xc08   : > { %v15046_v27 = vpop.f32.mrb[84].mxu1 }
 0xc09   : > { %v15048_v39 = vpop.f32.mrb[85].mxu1 }
 0xc0a   : > { %4188 = vmax.xlane.f32.xlu1 %v4187_v16  ;;  %v4205_v16 = vsel %vm2712_vm8, %v15022_v42, -inf }
 0xc0b   : > { %4179 = vmax.xlane.f32.xlu0 %v4178_v28  ;;  %v4196_v28 = vsel %vm2712_vm8, %v15016_v23, -inf }
 0xc0c   : > { %v15054_v4 = vpop.f32.mrb[86].mxu1 }
 0xc0d   : > { %v15056_v54 = vpop.f32.mrb[87].mxu1 }
 0xc0e   : > { %4194 = vmax.xlane.f32.xlu1 %v4193_v35 }
 0xc0f   : > { %4185 = vmax.xlane.f32.xlu0 %v4184_v51  ;;  %v4211_v51 = vsel %vm2712_vm8, %v15030_v62, -inf }
 0xc12   : > { %4200 = vmax.xlane.f32.xlu1 %v4199_v9 }
 0xc13   : > { %4191 = vmax.xlane.f32.xlu0 %v4190_v0  ;;  %v4202_v0 = vsel %vm2712_vm8, %v15024_v44, -inf }
 0xc16   : > { %v4033_v31 = vpop.xlane.xlu0 %4032  ;;  %4206 = vmax.xlane.f32.xlu1 %v4205_v16  ;;  %v4208_v16 = vsel %vm2712_vm8, %v15032_v1, -inf }
 0xc17   : > { %v4233_v3 = vsub.f32 %v14810_v58, %v4033_v31  ;;  %v4030_v35 = vpop.xlane.xlu1 %4029  ;;  %4197 = vmax.xlane.f32.xlu0 %v4196_v28  ;;  %v4217_v58 = vsel %vm2712_vm8, %v15038_v48, -inf }
 0xc18   : > { %v4232_v55 = vsub.f32 %v14812_v59, %v4030_v35  ;;  %v4223_v35 = vsel %vm2712_vm8, %v15046_v27, -inf }
 0xc19   : > { %v4302_v9 = vmul.f32 1.442695, %v4233_v3 }
 0xc1a   : > { %v4300_v38 = vmul.f32 1.442695, %v4232_v55  ;;  %4212 = vmax.xlane.f32.xlu1 %v4211_v51 }
 0xc1b   : > { %12338 = vpow2.f32 %v4302_v9  ;;  %v4039_v42 = vpop.xlane.xlu1 %4038  ;;  %v4036_v23 = vpop.xlane.xlu0 %4035  ;;  %4203 = vmax.xlane.f32.xlu0 %v4202_v0  ;;  %v4229_v9 = vsel %vm2712_vm8, %v15054_v4, -inf }
 0xc1c   : > { %12340 = vpow2.f32 %v4300_v38  ;;  %v4235_v31 = vsub.f32 %v14818_v63, %v4039_v42  ;;  %v4234_v59 = vsub.f32 %v14820_v2, %v4036_v23  ;;  %v4214_v38 = vsel %vm2712_vm8, %v15040_v41, -inf }
 0xc1e   : > { %v4306_v28 = vmul.f32 1.442695, %v4235_v31  ;;  %4218 = vmax.xlane.f32.xlu1 %v4217_v58  ;;  %v4304_v63 = vmul.f32 1.442695, %v4234_v59 }
 0xc1f   : > { %v4045_v3 = vpop.xlane.xlu1 %4044  ;;  %v4042_v55 = vpop.xlane.xlu0 %4041  ;;  %4209 = vmax.xlane.f32.xlu0 %v4208_v16 }
 0xc20   : > { %12342 = vpow2.f32 %v4306_v28  ;;  %v4237_v51 = vsub.f32 %v14826_v6, %v4045_v3  ;;  %v4236_v42 = vsub.f32 %v14828_v7, %v4042_v55  ;;  %v4220_v6 = vsel %vm2712_vm8, %v15048_v39, -inf }
 0xc22   : > { %v4310_v0 = vmul.f32 1.442695, %v4237_v51  ;;  %4224 = vmax.xlane.f32.xlu1 %v4223_v35  ;;  %v4308_v16 = vmul.f32 1.442695, %v4236_v42  ;;  %v4226_v35 = vsel %vm2712_vm8, %v15056_v54, -inf }
 0xc23   : > { %v4051_v2 = vpop.xlane.xlu1 %4050  ;;  %v4048_v23 = vpop.xlane.xlu0 %4047  ;;  %4215 = vmax.xlane.f32.xlu0 %v4214_v38 }
 0xc24   : > { %12344 = vpow2.f32 %v4310_v0  ;;  %v4239_v58 = vsub.f32 %v14834_v10, %v4051_v2  ;;  %v4238_v7 = vsub.f32 %v14836_v11, %v4048_v23 }
 0xc25   : > { %v15089_v31 = vpop.eup %12338  ;;  %12346 = vpow2.f32 %v4304_v63 }
 0xc26   : > { %v12341_v59 = vpop.eup %12340  ;;  %v4314_v28 = vmul.f32 1.442695, %v4239_v58  ;;  %4230 = vmax.xlane.f32.xlu1 %v4229_v9  ;;  %v4312_v51 = vmul.f32 1.442695, %v4238_v7  ;;  %v4439_v11 = vsel %vm2712_vm8, %v15089_v31, 0.0 }
 0xc27   : > { %11030 = vmatprep.mubr.msk.f32.mxu0 %vm2712_vm8, %v12341_v59  ;;  %v4057_v3 = vpop.xlane.xlu1 %4056  ;;  %v4054_v55 = vpop.xlane.xlu0 %4053  ;;  %4221 = vmax.xlane.f32.xlu0 %v4220_v6  ;;  %v4436_v58 = vsel %vm2712_vm8, %v12341_v59, 0.0 }
 0xc28   : > { %12348 = vpow2.f32 %v4314_v28  ;;  %v4241_v10 = vsub.f32 %v14842_v14, %v4057_v3  ;;  %v4240_v38 = vsub.f32 %v14844_v15, %v4054_v55 }
 0xc29   : > { %12350 = vpow2.f32 %v4308_v16 }
 0xc2a   : > { %v15099_v63 = vpop.eup %12342  ;;  %v4318_v42 = vmul.f32 1.442695, %v4241_v10  ;;  %4440 = vadd.xlane.f32.xlu1 %v4439_v11  ;;  %v4316_v14 = vmul.f32 1.442695, %v4240_v38 }
 0xc2b   : > { %v4063_v0 = vpop.xlane.xlu1 %4062  ;;  %4227 = vmax.xlane.f32.xlu0 %v4226_v35  ;;  %v4445_v23 = vsel %vm2712_vm8, %v15099_v63, 0.0 }
 0xc2c   : > { %12352 = vpow2.f32 %v4318_v42  ;;  %v4243_v2 = vsub.f32 %v14850_v18, %v4063_v0 }
 0xc2d   : > { %12354 = vpow2.f32 %v4312_v51 }
 0xc2e   : > { %v15104_v9 = vpop.eup %12344  ;;  %v4322_v15 = vmul.f32 1.442695, %v4243_v2  ;;  %4446 = vadd.xlane.f32.xlu1 %v4445_v23 }
 0xc2f   : > { %v12347_v6 = vpop.eup %12346  ;;  %v4060_v16 = vpop.xlane.xlu1 %4059  ;;  %4437 = vadd.xlane.f32.xlu0 %v4436_v58  ;;  %v4451_v3 = vsel %vm2712_vm8, %v15104_v9, 0.0 }
 0xc30   : > { %v4066_v7 = vpop.xlane.xlu0 %4065  ;;  %12356 = vpow2.f32 %v4322_v15  ;;  %v4242_v28 = vsub.f32 %v14852_v19, %v4060_v16  ;;  %v4442_v35 = vsel %vm2712_vm8, %v12347_v6, 0.0 }
 0xc31   : > { %12358 = vpow2.f32 %v4316_v14  ;;  %v4244_v18 = vsub.f32 %v14858_v22, %v4066_v7 }
 0xc32   : > { %v15111_v55 = vpop.eup %12348  ;;  %v4320_v10 = vmul.f32 1.442695, %v4242_v28  ;;  %4452 = vadd.xlane.f32.xlu1 %v4451_v3 }
 0xc33   : > { %v12351_v59 = vpop.eup %12350  ;;  %v4069_v51 = vpop.xlane.xlu1 %4068  ;;  %4443 = vadd.xlane.f32.xlu0 %v4442_v35  ;;  %v4324_v19 = vmul.f32 1.442695, %v4244_v18  ;;  %v4457_v22 = vsel %vm2712_vm8, %v15111_v55, 0.0 }
 0xc34   : > { %v4072_v38 = vpop.xlane.xlu0 %4071  ;;  %v4245_v11 = vsub.f32 %v14856_v21, %v4069_v51  ;;  %12360 = vpow2.f32 %v4320_v10  ;;  %v4448_v14 = vsel %vm2712_vm8, %v12351_v59, 0.0 }
 0xc35   : > { %v4246_v42 = vsub.f32 %v14866_v26, %v4072_v38 }
 0xc36   : > { %v15118_v0 = vpop.eup %12352  ;;  %v4326_v2 = vmul.f32 1.442695, %v4245_v11  ;;  %4458 = vadd.xlane.f32.xlu1 %v4457_v22 }
 0xc37   : > { %v12355_v23 = vpop.eup %12354  ;;  %v4075_v15 = vpop.xlane.xlu1 %4074  ;;  %4449 = vadd.xlane.f32.xlu0 %v4448_v14  ;;  %v4328_v26 = vmul.f32 1.442695, %v4246_v42  ;;  %v4463_v16 = vsel %vm2712_vm8, %v15118_v0, 0.0 }
 0xc38   : > { %v4785_v58 = vpop.permute.xlu0 %4784  ;;  %12362 = vpow2.f32 %v4326_v2  ;;  %v4247_v21 = vsub.f32 %v14864_v25, %v4075_v15  ;;  %v4454_v18 = vsel %vm2712_vm8, %v12355_v23, 0.0 }
 0xc39   : > { %11028 = vmatprep.subr.msk.mxu0 %vm2917_vm9, %v4785_v58  ;;  %12364 = vpow2.f32 %v4324_v19 }
 0xc3a   : > { %11029 = vmatpush3.msk.msra.mxu0 %vm2917_vm9, %v4785_v58  ;;  %v12357_v7 = vpop.eup %12356  ;;  %v4330_v28 = vmul.f32 1.442695, %v4247_v21  ;;  %4464 = vadd.xlane.f32.xlu1 %v4463_v16 }
 0xc3b   : > { %11031 = vmatmul.mubr.msk.f32.vlgmr.msra.gmra.mrb[98].mxu0 %vm2712_vm8, %v15089_v31  ;;  %v12359_v3 = vpop.eup %12358  ;;  %v4081_v25 = vpop.xlane.xlu1 %4080  ;;  %4455 = vadd.xlane.f32.xlu0 %v4454_v18  ;;  %v4469_v35 = vsel %vm2712_vm8, %v12357_v7, 0.0 }
 0xc3c   : > { %11033 = vmatprep.mubr.msk.f32.mxu0 %vm2712_vm8, %v12347_v6  ;;  %12366 = vpow2.f32 %v4330_v28  ;;  %v4249_v10 = vsub.f32 %v14872_v29, %v4081_v25  ;;  %v4460_v31 = vsel %vm2712_vm8, %v12359_v3, 0.0 }
 0xc3d   : > { %12368 = vpow2.f32 %v4328_v26 }
 0xc3e   : > { %v4334_v51 = vmul.f32 1.442695, %v4249_v10  ;;  %4470 = vadd.xlane.f32.xlu1 %v4469_v35  ;;  %v12361_v38 = vpop.eup %12360 }
 0xc3f   : > { %11034 = vmatmul.mubr.msk.f32.gmra.mrb[100].mxu0 %vm2712_vm8, %v15099_v63  ;;  %v4078_v11 = vpop.xlane.xlu1 %4077  ;;  %4461 = vadd.xlane.f32.xlu0 %v4460_v31  ;;  %v4466_v42 = vsel %vm2712_vm8, %v12361_v38, 0.0 }
 0xc40   : > { %11036 = vmatprep.mubr.msk.f32.mxu0 %vm2712_vm8, %v12351_v59  ;;  %12370 = vpow2.f32 %v4334_v51  ;;  %v4248_v6 = vsub.f32 %v14874_v30, %v4078_v11 }
 0xc42   : > { %v12363_v19 = vpop.eup %12362  ;;  %v4332_v29 = vmul.f32 1.442695, %v4248_v6 }
 0xc43   : > { %11037 = vmatmul.mubr.msk.f32.gmra.mrb[102].mxu0 %vm2712_vm8, %v15104_v9  ;;  %v12365_v22 = vpop.eup %12364  ;;  %v4087_v63 = vpop.xlane.xlu1 %4086  ;;  %4467 = vadd.xlane.f32.xlu0 %v4466_v42  ;;  %v4475_v2 = vsel %vm2712_vm8, %v12363_v19, 0.0 }
 0xc44   : > { %11039 = vmatprep.mubr.msk.f32.mxu0 %vm2712_vm8, %v12355_v23  ;;  %12372 = vpow2.f32 %v4332_v29  ;;  %v4251_v59 = vsub.f32 %v14880_v33, %v4087_v63  ;;  %4476 = vadd.xlane.f32.xlu1 %v4475_v2  ;;  %v4472_v9 = vsel %vm2712_vm8, %v12365_v22, 0.0 }
 0xc46   : > { %v12367_v14 = vpop.eup %12366  ;;  %v4338_v30 = vmul.f32 1.442695, %v4251_v59 }
 0xc47   : > { %11040 = vmatmul.mubr.msk.f32.gmra.mrb[104].mxu0 %vm2712_vm8, %v15111_v55  ;;  %v12369_v15 = vpop.eup %12368  ;;  %v4084_v58 = vpop.xlane.xlu1 %4083  ;;  %4473 = vadd.xlane.f32.xlu0 %v4472_v9  ;;  %v4481_v23 = vsel %vm2712_vm8, %v12367_v14, 0.0 }
 0xc48   : > { %11042 = vmatprep.mubr.msk.f32.mxu0 %vm2712_vm8, %v12359_v3  ;;  %12374 = vpow2.f32 %v4338_v30  ;;  %v4250_v21 = vsub.f32 %v14882_v34, %v4084_v58  ;;  %4482 = vadd.xlane.f32.xlu1 %v4481_v23  ;;  %v4478_v55 = vsel %vm2712_vm8, %v12369_v15, 0.0 }
 0xc4a   : > { %v12371_v33 = vpop.eup %12370  ;;  %v4336_v26 = vmul.f32 1.442695, %v4250_v21 }
 0xc4b   : > { %11043 = vmatmul.mubr.msk.f32.gmra.mrb[106].mxu0 %vm2712_vm8, %v15118_v0  ;;  %v4093_v16 = vpop.xlane.xlu1 %4092  ;;  %4479 = vadd.xlane.f32.xlu0 %v4478_v55  ;;  %v4487_v28 = vsel %vm2712_vm8, %v12371_v33, 0.0 }
 0xc4c   : > { %11045 = vmatprep.mubr.msk.f32.mxu0 %vm2712_vm8, %v12361_v38  ;;  %12376 = vpow2.f32 %v4336_v26  ;;  %v4253_v18 = vsub.f32 %v14886_v36, %v4093_v16  ;;  %4488 = vadd.xlane.f32.xlu1 %v4487_v28 }
 0xc4e   : > { %v12373_v3 = vpop.eup %12372  ;;  %v4342_v34 = vmul.f32 1.442695, %v4253_v18 }
 0xc4f   : > { %11046 = vmatmul.mubr.msk.f32.gmra.mrb[108].mxu0 %vm2712_vm8, %v12357_v7  ;;  %v4099_v25 = vpop.xlane.xlu1 %4098  ;;  %v4484_v0 = vsel %vm2712_vm8, %v12373_v3, 0.0 }
 0xc50   : > { %11048 = vmatprep.mubr.msk.f32.mxu0 %vm2712_vm8, %v12365_v22  ;;  %12378 = vpow2.f32 %v4342_v34  ;;  %v4255_v10 = vsub.f32 %v14892_v40, %v4099_v25  ;;  %4485 = vadd.xlane.f32.xlu0 %v4484_v0 }
 0xc52   : > { %v12375_v35 = vpop.eup %12374  ;;  %v4346_v51 = vmul.f32 1.442695, %v4255_v10 }
 0xc53   : > { %11049 = vmatmul.mubr.msk.f32.gmra.mrb[110].mxu0 %vm2712_vm8, %v12363_v19  ;;  %v4096_v36 = vpop.xlane.xlu1 %4095  ;;  %v4493_v31 = vsel %vm2712_vm8, %v12375_v35, 0.0 }
 0xc54   : > { %11051 = vmatprep.mubr.msk.f32.mxu0 %vm2712_vm8, %v12369_v15  ;;  %12380 = vpow2.f32 %v4346_v51  ;;  %4494 = vadd.xlane.f32.xlu1 %v4493_v31  ;;  %v4254_v9 = vsub.f32 %v14894_v43, %v4096_v36 }
 0xc56   : > { %v12377_v7 = vpop.eup %12376  ;;  %v4344_v55 = vmul.f32 1.442695, %v4254_v9 }
 0xc57   : > { %11052 = vmatmul.mubr.msk.f32.gmra.mrb[112].mxu0 %vm2712_vm8, %v12367_v14  ;;  %v4105_v38 = vpop.xlane.xlu1 %4104  ;;  %v4490_v40 = vsel %vm2712_vm8, %v12377_v7, 0.0 }
 0xc58   : > { %11054 = vmatprep.mubr.msk.f32.mxu0 %vm2712_vm8, %v12373_v3  ;;  %v4257_v11 = vsub.f32 %v14898_v45, %v4105_v38  ;;  %4491 = vadd.xlane.f32.xlu0 %v4490_v40 }
 0xc5a   : > { %v15166_v6 = vpop.eup %12378  ;;  %v4350_v19 = vmul.f32 1.442695, %v4257_v11 }
 0xc5b   : > { %11055 = vmatmul.mubr.msk.f32.gmra.mrb[114].mxu0 %vm2712_vm8, %v12371_v33  ;;  %v4102_v29 = vpop.xlane.xlu1 %4101  ;;  %v4499_v42 = vsel %vm2712_vm8, %v15166_v6, 0.0 }
 0xc5c   : > { %11057 = vmatprep.mubr.msk.f32.mxu0 %vm2712_vm8, %v12377_v7  ;;  %12382 = vpow2.f32 %v4350_v19  ;;  %4500 = vadd.xlane.f32.xlu1 %v4499_v42 }
 0xc5e   : > { %v15172_v22 = vpop.eup %12380 }
 0xc5f   : > { %11058 = vmatmul.mubr.msk.f32.gmra.mrb[116].mxu0 %vm2712_vm8, %v12375_v35  ;;  %v4108_v63 = vpop.xlane.xlu1 %4107  ;;  %v4505_v45 = vsel %vm2712_vm8, %v15172_v22, 0.0 }
 0xc60   : > { %4506 = vadd.xlane.f32.xlu1 %v4505_v45 }
 0xc63   : > { %v4111_v2 = vpop.xlane.xlu1 %4110 }
 0xc64   : > { %v4259_v59 = vsub.f32 %v14904_v49, %v4111_v2  ;;  %v4256_v49 = vsub.f32 %v14900_v46, %v4102_v29 }
 0xc66   : > { %v15178_v14 = vpop.eup %12382  ;;  %v4354_v30 = vmul.f32 1.442695, %v4259_v59  ;;  %v4348_v34 = vmul.f32 1.442695, %v4256_v49 }
 0xc67   : > { %v4117_v15 = vpop.xlane.xlu1 %4116  ;;  %v4511_v58 = vsel %vm2712_vm8, %v15178_v14, 0.0 }
 0xc68   : > { %12384 = vpow2.f32 %v4354_v30  ;;  %v4261_v23 = vsub.f32 %v14912_v52, %v4117_v15  ;;  %v4090_v21 = vpop.xlane.xlu0 %4089  ;;  %4512 = vadd.xlane.f32.xlu1 %v4511_v58  ;;  %v4258_v52 = vsub.f32 %v14908_v50, %v4108_v63 }
 0xc69   : > { %v4252_v33 = vsub.f32 %v14888_v37, %v4090_v21 }
 0xc6a   : > { %v4358_v26 = vmul.f32 1.442695, %v4261_v23  ;;  %v4352_v35 = vmul.f32 1.442695, %v4258_v52 }
 0xc6b   : > { %v4340_v16 = vmul.f32 1.442695, %v4252_v33  ;;  %v4123_v28 = vpop.xlane.xlu1 %4122 }
 0xc6c   : > { %12386 = vpow2.f32 %v4358_v26  ;;  %v4263_v43 = vsub.f32 %v14918_v56, %v4123_v28  ;;  %v4114_v18 = vpop.xlane.xlu0 %4113 }
 0xc6d   : > { %12388 = vpow2.f32 %v4340_v16  ;;  %v4260_v51 = vsub.f32 %v14914_v53, %v4114_v18 }
 0xc6e   : > { %v4362_v3 = vmul.f32 1.442695, %v4263_v43  ;;  %12390 = vpow2.f32 %v4344_v55 }
 0xc6f   : > { %v4129_v25 = vpop.xlane.xlu1 %4128  ;;  %v4356_v40 = vmul.f32 1.442695, %v4260_v51 }
 0xc70   : > { %12392 = vpow2.f32 %v4362_v3  ;;  %v4265_v37 = vsub.f32 %v14924_v60, %v4129_v25  ;;  %v4120_v0 = vpop.xlane.xlu0 %4119 }
 0xc71   : > { %12394 = vpow2.f32 %v4348_v34  ;;  %v4262_v11 = vsub.f32 %v14920_v57, %v4120_v0 }
 0xc72   : > { %v15189_v10 = vpop.eup %12384  ;;  %v4366_v46 = vmul.f32 1.442695, %v4265_v37 }
 0xc73   : > { %v4135_v56 = vpop.xlane.xlu1 %4134  ;;  %v4517_v36 = vsel %vm2712_vm8, %v15189_v10, 0.0  ;;  %v4360_v2 = vmul.f32 1.442695, %v4262_v11 }
 0xc74   : > { %12396 = vpow2.f32 %v4366_v46  ;;  %v4267_v31 = vsub.f32 %v14930_v5, %v4135_v56  ;;  %v4126_v50 = vpop.xlane.xlu0 %4125  ;;  %4518 = vadd.xlane.f32.xlu1 %v4517_v36 }
 0xc75   : > { %12398 = vpow2.f32 %v4352_v35 }
 0xc76   : > { %v15195_v7 = vpop.eup %12386  ;;  %v4370_v60 = vmul.f32 1.442695, %v4267_v31 }
 0xc77   : > { %v12389_v38 = vpop.eup %12388  ;;  %v4141_v19 = vpop.xlane.xlu1 %4140  ;;  %v4523_v53 = vsel %vm2712_vm8, %v15195_v7, 0.0 }
 0xc78   : > { %12400 = vpow2.f32 %v4370_v60  ;;  %v4269_v29 = vsub.f32 %v14936_v12, %v4141_v19  ;;  %11060 = vmatprep.mubr.msk.f32.mxu0 %vm2712_vm8, %v12389_v38  ;;  %v4132_v5 = vpop.xlane.xlu0 %4131  ;;  %4524 = vadd.xlane.f32.xlu1 %v4523_v53  ;;  %v4496_v42 = vsel %vm2712_vm8, %v12389_v38, 0.0  ;;  %v12391_v63 = vpop.eup %12390  ;;  %v4264_v12 = vsub.f32 %v14926_v61, %v4126_v50  ;;  %v16880_v60 = vld [vmem:[#allocation88_spill] sm:$0xff] }
 0xc79   : > { %11061 = vmatmul.mubr.msk.f32.gmra.mrb[118].mxu0 %vm2712_vm8, %v15166_v6  ;;  %4497 = vadd.xlane.f32.xlu0 %v4496_v42  ;;  %12402 = vpow2.f32 %v4356_v40  ;;  %v4502_v6 = vsel %vm2712_vm8, %v12391_v63, 0.0  ;;  %v4266_v33 = vsub.f32 %v14932_v8, %v4132_v5  ;;  %v16881_v5 = vld [vmem:[#allocation89_spill] sm:$0xff] }
 0xc7a   : > { %v15205_v45 = vpop.eup %12392  ;;  %v4374_v57 = vmul.f32 1.442695, %v4269_v29  ;;  %11063 = vmatprep.mubr.msk.f32.mxu0 %vm2712_vm8, %v12391_v63  ;;  %v4364_v61 = vmul.f32 1.442695, %v4264_v12 }
 0xc7b   : > { %v4147_v59 = vpop.xlane.xlu1 %4146  ;;  %v4529_v30 = vsel %vm2712_vm8, %v15205_v45, 0.0  ;;  %v12395_v58 = vpop.eup %12394  ;;  %v4368_v8 = vmul.f32 1.442695, %v4266_v33 }
 0xc7c   : > { %12404 = vpow2.f32 %v4374_v57  ;;  %v4271_v9 = vsub.f32 %v14942_v17, %v4147_v59  ;;  %v4138_v15 = vpop.xlane.xlu0 %4137  ;;  %4530 = vadd.xlane.f32.xlu1 %v4529_v30 }
 0xc7d   : > { %11064 = vmatmul.mubr.msk.f32.gmra.mrb[120].mxu0 %vm2712_vm8, %v15172_v22  ;;  %4503 = vadd.xlane.f32.xlu0 %v4502_v6  ;;  %12406 = vpow2.f32 %v4360_v2  ;;  %v4508_v22 = vsel %vm2712_vm8, %v12395_v58, 0.0  ;;  %v4268_v18 = vsub.f32 %v14938_v13, %v4138_v15  ;;  %v16882_v2 = vld [vmem:[#allocation93_spill] sm:$0xff] }
 0xc7e   : > { %v15215_v23 = vpop.eup %12396  ;;  %v4378_v21 = vmul.f32 1.442695, %v4271_v9  ;;  %11066 = vmatprep.mubr.msk.f32.mxu0 %vm2712_vm8, %v12395_v58  ;;  %v16883_v58 = vld [vmem:[#allocation90_spill] sm:$0xff] }
 0xc7f   : > { %v4153_v26 = vpop.xlane.xlu1 %4152  ;;  %v4535_v17 = vsel %vm2712_vm8, %v15215_v23, 0.0  ;;  %v12399_v16 = vpop.eup %12398  ;;  %v4372_v13 = vmul.f32 1.442695, %v4268_v18 }
 0xc80   : > { %12408 = vpow2.f32 %v4378_v21  ;;  %v4273_v55 = vsub.f32 %v14948_v24, %v4153_v26  ;;  %v4144_v49 = vpop.xlane.xlu0 %4143  ;;  %4536 = vadd.xlane.f32.xlu1 %v4535_v17  ;;  %v16884_v26 = vld [vmem:[#allocation95_spill] sm:$0xff] }
 0xc81   : > { %11067 = vmatmul.mubr.msk.f32.gmra.mrb[122].mxu0 %vm2712_vm8, %v15178_v14  ;;  %4509 = vadd.xlane.f32.xlu0 %v4508_v22  ;;  %12410 = vpow2.f32 %v4364_v61  ;;  %v4514_v14 = vsel %vm2712_vm8, %v12399_v16, 0.0  ;;  %v4270_v46 = vsub.f32 %v14944_v20, %v4144_v49 }
 0xc82   : > { %v15225_v28 = vpop.eup %12400  ;;  %v4382_v43 = vmul.f32 1.442695, %v4273_v55  ;;  %11069 = vmatprep.mubr.msk.f32.mxu0 %vm2712_vm8, %v12399_v16  ;;  %v16885_v16 = vld [vmem:[#allocation92_spill] sm:$0xff] }
 0xc83   : > { %v4159_v3 = vpop.xlane.xlu1 %4158  ;;  %v4541_v24 = vsel %vm2712_vm8, %v15225_v28, 0.0  ;;  %v12403_v25 = vpop.eup %12402  ;;  %v4376_v20 = vmul.f32 1.442695, %v4270_v46  ;;  %v16888_v46 = vld [vmem:[#allocation91_spill] sm:$0xff] }
 0xc84   : > { %12412 = vpow2.f32 %v4382_v43  ;;  %v4275_v34 = vsub.f32 %v14956_v32, %v4159_v3  ;;  %v4150_v52 = vpop.xlane.xlu0 %4149  ;;  %4542 = vadd.xlane.f32.xlu1 %v4541_v24  ;;  %v16886_v3 = vld [vmem:[#allocation94_spill] sm:$0xff] }
 0xc85   : > { %11070 = vmatmul.mubr.msk.f32.gmra.mrb[124].mxu0 %vm2712_vm8, %v15189_v10  ;;  %4515 = vadd.xlane.f32.xlu0 %v4514_v14  ;;  %12414 = vpow2.f32 %v4368_v8  ;;  %v4520_v10 = vsel %vm2712_vm8, %v12403_v25, 0.0  ;;  %v4272_v38 = vsub.f32 %v16880_v60, %v4150_v52  ;;  %v16887_v14 = vld [vmem:[#allocation97_spill] sm:$0xff] }
 0xc86   : > { %v15235_v37 = vpop.eup %12404  ;;  %v4386_v0 = vmul.f32 1.442695, %v4275_v34  ;;  %11072 = vmatprep.mubr.msk.f32.mxu0 %vm2712_vm8, %v12403_v25 }
 0xc87   : > { %v4165_v35 = vpop.xlane.xlu1 %4164  ;;  %v4547_v32 = vsel %vm2712_vm8, %v15235_v37, 0.0  ;;  %v12407_v36 = vpop.eup %12406  ;;  %v4380_v29 = vmul.f32 1.442695, %v4272_v38 }
 0xc88   : > { %12416 = vpow2.f32 %v4386_v0  ;;  %v4277_v51 = vsub.f32 %v14964_v47, %v4165_v35  ;;  %v4156_v56 = vpop.xlane.xlu0 %4155  ;;  %4548 = vadd.xlane.f32.xlu1 %v4547_v32 }
 0xc89   : > { %11073 = vmatmul.mubr.msk.f32.gmra.mrb[126].mxu0 %vm2712_vm8, %v15195_v7  ;;  %4521 = vadd.xlane.f32.xlu0 %v4520_v10  ;;  %12418 = vpow2.f32 %v4372_v13  ;;  %v4526_v7 = vsel %vm2712_vm8, %v12407_v36, 0.0  ;;  %v4274_v42 = vsub.f32 %v16881_v5, %v4156_v56  ;;  %v16889_v10 = vld [vmem:[#allocation96_spill] sm:$0xff] }
 0xc8a   : > { %v15245_v31 = vpop.eup %12408  ;;  %v4390_v50 = vmul.f32 1.442695, %v4277_v51  ;;  %11075 = vmatprep.mubr.msk.f32.mxu0 %vm2712_vm8, %v12407_v36 }
 0xc8b   : > { %v15249_v40 = vpop.xlane.xlu1 %4170  ;;  %v4553_v47 = vsel %vm2712_vm8, %v15245_v31, 0.0  ;;  %v12411_v19 = vpop.eup %12410  ;;  %v4384_v6 = vmul.f32 1.442695, %v4274_v42 }
 0xc8c   : > { %12420 = vpow2.f32 %v4390_v50  ;;  %v4162_v11 = vpop.xlane.xlu0 %4161  ;;  %4554 = vadd.xlane.f32.xlu1 %v4553_v47  ;;  %v4532_v30 = vsel %vm2712_vm8, %v12411_v19, 0.0  ;;  %v4279_v35 = vsub.f32 %v16888_v46, %v15249_v40 }
 0xc8d   : > { %11076 = vmatmul.mubr.msk.f32.gmra.mrb[128].mxu0 %vm2712_vm8, %v15205_v45  ;;  %4527 = vadd.xlane.f32.xlu0 %v4526_v7  ;;  %12422 = vpow2.f32 %v4376_v20  ;;  %v4276_v21 = vsub.f32 %v16883_v58, %v4162_v11  ;;  %v16890_v20 = vld [vmem:[#allocation99_spill] sm:$0xff] }
 0xc8e   : > { %v15256_v53 = vpop.eup %12412  ;;  %11078 = vmatprep.mubr.msk.f32.mxu0 %vm2712_vm8, %v12411_v19  ;;  %12424 = vpow2.f32 %v4380_v29  ;;  %v4394_v11 = vmul.f32 1.442695, %v4279_v35  ;;  %v16891_v29 = vld [vmem:[#allocation98_spill] sm:$0xff] }
 0xc8f   : > { %v4177_v63 = vpop.xlane.xlu1 %4176  ;;  %v4559_v57 = vsel %vm2712_vm8, %v15256_v53, 0.0  ;;  %v12415_v45 = vpop.eup %12414  ;;  %v4388_v18 = vmul.f32 1.442695, %v4276_v21 }
 0xc90   : > { %v4281_v12 = vsub.f32 %v16882_v2, %v4177_v63  ;;  %v4168_v59 = vpop.xlane.xlu0 %4167  ;;  %4560 = vadd.xlane.f32.xlu1 %v4559_v57  ;;  %v16892_v57 = vld [vmem:[#allocation101_spill] sm:$0xff] }
 0xc91   : > { %11079 = vmatmul.mubr.msk.f32.gmra.mrb[130].mxu0 %vm2712_vm8, %v15215_v23  ;;  %4533 = vadd.xlane.f32.xlu0 %v4532_v30  ;;  %v4538_v23 = vsel %vm2712_vm8, %v12415_v45, 0.0  ;;  %v4278_v43 = vsub.f32 %v16885_v16, %v4168_v59 }
 0xc92   : > { %v15266_v9 = vpop.eup %12416  ;;  %v4398_v15 = vmul.f32 1.442695, %v4281_v12  ;;  %11081 = vmatprep.mubr.msk.f32.mxu0 %vm2712_vm8, %v12415_v45 }
 0xc93   : > { %v4183_v61 = vpop.xlane.xlu1 %4182  ;;  %v4565_v33 = vsel %vm2712_vm8, %v15266_v9, 0.0  ;;  %v12419_v49 = vpop.eup %12418  ;;  %v4392_v32 = vmul.f32 1.442695, %v4278_v43  ;;  %v16895_v43 = vld [vmem:[#allocation102_spill] sm:$0xff] }
 0xc94   : > { %12426 = vpow2.f32 %v4398_v15  ;;  %v4283_v17 = vsub.f32 %v16884_v26, %v4183_v61  ;;  %v4174_v55 = vpop.xlane.xlu0 %4173  ;;  %4566 = vadd.xlane.f32.xlu1 %v4565_v33  ;;  %v4544_v0 = vsel %vm2712_vm8, %v12419_v49, 0.0  ;;  %v16894_v33 = vld [vmem:[#allocation103_spill] sm:$0xff] }
 0xc95   : > { %11082 = vmatmul.mubr.msk.f32.gmra.mrb[132].mxu0 %vm2712_vm8, %v15225_v28  ;;  %4539 = vadd.xlane.f32.xlu0 %v4538_v23  ;;  %12428 = vpow2.f32 %v4384_v6  ;;  %v4280_v24 = vsub.f32 %v16886_v3, %v4174_v55  ;;  %v16893_v6 = vld [vmem:[#allocation100_spill] sm:$0xff] }
 0xc96   : > { %v15276_v22 = vpop.eup %12420  ;;  %v4402_v8 = vmul.f32 1.442695, %v4283_v17  ;;  %11084 = vmatprep.mubr.msk.f32.mxu0 %vm2712_vm8, %v12419_v49 }
 0xc97   : > { %v4189_v34 = vpop.xlane.xlu1 %4188  ;;  %v4571_v52 = vsel %vm2712_vm8, %v15276_v22, 0.0  ;;  %v12423_v13 = vpop.eup %12422  ;;  %v4396_v56 = vmul.f32 1.442695, %v4280_v24 }
 0xc98   : > { %12430 = vpow2.f32 %v4402_v8  ;;  %v4285_v25 = vsub.f32 %v16887_v14, %v4189_v34  ;;  %v4180_v28 = vpop.xlane.xlu0 %4179  ;;  %4572 = vadd.xlane.f32.xlu1 %v4571_v52  ;;  %v4550_v47 = vsel %vm2712_vm8, %v12423_v13, 0.0 }
 0xc99   : > { %11085 = vmatmul.mubr.msk.f32.gmra.mrb[134].mxu0 %vm2712_vm8, %v15235_v37  ;;  %4545 = vadd.xlane.f32.xlu0 %v4544_v0  ;;  %12432 = vpow2.f32 %v4388_v18  ;;  %v4282_v36 = vsub.f32 %v16889_v10, %v4180_v28  ;;  %v12425_v37 = vpop.eup %12424 }
 0xc9a   : > { %v4406_v51 = vmul.f32 1.442695, %v4285_v25  ;;  %11087 = vmatprep.mubr.msk.f32.mxu0 %vm2712_vm8, %v12423_v13  ;;  %v4556_v12 = vsel %vm2712_vm8, %v12425_v37, 0.0 }
 0xc9b   : > { %v4195_v50 = vpop.xlane.xlu1 %4194  ;;  %v4400_v19 = vmul.f32 1.442695, %v4282_v36 }
 0xc9c   : > { %12434 = vpow2.f32 %v4406_v51  ;;  %v4287_v60 = vsub.f32 %v16890_v20, %v4195_v50  ;;  %v4186_v38 = vpop.xlane.xlu0 %4185 }
 0xc9d   : > { %11088 = vmatmul.mubr.msk.f32.gmra.mrb[136].mxu0 %vm2712_vm8, %v15245_v31  ;;  %4551 = vadd.xlane.f32.xlu0 %v4550_v47  ;;  %12436 = vpow2.f32 %v4392_v32  ;;  %v4284_v5 = vsub.f32 %v16891_v29, %v4186_v38 }
 0xc9e   : > { %v15295_v40 = vpop.eup %12426  ;;  %v4410_v7 = vmul.f32 1.442695, %v4287_v60  ;;  %11090 = vmatprep.mubr.msk.f32.mxu0 %vm2712_vm8, %v12425_v37  ;;  %12438 = vpow2.f32 %v4396_v56 }
 0xc9f   : > { %v4201_v42 = vpop.xlane.xlu1 %4200  ;;  %v4583_v63 = vsel %vm2712_vm8, %v15295_v40, 0.0  ;;  %v12429_v59 = vpop.eup %12428  ;;  %v4404_v15 = vmul.f32 1.442695, %v4284_v5 }
 0xca0   : > { %12440 = vpow2.f32 %v4410_v7  ;;  %v4289_v2 = vsub.f32 %v16892_v57, %v4201_v42  ;;  %v4192_v31 = vpop.xlane.xlu0 %4191  ;;  %4584 = vadd.xlane.f32.xlu1 %v4583_v63 }
 0xca1   : > { %11091 = vmatmul.mubr.msk.f32.gmra.mrb[138].mxu0 %vm2712_vm8, %v15256_v53  ;;  %4557 = vadd.xlane.f32.xlu0 %v4556_v12  ;;  %12442 = vpow2.f32 %v4394_v11  ;;  %v4286_v58 = vsub.f32 %v16893_v6, %v4192_v31  ;;  %v4562_v53 = vsel %vm2712_vm8, %v12429_v59, 0.0 }
 0xca2   : > { %v15305_v30 = vpop.eup %12430  ;;  %v4414_v45 = vmul.f32 1.442695, %v4289_v2  ;;  %11093 = vmatprep.mubr.msk.f32.mxu0 %vm2712_vm8, %v12429_v59  ;;  %12444 = vpow2.f32 %v4400_v19 }
 0xca3   : > { %v4207_v21 = vpop.xlane.xlu1 %4206  ;;  %v4589_v61 = vsel %vm2712_vm8, %v15305_v30, 0.0  ;;  %v12433_v55 = vpop.eup %12432  ;;  %v4408_v16 = vmul.f32 1.442695, %v4286_v58 }
 0xca4   : > { %12446 = vpow2.f32 %v4414_v45  ;;  %v4291_v26 = vsub.f32 %v16894_v33, %v4207_v21  ;;  %v4198_v17 = vpop.xlane.xlu0 %4197  ;;  %4590 = vadd.xlane.f32.xlu1 %v4589_v61  ;;  %v4568_v52 = vsel %vm2712_vm8, %v12433_v55, 0.0 }
 0xca5   : > { %11094 = vmatmul.mubr.msk.f32.gmra.mrb[140].mxu0 %vm2712_vm8, %v15266_v9  ;;  %4563 = vadd.xlane.f32.xlu0 %v4562_v53  ;;  %12448 = vpow2.f32 %v4404_v15  ;;  %v4288_v8 = vsub.f32 %v16895_v43, %v4198_v17 }
 0xca6   : > { %v15315_v23 = vpop.eup %12434  ;;  %v4418_v49 = vmul.f32 1.442695, %v4291_v26  ;;  %11096 = vmatprep.mubr.msk.f32.mxu0 %vm2712_vm8, %v12433_v55 }
 0xca7   : > { %v4213_v18 = vpop.xlane.xlu1 %4212  ;;  %v4595_v3 = vsel %vm2712_vm8, %v15315_v23, 0.0  ;;  %v15321_v24 = vpop.eup %12436  ;;  %v4412_v0 = vmul.f32 1.442695, %v4288_v8 }
 0xca8   : > { %12450 = vpow2.f32 %v4418_v49  ;;  %v4293_v34 = vsub.f32 %v15030_v62, %v4213_v18  ;;  %v4204_v9 = vpop.xlane.xlu0 %4203  ;;  %4596 = vadd.xlane.f32.xlu1 %v4595_v3  ;;  %v12439_v14 = vpop.eup %12438  ;;  %v4574_v18 = vsel %vm2712_vm8, %v15321_v24, 0.0 }
 0xca9   : > { %11097 = vmatmul.mubr.msk.f32.gmra.mrb[142].mxu0 %vm2712_vm8, %v15276_v22  ;;  %4569 = vadd.xlane.f32.xlu0 %v4568_v52  ;;  %12452 = vpow2.f32 %v4408_v16  ;;  %v4290_v13 = vsub.f32 %v15024_v44, %v4204_v9  ;;  %v4580_v51 = vsel %vm2712_vm8, %v12439_v14, 0.0 }
 0xcaa   : > { %v15327_v25 = vpop.eup %12440  ;;  %v4422_v28 = vmul.f32 1.442695, %v4293_v34  ;;  %11099 = vmatprep.mubr.msk.f32.mxu0 %vm2712_vm8, %v15321_v24 }
 0xcab   : > { %v4219_v62 = vpop.xlane.xlu1 %4218  ;;  %v4601_v46 = vsel %vm2712_vm8, %v15327_v25, 0.0  ;;  %v15334_v35 = vpop.eup %12442  ;;  %v4416_v36 = vmul.f32 1.442695, %v4290_v13 }
 0xcac   : > { %12454 = vpow2.f32 %v4422_v28  ;;  %v4295_v22 = vsub.f32 %v15038_v48, %v4219_v62  ;;  %v4210_v32 = vpop.xlane.xlu0 %4209  ;;  %4602 = vadd.xlane.f32.xlu1 %v4601_v46  ;;  %v12445_v56 = vpop.eup %12444  ;;  %v4577_v33 = vsel %vm2712_vm8, %v15334_v35, 0.0 }
 0xcad   : > { %11100 = vmatmul.mubr.msk.f32.gmra.mrb[144].mxu0 %vm2712_vm8, %v15334_v35  ;;  %4581 = vadd.xlane.f32.xlu0 %v4580_v51  ;;  %12456 = vpow2.f32 %v4412_v0  ;;  %v4292_v50 = vsub.f32 %v15032_v1, %v4210_v32  ;;  %v4586_v47 = vsel %vm2712_vm8, %v12445_v56, 0.0 }
 0xcae   : > { %v15340_v10 = vpop.eup %12446  ;;  %v4426_v44 = vmul.f32 1.442695, %v4295_v22  ;;  %11102 = vmatprep.mubr.msk.f32.mxu0 %vm2712_vm8, %v12439_v14 }
 0xcaf   : > { %v4225_v20 = vpop.xlane.xlu1 %4224  ;;  %v4607_v48 = vsel %vm2712_vm8, %v15340_v10, 0.0  ;;  %v12449_v37 = vpop.eup %12448  ;;  %v4420_v1 = vmul.f32 1.442695, %v4292_v50 }
 0xcb0   : > { %12458 = vpow2.f32 %v4426_v44  ;;  %v4297_v60 = vsub.f32 %v15046_v27, %v4225_v20  ;;  %v4216_v38 = vpop.xlane.xlu0 %4215  ;;  %4608 = vadd.xlane.f32.xlu1 %v4607_v48  ;;  %v4592_v42 = vsel %vm2712_vm8, %v12449_v37, 0.0 }
 0xcb1   : > { %11103 = vmatmul.mubr.msk.f32.gmra.mrb[146].mxu0 %vm2712_vm8, %v15295_v40  ;;  %4587 = vadd.xlane.f32.xlu0 %v4586_v47  ;;  %12460 = vpow2.f32 %v4416_v36  ;;  %v4294_v19 = vsub.f32 %v15040_v41, %v4216_v38 }
 0xcb2   : > { %v12451_v11 = vpop.eup %12450  ;;  %v4430_v7 = vmul.f32 1.442695, %v4297_v60  ;;  %11105 = vmatprep.mubr.msk.f32.mxu0 %vm2712_vm8, %v12445_v56 }
 0xcb3   : > { %v4231_v29 = vpop.xlane.xlu1 %4230  ;;  %v4613_v27 = vsel %vm2712_vm8, %v12451_v11, 0.0  ;;  %v12453_v63 = vpop.eup %12452  ;;  %v4424_v41 = vmul.f32 1.442695, %v4294_v19 }
 0xcb4   : > { %v4299_v5 = vsub.f32 %v15054_v4, %v4231_v29  ;;  %4614 = vadd.xlane.f32.xlu1 %v4613_v27  ;;  %12462 = vpow2.f32 %v4430_v7  ;;  %v4222_v2 = vpop.xlane.xlu0 %4221  ;;  %v4598_v4 = vsel %vm2712_vm8, %v12453_v63, 0.0  ;;  %v12756_v29 = vld [vmem:[%s16863_s0 + $0x8] sm:$0xff] }
 0xcb5   : > { %11106 = vmatmul.mubr.msk.f32.gmra.mrb[148].mxu0 %vm2712_vm8, %v15305_v30  ;;  %4593 = vadd.xlane.f32.xlu0 %v4592_v42  ;;  %12464 = vpow2.f32 %v4420_v1  ;;  %v4296_v30 = vsub.f32 %v15048_v39, %v4222_v2  ;;  %v5538_v1 = vld [vmem:[#allocation21 + $0x8] sm:$0xff] }
 0xcb6   : > { %v12455_v40 = vpop.eup %12454  ;;  %v4434_v57 = vmul.f32 1.442695, %v4299_v5  ;;  %11108 = vmatprep.mubr.msk.f32.mxu0 %vm2712_vm8, %v12449_v37  ;;  %5641 = vmatprep.mubr.f32.mxu1 %v5538_v1 }
 0xcb7   : > { %v4619_v31 = vsel %vm2712_vm8, %v12455_v40, 0.0  ;;  %v12457_v12 = vpop.eup %12456  ;;  %v4428_v21 = vmul.f32 1.442695, %v4296_v30  ;;  %v4441_v16 = vpop.xlane.xlu1 %4440 }
 0xcb8   : > { %4620 = vadd.xlane.f32.xlu1 %v4619_v31  ;;  %12466 = vpow2.f32 %v4434_v57  ;;  %v4228_v15 = vpop.xlane.xlu0 %4227  ;;  %v4604_v6 = vsel %vm2712_vm8, %v12457_v12, 0.0 }
 0xcb9   : > { %11109 = vmatmul.mubr.msk.f32.gmra.mrb[150].mxu0 %vm2712_vm8, %v15315_v23  ;;  %4599 = vadd.xlane.f32.xlu0 %v4598_v4  ;;  %12468 = vpow2.f32 %v4424_v41  ;;  %v4298_v61 = vsub.f32 %v15056_v54, %v4228_v15 }
 0xcba   : > { %v12459_v59 = vpop.eup %12458  ;;  %11111 = vmatprep.mubr.msk.f32.mxu0 %vm2712_vm8, %v12453_v63  ;;  %12470 = vpow2.f32 %v4428_v21  ;;  %v12759_v21 = vld [vmem:[%s16863_s0 + $0x10] sm:$0xff] }
 0xcbb   : > { %v4625_v45 = vsel %vm2712_vm8, %v12459_v59, 0.0  ;;  %v12461_v58 = vpop.eup %12460  ;;  %v4432_v53 = vmul.f32 1.442695, %v4298_v61  ;;  %v4447_v34 = vpop.xlane.xlu1 %4446 }
 0xcbc   : > { %4626 = vadd.xlane.f32.xlu1 %v4625_v45  ;;  %v4610_v26 = vsel %vm2712_vm8, %v12461_v58, 0.0  ;;  %v4438_v9 = vpop.xlane.xlu0 %4437 }
 0xcbd   : > { %11112 = vmatmul.mubr.msk.f32.gmra.mrb[152].mxu0 %vm2712_vm8, %v15327_v25  ;;  %4605 = vadd.xlane.f32.xlu0 %v4604_v6  ;;  %12472 = vpow2.f32 %v4432_v53  ;;  %v12760_v53 = vld [vmem:[%s16863_s0 + $0x28] sm:$0xff] }
 0xcbe   : > { %11114 = vmatprep.mubr.msk.f32.mxu0 %vm2712_vm8, %v12457_v12  ;;  %v12463_v39 = vpop.eup %12462  ;;  %12474 = vrcp.f32 %v4441_v16 }
 0xcbf   : > { %v12465_v17 = vpop.eup %12464  ;;  %v4631_v55 = vsel %vm2712_vm8, %v12463_v39, 0.0  ;;  %v4453_v25 = vpop.xlane.xlu1 %4452  ;;  %12476 = vrcp.f32 %v4438_v9 }
 0xcc0   : > { %4578 = vadd.xlane.f32.xlu1 %v4577_v33  ;;  %v4616_v54 = vsel %vm2712_vm8, %v12465_v17, 0.0  ;;  %v4444_v28 = vpop.xlane.xlu0 %4443  ;;  %12478 = vrcp.f32 %v4447_v34 }
 0xcc1   : > { %11115 = vmatmul.mubr.msk.f32.gmra.mrb[154].mxu0 %vm2712_vm8, %v15340_v10  ;;  %4611 = vadd.xlane.f32.xlu0 %v4610_v26  ;;  %12480 = vrcp.f32 %v4444_v28 }
 0xcc2   : > { %11117 = vmatprep.mubr.msk.f32.mxu0 %vm2712_vm8, %v12461_v58  ;;  %v12467_v23 = vpop.eup %12466  ;;  %12482 = vrcp.f32 %v4453_v25 }
 0xcc3   : > { %v12469_v49 = vpop.eup %12468  ;;  %v4637_v43 = vsel %vm2712_vm8, %v12467_v23, 0.0  ;;  %v4459_v0 = vpop.xlane.xlu1 %4458 }
 0xcc4   : > { %4632 = vadd.xlane.f32.xlu1 %v4631_v55  ;;  %v4622_v8 = vsel %vm2712_vm8, %v12469_v49, 0.0  ;;  %v12471_v3 = vpop.eup %12470  ;;  %v4450_v13 = vpop.xlane.xlu0 %4449 }
 0xcc5   : > { %11118 = vmatmul.mubr.msk.f32.gmra.mrb[156].mxu0 %vm2712_vm8, %v12451_v11  ;;  %4617 = vadd.xlane.f32.xlu0 %v4616_v54  ;;  %v4628_v52 = vsel %vm2712_vm8, %v12471_v3, 0.0  ;;  %12484 = vrcp.f32 %v4450_v13 }
 0xcc6   : > { %11120 = vmatprep.mubr.msk.f32.mxu0 %vm2712_vm8, %v12465_v17  ;;  %12486 = vrcp.f32 %v4459_v0 }
 0xcc7   : > { %v12473_v14 = vpop.eup %12472  ;;  %v4465_v62 = vpop.xlane.xlu1 %4464 }
 0xcc8   : > { %4638 = vadd.xlane.f32.xlu1 %v4637_v43  ;;  %v4634_v24 = vsel %vm2712_vm8, %v12473_v14, 0.0  ;;  %v4456_v46 = vpop.xlane.xlu0 %4455  ;;  %v12475_v63 = vpop.eup %12474 }
 0xcc9   : > { %11121 = vmatmul.mubr.msk.f32.gmra.mrb[158].mxu0 %vm2712_vm8, %v12455_v40  ;;  %4623 = vadd.xlane.f32.xlu0 %v4622_v8  ;;  %v12757_v40 = vld [vmem:[%s16863_s0] sm:$0xff]  ;;  %v12477_v2 = vpop.eup %12476  ;;  %12488 = vrcp.f32 %v4456_v46 }
 0xcca   : > { %11123 = vmatprep.mubr.msk.f32.mxu0 %vm2712_vm8, %v12469_v49  ;;  %v12479_v6 = vpop.eup %12478  ;;  %12490 = vrcp.f32 %v4465_v62  ;;  %v12761_v8 = vld [vmem:[%s16863_s0 + $0x20] sm:$0xff]  ;;  %v12763_v62 = vld [vmem:[%s16863_s0 + $0x30] sm:$0xff] }
 0xccb   : > { %v15393_v35 = vpop.xlane.xlu1 %4470  ;;  %v12481_v33 = vpop.eup %12480 }
 0xccc   : > { %v4462_v22 = vpop.xlane.xlu0 %4461  ;;  %v12483_v49 = vpop.eup %12482 }
 0xccd   : > { %11124 = vmatmul.mubr.msk.f32.gmra.mrb[160].mxu0 %vm2712_vm8, %v12459_v59  ;;  %4575 = vadd.xlane.f32.xlu0 %v4574_v18  ;;  %v12758_v59 = vld [vmem:[%s16863_s0 + $0x18] sm:$0xff]  ;;  %12492 = vrcp.f32 %v4462_v22 }
 0xcce   : > { %11126 = vmatprep.mubr.msk.f32.mxu0 %vm2712_vm8, %v12471_v3  ;;  %12494 = vrcp.f32 %v15393_v35 }
 0xccf   : > { %v12485_v3 = vpop.eup %12484 }
 0xcd0   : > { %v15397_v51 = vpop.xlane.xlu0 %4467  ;;  %v12487_v0 = vpop.eup %12486 }
 0xcd1   : > { %11127 = vmatmul.mubr.msk.f32.gmra.mrb[162].mxu0 %vm2712_vm8, %v12463_v39  ;;  %4629 = vadd.xlane.f32.xlu0 %v4628_v52  ;;  %v15395_v32 = vpop.xlane.xlu1 %4476  ;;  %12496 = vrcp.f32 %v15397_v51 }
 0xcd2   : > { %11129 = vmatprep.mubr.msk.f32.mxu0 %vm2712_vm8, %v12473_v14  ;;  %v12762_v14 = vld [vmem:[%s16863_s0 + $0x38] sm:$0xff]  ;;  %12498 = vrcp.f32 %v15395_v32 }
 0xcd3   : > { %v12489_v22 = vpop.eup %12488 }
 0xcd4   : > { %v15401_v10 = vpop.xlane.xlu0 %4473 }
 0xcd5   : > { %11130 = vmatmul.mubr.msk.f32.gmra.mrb[164].mxu0 %vm2712_vm8, %v12467_v23  ;;  %4635 = vadd.xlane.f32.xlu0 %v4634_v24  ;;  %v15399_v56 = vpop.xlane.xlu1 %4482  ;;  %12500 = vrcp.f32 %v15401_v10 }
 0xcd6   : > { %12502 = vrcp.f32 %v15399_v56 }
 0xcd8   : > { %v15405_v36 = vpop.xlane.xlu0 %4479 }
 0xcd9   : > { %v15403_v44 = vpop.xlane.xlu1 %4488  ;;  %12504 = vrcp.f32 %v15405_v36 }
 0xcda   : > { %12506 = vrcp.f32 %v15403_v44 }
 0xcdd   : > { %v15411_v48 = vpop.xlane.xlu0 %4485 }
 0xcde   : > { %12508 = vrcp.f32 %v15411_v48 }
 0xce1   : > { %v15407_v50 = vpop.xlane.xlu1 %4494 }
 0xce2   : > { %12510 = vrcp.f32 %v15407_v50 }
 0xce5   : > { %v15413_v60 = vpop.xlane.xlu0 %4491 }
 0xce6   : > { %12512 = vrcp.f32 %v15413_v60  ;;  %v12772_v60 = vld [vmem:[%s16863_s0 + $0x88] sm:$0xff] }
 0xce9   : > { %v15409_v20 = vpop.xlane.xlu1 %4500 }
 0xcea   : > { %12514 = vrcp.f32 %v15409_v20  ;;  %v12776_v20 = vld [vmem:[%s16863_s0 + $0xa8] sm:$0xff] }
 0xced   : > { %v15415_v38 = vpop.xlane.xlu1 %4506 }
 0xcf5   : > { %v15419_v37 = vpop.xlane.xlu1 %4512 }
 0xd01   : > { %v15423_v7 = vpop.xlane.xlu1 %4518 }
 0xd05   : > { %v15431_v31 = vpop.xlane.xlu1 %4524 }
 0xd06   : > { %v15417_v47 = vpop.xlane.xlu0 %4497 }
 0xd07   : > { %12516 = vrcp.f32 %v15417_v47 }
 0xd08   : > { %12518 = vrcp.f32 %v15415_v38 }
 0xd09   : > { %v15448_v16 = vpop.xlane.xlu1 %4530 }
 0xd0a   : > { %v15421_v11 = vpop.xlane.xlu0 %4503 }
 0xd0b   : > { %12520 = vrcp.f32 %v15421_v11 }
 0xd0d   : > { %v15468_v1 = vpop.xlane.xlu1 %4536 }
 0xd0e   : > { %v11032_v19 = vpop.f32.mrb[98].mxu0  ;;  %v15426_v42 = vpop.xlane.xlu0 %4509 }
 0xd0f   : > { %v5402_v27 = vmul.f32 %v12756_v29, %v11032_v19  ;;  %v5062_v5 = vpop.f32.mrb[99].mxu0  ;;  %v12764_v29 = vld [vmem:[%s16863_s0 + $0x48] sm:$0xff] }
 0xd10   : > { %v5401_v57 = vmul.f32 %v12757_v40, %v5062_v5  ;;  %v12491_v40 = vpop.eup %12490  ;;  %12522 = vrcp.f32 %v15419_v37 }
 0xd11   : > { %v15429_v41 = vmul.f32 %v12475_v63, %v5402_v27 }
 0xd12   : > { %v15433_v4 = vmul.f32 %v12477_v2, %v5401_v57  ;;  %v11035_v12 = vpop.f32.mrb[100].mxu0  ;;  %v15436_v15 = vpop.xlane.xlu0 %4515  ;;  %v12765_v2 = vld [vmem:[%s16863_s0 + $0x40] sm:$0xff] }
 0xd13   : > { %v5404_v30 = vmul.f32 %v12758_v59, %v11035_v12  ;;  %v5072_v45 = vpop.f32.mrb[101].mxu0  ;;  %v12493_v12 = vpop.eup %12492  ;;  %12524 = vrcp.f32 %v15426_v42 }
 0xd14   : > { %v11693_v58 = vpack.c.bf16 %v15429_v41, %v15433_v4  ;;  %v5403_v61 = vmul.f32 %v12759_v21, %v5072_v45  ;;  %v12766_v45 = vld [vmem:[%s16863_s0 + $0x58] sm:$0xff] }
 0xd15   : > { %v15441_v39 = vmul.f32 %v12479_v6, %v5404_v30 }
 0xd16   : > { %v15443_v26 = vmul.f32 %v12481_v33, %v5403_v61  ;;  %v11038_v17 = vpop.f32.mrb[102].mxu0  ;;  %v15446_v54 = vpop.xlane.xlu0 %4521 }
 0xd17   : > { %v5406_v55 = vmul.f32 %v12760_v53, %v11038_v17  ;;  %v5082_v23 = vpop.f32.mrb[103].mxu0  ;;  %v12495_v33 = vpop.eup %12494  ;;  %12526 = vrcp.f32 %v15423_v7 }
 0xd18   : > { %v11697_v43 = vpack.c.bf16 %v15441_v39, %v15443_v26  ;;  %v5405_v18 = vmul.f32 %v12761_v8, %v5082_v23  ;;  %v15488_v17 = vpop.xlane.xlu1 %4542  ;;  %v12497_v23 = vpop.eup %12496  ;;  %12528 = vrcp.f32 %v15436_v15  ;;  %v12780_v15 = vld [vmem:[%s16863_s0 + $0xc8] sm:$0xff] }
 0xd19   : > { %v15453_v34 = vmul.f32 %v12483_v49, %v5406_v55  ;;  %v12767_v55 = vld [vmem:[%s16863_s0 + $0x50] sm:$0xff] }
 0xd1a   : > { %v15456_v9 = vmul.f32 %v12485_v3, %v5405_v18  ;;  %v11041_v52 = vpop.f32.mrb[104].mxu0  ;;  %v15460_v24 = vpop.xlane.xlu0 %4527  ;;  %v12768_v18 = vld [vmem:[%s16863_s0 + $0x68] sm:$0xff] }
 0xd1b   : > { %v5408_v25 = vmul.f32 %v12762_v14, %v11041_v52  ;;  %v5092_v28 = vpop.f32.mrb[105].mxu0  ;;  %v12499_v14 = vpop.eup %12498  ;;  %12530 = vrcp.f32 %v15431_v31 }
 0xd1c   : > { %v11701_v13 = vpack.c.bf16 %v15453_v34, %v15456_v9  ;;  %v5407_v46 = vmul.f32 %v12763_v62, %v5092_v28  ;;  %v12769_v28 = vld [vmem:[%s16863_s0 + $0x60] sm:$0xff]  ;;  %v12501_v62 = vpop.eup %12500  ;;  %12532 = vrcp.f32 %v15446_v54  ;;  %v12782_v34 = vld [vmem:[%s16863_s0 + $0xd8] sm:$0xff] }
 0xd1d   : > { %v15465_v35 = vmul.f32 %v12487_v0, %v5408_v25 }
 0xd1e   : > { %v15470_v51 = vmul.f32 %v12489_v22, %v5407_v46  ;;  %v11044_v19 = vpop.f32.mrb[106].mxu0  ;;  %v15474_v63 = vpop.xlane.xlu0 %4533 }
 0xd1f   : > { %v5410_v27 = vmul.f32 %v12764_v29, %v11044_v19  ;;  %v5102_v5 = vpop.f32.mrb[107].mxu0  ;;  %v15508_v22 = vpop.xlane.xlu1 %4548  ;;  %v12770_v29 = vld [vmem:[%s16863_s0 + $0x78] sm:$0xff] }
 0xd20   : > { %v11705_v57 = vpack.c.bf16 %v15465_v35, %v15470_v51  ;;  %v5409_v32 = vmul.f32 %v12765_v2, %v5102_v5 }
 0xd21   : > { %v15479_v59 = vmul.f32 %v12491_v40, %v5410_v27  ;;  %v12503_v40 = vpop.eup %12502  ;;  %12534 = vrcp.f32 %v15448_v16 }
 0xd22   : > { %v15482_v30 = vmul.f32 %v12493_v12, %v5409_v32  ;;  %v11047_v10 = vpop.f32.mrb[108].mxu0  ;;  %v15486_v61 = vpop.xlane.xlu0 %4539  ;;  %v12771_v32 = vld [vmem:[%s16863_s0 + $0x70] sm:$0xff] }
 0xd23   : > { %v5412_v6 = vmul.f32 %v12766_v45, %v11047_v10  ;;  %v5112_v21 = vpop.f32.mrb[109].mxu0  ;;  %v12505_v10 = vpop.eup %12504  ;;  %12536 = vrcp.f32 %v15460_v24 }
 0xd24   : > { %v11709_v53 = vpack.c.bf16 %v15479_v59, %v15482_v30  ;;  %v5411_v56 = vmul.f32 %v12767_v55, %v5112_v21 }
 0xd25   : > { %v15493_v49 = vmul.f32 %v12495_v33, %v5412_v6 }
 0xd26   : > { %v15496_v36 = vmul.f32 %v12497_v23, %v5411_v56  ;;  %v11050_v8 = vpop.f32.mrb[110].mxu0  ;;  %v15505_v44 = vpop.xlane.xlu0 %4545 }
 0xd27   : > { %v5414_v3 = vmul.f32 %v12768_v18, %v11050_v8  ;;  %v5122_v52 = vpop.f32.mrb[111].mxu0  ;;  %v12507_v56 = vpop.eup %12506  ;;  %v12773_v18 = vld [vmem:[%s16863_s0 + $0x80] sm:$0xff]  ;;  %12538 = vrcp.f32 %v15468_v1 }
 0xd28   : > { %v11713_v25 = vpack.c.bf16 %v15493_v49, %v15496_v36  ;;  %v5413_v0 = vmul.f32 %v12769_v28, %v5122_v52  ;;  %v15524_v23 = vpop.xlane.xlu1 %4554  ;;  %v12509_v52 = vpop.eup %12508  ;;  %12540 = vrcp.f32 %v15474_v63  ;;  %v12785_v1 = vld [vmem:[%s16863_s0 + $0xe0] sm:$0xff]  ;;  %v12788_v49 = vld [vmem:[%s16863_s0 + $0x108] sm:$0xff] }
 0xd29   : > { %v15503_v46 = vmul.f32 %v12499_v14, %v5414_v3 }
 0xd2a   : > { %v15510_v48 = vmul.f32 %v12501_v62, %v5413_v0  ;;  %v11053_v19 = vpop.f32.mrb[112].mxu0  ;;  %v15521_v21 = vpop.xlane.xlu0 %4551  ;;  %v12774_v62 = vld [vmem:[%s16863_s0 + $0x98] sm:$0xff] }
 0xd2b   : > { %v5416_v27 = vmul.f32 %v12770_v29, %v11053_v19  ;;  %v5132_v5 = vpop.f32.mrb[113].mxu0 }
 0xd2c   : > { %v11717_v2 = vpack.c.bf16 %v15503_v46, %v15510_v48  ;;  %v5415_v12 = vmul.f32 %v12771_v32, %v5132_v5  ;;  %v12775_v5 = vld [vmem:[%s16863_s0 + $0x90] sm:$0xff]  ;;  %v12790_v46 = vld [vmem:[%s16863_s0 + $0x118] sm:$0xff] }
 0xd2d   : > { %v15517_v50 = vmul.f32 %v12503_v40, %v5416_v27  ;;  %v12511_v27 = vpop.eup %12510  ;;  %12542 = vrcp.f32 %v15488_v17 }
 0xd2e   : > { %v15519_v45 = vmul.f32 %v12505_v10, %v5415_v12  ;;  %v11056_v6 = vpop.f32.mrb[114].mxu0  ;;  %v12513_v12 = vpop.eup %12512  ;;  %12544 = vrcp.f32 %v15486_v61 }
 0xd2f   : > { %v5418_v33 = vmul.f32 %v12772_v60, %v11056_v6  ;;  %v5142_v55 = vpop.f32.mrb[115].mxu0  ;;  %v15531_v10 = vpop.xlane.xlu0 %4557 }
 0xd30   : > { %v5417_v3 = vmul.f32 %v12773_v18, %v5142_v55  ;;  %v15533_v60 = vpop.xlane.xlu1 %4560 }
 0xd31   : > { %v5486_v14 = vmul.f32 %v12507_v56, %v5418_v33 }
 0xd32   : > { %v5485_v28 = vmul.f32 %v12509_v52, %v5417_v3  ;;  %v11059_v0 = vpop.f32.mrb[116].mxu0  ;;  %v12777_v52 = vld [vmem:[%s16863_s0 + $0xa0] sm:$0xff] }
 0xd33   : > { %v5420_v19 = vmul.f32 %v12774_v62, %v11059_v0  ;;  %v5152_v29 = vpop.f32.mrb[117].mxu0  ;;  %v15538_v55 = vpop.xlane.xlu0 %4563  ;;  %v12778_v62 = vld [vmem:[%s16863_s0 + $0xb8] sm:$0xff] }
 0xd34   : > { %v5419_v40 = vmul.f32 %v12775_v5, %v5152_v29  ;;  %v11691_v32 = vpack.c.bf16 %v5486_v14, %v5485_v28  ;;  %v15543_v56 = vpop.xlane.xlu1 %4566  ;;  %v12779_v5 = vld [vmem:[%s16863_s0 + $0xb0] sm:$0xff] }
 0xd35   : > { %v5488_v6 = vmul.f32 %v12511_v27, %v5420_v19 }
 0xd36   : > { %v5487_v8 = vmul.f32 %v12513_v12, %v5419_v40  ;;  %11692 = vmatprep.subr.bf16.mxu1 %v11691_v32 }
 0xd37   : > { %11694 = vmatpush3.bf16.msra.mxu1 %v11693_v58  ;;  %v15545_v18 = vpop.xlane.xlu0 %4569 }
 0xd38   : > { %v11695_v33 = vpack.c.bf16 %v5488_v6, %v5487_v8  ;;  %v15547_v3 = vpop.xlane.xlu1 %4572  ;;  %v12515_v8 = vpop.eup %12514  ;;  %12546 = vrcp.f32 %v15508_v22 }
 0xd39   : > { %v12517_v38 = vpop.eup %12516  ;;  %12548 = vrcp.f32 %v15505_v44 }
 0xd3a   : > { %11696 = vmatprep.subr.bf16.mxu1 %v11695_v33  ;;  %v12519_v29 = vpop.eup %12518  ;;  %12550 = vrcp.f32 %v15524_v23 }
 0xd3b   : > { %11698 = vmatpush3.bf16.msra.mxu1 %v11697_v43  ;;  %v15553_v4 = vpop.xlane.xlu0 %4581  ;;  %v12521_v12 = vpop.eup %12520  ;;  %12552 = vrcp.f32 %v15521_v21  ;;  %v5543_v21 = vld [vmem:[#allocation21 + $0x30] sm:$0xff] }
 0xd3c   : > { %v15551_v41 = vpop.xlane.xlu1 %4584 }
 0xd3f   : > { %v15560_v39 = vpop.xlane.xlu0 %4587 }
 0xd40   : > { %v15557_v58 = vpop.xlane.xlu1 %4590 }
 0xd43   : > { %v15570_v27 = vpop.xlane.xlu0 %4593 }
 0xd44   : > { %v15567_v37 = vpop.xlane.xlu1 %4596 }
 0xd47   : > { %v15583_v54 = vpop.xlane.xlu0 %4599 }
 0xd48   : > { %v15580_v31 = vpop.xlane.xlu1 %4602 }
 0xd4c   : > { %v11062_v26 = vpop.f32.mrb[118].mxu0  ;;  %v15593_v24 = vpop.xlane.xlu1 %4608 }
 0xd4d   : > { %v5422_v47 = vmul.f32 %v12776_v20, %v11062_v26  ;;  %v5162_v43 = vpop.f32.mrb[119].mxu0 }
 0xd4e   : > { %v5421_v14 = vmul.f32 %v12777_v52, %v5162_v43  ;;  %v12781_v43 = vld [vmem:[%s16863_s0 + $0xc0] sm:$0xff] }
 0xd4f   : > { %v5490_v28 = vmul.f32 %v12515_v8, %v5422_v47  ;;  %v12523_v47 = vpop.eup %12522  ;;  %12554 = vrcp.f32 %v15533_v60 }
 0xd50   : > { %v5489_v11 = vmul.f32 %v12517_v38, %v5421_v14  ;;  %v11065_v0 = vpop.f32.mrb[120].mxu0  ;;  %v12525_v14 = vpop.eup %12524  ;;  %12556 = vrcp.f32 %v15531_v10 }
 0xd51   : > { %v5424_v42 = vmul.f32 %v12778_v62, %v11065_v0  ;;  %v5172_v19 = vpop.f32.mrb[121].mxu0  ;;  %v12527_v0 = vpop.eup %12526  ;;  %v12783_v62 = vld [vmem:[%s16863_s0 + $0xd0] sm:$0xff]  ;;  %12558 = vrcp.f32 %v15543_v56 }
 0xd52   : > { %v5423_v40 = vmul.f32 %v12779_v5, %v5172_v19  ;;  %v11699_v32 = vpack.c.bf16 %v5490_v28, %v5489_v11  ;;  %v12529_v19 = vpop.eup %12528  ;;  %v15609_v17 = vpop.xlane.xlu1 %4614  ;;  %12560 = vrcp.f32 %v15538_v55 }
 0xd53   : > { %v5492_v6 = vmul.f32 %v12519_v29, %v5424_v42 }
 0xd54   : > { %v5491_v7 = vmul.f32 %v12521_v12, %v5423_v40  ;;  %v11068_v33 = vpop.f32.mrb[122].mxu0  ;;  %11700 = vmatprep.subr.bf16.mxu1 %v11699_v32  ;;  %v12784_v32 = vld [vmem:[%s16863_s0 + $0xe8] sm:$0xff]  ;;  %v15599_v12 = vpop.xlane.xlu0 %4605 }
 0xd55   : > { %v5426_v26 = vmul.f32 %v12780_v15, %v11068_v33  ;;  %v5182_v20 = vpop.f32.mrb[123].mxu0  ;;  %11702 = vmatpush3.bf16.msra.mxu1 %v11701_v13 }
 0xd56   : > { %v5425_v8 = vmul.f32 %v12781_v43, %v5182_v20  ;;  %v11703_v52 = vpack.c.bf16 %v5492_v6, %v5491_v7  ;;  %v12786_v20 = vld [vmem:[%s16863_s0 + $0xf8] sm:$0xff] }
 0xd57   : > { %v5494_v38 = vmul.f32 %v12523_v47, %v5426_v26 }
 0xd58   : > { %v5493_v28 = vmul.f32 %v12525_v14, %v5425_v8  ;;  %v11071_v11 = vpop.f32.mrb[124].mxu0  ;;  %11704 = vmatprep.subr.bf16.mxu1 %v11703_v52  ;;  %v15612_v61 = vpop.xlane.xlu0 %4611 }
 0xd59   : > { %v5428_v9 = vmul.f32 %v12782_v34, %v11071_v11  ;;  %v5192_v13 = vpop.f32.mrb[125].mxu0  ;;  %11706 = vmatpush3.bf16.msra.mxu1 %v11705_v57  ;;  %v12531_v57 = vpop.eup %12530  ;;  %v12789_v34 = vld [vmem:[%s16863_s0 + $0x100] sm:$0xff]  ;;  %12562 = vrcp.f32 %v15547_v3 }
 0xd5a   : > { %v5427_v42 = vmul.f32 %v12783_v62, %v5192_v13  ;;  %v11707_v16 = vpack.c.bf16 %v5494_v38, %v5493_v28  ;;  %v12533_v33 = vpop.eup %12532  ;;  %12564 = vrcp.f32 %v15545_v18 }
 0xd5b   : > { %v5496_v29 = vmul.f32 %v12527_v0, %v5428_v9  ;;  %v12535_v30 = vpop.eup %12534 }
 0xd5c   : > { %v5495_v5 = vmul.f32 %v12529_v19, %v5427_v42  ;;  %v11074_v40 = vpop.f32.mrb[126].mxu0  ;;  %11708 = vmatprep.subr.bf16.mxu1 %v11707_v16  ;;  %v12537_v52 = vpop.eup %12536  ;;  %v16896_v16 = vpack.c.bf16 %v15517_v50, %v15519_v45  ;;  %v5537_v19 = vld [vmem:[#allocation21] sm:$0xff]  ;;  %v12792_v45 = vld [vmem:[%s16863_s0 + $0x128] sm:$0xff] }
 0xd5d   : > { %v5430_v35 = vmul.f32 %v12784_v32, %v11074_v40  ;;  %v5202_v51 = vpop.f32.mrb[127].mxu0  ;;  %11710 = vmatpush3.bf16.msra.mxu1 %v11709_v53  ;;  %v12787_v53 = vld [vmem:[%s16863_s0 + $0xf0] sm:$0xff]  ;;  %v12539_v11 = vpop.eup %12538 }
 0xd5e   : > { %v5429_v6 = vmul.f32 %v12785_v1, %v5202_v51  ;;  %v11711_v7 = vpack.c.bf16 %v5496_v29, %v5495_v5  ;;  %v12541_v22 = vpop.eup %12540  ;;  %v15626_v42 = vpop.xlane.xlu1 %4620  ;;  %v12791_v40 = vld [vmem:[%s16863_s0 + $0x110] sm:$0xff] }
 0xd5f   : > { %v5498_v15 = vmul.f32 %v12531_v57, %v5430_v35  ;;  %v12543_v29 = vpop.eup %12542  ;;  %v15632_v5 = vpop.xlane.xlu0 %4617 }
 0xd60   : > { %v5497_v63 = vmul.f32 %v12533_v33, %v5429_v6  ;;  %v11077_v26 = vpop.f32.mrb[128].mxu0  ;;  %11712 = vmatprep.subr.bf16.mxu1 %v11711_v7  ;;  %v12545_v35 = vpop.eup %12544  ;;  %v5542_v7 = vld [vmem:[#allocation21 + $0x28] sm:$0xff] }
 0xd61   : > { %v5432_v47 = vmul.f32 %v12786_v20, %v11077_v26  ;;  %v5212_v59 = vpop.f32.mrb[129].mxu0  ;;  %11714 = vmatpush3.bf16.msra.mxu1 %v11713_v25  ;;  %v12547_v33 = vpop.eup %12546  ;;  %v5548_v20 = vld [vmem:[#allocation21 + $0x58] sm:$0xff] }
 0xd62   : > { %v5431_v43 = vmul.f32 %v12787_v53, %v5212_v59  ;;  %v11715_v8 = vpack.c.bf16 %v5498_v15, %v5497_v63  ;;  %v12793_v63 = vld [vmem:[%s16863_s0 + $0x120] sm:$0xff]  ;;  %v12549_v60 = vpop.eup %12548 }
 0xd63   : > { %v5500_v14 = vmul.f32 %v12535_v30, %v5432_v47  ;;  %v15647_v47 = vpop.xlane.xlu1 %4626  ;;  %v15652_v10 = vpop.xlane.xlu0 %4623 }
 0xd64   : > { %v5499_v38 = vmul.f32 %v12537_v52, %v5431_v43  ;;  %v11080_v28 = vpop.f32.mrb[130].mxu0  ;;  %11716 = vmatprep.subr.bf16.mxu1 %v11715_v8  ;;  %v12794_v43 = vld [vmem:[%s16863_s0 + $0x138] sm:$0xff] }
 0xd65   : > { %v5434_v36 = vmul.f32 %v12788_v49, %v11080_v28  ;;  %v5222_v25 = vpop.f32.mrb[131].mxu0  ;;  %11718 = vmatpush3.bf16.msra.mxu1 %v11717_v2  ;;  %v12795_v49 = vld [vmem:[%s16863_s0 + $0x130] sm:$0xff] }
 0xd66   : > { %v5433_v9 = vmul.f32 %v12789_v34, %v5222_v25  ;;  %v11719_v13 = vpack.c.bf16 %v5500_v14, %v5499_v38  ;;  %v5547_v14 = vld [vmem:[#allocation21 + $0x50] sm:$0xff]  ;;  %v12551_v38 = vpop.eup %12550 }
 0xd67   : > { %v15620_v0 = vmul.f32 %v12539_v11, %v5434_v36  ;;  %v5553_v36 = vld [vmem:[#allocation21 + $0x80] sm:$0xff]  ;;  %v12553_v25 = vpop.eup %12552 }
 0xd68   : > { %v15623_v62 = vmul.f32 %v12541_v22, %v5433_v9  ;;  %v11083_v44 = vpop.f32.mrb[132].mxu0  ;;  %11720 = vmatprep.subr.bf16.mxu1 %v11719_v13  ;;  %v4579_v9 = vpop.xlane.xlu1 %4578  ;;  %v12796_v13 = vld [vmem:[%s16863_s0 + $0x148] sm:$0xff] }
 0xd69   : > { %v5436_v48 = vmul.f32 %v12790_v46, %v11083_v44  ;;  %v5232_v2 = vpop.f32.mrb[133].mxu0  ;;  %11722 = vmatpush3.bf16.msra.mxu1 %v16896_v16  ;;  %v5552_v46 = vld [vmem:[#allocation21 + $0x78] sm:$0xff]  ;;  %12566 = vrcp.f32 %v4579_v9  ;;  %v12802_v9 = vld [vmem:[%s16863_s0 + $0x178] sm:$0xff] }
 0xd6a   : > { %v11725_v23 = vpack.c.bf16 %v15620_v0, %v15623_v62  ;;  %v5435_v32 = vmul.f32 %v12791_v40, %v5232_v2  ;;  %v4576_v2 = vpop.xlane.xlu0 %4575  ;;  %v12811_v62 = vld [vmem:[%s16863_s0 + $0x1b0] sm:$0xff] }
 0xd6b   : > { %v15637_v51 = vmul.f32 %v12543_v29, %v5436_v48  ;;  %v12555_v48 = vpop.eup %12554  ;;  %v5558_v29 = vld [vmem:[#allocation21 + $0xa8] sm:$0x3]  ;;  %12568 = vrcp.f32 %v4576_v2 }
 0xd6c   : > { %v15640_v57 = vmul.f32 %v12545_v35, %v5435_v32  ;;  %v11086_v50 = vpop.f32.mrb[134].mxu0  ;;  %5642 = vmatmul.mubr.f32.vlgmr.msra.gmra.mrb[88].mxu1 %v5537_v19  ;;  %v12797_v19 = vld [vmem:[%s16863_s0 + $0x140] sm:$0xff]  ;;  %v12557_v40 = vpop.eup %12556  ;;  %v12798_v35 = vld [vmem:[%s16863_s0 + $0x158] sm:$0xff]  ;;  %12570 = vrcp.f32 %v15551_v41 }
 0xd6d   : > { %v5438_v1 = vmul.f32 %v12792_v45, %v11086_v50  ;;  %v5242_v6 = vpop.f32.mrb[135].mxu0  ;;  %5646 = vmatprep.mubr.f32.mxu1 %v5543_v21  ;;  %12572 = vrcp.f32 %v15553_v4 }
 0xd6e   : > { %v11729_v15 = vpack.c.bf16 %v15637_v51, %v15640_v57  ;;  %v5437_v26 = vmul.f32 %v12793_v63, %v5242_v6  ;;  %v12559_v6 = vpop.eup %12558  ;;  %12574 = vrcp.f32 %v15557_v58  ;;  %v12813_v57 = vld [vmem:[%s16863_s0 + $0x1c0] sm:$0xff] }
 0xd6f   : > { %v15649_v59 = vmul.f32 %v12547_v33, %v5438_v1  ;;  %v5557_v1 = vld [vmem:[#allocation21 + $0xa0] sm:$0x3]  ;;  %12576 = vrcp.f32 %v15560_v39  ;;  %v12804_v39 = vld [vmem:[%s16863_s0 + $0x188] sm:$0xff] }
 0xd70   : > { %v15654_v30 = vmul.f32 %v12549_v60, %v5437_v26  ;;  %v11089_v53 = vpop.f32.mrb[136].mxu0  ;;  %5647 = vmatmul.mubr.f32.gmra.mrb[90].mxu1 %v5542_v7  ;;  %v12799_v33 = vld [vmem:[%s16863_s0 + $0x150] sm:$0xff]  ;;  %12578 = vrcp.f32 %v15567_v37 }
 0xd71   : > { %v5440_v8 = vmul.f32 %v12794_v43, %v11089_v53  ;;  %v5252_v52 = vpop.f32.mrb[137].mxu0  ;;  %5651 = vmatprep.mubr.f32.mxu1 %v5548_v20  ;;  %v5540_v26 = vld [vmem:[#allocation21 + $0x18] sm:$0xff]  ;;  %v12561_v20 = vpop.eup %12560  ;;  %12580 = vrcp.f32 %v15570_v27  ;;  %v12806_v27 = vld [vmem:[%s16863_s0 + $0x198] sm:$0xff] }
 0xd72   : > { %v11733_v28 = vpack.c.bf16 %v15649_v59, %v15654_v30  ;;  %v5439_v56 = vmul.f32 %v12795_v49, %v5252_v52  ;;  %12582 = vrcp.f32 %v15580_v31  ;;  %v12808_v31 = vld [vmem:[%s16863_s0 + $0x1a8] sm:$0xff] }
 0xd73   : > { %v15661_v11 = vmul.f32 %v12551_v38, %v5440_v8  ;;  %v12800_v8 = vld [vmem:[%s16863_s0 + $0x168] sm:$0xff]  ;;  %v12563_v38 = vpop.eup %12562  ;;  %12584 = vrcp.f32 %v15583_v54 }
 0xd74   : > { %v15664_v55 = vmul.f32 %v12553_v25, %v5439_v56  ;;  %v11092_v34 = vpop.f32.mrb[138].mxu0  ;;  %5652 = vmatmul.mubr.f32.gmra.mrb[92].mxu1 %v5547_v14  ;;  %v12801_v56 = vld [vmem:[%s16863_s0 + $0x160] sm:$0xff]  ;;  %v12565_v25 = vpop.eup %12564  ;;  %12586 = vrcp.f32 %v15593_v24 }
 0xd75   : > { %v5442_v22 = vmul.f32 %v12796_v13, %v11092_v34  ;;  %v5262_v44 = vpop.f32.mrb[139].mxu0  ;;  %5656 = vmatprep.mubr.f32.mxu1 %v5553_v36  ;;  %12588 = vrcp.f32 %v15599_v12  ;;  %v12810_v12 = vld [vmem:[%s16863_s0 + $0x1b8] sm:$0xff] }
 0xd76   : > { %v11737_v16 = vpack.c.bf16 %v15661_v11, %v15664_v55  ;;  %v5441_v3 = vmul.f32 %v12797_v19, %v5262_v44  ;;  %v12567_v44 = vpop.eup %12566  ;;  %12590 = vrcp.f32 %v15609_v17 }
 0xd77   : > { %v15671_v32 = vmul.f32 %v12555_v48, %v5442_v22  ;;  %v12803_v48 = vld [vmem:[%s16863_s0 + $0x170] sm:$0xff]  ;;  %v12569_v19 = vpop.eup %12568  ;;  %12592 = vrcp.f32 %v15612_v61  ;;  %v12812_v61 = vld [vmem:[%s16863_s0 + $0x1c8] sm:$0xff] }
 0xd78   : > { %v15673_v18 = vmul.f32 %v12557_v40, %v5441_v3  ;;  %v11095_v21 = vpop.f32.mrb[140].mxu0  ;;  %5657 = vmatmul.mubr.f32.gmra.mrb[94].mxu1 %v5552_v46  ;;  %12594 = vrcp.f32 %v15626_v42  ;;  %v4633_v42 = vpop.xlane.xlu1 %4632 }
 0xd79   : > { %v5444_v50 = vmul.f32 %v12798_v35, %v11095_v21  ;;  %v5272_v45 = vpop.f32.mrb[141].mxu0  ;;  %5661 = vmatprep.mubr.f32.mxu1 %v5558_v29  ;;  %v12571_v35 = vpop.eup %12570  ;;  %12596 = vrcp.f32 %v15632_v5 }
 0xd7a   : > { %v11741_v7 = vpack.c.bf16 %v15671_v32, %v15673_v18  ;;  %v5443_v63 = vmul.f32 %v12799_v33, %v5272_v45  ;;  %v12805_v45 = vld [vmem:[%s16863_s0 + $0x180] sm:$0xff]  ;;  %12598 = vrcp.f32 %v15647_v47  ;;  %v12819_v18 = vld [vmem:[%s16863_s0 + $0x1f0] sm:$0xff] }
 0xd7b   : > { %v15679_v60 = vmul.f32 %v12559_v6, %v5444_v50  ;;  %v12573_v6 = vpop.eup %12572  ;;  %12600 = vrcp.f32 %v15652_v10 }
 0xd7c   : > { %v15682_v53 = vmul.f32 %v12561_v20, %v5443_v63  ;;  %v11098_v43 = vpop.f32.mrb[142].mxu0  ;;  %5662 = vmatmul.mubr.f32.gmra.mrb[96].mxu1 %v5557_v1  ;;  %12602 = vrcp.f32 %v4633_v42  ;;  %v4639_v10 = vpop.xlane.xlu1 %4638 }
 0xd7d   : > { %v5446_v52 = vmul.f32 %v12800_v8, %v11098_v43  ;;  %v5282_v14 = vpop.f32.mrb[143].mxu0  ;;  %5731 = vmatprep.mubr.f32.mxu1 %v5540_v26  ;;  %v12575_v43 = vpop.eup %12574  ;;  %v12807_v8 = vld [vmem:[%s16863_s0 + $0x190] sm:$0xff] }
 0xd7e   : > { %v11745_v49 = vpack.c.bf16 %v15679_v60, %v15682_v53  ;;  %v5445_v36 = vmul.f32 %v12801_v56, %v5282_v14  ;;  %v12821_v53 = vld [vmem:[%s16863_s0 + $0x200] sm:$0xff] }
 0xd7f   : > { %v15689_v41 = vmul.f32 %v12563_v38, %v5446_v52  ;;  %v12577_v38 = vpop.eup %12576 }
 0xd80   : > { %v15692_v34 = vmul.f32 %v12565_v25, %v5445_v36  ;;  %v11101_v4 = vpop.f32.mrb[144].mxu0 }
 0xd81   : > { %v5448_v13 = vmul.f32 %v12802_v9, %v11101_v4  ;;  %v5292_v22 = vpop.f32.mrb[145].mxu0  ;;  %v12579_v9 = vpop.eup %12578 }
 0xd82   : > { %v11749_v46 = vpack.c.bf16 %v15689_v41, %v15692_v34  ;;  %v5447_v2 = vmul.f32 %v12803_v48, %v5292_v22  ;;  %v12581_v48 = vpop.eup %12580 }
 0xd83   : > { %v15699_v3 = vmul.f32 %v12567_v44, %v5448_v13  ;;  %v12809_v13 = vld [vmem:[%s16863_s0 + $0x1a0] sm:$0xff]  ;;  %v12583_v0 = vpop.eup %12582 }
 0xd84   : > { %v15702_v58 = vmul.f32 %v12569_v19, %v5447_v2  ;;  %v11104_v29 = vpop.f32.mrb[146].mxu0 }
 0xd85   : > { %v5450_v40 = vmul.f32 %v12804_v39, %v11104_v29  ;;  %v5302_v21 = vpop.f32.mrb[147].mxu0 }
 0xd86   : > { %v11753_v50 = vpack.c.bf16 %v15699_v3, %v15702_v58  ;;  %v5449_v1 = vmul.f32 %v12805_v45, %v5302_v21  ;;  %v12585_v21 = vpop.eup %12584  ;;  %v5550_v3 = vld [vmem:[#allocation21 + $0x68] sm:$0xff]  ;;  %v5549_v58 = vld [vmem:[#allocation21 + $0x60] sm:$0xff] }
 0xd87   : > { %v5518_v33 = vmul.f32 %v12571_v35, %v5450_v40  ;;  %v12587_v51 = vpop.eup %12586 }
 0xd88   : > { %v5517_v37 = vmul.f32 %v12573_v6, %v5449_v1  ;;  %v11107_v63 = vpop.f32.mrb[148].mxu0 }
 0xd89   : > { %v5452_v26 = vmul.f32 %v12806_v27, %v11107_v63  ;;  %v5312_v20 = vpop.f32.mrb[149].mxu0  ;;  %v4630_v27 = vpop.xlane.xlu0 %4629 }
 0xd8a   : > { %v5451_v52 = vmul.f32 %v12807_v8, %v5312_v20  ;;  %v11723_v14 = vpack.c.bf16 %v5518_v33, %v5517_v37  ;;  %v12589_v37 = vpop.eup %12588  ;;  %v12814_v20 = vld [vmem:[%s16863_s0 + $0x1d8] sm:$0xff]  ;;  %12604 = vrcp.f32 %v4630_v27 }
 0xd8b   : > { %v5520_v56 = vmul.f32 %v12575_v43, %v5452_v26  ;;  %v12815_v43 = vld [vmem:[%s16863_s0 + $0x1d0] sm:$0xff]  ;;  %12606 = vrcp.f32 %v4639_v10 }
 0xd8c   : > { %v5519_v36 = vmul.f32 %v12577_v38, %v5451_v52  ;;  %v11110_v25 = vpop.f32.mrb[150].mxu0  ;;  %11724 = vmatprep.subr.bf16.mxu1 %v11723_v14 }
 0xd8d   : > { %v5454_v54 = vmul.f32 %v12808_v31, %v11110_v25  ;;  %v5322_v4 = vpop.f32.mrb[151].mxu0  ;;  %11726 = vmatpush3.bf16.msra.mxu1 %v11725_v23  ;;  %v4636_v55 = vpop.xlane.xlu0 %4635 }
 0xd8e   : > { %v5453_v22 = vmul.f32 %v12809_v13, %v5322_v4  ;;  %v11727_v44 = vpack.c.bf16 %v5520_v56, %v5519_v36  ;;  %v12816_v36 = vld [vmem:[%s16863_s0 + $0x1e8] sm:$0xff]  ;;  %12608 = vrcp.f32 %v4636_v55 }
 0xd8f   : > { %v5522_v24 = vmul.f32 %v12579_v9, %v5454_v54 }
 0xd90   : > { %v5521_v2 = vmul.f32 %v12581_v48, %v5453_v22  ;;  %v11113_v19 = vpop.f32.mrb[152].mxu0  ;;  %11728 = vmatprep.subr.bf16.mxu1 %v11727_v44  ;;  %v12818_v48 = vld [vmem:[%s16863_s0 + $0x1f8] sm:$0xff] }
 0xd91   : > { %v5456_v29 = vmul.f32 %v12810_v12, %v11113_v19  ;;  %v5332_v39 = vpop.f32.mrb[153].mxu0  ;;  %11730 = vmatpush3.bf16.msra.mxu1 %v11729_v15 }
 0xd92   : > { %v5455_v23 = vmul.f32 %v12811_v62, %v5332_v39  ;;  %v11731_v40 = vpack.c.bf16 %v5522_v24, %v5521_v2  ;;  %v12820_v62 = vld [vmem:[%s16863_s0 + $0x208] sm:$0xff] }
 0xd93   : > { %v5524_v17 = vmul.f32 %v12583_v0, %v5456_v29 }
 0xd94   : > { %v5523_v35 = vmul.f32 %v12585_v21, %v5455_v23  ;;  %v11116_v45 = vpop.f32.mrb[154].mxu0  ;;  %11732 = vmatprep.subr.bf16.mxu1 %v11731_v40 }
 0xd95   : > { %v5458_v1 = vmul.f32 %v12812_v61, %v11116_v45  ;;  %v5342_v6 = vpop.f32.mrb[155].mxu0  ;;  %11734 = vmatpush3.bf16.msra.mxu1 %v11733_v28  ;;  %v12591_v28 = vpop.eup %12590 }
 0xd96   : > { %v5457_v15 = vmul.f32 %v12813_v57, %v5342_v6  ;;  %v11735_v33 = vpack.c.bf16 %v5524_v17, %v5523_v35  ;;  %v12593_v47 = vpop.eup %12592  ;;  %v5539_v57 = vld [vmem:[#allocation21 + $0x10] sm:$0xff] }
 0xd97   : > { %v5526_v63 = vmul.f32 %v12587_v51, %v5458_v1  ;;  %v12595_v11 = vpop.eup %12594  ;;  %v12822_v1 = vld [vmem:[%s16863_s0 + $0x218] sm:$0xff] }
 0xd98   : > { %v5525_v5 = vmul.f32 %v12589_v37, %v5457_v15  ;;  %v11119_v26 = vpop.f32.mrb[156].mxu0  ;;  %11736 = vmatprep.subr.bf16.mxu1 %v11735_v33  ;;  %v12597_v9 = vpop.eup %12596  ;;  %v16897_v33 = vmov 0.0|0.0   ;;  %v5545_v37 = vld [vmem:[#allocation21 + $0x40] sm:$0xff] }
 0xd99   : > { %v5460_v59 = vmul.f32 %v12814_v20, %v11119_v26  ;;  %v5352_v30 = vpop.f32.mrb[157].mxu0  ;;  %11738 = vmatpush3.bf16.msra.mxu1 %v11737_v16  ;;  %v12817_v16 = vld [vmem:[%s16863_s0 + $0x1e0] sm:$0xff]  ;;  %v12599_v32 = vpop.eup %12598 }
 0xd9a   : > { %v5459_v8 = vmul.f32 %v12815_v43, %v5352_v30  ;;  %v11739_v52 = vpack.c.bf16 %v5526_v63, %v5525_v5  ;;  %v12601_v12 = vpop.eup %12600  ;;  %v5544_v5 = vld [vmem:[#allocation21 + $0x38] sm:$0xff]  ;;  %v5554_v20 = vld [vmem:[#allocation21 + $0x88] sm:$0xff]  ;;  %v5559_v30 = vld [vmem:[#allocation21 + $0xb0] sm:$0x3] }
 0xd9b   : > { %v5528_v14 = vmul.f32 %v12591_v28, %v5460_v59  ;;  %v12603_v60 = vpop.eup %12602  ;;  %v5560_v59 = vld [vmem:[#allocation21 + $0xb8] sm:$0x3]  ;;  %v16898_v28 = vmov 0.0   ;;  %v5541_v43 = vld [vmem:[#allocation21 + $0x20] sm:$0xff] }
 0xd9c   : > { %v5527_v38 = vmul.f32 %v12593_v47, %v5459_v8  ;;  %v11122_v56 = vpop.f32.mrb[158].mxu0  ;;  %11740 = vmatprep.subr.bf16.mxu1 %v11739_v52  ;;  %v12605_v17 = vpop.eup %12604  ;;  %v5546_v8 = vld [vmem:[#allocation21 + $0x48] sm:$0xff]  ;;  %v5551_v52 = vld [vmem:[#allocation21 + $0x70] sm:$0xff]  ;;  %v5556_v47 = vld [vmem:[#allocation21 + $0x98] sm:$0xff] }
 0xd9d   : > { %v5462_v25 = vmul.f32 %v12816_v36, %v11122_v56  ;;  %v5362_v31 = vpop.f32.mrb[159].mxu0  ;;  %11742 = vmatpush3.bf16.msra.mxu1 %v11741_v7  ;;  %v12607_v41 = vpop.eup %12606  ;;  %v5848_v56 = vld [vmem:[%s16900_s8 + $0x8] sm:$0xff]  ;;  %v5849_v36 = vld [vmem:[%s16900_s8 + $0x10] sm:$0xff] }
 0xd9e   : > { %v5461_v54 = vmul.f32 %v12817_v16, %v5362_v31  ;;  %v11743_v4 = vpack.c.bf16 %v5528_v14, %v5527_v38  ;;  %v12609_v42 = vpop.eup %12608  ;;  %v5561_v14 = vld [vmem:[#allocation21 + $0xc0] sm:$0x3]  ;;  %v5847_v38 = vld [vmem:[%s16899_s7] sm:$0xff]  ;;  %s16911_s7 = sld [smem:[#allocation78_spill]] }
 0xd9f   : > { %v5530_v13 = vmul.f32 %v12595_v11, %v5462_v25  ;;  %v11762_v10 = vpack.c.bf16 %v5848_v56, %v5847_v38  ;;  %v5850_v25 = vld [vmem:[%s16900_s8 + $0x18] sm:$0xff] }
 0xda0   : > { %v5529_v22 = vmul.f32 %v12597_v9, %v5461_v54  ;;  %v11125_v44 = vpop.f32.mrb[160].mxu0  ;;  %11744 = vmatprep.subr.bf16.mxu1 %v11743_v4  ;;  %v11765_v31 = vpack.c.bf16 %v5850_v25, %v5849_v36  ;;  %v16902_v25 = vld [vmem:[#allocation83_spill] sm:$0xff] }
 0xda1   : > { %v5464_v24 = vmul.f32 %v12818_v48, %v11125_v44  ;;  %v5372_v2 = vpop.f32.mrb[161].mxu0  ;;  %11746 = vmatpush3.bf16.msra.mxu1 %v11745_v49 }
 0xda2   : > { %v5463_v7 = vmul.f32 %v12819_v18, %v5372_v2  ;;  %v11747_v19 = vpack.c.bf16 %v5530_v13, %v5529_v22 }
 0xda3   : > { %v5532_v29 = vmul.f32 %v12599_v32, %v5464_v24 }
 0xda4   : > { %v5531_v39 = vmul.f32 %v12601_v12, %v5463_v7  ;;  %v11128_v0 = vpop.f32.mrb[162].mxu0  ;;  %11748 = vmatprep.subr.bf16.mxu1 %v11747_v19 }
 0xda5   : > { %v5466_v23 = vmul.f32 %v12820_v62, %v11128_v0  ;;  %v5382_v40 = vpop.f32.mrb[163].mxu0  ;;  %11750 = vmatpush3.bf16.msra.mxu1 %v11749_v46  ;;  %v12823_v46 = vld [vmem:[%s16863_s0 + $0x210] sm:$0xff] }
 0xda6   : > { %v5465_v49 = vmul.f32 %v12821_v53, %v5382_v40  ;;  %v11751_v21 = vpack.c.bf16 %v5532_v29, %v5531_v39 }
 0xda7   : > { %v5534_v35 = vmul.f32 %v12603_v60, %v5466_v23 }
 0xda8   : > { %v5533_v45 = vmul.f32 %v12605_v17, %v5465_v49  ;;  %v11131_v61 = vpop.f32.mrb[164].mxu0  ;;  %11752 = vmatprep.subr.bf16.mxu1 %v11751_v21 }
 0xda9   : > { %v5468_v6 = vmul.f32 %v12822_v1, %v11131_v61  ;;  %v5392_v51 = vpop.f32.mrb[165].mxu0  ;;  %11754 = vmatpush3.bf16.msra.mxu1 %v11753_v50  ;;  %v5555_v50 = vld [vmem:[#allocation21 + $0x90] sm:$0xff] }
 0xdaa   : > { %v11756_v34 = vpack.c.bf16 %v5534_v35, %v5533_v45  ;;  %v5467_v15 = vmul.f32 %v12823_v46, %v5392_v51  ;;  %11755 = vmatprep.subr.bf16.mxu1 %v16897_v33 }
 0xdab   : > { %v5536_v63 = vmul.f32 %v12607_v41, %v5468_v6 }
 0xdac   : > { %v5535_v27 = vmul.f32 %v12609_v42, %v5467_v15  ;;  %5732 = vmatmul.mubr.f32.vlgmr.msra.gmra.mrb[98].mxu1 %v5539_v57 }
 0xdad   : > { %11757 = vmatpush3.bf16.msra.mxu1 %v11756_v34  ;;  %5736 = vmatprep.mubr.f32.mxu1 %v5545_v37 }
 0xdae   : > { %v11759_v26 = vpack.c.bf16 %v5536_v63, %v5535_v27  ;;  %11758 = vmatprep.subr.bf16.mxu1 %v16897_v33 }
 0xdb0   : > { %5737 = vmatmul.mubr.f32.gmra.mrb[100].mxu1 %v5544_v5 }
 0xdb1   : > { %11760 = vmatpush3.bf16.msra.mxu1 %v11759_v26  ;;  %5741 = vmatprep.mubr.f32.mxu1 %v5550_v3 }
 0xdb2   : > { %11761 = vmatprep.subr.bf16.mxu1 %v16897_v33 }
 0xdb4   : > { %5742 = vmatmul.mubr.f32.gmra.mrb[102].mxu1 %v5549_v58 }
 0xdb5   : > { %5746 = vmatprep.mubr.f32.mxu1 %v5555_v50 }
 0xdb8   : > { %5747 = vmatmul.mubr.f32.gmra.mrb[104].mxu1 %v5554_v20 }
 0xdb9   : > { %5751 = vmatprep.mubr.f32.mxu1 %v5560_v59 }
 0xdbc   : > { %5752 = vmatmul.mubr.f32.gmra.mrb[106].mxu1 %v5559_v30  ;;  %v9767_v30 = vld [vmem:[#allocation12] ss:$0 sm:$0xff] }
 0xdbd   : > { %11140 = vmatprep.mubr.msk.f32.mxu1 %vm13660_vm0, %v16898_v28 }
 0xdc0   : > { %11141 = vmatmul.mubr.msk.f32.vlgmr.msra.gmra.mrb[108].mxu1 %vm1758_vm4, %v5541_v43 }
 0xdc1   : > { %11143 = vmatprep.mubr.msk.f32.mxu1 %vm13660_vm0, %v16898_v28  ;;  %11763 = vmatpush3.bf16.msra.mxu1 %v11762_v10 }
 0xdc2   : > { %11764 = vmatprep.subr.bf16.mxu1 %v16897_v33 }
 0xdc4   : > { %11144 = vmatmul.mubr.msk.f32.gmra.mrb[110].mxu1 %vm1758_vm4, %v5546_v8 }
 0xdc5   : > { %11146 = vmatprep.mubr.msk.f32.mxu1 %vm13660_vm0, %v16898_v28  ;;  %11766 = vmatpush3.bf16.msra.mxu1 %v11765_v31 }
 0xdc6   : > { %11767 = vmatprep.subr.bf16.mxu1 %v16897_v33 }
 0xdc8   : > { %11147 = vmatmul.mubr.msk.f32.gmra.mrb[112].mxu1 %vm1758_vm4, %v5551_v52 }
 0xdc9   : > { %11149 = vmatprep.mubr.msk.f32.mxu1 %vm13660_vm0, %v16898_v28 }
 0xdcc   : > { %11150 = vmatmul.mubr.msk.f32.gmra.mrb[114].mxu1 %vm1758_vm4, %v5556_v47  ;;  %v16901_v47 = vld [vmem:[#allocation82_spill] sm:$0xff] }
 0xdcd   : > { %11152 = vmatprep.mubr.msk.f32.mxu1 %vm13660_vm0, %v16898_v28 }
 0xdd0   : > { %11153 = vmatmul.mubr.msk.f32.gmra.mrb[116].mxu1 %vm1758_vm4, %v5561_v14 }
 0xdd1   : > { %11163 = vmatprep.mubr.msk.f32.mxu1 %vm13660_vm0, %v16898_v28 }
 0xe3f   : > { %v10287_v11 = vpop.f32.mrb[88].mxu1 }
 0xe40   : > { %v10288_v55 = vpop.f32.mrb[89].mxu1 }
 0xe41   : > { %v10289_v16 = vadd.f32 %v10288_v55, %v10287_v11 }
 0xe43   : > { %v10290_v54 = vpop.f32.mrb[90].mxu1 }
 0xe44   : > { %v10291_v4 = vpop.f32.mrb[91].mxu1 }
 0xe45   : > { %v10292_v9 = vadd.f32 %v10291_v4, %v10290_v54  ;;  %v16903_v4 = vld [vmem:[#allocation84_spill] sm:$0xff] }
 0xe47   : > { %v10293_v13 = vpop.f32.mrb[92].mxu1 }
 0xe48   : > { %v10294_v22 = vpop.f32.mrb[93].mxu1 }
 0xe49   : > { %v10295_v44 = vadd.f32 %v10294_v22, %v10293_v13 }
 0xe4b   : > { %v10296_v48 = vpop.f32.mrb[94].mxu1 }
 0xe4c   : > { %v10297_v24 = vpop.f32.mrb[95].mxu1 }
 0xe4d   : > { %v10298_v2 = vadd.f32 %v10297_v24, %v10296_v48  ;;  %v16904_v24 = vld [vmem:[#allocation85_spill] sm:$0xff] }
 0xe4f   : > { %v10299_v32 = vpop.f32.mrb[96].mxu1 }
 0xe50   : > { %v10300_v18 = vpop.f32.mrb[97].mxu1 }
 0xe51   : > { %v10301_v7 = vadd.f32 %v10300_v18, %v10299_v32 }
 0xe7f   : > { %v10334_v19 = vpop.f32.mrb[98].mxu1 }
 0xe80   : > { %v10335_v12 = vpop.f32.mrb[99].mxu1 }
 0xe81   : > { %v10336_v29 = vadd.f32 %v10335_v12, %v10334_v19  ;;  %v16905_v12 = vld [vmem:[#allocation86_spill] sm:$0xff] }
 0xe83   : > { %v10337_v39 = vpop.f32.mrb[100].mxu1  ;;  %v5734_v0 = vadd.f32 %v10336_v29, %v10289_v16 }
 0xe84   : > { %v10338_v62 = vpop.f32.mrb[101].mxu1 }
 0xe85   : > { %v10339_v23 = vadd.f32 %v10338_v62, %v10337_v39 }
 0xe87   : > { %v10340_v40 = vpop.f32.mrb[102].mxu1  ;;  %v5739_v60 = vadd.f32 %v10339_v23, %v10292_v9 }
 0xe88   : > { %v10341_v53 = vpop.f32.mrb[103].mxu1 }
 0xe89   : > { %v10342_v49 = vadd.f32 %v10341_v53, %v10340_v40 }
 0xe8b   : > { %v10343_v21 = vpop.f32.mrb[104].mxu1  ;;  %v5744_v17 = vadd.f32 %v10342_v49, %v10295_v44 }
 0xe8c   : > { %v10344_v35 = vpop.f32.mrb[105].mxu1 }
 0xe8d   : > { %v10345_v45 = vadd.f32 %v10344_v35, %v10343_v21 }
 0xe8f   : > { %v10346_v61 = vpop.f32.mrb[106].mxu1  ;;  %v5749_v1 = vadd.f32 %v10345_v45, %v10298_v2 }
 0xe90   : > { %v10347_v6 = vpop.f32.mrb[107].mxu1 }
 0xe91   : > { %v10348_v51 = vadd.f32 %v10347_v6, %v10346_v61 }
 0xe93   : > { %v5823_v57 = vpop.f32.mrb[108].mxu1  ;;  %v5754_v41 = vadd.f32 %v10348_v51, %v10301_v7 }
 0xe94   : > { %v5824_v34 = vadd.f32 %v5823_v57, %v5734_v0  ;;  %v11142_v46 = vpop.f32.mrb[109].mxu1 }
 0xe96   : > { %11164 = vmatmul.mubr.msk.f32.vlgmr.msra.gmra.mrb[118].mxu1 %vm1758_vm4, %v5824_v34 }
 0xe97   : > { %v5828_v15 = vpop.f32.mrb[110].mxu1  ;;  %11166 = vmatprep.mubr.msk.f32.mxu1 %vm13660_vm0, %v16898_v28 }
 0xe98   : > { %v5829_v37 = vadd.f32 %v5828_v15, %v5739_v60  ;;  %v11145_v42 = vpop.f32.mrb[111].mxu1 }
 0xe9a   : > { %11167 = vmatmul.mubr.msk.f32.gmra.mrb[120].mxu1 %vm1758_vm4, %v5829_v37 }
 0xe9b   : > { %v5833_v63 = vpop.f32.mrb[112].mxu1  ;;  %11169 = vmatprep.mubr.msk.f32.mxu1 %vm13660_vm0, %v16898_v28 }
 0xe9c   : > { %v5834_v27 = vadd.f32 %v5833_v63, %v5744_v17  ;;  %v11148_v5 = vpop.f32.mrb[113].mxu1 }
 0xe9e   : > { %11170 = vmatmul.mubr.msk.f32.gmra.mrb[122].mxu1 %vm1758_vm4, %v5834_v27 }
 0xe9f   : > { %v5838_v26 = vpop.f32.mrb[114].mxu1  ;;  %11172 = vmatprep.mubr.msk.f32.mxu1 %vm13660_vm0, %v16898_v28 }
 0xea0   : > { %v5839_v3 = vadd.f32 %v5838_v26, %v5749_v1  ;;  %v11151_v58 = vpop.f32.mrb[115].mxu1  ;;  %v6057_v26 = vld [vmem:[#allocation16] sm:$0xff] }
 0xea2   : > { %11173 = vmatmul.mubr.msk.f32.gmra.mrb[124].mxu1 %vm1758_vm4, %v5839_v3  ;;  %v6058_v3 = vld [vmem:[#allocation16 + $0x8] sm:$0xff] }
 0xea3   : > { %v5843_v50 = vpop.f32.mrb[116].mxu1  ;;  %11175 = vmatprep.mubr.msk.f32.mxu1 %vm13660_vm0, %v16898_v28  ;;  %v11768_v58 = vpack.c.bf16 %v6058_v3, %v6057_v26 }
 0xea4   : > { %v5844_v20 = vadd.f32 %v5843_v50, %v5754_v41  ;;  %v11154_v59 = vpop.f32.mrb[117].mxu1  ;;  %v6059_v50 = vld [vmem:[#allocation16 + $0x10] sm:$0xff] }
 0xea5   : > { %11769 = vmatpush3.bf16.msra.mxu1 %v11768_v58  ;;  %v6189_v58 = vld [vmem:[%s16906_s3 + $0x58] sm:$0xff] }
 0xea6   : > { %11176 = vmatmul.mubr.msk.f32.gmra.mrb[126].mxu1 %vm1758_vm4, %v5844_v20  ;;  %11770 = vmatprep.subr.bf16.mxu1 %v16897_v33  ;;  %v6060_v20 = vld [vmem:[#allocation16 + $0x18] sm:$0xff] }
 0xea7   : > { %11186 = vmatprep.mubr.msk.f32.mxu1 %vm13660_vm0, %v16898_v28  ;;  %v11771_v59 = vpack.c.bf16 %v6060_v20, %v6059_v50  ;;  %v6190_v20 = vld [vmem:[%s16906_s3 + $0x60] sm:$0xff] }
 0xea9   : > { %11772 = vmatpush3.bf16.msra.mxu1 %v11771_v59  ;;  %v6191_v59 = vld [vmem:[%s16906_s3 + $0x68] sm:$0xff] }
 0xeaa   : > { %11773 = vmatprep.subr.bf16.mxu1 %v16897_v33 }
 0xf69   : > { %v5939_v43 = vpop.f32.mrb[118].mxu1 }
 0xf6a   : > { %v5940_v8 = vadd.f32 %v9767_v30, %v5939_v43  ;;  %v11165_v52 = vpop.f32.mrb[119].mxu1 }
 0xf6c   : > { %v15803_v14 = vadd.f32 %v5940_v8, %v16901_v47 }
 0xf6d   : > { %v5944_v38 = vpop.f32.mrb[120].mxu1 }
 0xf6e   : > { %v5945_v56 = vadd.f32 %v9767_v30, %v5944_v38  ;;  %v11168_v10 = vpop.f32.mrb[121].mxu1  ;;  %v5970_v36 = vsel %vm1758_vm4, %v15803_v14, 0.0 }
 0xf6f   : > { %5971 = vadd.xlane.f32.xlu0 %v5970_v36 }
 0xf70   : > { %v15808_v31 = vadd.f32 %v5945_v56, %v16902_v25 }
 0xf71   : > { %v5949_v11 = vpop.f32.mrb[122].mxu1 }
 0xf72   : > { %v5950_v55 = vadd.f32 %v9767_v30, %v5949_v11  ;;  %v11171_v16 = vpop.f32.mrb[123].mxu1  ;;  %v5973_v54 = vsel %vm1758_vm4, %v15808_v31, 0.0 }
 0xf73   : > { %5974 = vadd.xlane.f32.xlu1 %v5973_v54  ;;  %v9773_v16 = vld [vmem:[#allocation13] ss:$0 sm:$0xff] }
 0xf74   : > { %v15813_v9 = vadd.f32 %v5950_v55, %v16903_v4 }
 0xf75   : > { %v5954_v13 = vpop.f32.mrb[124].mxu1 }
 0xf76   : > { %v5955_v22 = vadd.f32 %v9767_v30, %v5954_v13  ;;  %v11174_v44 = vpop.f32.mrb[125].mxu1  ;;  %v5976_v48 = vsel %vm1758_vm4, %v15813_v9, 0.0 }
 0xf77   : > { %5977 = vadd.xlane.f32.xlu0 %v5976_v48  ;;  %v6179_v44 = vld [vmem:[%s16906_s3 + $0x8] sm:$0xff] }
 0xf78   : > { %v15818_v2 = vadd.f32 %v5955_v22, %v16904_v24  ;;  %v6178_v22 = vld [vmem:[%s16906_s3] sm:$0xff]  ;;  %v9774_v24 = vld [vmem:[#allocation15] ss:$0 sm:$0xff] }
 0xf79   : > { %v5959_v32 = vpop.f32.mrb[126].mxu1 }
 0xf7a   : > { %v5960_v18 = vadd.f32 %v9767_v30, %v5959_v32  ;;  %v11177_v7 = vpop.f32.mrb[127].mxu1  ;;  %v5979_v19 = vsel %vm1758_vm4, %v15818_v2, 0.0 }
 0xf7b   : > { %5980 = vadd.xlane.f32.xlu1 %v5979_v19  ;;  %v11774_v19 = vpack.c.bf16 %v6179_v44, %v6178_v22 }
 0xf7c   : > { %v15823_v29 = vadd.f32 %v5960_v18, %v16905_v12 }
 0xf7e   : > { %v5982_v39 = vsel %vm2378_vm7, %v15823_v29, 0.0 }
 0xf7f   : > { %5983 = vadd.xlane.f32.xlu0 %v5982_v39 }
 0xffc   : > { %v5972_v0 = vpop.xlane.xlu0 %5971 }
 0xffd   : > { %v5985_v62 = vmul.f32 0.03125, %v5972_v0  ;;  %v6180_v0 = vld [vmem:[%s16906_s3 + $0x10] sm:$0xff] }
 0xfff   : > { %v5990_v23 = vsub.f32 %v15803_v14, %v5985_v62  ;;  %v6181_v62 = vld [vmem:[%s16906_s3 + $0x18] sm:$0xff] }
0x1000   : > { %v5975_v40 = vpop.xlane.xlu1 %5974 }
0x1001   : > { %v5986_v60 = vmul.f32 0.03125, %v5975_v40  ;;  %v5995_v53 = vmul.f32 %v5990_v23, %v5990_v23 }
0x1003   : > { %v15829_v49 = vsub.f32 %v15808_v31, %v5986_v60  ;;  %v6000_v21 = vsel %vm1758_vm4, %v5995_v53, 0.0  ;;  %v11777_v60 = vpack.c.bf16 %v6181_v62, %v6180_v0  ;;  %v9783_v0 = vld [vmem:[%s16848_s2 + $0x128] sm:$0xff]  ;;  %v9784_v62 = vld [vmem:[%s16848_s2 + $0x130] sm:$0xff] }
0x1004   : > { %v5978_v17 = vpop.xlane.xlu0 %5977  ;;  %6001 = vadd.xlane.f32.xlu1 %v6000_v21 }
0x1005   : > { %v5987_v35 = vmul.f32 0.03125, %v5978_v17  ;;  %v5996_v45 = vmul.f32 %v15829_v49, %v15829_v49  ;;  %v6183_v17 = vld [vmem:[%s16906_s3 + $0x28] sm:$0xff] }
0x1007   : > { %v15835_v61 = vsub.f32 %v15813_v9, %v5987_v35  ;;  %v6003_v1 = vsel %vm1758_vm4, %v5996_v45, 0.0 }
0x1008   : > { %v5981_v6 = vpop.xlane.xlu1 %5980  ;;  %6004 = vadd.xlane.f32.xlu0 %v6003_v1 }
0x1009   : > { %v5988_v51 = vmul.f32 0.03125, %v5981_v6  ;;  %v5997_v57 = vmul.f32 %v15835_v61, %v15835_v61 }
0x100b   : > { %v15841_v41 = vsub.f32 %v15818_v2, %v5988_v51  ;;  %v6006_v34 = vsel %vm1758_vm4, %v5997_v57, 0.0  ;;  %v6185_v57 = vld [vmem:[%s16906_s3 + $0x38] sm:$0xff] }
0x100c   : > { %6007 = vadd.xlane.f32.xlu1 %v6006_v34  ;;  %v5984_v46 = vpop.xlane.xlu0 %5983 }
0x100d   : > { %v5989_v15 = vmul.f32 0.03125, %v5984_v46  ;;  %v5998_v37 = vmul.f32 %v15841_v41, %v15841_v41 }
0x100f   : > { %v15847_v42 = vsub.f32 %v15823_v29, %v5989_v15  ;;  %v6009_v63 = vsel %vm1758_vm4, %v5998_v37, 0.0 }
0x1010   : > { %6010 = vadd.xlane.f32.xlu0 %v6009_v63 }
0x1011   : > { %v5999_v27 = vmul.f32 %v15847_v42, %v15847_v42 }
0x1013   : > { %v6012_v5 = vsel %vm2378_vm7, %v5999_v27, 0.0  ;;  %v6187_v27 = vld [vmem:[%s16906_s3 + $0x48] sm:$0xff] }
0x1014   : > { %6013 = vadd.xlane.f32.xlu1 %v6012_v5 }
0x1091   : > { %v6002_v30 = vpop.xlane.xlu1 %6001 }
0x1092   : > { %v6015_v43 = vmul.f32 0.03125, %v6002_v30  ;;  %v11792_v30 = vpack.c.bf16 %v6191_v59, %v6190_v20 }
0x1094   : > { %v6020_v8 = vadd.f32 1e-06, %v6015_v43  ;;  %v6192_v43 = vld [vmem:[%s16906_s3 + $0x70] sm:$0xff] }
0x1095   : > { %v6005_v52 = vpop.xlane.xlu0 %6004 }
0x1096   : > { %12610 = vrsqrt.f32 %v6020_v8  ;;  %v6016_v47 = vmul.f32 0.03125, %v6005_v52  ;;  %v6193_v8 = vld [vmem:[%s16906_s3 + $0x78] sm:$0xff] }
0x1097   : > { %v11795_v52 = vpack.c.bf16 %v6193_v8, %v6192_v43 }
0x1098   : > { %v6021_v38 = vadd.f32 1e-06, %v6016_v47  ;;  %v9775_v47 = vld [vmem:[#allocation18] ss:$0 sm:$0xff] }
0x1099   : > { %v6008_v56 = vpop.xlane.xlu1 %6007 }
0x109a   : > { %12612 = vrsqrt.f32 %v6021_v38  ;;  %v6017_v10 = vmul.f32 0.03125, %v6008_v56 }
0x109c   : > { %v6022_v36 = vadd.f32 1e-06, %v6017_v10 }
0x109d   : > { %v6011_v25 = vpop.xlane.xlu0 %6010 }
0x109e   : > { %12614 = vrsqrt.f32 %v6022_v36  ;;  %v6018_v11 = vmul.f32 0.03125, %v6011_v25 }
0x10a0   : > { %v12611_v55 = vpop.eup %12610  ;;  %v6023_v54 = vadd.f32 1e-06, %v6018_v11 }
0x10a1   : > { %v6030_v4 = vmul.f32 %v12611_v55, %v5990_v23  ;;  %v6014_v13 = vpop.xlane.xlu1 %6013 }
0x10a2   : > { %12616 = vrsqrt.f32 %v6023_v54  ;;  %v6019_v48 = vmul.f32 0.03125, %v6014_v13 }
0x10a3   : > { %v6041_v32 = vmul.f32 %v9773_v16, %v6030_v4 }
0x10a4   : > { %v12613_v18 = vpop.eup %12612  ;;  %v6024_v7 = vadd.f32 1e-06, %v6019_v48 }
0x10a5   : > { %v6052_v12 = vadd.f32 %v9774_v24, %v6041_v32  ;;  %v6031_v39 = vmul.f32 %v12613_v18, %v15829_v49  ;;  %v6182_v49 = vld [vmem:[%s16906_s3 + $0x20] sm:$0xff] }
0x10a6   : > { %12618 = vrsqrt.f32 %v6024_v7  ;;  %v11780_v1 = vpack.c.bf16 %v6183_v17, %v6182_v49  ;;  %v9788_v17 = vld [vmem:[%s16848_s2 + $0x150] sm:$0xff] }
0x10a7   : > { %11187 = vmatmul.mubr.msk.f32.vlgmr.msra.gmra.mrb[128].mxu1 %vm1758_vm4, %v6052_v12  ;;  %v6042_v23 = vmul.f32 %v9773_v16, %v6031_v39  ;;  %v9782_v39 = vld [vmem:[%s16848_s2 + $0x120] sm:$0xff] }
0x10a8   : > { %v12615_v40 = vpop.eup %12614  ;;  %11189 = vmatprep.mubr.msk.f32.mxu1 %vm13660_vm0, %v16898_v28  ;;  %11775 = vmatpush3.bf16.msra.mxu1 %v11774_v19 }
0x10a9   : > { %v6053_v53 = vadd.f32 %v9774_v24, %v6042_v23  ;;  %v6032_v21 = vmul.f32 %v12615_v40, %v15835_v61  ;;  %11776 = vmatprep.subr.bf16.mxu1 %v16897_v33  ;;  %v6184_v61 = vld [vmem:[%s16906_s3 + $0x30] sm:$0xff]  ;;  %v11797_v23 = vpack.c.bf16 %v9783_v0, %v9782_v39  ;;  %v9785_v40 = vld [vmem:[%s16848_s2 + $0x138] sm:$0xff] }
0x10aa   : > { %v11783_v15 = vpack.c.bf16 %v6185_v57, %v6184_v61 }
0x10ab   : > { %11190 = vmatmul.mubr.msk.f32.gmra.mrb[130].mxu1 %vm1758_vm4, %v6053_v53  ;;  %v6043_v35 = vmul.f32 %v9773_v16, %v6032_v21  ;;  %v9786_v53 = vld [vmem:[%s16848_s2 + $0x140] sm:$0xff]  ;;  %v9787_v21 = vld [vmem:[%s16848_s2 + $0x148] sm:$0xff]  ;;  %11798 = vmatprep.subr.bf16.mxu0 %v11797_v23 }
0x10ac   : > { %v12617_v45 = vpop.eup %12616  ;;  %11192 = vmatprep.mubr.msk.f32.mxu1 %vm13660_vm0, %v16898_v28  ;;  %11778 = vmatpush3.bf16.msra.mxu1 %v11777_v60  ;;  %v11801_v60 = vpack.c.bf16 %v9785_v40, %v9784_v62  ;;  %v11805_v49 = vpack.c.bf16 %v9787_v21, %v9786_v53 }
0x10ad   : > { %v6054_v6 = vadd.f32 %v9774_v24, %v6043_v35  ;;  %v6033_v51 = vmul.f32 %v12617_v45, %v15841_v41  ;;  %11779 = vmatprep.subr.bf16.mxu1 %v16897_v33  ;;  %v6186_v41 = vld [vmem:[%s16906_s3 + $0x40] sm:$0xff]  ;;  %11800 = vmatpush3.bf16.msra.mxu0 %v11797_v23  ;;  %v9789_v35 = vld [vmem:[%s16848_s2 + $0x158] sm:$0xff] }
0x10ae   : > { %v11786_v26 = vpack.c.bf16 %v6187_v27, %v6186_v41  ;;  %11802 = vmatprep.subr.bf16.mxu0 %v11801_v60  ;;  %v11809_v45 = vpack.c.bf16 %v9789_v35, %v9788_v17  ;;  %v9801_v17 = vld [vmem:[%s16848_s2 + $0x180] sm:$0xff]  ;;  %v9802_v35 = vld [vmem:[%s16848_s2 + $0x188] sm:$0xff] }
0x10af   : > { %11193 = vmatmul.mubr.msk.f32.gmra.mrb[132].mxu1 %vm1758_vm4, %v6054_v6  ;;  %v6044_v34 = vmul.f32 %v9773_v16, %v6033_v51  ;;  %v9790_v6 = vld [vmem:[%s16848_s2 + $0x160] sm:$0xff]  ;;  %v9791_v51 = vld [vmem:[%s16848_s2 + $0x168] sm:$0xff] }
0x10b0   : > { %v12619_v46 = vpop.eup %12618  ;;  %11195 = vmatprep.mubr.msk.f32.mxu1 %vm13660_vm0, %v16898_v28  ;;  %11781 = vmatpush3.bf16.msra.mxu1 %v11780_v1  ;;  %v9781_v1 = vld [vmem:[#allocation19] ss:$0 sm:$0xff]  ;;  %v11813_v57 = vpack.c.bf16 %v9791_v51, %v9790_v6  ;;  %v9804_v6 = vld [vmem:[%s16848_s2 + $0x198] sm:$0xff] }
0x10b1   : > { %v6055_v37 = vadd.f32 %v9774_v24, %v6044_v34  ;;  %v6034_v63 = vmul.f32 %v12619_v46, %v15847_v42  ;;  %11782 = vmatprep.subr.bf16.mxu1 %v16897_v33  ;;  %v6188_v42 = vld [vmem:[%s16906_s3 + $0x50] sm:$0xff]  ;;  %11804 = vmatpush3.bf16.msra.mxu0 %v11801_v60 }
0x10b2   : > { %v11789_v50 = vpack.c.bf16 %v6189_v58, %v6188_v42  ;;  %11806 = vmatprep.subr.bf16.mxu0 %v11805_v49 }
0x10b3   : > { %11196 = vmatmul.mubr.msk.f32.gmra.mrb[134].mxu1 %vm1758_vm4, %v6055_v37  ;;  %v6045_v5 = vmul.f32 %v9773_v16, %v6034_v63  ;;  %v9793_v37 = vld [vmem:[%s16848_s2 + $0x178] sm:$0xff] }
0x10b4   : > { %11198 = vmatprep.mubr.msk.f32.mxu1 %vm13660_vm0, %v16898_v28  ;;  %11784 = vmatpush3.bf16.msra.mxu1 %v11783_v15  ;;  %v9792_v15 = vld [vmem:[%s16848_s2 + $0x170] sm:$0xff] }
0x10b5   : > { %v6056_v3 = vadd.f32 %v9774_v24, %v6045_v5  ;;  %11785 = vmatprep.subr.bf16.mxu1 %v16897_v33  ;;  %11808 = vmatpush3.bf16.msra.mxu0 %v11805_v49  ;;  %v11817_v27 = vpack.c.bf16 %v9793_v37, %v9792_v15  ;;  %v9808_v15 = vld [vmem:[%s16848_s2 + $0x1b8] sm:$0xff] }
0x10b6   : > { %11810 = vmatprep.subr.bf16.mxu0 %v11809_v45 }
0x10b7   : > { %11199 = vmatmul.mubr.msk.f32.gmra.mrb[136].mxu1 %vm1758_vm4, %v6056_v3 }
0x10b8   : > { %11787 = vmatpush3.bf16.msra.mxu1 %v11786_v26  ;;  %11233 = vmatprep.mubr.msk.f32.mxu1 %vm13660_vm0, %v16898_v28 }
0x10b9   : > { %11788 = vmatprep.subr.bf16.mxu1 %v16897_v33  ;;  %11812 = vmatpush3.bf16.msra.mxu0 %v11809_v45  ;;  %v9803_v45 = vld [vmem:[%s16848_s2 + $0x190] sm:$0xff] }
0x10ba   : > { %11814 = vmatprep.subr.bf16.mxu0 %v11813_v57  ;;  %v11825_v51 = vpack.c.bf16 %v9804_v6, %v9803_v45 }
0x10bc   : > { %11790 = vmatpush3.bf16.msra.mxu1 %v11789_v50 }
0x10bd   : > { %11791 = vmatprep.subr.bf16.mxu1 %v16897_v33  ;;  %11816 = vmatpush3.bf16.msra.mxu0 %v11813_v57  ;;  %v9806_v57 = vld [vmem:[%s16848_s2 + $0x1a8] sm:$0xff] }
0x10be   : > { %11818 = vmatprep.subr.bf16.mxu0 %v11817_v27 }
0x10c0   : > { %11793 = vmatpush3.bf16.msra.mxu1 %v11792_v30 }
0x10c1   : > { %11794 = vmatprep.subr.bf16.mxu1 %v16897_v33  ;;  %11820 = vmatpush3.bf16.msra.mxu0 %v11817_v27 }
0x10c4   : > { %11796 = vmatpush3.bf16.msra.mxu1 %v11795_v52 }
0x10c5   : > { %11821 = vmatprep.subr.bf16.mxu1 %v16897_v33 }
0x117a   : > { %v6149_v38 = vpop.f32.mrb[128].mxu1 }
0x117b   : > { %v6150_v56 = vadd.f32 %v9775_v47, %v6149_v38  ;;  %v11188_v10 = vpop.f32.mrb[129].mxu1 }
0x117d   : > { %v6173_v36 = vmax.f32 %v6150_v56, 0.0 }
0x117e   : > { %v6154_v25 = vpop.f32.mrb[130].mxu1 }
0x117f   : > { %v6155_v11 = vadd.f32 %v9775_v47, %v6154_v25  ;;  %v11191_v55 = vpop.f32.mrb[131].mxu1  ;;  %11234 = vmatmul.mubr.f32.vlgmr.msra.gmra.mrb[138].mxu1 %v6173_v36 }
0x1180   : > { %11236 = vmatprep.mubr.msk.f32.mxu1 %vm13660_vm0, %v16898_v28 }
0x1181   : > { %v6174_v16 = vmax.f32 %v6155_v11, 0.0 }
0x1182   : > { %v6159_v54 = vpop.f32.mrb[132].mxu1 }
0x1183   : > { %v6160_v4 = vadd.f32 %v9775_v47, %v6159_v54  ;;  %v11194_v13 = vpop.f32.mrb[133].mxu1  ;;  %11237 = vmatmul.mubr.f32.gmra.mrb[140].mxu1 %v6174_v16 }
0x1184   : > { %11239 = vmatprep.mubr.msk.f32.mxu1 %vm13660_vm0, %v16898_v28 }
0x1185   : > { %v6175_v22 = vmax.f32 %v6160_v4, 0.0 }
0x1186   : > { %v6164_v44 = vpop.f32.mrb[134].mxu1 }
0x1187   : > { %v6165_v48 = vadd.f32 %v9775_v47, %v6164_v44  ;;  %v11197_v24 = vpop.f32.mrb[135].mxu1  ;;  %11240 = vmatmul.mubr.f32.gmra.mrb[142].mxu1 %v6175_v22 }
0x1188   : > { %11242 = vmatprep.mubr.msk.f32.mxu1 %vm13660_vm0, %v16898_v28 }
0x1189   : > { %v6176_v32 = vmax.f32 %v6165_v48, 0.0 }
0x118a   : > { %v6169_v18 = vpop.f32.mrb[136].mxu1 }
0x118b   : > { %v6170_v7 = vadd.f32 %v9775_v47, %v6169_v18  ;;  %v11200_v19 = vpop.f32.mrb[137].mxu1  ;;  %11243 = vmatmul.mubr.f32.gmra.mrb[144].mxu1 %v6176_v32 }
0x118c   : > { %11245 = vmatprep.mubr.msk.f32.mxu1 %vm13660_vm0, %v16898_v28 }
0x118d   : > { %v6177_v12 = vmax.f32 %v6170_v7, 0.0 }
0x118f   : > { %11246 = vmatmul.mubr.f32.gmra.mrb[146].mxu1 %v6177_v12 }
0x1190   : > { %11302 = vmatprep.mubr.msk.f32.mxu1 %vm13660_vm0, %v16898_v28 }
0x1252   : > { %v6267_v61 = vpop.f32.mrb[138].mxu1 }
0x1253   : > { %v6268_v34 = vadd.f32 %v9781_v1, %v6267_v61  ;;  %v11235_v46 = vpop.f32.mrb[139].mxu1  ;;  %v9805_v61 = vld [vmem:[%s16848_s2 + $0x1a0] sm:$0xff] }
0x1254   : > { %v9807_v46 = vld [vmem:[%s16848_s2 + $0x1b0] sm:$0xff] }
0x1255   : > { %v6291_v63 = vadd.f32 %v6268_v34, %v15803_v14  ;;  %v11828_v34 = vpack.c.bf16 %v9806_v57, %v9805_v61  ;;  %v11831_v37 = vpack.c.bf16 %v9808_v15, %v9807_v46  ;;  %v9820_v61 = vld [vmem:[%s16848_s2 + $0x1e8] sm:$0xff]  ;;  %v9821_v57 = vld [vmem:[%s16848_s2 + $0x1f0] sm:$0xff]  ;;  %v9822_v46 = vld [vmem:[%s16848_s2 + $0x1f8] sm:$0xff] }
0x1256   : > { %v6272_v41 = vpop.f32.mrb[140].mxu1  ;;  %v11843_v15 = vpack.c.bf16 %v9822_v46, %v9821_v57  ;;  %v9835_v57 = vld [vmem:[#allocation7 + $0x5] ss:$0 sm:$0xff] }
0x1257   : > { %v6273_v5 = vadd.f32 %v9781_v1, %v6272_v41  ;;  %v11238_v26 = vpop.f32.mrb[141].mxu1  ;;  %v6301_v42 = vrot.slane %v6291_v63, 3  ;;  %v6321_v50 = vrot.slane %v6291_v63, 6  ;;  %v9810_v41 = vld [vmem:[%s16848_s2 + $0x1c8] sm:$0xff] }
0x1258   : > { %v9812_v26 = vld [vmem:[%s16848_s2 + $0x1d8] sm:$0xff] }
0x1259   : > { %v6292_v3 = vadd.f32 %v6273_v5, %v15808_v31  ;;  %v9811_v5 = vld [vmem:[%s16848_s2 + $0x1d0] sm:$0xff] }
0x125a   : > { %v6277_v58 = vpop.f32.mrb[142].mxu1 }
0x125b   : > { %v6302_v20 = vrot.slane %v6292_v3, 3  ;;  %v6322_v59 = vrot.slane %v6292_v3, 6  ;;  %v6278_v30 = vadd.f32 %v9781_v1, %v6277_v58  ;;  %v11241_v43 = vpop.f32.mrb[143].mxu1 }
0x125d   : > { %v6293_v8 = vadd.f32 %v6278_v30, %v15813_v9  ;;  %v6323_v14 = vsel %vm2917_vm9, %v6321_v50, %v6322_v59  ;;  %v6303_v52 = vsel %vm6300_vm11, %v6301_v42, %v6302_v20  ;;  %v9794_v42 = vld [vmem:[#allocation4 + $0x3] ss:$0 sm:$0xff] }
0x125e   : > { %6330 = vrot.lane.b32.xlu1 %v6323_v14, %s16766_s10  ;;  %6308 = vrot.lane.b32.xlu0 %v6303_v52, %s13662_s9  ;;  %v6282_v31 = vpop.f32.mrb[144].mxu1 }
0x125f   : > { %v6304_v47 = vrot.slane %v6293_v8, 3  ;;  %v6283_v38 = vadd.f32 %v9781_v1, %v6282_v31  ;;  %v11244_v56 = vpop.f32.mrb[145].mxu1  ;;  %v6324_v10 = vrot.slane %v6293_v8, 6 }
0x1261   : > { %v6294_v36 = vadd.f32 %v6283_v38, %v15818_v2  ;;  %v6305_v25 = vsel %vm6300_vm11, %v6302_v20, %v6304_v47  ;;  %v6325_v13 = vsel %vm2917_vm9, %v6322_v59, %v6324_v10  ;;  %v9799_v59 = vld [vmem:[#allocation6 + $0x3] ss:$0 sm:$0xff] }
0x1262   : > { %6310 = vrot.lane.b32.xlu1 %v6305_v25, %s13662_s9  ;;  %v6287_v9 = vpop.f32.mrb[146].mxu1 }
0x1263   : > { %v6306_v11 = vrot.slane %v6294_v36, 3  ;;  %v6288_v55 = vadd.f32 %v9781_v1, %v6287_v9  ;;  %v11247_v16 = vpop.f32.mrb[147].mxu1  ;;  %v6326_v54 = vrot.slane %v6294_v36, 6  ;;  %v11822_v1 = vpack.c.bf16 %v9802_v35, %v9801_v17 }
0x1265   : > { %v6295_v4 = vadd.f32 %v6288_v55, %v15823_v29  ;;  %v6307_v22 = vsel %vm6300_vm11, %v6304_v47, %v6306_v11  ;;  %v6327_v44 = vsel %vm2917_vm9, %v6324_v10, %v6326_v54  ;;  %11823 = vmatpush3.bf16.msra.mxu1 %v11822_v1 }
0x1266   : > { %6332 = vrot.lane.b32.xlu1 %v6325_v13, %s16766_s10  ;;  %6312 = vrot.lane.b32.xlu0 %v6307_v22, %s13662_s9 }
0x1267   : > { %v6328_v2 = vrot.slane %v6295_v4, 6  ;;  %11824 = vmatprep.subr.bf16.mxu1 %v16897_v33 }
0x1269   : > { %v6329_v48 = vsel %vm2917_vm9, %v6326_v54, %v6328_v2  ;;  %11826 = vmatpush3.bf16.msra.mxu1 %v11825_v51  ;;  %v9819_v51 = vld [vmem:[%s16848_s2 + $0x1e0] sm:$0xff] }
0x126a   : > { %6314 = vrot.lane.b32.xlu1 %v6306_v11, %s13662_s9  ;;  %6334 = vrot.lane.b32.xlu0 %v6327_v44, %s16766_s10 }
0x126b   : > { %11827 = vmatprep.subr.bf16.mxu1 %v16897_v33 }
0x126d   : > { %11829 = vmatpush3.bf16.msra.mxu1 %v11828_v34  ;;  %v11839_v34 = vpack.c.bf16 %v9820_v61, %v9819_v51 }
0x126e   : > { %6336 = vrot.lane.b32.xlu1 %v6329_v48, %s16766_s10  ;;  %11830 = vmatprep.subr.bf16.mxu1 %v16897_v33 }
0x126f   : > { %11840 = vmatprep.subr.bf16.mxu0 %v11839_v34 }
0x1271   : > { %11832 = vmatpush3.bf16.msra.mxu1 %v11831_v37  ;;  %v9823_v37 = vld [vmem:[%s16848_s2 + $0x200] sm:$0xff] }
0x1272   : > { %11833 = vmatprep.subr.bf16.mxu1 %v16897_v33 }
0x12d0   : > { %v6331_v29 = vpop.permute.xlu1 %6330  ;;  %v6309_v24 = vpop.permute.xlu0 %6308 }
0x12d1   : > { %v6342_v32 = vsel %vm1758_vm4, %v6291_v63, %v6309_v24  ;;  %v9809_v63 = vld [vmem:[%s16848_s2 + $0x1c0] sm:$0xff] }
0x12d2   : > { %v6346_v18 = vsel %vm1764_vm5, %v6342_v32, %v6331_v29  ;;  %v11834_v27 = vpack.c.bf16 %v9810_v41, %v9809_v63  ;;  %v9824_v63 = vld [vmem:[%s16848_s2 + $0x208] sm:$0xff] }
0x12d3   : > { %11272 = vmatprep.mubr.msk.f32.mxu0 %vm1789_vm6, %v6346_v18  ;;  %v11847_v41 = vpack.c.bf16 %v9824_v63, %v9823_v37 }
0x12d4   : > { %v6311_v7 = vpop.permute.xlu1 %6310  ;;  %11835 = vmatpush3.bf16.msra.mxu1 %v11834_v27  ;;  %v9825_v27 = vld [vmem:[%s16848_s2 + $0x210] sm:$0xff] }
0x12d5   : > { %v6343_v19 = vsel %vm1758_vm4, %v6292_v3, %v6311_v7  ;;  %v11837_v3 = vpack.c.bf16 %v9812_v26, %v9811_v5  ;;  %11836 = vmatprep.subr.bf16.mxu1 %v16897_v33  ;;  %v9826_v5 = vld [vmem:[%s16848_s2 + $0x218] sm:$0xff] }
0x12d6   : > { %v11851_v26 = vpack.c.bf16 %v9826_v5, %v9825_v27 }
0x12d8   : > { %v6333_v12 = vpop.permute.xlu1 %6332  ;;  %v6313_v39 = vpop.permute.xlu0 %6312  ;;  %11838 = vmatpush3.bf16.msra.mxu1 %v11837_v3  ;;  %v9813_v3 = vld [vmem:[#allocation4 + $0x4] ss:$0 sm:$0xff] }
0x12d9   : > { %v6347_v0 = vsel %vm1764_vm5, %v6343_v19, %v6333_v12  ;;  %v6344_v62 = vsel %vm1758_vm4, %v6293_v8, %v6313_v39  ;;  %v9800_v8 = vld [vmem:[#allocation7 + $0x3] ss:$0 sm:$0xff] }
0x12da   : > { %11273 = vmatmul.mubr.msk.f32.vlgmr.msra.gmra.mrb[166].mxu0 %vm1789_vm6, %v6347_v0 }
0x12db   : > { %11842 = vmatpush3.bf16.msra.mxu0 %v11839_v34 }
0x12dc   : > { %v6315_v23 = vpop.permute.xlu1 %6314  ;;  %v6335_v40 = vpop.permute.xlu0 %6334  ;;  %11844 = vmatprep.subr.bf16.mxu0 %v11843_v15 }
0x12dd   : > { %v6348_v60 = vsel %vm1764_vm5, %v6344_v62, %v6335_v40  ;;  %v6345_v53 = vsel %vm1758_vm4, %v6294_v36, %v6315_v23 }
0x12de   : > { %11275 = vmatprep.mubr.msk.f32.mxu0 %vm1789_vm6, %v6348_v60 }
0x12df   : > { %11846 = vmatpush3.bf16.msra.mxu0 %v11843_v15 }
0x12e0   : > { %v6337_v21 = vpop.permute.xlu1 %6336  ;;  %11848 = vmatprep.subr.bf16.mxu0 %v11847_v41 }
0x12e1   : > { %v6349_v49 = vsel %vm1764_vm5, %v6345_v53, %v6337_v21 }
0x12e2   : > { %11276 = vmatmul.mubr.msk.f32.gmra.mrb[168].mxu0 %vm1789_vm6, %v6349_v49 }
0x12e3   : > { %11850 = vmatpush3.bf16.msra.mxu0 %v11847_v41 }
0x12e4   : > { %11852 = vmatprep.subr.bf16.mxu0 %v11851_v26 }
0x12e7   : > { %11854 = vmatpush3.bf16.msra.mxu0 %v11851_v26 }
0x13ad   : > { %v11274_v58 = vpop.f32.mrb[166].mxu0 }
0x13ae   : > { %v6455_v50 = vadd.f32 %v11274_v58, %v9794_v42  ;;  %v6449_v20 = vpop.f32.mrb[167].mxu0 }
0x13af   : > { %v6450_v30 = vadd.f32 %v9794_v42, %v6449_v20 }
0x13b0   : > { %v6469_v43 = vmax.f32 %v6455_v50, 0.0 }
0x13b1   : > { %v6468_v14 = vmax.f32 %v6450_v30, 0.0  ;;  %v9827_v30 = vld [vmem:[%s16848_s2 + $0x220] sm:$0xff] }
0x13b2   : > { %v6481_v52 = vmul.f32 %v9799_v59, %v6469_v43  ;;  %v9828_v43 = vld [vmem:[%s16848_s2 + $0x228] sm:$0xff] }
0x13b3   : > { %v6480_v31 = vmul.f32 %v9799_v59, %v6468_v14  ;;  %v11855_v14 = vpack.c.bf16 %v9828_v43, %v9827_v30 }
0x13b4   : > { %v6493_v47 = vadd.f32 %v9800_v8, %v6481_v52 }
0x13b5   : > { %v6492_v38 = vadd.f32 %v9800_v8, %v6480_v31  ;;  %v11277_v56 = vpop.f32.mrb[168].mxu0  ;;  %11856 = vmatprep.subr.bf16.mxu0 %v11855_v14 }
0x13b6   : > { %v6465_v10 = vadd.f32 %v11277_v56, %v9794_v42  ;;  %v6459_v36 = vpop.f32.mrb[169].mxu0  ;;  %v6501_v25 = vrot.slane %v6493_v47, 3  ;;  %v6517_v9 = vrot.slane %v6493_v47, 6  ;;  %11858 = vmatpush3.bf16.msra.mxu0 %v11855_v14  ;;  %v6871_v14 = vld [vmem:[%s16907_s5 + $0x8] sm:$0xff] }
0x13b7   : > { %v6460_v11 = vadd.f32 %v9794_v42, %v6459_v36  ;;  %v6500_v55 = vrot.slane %v6492_v38, 3  ;;  %v6516_v16 = vrot.slane %v6492_v38, 6  ;;  %v9830_v36 = vld [vmem:[%s16848_s2 + $0x238] sm:$0xff] }
0x13b8   : > { %v6471_v54 = vmax.f32 %v6465_v10, 0.0  ;;  %v9829_v10 = vld [vmem:[%s16848_s2 + $0x230] sm:$0xff] }
0x13b9   : > { %v6470_v4 = vmax.f32 %v6460_v11, 0.0  ;;  %v6502_v13 = vsel %vm6300_vm11, %v6500_v55, %v6501_v25  ;;  %v6518_v22 = vsel %vm2917_vm9, %v6516_v16, %v6517_v9 }
0x13ba   : > { %v6483_v2 = vmul.f32 %v9799_v59, %v6471_v54  ;;  %6507 = vrot.lane.b32.xlu0 %v6502_v13, %s13662_s9  ;;  %6523 = vrot.lane.b32.xlu1 %v6518_v22, %s16766_s10 }
0x13bb   : > { %v6482_v44 = vmul.f32 %v9799_v59, %v6470_v4  ;;  %v9817_v59 = vld [vmem:[#allocation6 + $0x4] ss:$0 sm:$0xff] }
0x13bc   : > { %v6495_v48 = vadd.f32 %v9800_v8, %v6483_v2 }
0x13bd   : > { %v6494_v29 = vadd.f32 %v9800_v8, %v6482_v44 }
0x13be   : > { %v6505_v18 = vrot.slane %v6495_v48, 3  ;;  %v6521_v7 = vrot.slane %v6495_v48, 6 }
0x13bf   : > { %v6519_v24 = vrot.slane %v6494_v29, 6  ;;  %v6503_v32 = vrot.slane %v6494_v29, 3 }
0x13c1   : > { %v6520_v19 = vsel %vm2917_vm9, %v6517_v9, %v6519_v24  ;;  %v6504_v12 = vsel %vm6300_vm11, %v6501_v25, %v6503_v32  ;;  %v6522_v39 = vsel %vm2917_vm9, %v6519_v24, %v6521_v7  ;;  %v6506_v0 = vsel %vm6300_vm11, %v6503_v32, %v6505_v18 }
0x13c2   : > { %6525 = vrot.lane.b32.xlu1 %v6520_v19, %s16766_s10  ;;  %6509 = vrot.lane.b32.xlu0 %v6504_v12, %s13662_s9  ;;  %v11859_v9 = vpack.c.bf16 %v9830_v36, %v9829_v10 }
0x13c4   : > { %11860 = vmatprep.subr.bf16.mxu0 %v11859_v9 }
0x13c5   : > { %11862 = vmatpush3.bf16.msra.mxu0 %v11859_v9 }
0x13c6   : > { %6527 = vrot.lane.b32.xlu1 %v6522_v39, %s16766_s10  ;;  %6511 = vrot.lane.b32.xlu0 %v6506_v0, %s13662_s9 }
0x142c   : > { %v6508_v62 = vpop.permute.xlu0 %6507  ;;  %v6524_v23 = vpop.permute.xlu1 %6523 }
0x142d   : > { %v6532_v40 = vsel %vm1758_vm4, %v6492_v38, %v6508_v62  ;;  %v9818_v38 = vld [vmem:[#allocation7 + $0x4] ss:$0 sm:$0xff] }
0x142e   : > { %v6535_v60 = vsel %vm1764_vm5, %v6532_v40, %v6524_v23 }
0x142f   : > { %11303 = vmatmul.mubr.msk.f32.vlgmr.msra.gmra.mrb[148].mxu1 %vm1789_vm6, %v6535_v60 }
0x1430   : > { %11305 = vmatprep.mubr.msk.f32.mxu1 %vm13660_vm0, %v16898_v28 }
0x1434   : > { %v6510_v53 = vpop.permute.xlu0 %6509  ;;  %v6526_v21 = vpop.permute.xlu1 %6525 }
0x1435   : > { %v6533_v49 = vsel %vm1758_vm4, %v6493_v47, %v6510_v53 }
0x1436   : > { %v6536_v17 = vsel %vm1764_vm5, %v6533_v49, %v6526_v21 }
0x1437   : > { %11306 = vmatmul.mubr.msk.f32.gmra.mrb[150].mxu1 %vm1789_vm6, %v6536_v17  ;;  %v9831_v17 = vld [vmem:[#allocation4 + $0x5] ss:$0 sm:$0xff] }
0x1438   : > { %v6512_v35 = vpop.permute.xlu0 %6511  ;;  %v6528_v45 = vpop.permute.xlu1 %6527  ;;  %11308 = vmatprep.mubr.msk.f32.mxu1 %vm13660_vm0, %v16898_v28 }
0x1439   : > { %v6534_v1 = vsel %vm1758_vm4, %v6494_v29, %v6512_v35 }
0x143a   : > { %v6537_v6 = vsel %vm1764_vm5, %v6534_v1, %v6528_v45 }
0x143b   : > { %11309 = vmatmul.mubr.msk.f32.gmra.mrb[152].mxu1 %vm1789_vm6, %v6537_v6  ;;  %v9834_v6 = vld [vmem:[#allocation6 + $0x5] ss:$0 sm:$0xff] }
0x1502   : > { %v6634_v42 = vpop.f32.mrb[148].mxu1 }
0x1503   : > { %v6635_v58 = vadd.f32 %v9813_v3, %v6634_v42  ;;  %v11304_v50 = vpop.f32.mrb[149].mxu1 }
0x1505   : > { %v6648_v20 = vmax.f32 %v6635_v58, 0.0 }
0x1507   : > { %v6659_v52 = vmul.f32 %v9817_v59, %v6648_v20 }
0x1509   : > { %v6670_v11 = vadd.f32 %v9818_v38, %v6659_v52 }
0x150a   : > { %v6639_v8 = vpop.f32.mrb[150].mxu1 }
0x150b   : > { %v6640_v31 = vadd.f32 %v9813_v3, %v6639_v8  ;;  %v11307_v47 = vpop.f32.mrb[151].mxu1  ;;  %v6676_v2 = vrot.slane %v6670_v11, 3  ;;  %v6687_v18 = vrot.slane %v6670_v11, 6  ;;  %v6870_v8 = vld [vmem:[%s16907_s5] sm:$0xff] }
0x150c   : > { %v11863_v52 = vpack.c.bf16 %v6871_v14, %v6870_v8  ;;  %v6873_v47 = vld [vmem:[%s16907_s5 + $0x18] sm:$0xff] }
0x150d   : > { %v6649_v56 = vmax.f32 %v6640_v31, 0.0  ;;  %v6872_v31 = vld [vmem:[%s16907_s5 + $0x10] sm:$0xff]  ;;  %v7026_v14 = vld [vmem:[#allocation36 + $0xf0] sm:$0xff] }
0x150e   : > { %v6644_v25 = vpop.f32.mrb[152].mxu1  ;;  %11864 = vmatprep.subr.bf16.mxu1 %v11863_v52  ;;  %v7025_v8 = vld [vmem:[#allocation36 + $0xe8] sm:$0xff] }
0x150f   : > { %v6660_v55 = vmul.f32 %v9817_v59, %v6649_v56  ;;  %v6645_v16 = vadd.f32 %v9813_v3, %v6644_v25  ;;  %v11310_v54 = vpop.f32.mrb[153].mxu1  ;;  %11866 = vmatpush3.bf16.msra.mxu1 %v11863_v52  ;;  %v7027_v52 = vld [vmem:[#allocation36 + $0xf8] sm:$0xff] }
0x1511   : > { %v6671_v4 = vadd.f32 %v9818_v38, %v6660_v55  ;;  %v6650_v13 = vmax.f32 %v6645_v16, 0.0  ;;  %v9836_v16 = vld [vmem:[#allocation22] ss:$0 sm:$0xff] }
0x1513   : > { %v6661_v22 = vmul.f32 %v9817_v59, %v6650_v13  ;;  %v6677_v44 = vrot.slane %v6671_v4, 3  ;;  %v6688_v24 = vrot.slane %v6671_v4, 6 }
0x1515   : > { %v6672_v48 = vadd.f32 %v9818_v38, %v6661_v22  ;;  %v6678_v29 = vsel %vm6300_vm11, %v6676_v2, %v6677_v44  ;;  %v6689_v19 = vsel %vm2917_vm9, %v6687_v18, %v6688_v24  ;;  %v11867_v38 = vpack.c.bf16 %v6873_v47, %v6872_v31 }
0x1516   : > { %6681 = vrot.lane.b32.xlu0 %v6678_v29, %s13662_s9 }
0x1517   : > { %v6679_v32 = vrot.slane %v6672_v48, 3  ;;  %v6690_v7 = vrot.slane %v6672_v48, 6  ;;  %11868 = vmatprep.subr.bf16.mxu1 %v11867_v38 }
0x1518   : > { %11870 = vmatpush3.bf16.msra.mxu1 %v11867_v38 }
0x1519   : > { %v6680_v12 = vsel %vm6300_vm11, %v6677_v44, %v6679_v32  ;;  %v6691_v39 = vsel %vm2917_vm9, %v6688_v24, %v6690_v7  ;;  %v6996_v24 = vld [vmem:[#allocation36] sm:$0xff]  ;;  %v9838_v32 = vld [vmem:[#allocation25] ss:$0 sm:$0xff] }
0x151a   : > { %6692 = vrot.lane.b32.xlu0 %v6689_v19, %s16766_s10  ;;  %6683 = vrot.lane.b32.xlu1 %v6680_v12, %s13662_s9 }
0x151e   : > { %6694 = vrot.lane.b32.xlu1 %v6691_v39, %s16766_s10 }
0x1588   : > { %v6682_v0 = vpop.permute.xlu0 %6681 }
0x1589   : > { %v6698_v62 = vsel %vm1758_vm4, %v6670_v11, %v6682_v0 }
0x158c   : > { %v6693_v23 = vpop.permute.xlu0 %6692  ;;  %v6684_v40 = vpop.permute.xlu1 %6683 }
0x158d   : > { %v6700_v60 = vsel %vm1764_vm5, %v6698_v62, %v6693_v23  ;;  %v6699_v53 = vsel %vm1758_vm4, %v6671_v4, %v6684_v40  ;;  %v9837_v4 = vld [vmem:[#allocation24] ss:$0 sm:$0xff]  ;;  %v6997_v40 = vld [vmem:[#allocation36 + $0x8] sm:$0xff] }
0x158e   : > { %11335 = vmatprep.mubr.msk.f32.mxu0 %vm1789_vm6, %v6700_v60  ;;  %v6998_v60 = vld [vmem:[#allocation36 + $0x10] sm:$0xff] }
0x1590   : > { %v6695_v21 = vpop.permute.xlu1 %6694 }
0x1591   : > { %v6701_v49 = vsel %vm1764_vm5, %v6699_v53, %v6695_v21  ;;  %v6999_v53 = vld [vmem:[#allocation36 + $0x18] sm:$0xff]  ;;  %v7000_v21 = vld [vmem:[#allocation36 + $0x20] sm:$0xff] }
0x1592   : > { %11336 = vmatmul.mubr.msk.f32.vlgmr.msra.gmra.mrb[170].mxu0 %vm1789_vm6, %v6701_v49  ;;  %v7001_v49 = vld [vmem:[#allocation36 + $0x28] sm:$0xff] }
0x1593   : > { %11353 = vmatprep.mubr.msk.f32.mxu0 %vm1568_vm1, %v6996_v24 }
0x1665   : > { %v11337_v35 = vpop.f32.mrb[170].mxu0 }
0x1666   : > { %v6801_v45 = vadd.f32 %v11337_v35, %v9831_v17  ;;  %v6795_v1 = vpop.f32.mrb[171].mxu0  ;;  %v7003_v35 = vld [vmem:[#allocation36 + $0x38] sm:$0xff] }
0x1667   : > { %v6796_v51 = vadd.f32 %v9831_v17, %v6795_v1  ;;  %v7002_v17 = vld [vmem:[#allocation36 + $0x30] sm:$0xff]  ;;  %v7005_v1 = vld [vmem:[#allocation36 + $0x48] sm:$0xff] }
0x1668   : > { %v6805_v61 = vmax.f32 %v6801_v45, 0.0  ;;  %v7004_v45 = vld [vmem:[#allocation36 + $0x40] sm:$0xff] }
0x1669   : > { %v6804_v34 = vmax.f32 %v6796_v51, 0.0  ;;  %v7007_v51 = vld [vmem:[#allocation36 + $0x58] sm:$0xff] }
0x166a   : > { %v6815_v46 = vmul.f32 %v9834_v6, %v6805_v61  ;;  %v7008_v61 = vld [vmem:[#allocation36 + $0x60] sm:$0xff] }
0x166b   : > { %v6814_v15 = vmul.f32 %v9834_v6, %v6804_v34  ;;  %v7006_v6 = vld [vmem:[#allocation36 + $0x50] sm:$0xff] }
0x166c   : > { %v16020_v37 = vadd.f32 %v9835_v57, %v6815_v46  ;;  %v7010_v34 = vld [vmem:[#allocation36 + $0x70] sm:$0xff]  ;;  %v7011_v46 = vld [vmem:[#allocation36 + $0x78] sm:$0xff] }
0x166d   : > { %v16022_v63 = vadd.f32 %v9835_v57, %v6814_v15  ;;  %v7009_v57 = vld [vmem:[#allocation36 + $0x68] sm:$0xff]  ;;  %v7012_v15 = vld [vmem:[#allocation36 + $0x80] sm:$0xff] }
0x166e   : > { %v6831_v41 = vsel %vm1758_vm4, %v16020_v37, 0.0 }
0x166f   : > { %6832 = vadd.xlane.f32.xlu1 %v6831_v41  ;;  %v6828_v27 = vsel %vm1758_vm4, %v16022_v63, 0.0  ;;  %v7013_v41 = vld [vmem:[#allocation36 + $0x88] sm:$0xff] }
0x1670   : > { %6829 = vadd.xlane.f32.xlu0 %v6828_v27  ;;  %v7014_v27 = vld [vmem:[#allocation36 + $0x90] sm:$0xff] }
0x16fc   : > { %v6833_v5 = vpop.xlane.xlu1 %6832 }
0x16fd   : > { %v6835_v26 = vmul.f32 0.03125, %v6833_v5  ;;  %v6830_v3 = vpop.xlane.xlu0 %6829  ;;  %v7015_v5 = vld [vmem:[#allocation36 + $0x98] sm:$0xff] }
0x16fe   : > { %v6834_v42 = vmul.f32 0.03125, %v6830_v3  ;;  %v7017_v3 = vld [vmem:[#allocation36 + $0xa8] sm:$0xff] }
0x16ff   : > { %v6837_v58 = vsub.f32 %v16020_v37, %v6835_v26  ;;  %v7016_v26 = vld [vmem:[#allocation36 + $0xa0] sm:$0xff] }
0x1700   : > { %v6836_v50 = vsub.f32 %v16022_v63, %v6834_v42  ;;  %v7018_v42 = vld [vmem:[#allocation36 + $0xb0] sm:$0xff] }
0x1701   : > { %v6839_v30 = vmul.f32 %v6837_v58, %v6837_v58 }
0x1702   : > { %v6838_v20 = vmul.f32 %v6836_v50, %v6836_v50 }
0x1703   : > { %v6843_v43 = vsel %vm1758_vm4, %v6839_v30, 0.0  ;;  %v7023_v30 = vld [vmem:[#allocation36 + $0xd8] sm:$0xff] }
0x1704   : > { %v6840_v59 = vsel %vm1758_vm4, %v6838_v20, 0.0  ;;  %v7021_v20 = vld [vmem:[#allocation36 + $0xc8] sm:$0xff] }
0x1705   : > { %6841 = vadd.xlane.f32.xlu0 %v6840_v59  ;;  %v7022_v59 = vld [vmem:[#allocation36 + $0xd0] sm:$0xff] }
0x1709   : > { %6844 = vadd.xlane.f32.xlu0 %v6843_v43  ;;  %v7024_v43 = vld [vmem:[#allocation36 + $0xe0] sm:$0xff] }
0x1792   : > { %v6842_v56 = vpop.xlane.xlu0 %6841 }
0x1793   : > { %v6846_v10 = vmul.f32 0.03125, %v6842_v56 }
0x1795   : > { %v6848_v36 = vadd.f32 1e-06, %v6846_v10 }
0x1796   : > { %v6845_v25 = vpop.xlane.xlu0 %6844 }
0x1797   : > { %12620 = vrsqrt.f32 %v6848_v36  ;;  %v6847_v9 = vmul.f32 0.03125, %v6845_v25  ;;  %v6964_v36 = vld [vmem:[%s16908_s18] sm:$0xff]  ;;  %v6965_v25 = vld [vmem:[%s16908_s18 + $0x8] sm:$0xff] }
0x1799   : > { %v6849_v11 = vadd.f32 1e-06, %v6847_v9 }
0x179b   : > { %12622 = vrsqrt.f32 %v6849_v11 }
0x17a1   : > { %v12621_v55 = vpop.eup %12620 }
0x17a2   : > { %v6852_v54 = vmul.f32 %v12621_v55, %v6836_v50  ;;  %v7020_v50 = vld [vmem:[#allocation36 + $0xc0] sm:$0xff] }
0x17a4   : > { %v6860_v13 = vmul.f32 %v9836_v16, %v6852_v54 }
0x17a5   : > { %v12623_v22 = vpop.eup %12622 }
0x17a6   : > { %v6853_v2 = vmul.f32 %v12623_v22, %v6837_v58  ;;  %v6868_v44 = vadd.f32 %v9837_v4, %v6860_v13  ;;  %v7019_v58 = vld [vmem:[#allocation36 + $0xb8] sm:$0xff] }
0x17a8   : > { %v6861_v48 = vmul.f32 %v9836_v16, %v6853_v2  ;;  %11346 = vmatprep.mubr.msk.f32.mxu1 %vm1758_vm4, %v6868_v44  ;;  %v6967_v16 = vld [vmem:[%s16908_s18 + $0x18] sm:$0xff] }
0x17aa   : > { %v6869_v29 = vadd.f32 %v9837_v4, %v6861_v48  ;;  %v6966_v4 = vld [vmem:[%s16908_s18 + $0x10] sm:$0xff]  ;;  %v6969_v48 = vld [vmem:[%s16908_s18 + $0x28] sm:$0xff] }
0x17ac   : > { %11347 = vmatmul.mubr.msk.f32.vlgmr.msra.gmra.mrb[154].mxu1 %vm1758_vm4, %v6869_v29  ;;  %v6968_v29 = vld [vmem:[%s16908_s18 + $0x20] sm:$0xff] }
0x187f   : > { %v11348_v18 = vpop.f32.mrb[154].mxu1 }
0x1880   : > { %v6959_v7 = vadd.f32 %v11348_v18, %v9838_v32  ;;  %v6953_v19 = vpop.f32.mrb[155].mxu1 }
0x1881   : > { %v6954_v12 = vadd.f32 %v9838_v32, %v6953_v19  ;;  %v6971_v19 = vld [vmem:[%s16908_s18 + $0x38] sm:$0xff] }
0x1882   : > { %v6963_v39 = vmul.f32 0.70710677, %v6959_v7 }
0x1883   : > { %v16039_v0 = vpack.i.bf16 %v6959_v7, %v6954_v12  ;;  %v6962_v62 = vmul.f32 0.70710677, %v6954_v12  ;;  %v6970_v12 = vld [vmem:[%s16908_s18 + $0x30] sm:$0xff] }
0x1885   : > { %12319 = vrot.lane.b32.xlu0 %v16039_v0, %s13664_s22  ;;  %v11871_v23 = vpack.c.bf16 %v6963_v39, %v6962_v62  ;;  %s16910_s22 = sld [smem:[#allocation73_spill]] }
0x1887   : > { %11872 = vmatprep.subr.bf16.mxu0 %v11871_v23 }
0x1888   : > { %11874 = vmatpush3.bf16.msra.mxu0 %v11871_v23 }
0x188b   : > { %11354 = vmatmul.mubr.msk.f32.vlgmr.msra.gmra.mrb[172].mxu0 %vm1568_vm1, %v6997_v40 }
0x188c   : > { %11356 = vmatprep.mubr.msk.f32.mxu0 %vm1568_vm1, %v6998_v60  ;;  %v6973_v60 = vld [vmem:[%s16908_s18 + $0x48] sm:$0xff] }
0x188f   : > { %11357 = vmatmul.mubr.msk.f32.gmra.mrb[174].mxu0 %vm1568_vm1, %v6999_v53  ;;  %v6972_v53 = vld [vmem:[%s16908_s18 + $0x40] sm:$0xff] }
0x1890   : > { %11359 = vmatprep.mubr.msk.f32.mxu0 %vm1568_vm1, %v7000_v21 }
0x1893   : > { %11360 = vmatmul.mubr.msk.f32.gmra.mrb[176].mxu0 %vm1568_vm1, %v7001_v49 }
0x1894   : > { %11362 = vmatprep.mubr.msk.f32.mxu0 %vm1568_vm1, %v7002_v17 }
0x1897   : > { %11363 = vmatmul.mubr.msk.f32.gmra.mrb[178].mxu0 %vm1568_vm1, %v7003_v35 }
0x1898   : > { %11365 = vmatprep.mubr.msk.f32.mxu0 %vm1568_vm1, %v7004_v45  ;;  %v6975_v45 = vld [vmem:[%s16908_s18 + $0x58] sm:$0xff] }
0x189b   : > { %11366 = vmatmul.mubr.msk.f32.gmra.mrb[180].mxu0 %vm1568_vm1, %v7005_v1  ;;  %v6974_v1 = vld [vmem:[%s16908_s18 + $0x50] sm:$0xff] }
0x189c   : > { %11368 = vmatprep.mubr.msk.f32.mxu0 %vm1568_vm1, %v7006_v6 }
0x189f   : > { %11369 = vmatmul.mubr.msk.f32.gmra.mrb[182].mxu0 %vm1568_vm1, %v7007_v51 }
0x18a0   : > { %11371 = vmatprep.mubr.msk.f32.mxu0 %vm1568_vm1, %v7008_v61 }
0x18a3   : > { %11372 = vmatmul.mubr.msk.f32.gmra.mrb[184].mxu0 %vm1568_vm1, %v7009_v57 }
0x18a4   : > { %11374 = vmatprep.mubr.msk.f32.mxu0 %vm1568_vm1, %v7010_v34  ;;  %v6977_v34 = vld [vmem:[%s16908_s18 + $0x68] sm:$0xff] }
0x18a7   : > { %11375 = vmatmul.mubr.msk.f32.gmra.mrb[186].mxu0 %vm1568_vm1, %v7011_v46  ;;  %v6976_v46 = vld [vmem:[%s16908_s18 + $0x60] sm:$0xff] }
0x18a8   : > { %11377 = vmatprep.mubr.msk.f32.mxu0 %vm1568_vm1, %v7012_v15 }
0x18ab   : > { %11378 = vmatmul.mubr.msk.f32.gmra.mrb[188].mxu0 %vm1568_vm1, %v7013_v41 }
0x18ac   : > { %11380 = vmatprep.mubr.msk.f32.mxu0 %vm1568_vm1, %v7014_v27 }
0x18af   : > { %11381 = vmatmul.mubr.msk.f32.gmra.mrb[190].mxu0 %vm1568_vm1, %v7015_v5 }
0x18b0   : > { %11383 = vmatprep.mubr.msk.f32.mxu0 %vm1568_vm1, %v7016_v26  ;;  %v6979_v26 = vld [vmem:[%s16908_s18 + $0x78] sm:$0xff] }
0x18b3   : > { %11384 = vmatmul.mubr.msk.f32.gmra.mrb[192].mxu0 %vm1568_vm1, %v7017_v3  ;;  %v6978_v3 = vld [vmem:[%s16908_s18 + $0x70] sm:$0xff] }
0x18b4   : > { %11386 = vmatprep.mubr.msk.f32.mxu0 %vm1568_vm1, %v7018_v42 }
0x18b7   : > { %11387 = vmatmul.mubr.msk.f32.gmra.mrb[194].mxu0 %vm1568_vm1, %v7019_v58 }
0x18b8   : > { %11389 = vmatprep.mubr.msk.f32.mxu0 %vm1568_vm1, %v7020_v50 }
0x18bb   : > { %11390 = vmatmul.mubr.msk.f32.gmra.mrb[196].mxu0 %vm1568_vm1, %v7021_v20 }
0x18bc   : > { %11392 = vmatprep.mubr.msk.f32.mxu0 %vm1568_vm1, %v7022_v59  ;;  %v6981_v59 = vld [vmem:[%s16908_s18 + $0x88] sm:$0xff] }
0x18bf   : > { %11393 = vmatmul.mubr.msk.f32.gmra.mrb[198].mxu0 %vm1568_vm1, %v7023_v30  ;;  %v6980_v30 = vld [vmem:[%s16908_s18 + $0x80] sm:$0xff] }
0x18c0   : > { %11395 = vmatprep.mubr.msk.f32.mxu0 %vm1568_vm1, %v7024_v43 }
0x18c3   : > { %11396 = vmatmul.mubr.msk.f32.gmra.mrb[200].mxu0 %vm1568_vm1, %v7025_v8 }
0x18c4   : > { %11398 = vmatprep.mubr.msk.f32.mxu0 %vm1568_vm1, %v7026_v14 }
0x18c7   : > { %11399 = vmatmul.mubr.msk.f32.gmra.mrb[202].mxu0 %vm1568_vm1, %v7027_v52 }
0x18f7   : > { %v12320_v31 = vpop.permute.xlu0 %12319 }
0x18f8   : > { %v12322_v47 = vunpack.i.h.bf16 %v12320_v31  ;;  %v12321_v38 = vunpack.i.l.bf16 %v12320_v31  ;;  %v6983_v31 = vld [vmem:[%s16908_s18 + $0x98] sm:$0xff] }
0x18fa   : > { %v11875_v56 = vpack.c.bf16 %v12322_v47, %v12321_v38  ;;  %v6982_v47 = vld [vmem:[%s16908_s18 + $0x90] sm:$0xff] }
0x18fc   : > { %11877 = vmatprep.subr.msk.bf16.mxu1 %vm14628_vm10, %v11875_v56 }
0x18fd   : > { %11880 = vmatpush3.bf16.xpose.msk.msra.mxu1 %vm14628_vm10, %v11875_v56 }
0x195e   : > { %v11355_v9 = vpop.f32.mrb[172].mxu0 }
0x195f   : > { %v7190_v11 = vpop.f32.mrb[173].mxu0  ;;  %v7350_v54 = vmul.f32 %v11355_v9, %v6965_v25  ;;  %v6985_v25 = vld [vmem:[%s16908_s18 + $0xa8] sm:$0xff]  ;;  %v6984_v9 = vld [vmem:[%s16908_s18 + $0xa0] sm:$0xff] }
0x1960   : > { %v7349_v55 = vmul.f32 %v7190_v11, %v6964_v36 }
0x1962   : > { %v11358_v13 = vpop.f32.mrb[174].mxu0  ;;  %11405 = vmatprep.mubr.msk.f32.mxu1 %vm1758_vm4, %v7349_v55 }
0x1963   : > { %v7352_v22 = vmul.f32 %v11358_v13, %v6967_v16  ;;  %v7200_v2 = vpop.f32.mrb[175].mxu0  ;;  %11406 = vmatmul.mubr.msk.f32.vlgmr.msra.gmra.mrb[156].mxu1 %vm1758_vm4, %v7350_v54  ;;  %v6986_v13 = vld [vmem:[%s16908_s18 + $0xb0] sm:$0xff] }
0x1964   : > { %v7351_v44 = vmul.f32 %v7200_v2, %v6966_v4  ;;  %v6987_v4 = vld [vmem:[%s16908_s18 + $0xb8] sm:$0xff] }
0x1966   : > { %v11361_v24 = vpop.f32.mrb[176].mxu0  ;;  %11408 = vmatprep.mubr.msk.f32.mxu1 %vm1758_vm4, %v7351_v44 }
0x1967   : > { %v7354_v32 = vmul.f32 %v11361_v24, %v6969_v48  ;;  %v7210_v18 = vpop.f32.mrb[177].mxu0  ;;  %11409 = vmatmul.mubr.msk.f32.gmra.mrb[158].mxu1 %vm1758_vm4, %v7352_v22  ;;  %v6988_v24 = vld [vmem:[%s16908_s18 + $0xc0] sm:$0xff] }
0x1968   : > { %v7353_v7 = vmul.f32 %v7210_v18, %v6968_v29  ;;  %v6989_v29 = vld [vmem:[%s16908_s18 + $0xc8] sm:$0xff] }
0x196a   : > { %v11364_v39 = vpop.f32.mrb[178].mxu0  ;;  %11411 = vmatprep.mubr.msk.f32.mxu1 %vm1758_vm4, %v7353_v7 }
0x196b   : > { %v7356_v62 = vmul.f32 %v11364_v39, %v6971_v19  ;;  %v7220_v23 = vpop.f32.mrb[179].mxu0  ;;  %11412 = vmatmul.mubr.msk.f32.gmra.mrb[160].mxu1 %vm1758_vm4, %v7354_v32  ;;  %v6990_v39 = vld [vmem:[%s16908_s18 + $0xd0] sm:$0xff] }
0x196c   : > { %v7355_v40 = vmul.f32 %v7220_v23, %v6970_v12  ;;  %v6991_v12 = vld [vmem:[%s16908_s18 + $0xd8] sm:$0xff] }
0x196e   : > { %v11367_v21 = vpop.f32.mrb[180].mxu0  ;;  %11414 = vmatprep.mubr.msk.f32.mxu1 %vm1758_vm4, %v7355_v40 }
0x196f   : > { %v7358_v49 = vmul.f32 %v11367_v21, %v6973_v60  ;;  %v7230_v17 = vpop.f32.mrb[181].mxu0  ;;  %11415 = vmatmul.mubr.msk.f32.gmra.mrb[162].mxu1 %vm1758_vm4, %v7356_v62  ;;  %v6992_v21 = vld [vmem:[%s16908_s18 + $0xe0] sm:$0xff] }
0x1970   : > { %v7357_v35 = vmul.f32 %v7230_v17, %v6972_v53  ;;  %v6993_v53 = vld [vmem:[%s16908_s18 + $0xe8] sm:$0xff] }
0x1972   : > { %v11370_v6 = vpop.f32.mrb[182].mxu0  ;;  %11417 = vmatprep.mubr.msk.f32.mxu1 %vm1758_vm4, %v7357_v35 }
0x1973   : > { %v7360_v51 = vmul.f32 %v11370_v6, %v6975_v45  ;;  %v7240_v61 = vpop.f32.mrb[183].mxu0  ;;  %11418 = vmatmul.mubr.msk.f32.gmra.mrb[164].mxu1 %vm1758_vm4, %v7358_v49  ;;  %v6994_v6 = vld [vmem:[%s16908_s18 + $0xf0] sm:$0xff] }
0x1974   : > { %v7359_v57 = vmul.f32 %v7240_v61, %v6974_v1  ;;  %v6995_v1 = vld [vmem:[%s16908_s18 + $0xf8] sm:$0xff] }
0x1976   : > { %v11373_v15 = vpop.f32.mrb[184].mxu0  ;;  %11420 = vmatprep.mubr.msk.f32.mxu1 %vm1758_vm4, %v7359_v57 }
0x1977   : > { %v7362_v41 = vmul.f32 %v11373_v15, %v6977_v34  ;;  %v7250_v27 = vpop.f32.mrb[185].mxu0  ;;  %11421 = vmatmul.mubr.msk.f32.gmra.mrb[166].mxu1 %vm1758_vm4, %v7360_v51 }
0x1978   : > { %v7361_v5 = vmul.f32 %v7250_v27, %v6976_v46 }
0x197a   : > { %v11376_v42 = vpop.f32.mrb[186].mxu0  ;;  %11423 = vmatprep.mubr.msk.f32.mxu1 %vm1758_vm4, %v7361_v5 }
0x197b   : > { %v7364_v58 = vmul.f32 %v11376_v42, %v6979_v26  ;;  %v7260_v50 = vpop.f32.mrb[187].mxu0  ;;  %11424 = vmatmul.mubr.msk.f32.gmra.mrb[168].mxu1 %vm1758_vm4, %v7362_v41 }
0x197c   : > { %v7363_v20 = vmul.f32 %v7260_v50, %v6978_v3 }
0x197e   : > { %11426 = vmatprep.mubr.msk.f32.mxu1 %vm1758_vm4, %v7363_v20  ;;  %v11379_v43 = vpop.f32.mrb[188].mxu0 }
0x197f   : > { %11427 = vmatmul.mubr.msk.f32.gmra.mrb[170].mxu1 %vm1758_vm4, %v7364_v58  ;;  %v7366_v8 = vmul.f32 %v11379_v43, %v6981_v59  ;;  %v7270_v14 = vpop.f32.mrb[189].mxu0 }
0x1980   : > { %v7365_v52 = vmul.f32 %v7270_v14, %v6980_v30 }
0x1982   : > { %11429 = vmatprep.mubr.msk.f32.mxu1 %vm1758_vm4, %v7365_v52  ;;  %v11382_v38 = vpop.f32.mrb[190].mxu0 }
0x1983   : > { %v7368_v56 = vmul.f32 %v11382_v38, %v6983_v31  ;;  %11430 = vmatmul.mubr.msk.f32.gmra.mrb[172].mxu1 %vm1758_vm4, %v7366_v8  ;;  %v7280_v10 = vpop.f32.mrb[191].mxu0 }
0x1984   : > { %v7367_v36 = vmul.f32 %v7280_v10, %v6982_v47 }
0x1986   : > { %11432 = vmatprep.mubr.msk.f32.mxu1 %vm1758_vm4, %v7367_v36  ;;  %v11385_v11 = vpop.f32.mrb[192].mxu0 }
0x1987   : > { %11433 = vmatmul.mubr.msk.f32.gmra.mrb[174].mxu1 %vm1758_vm4, %v7368_v56  ;;  %v7370_v55 = vmul.f32 %v11385_v11, %v6985_v25  ;;  %v7290_v16 = vpop.f32.mrb[193].mxu0 }
0x1988   : > { %v7369_v54 = vmul.f32 %v7290_v16, %v6984_v9 }
0x198a   : > { %11435 = vmatprep.mubr.msk.f32.mxu1 %vm1758_vm4, %v7369_v54  ;;  %v11388_v22 = vpop.f32.mrb[194].mxu0 }
0x198b   : > { %11436 = vmatmul.mubr.msk.f32.gmra.mrb[176].mxu1 %vm1758_vm4, %v7370_v55  ;;  %v7372_v2 = vmul.f32 %v11388_v22, %v6987_v4  ;;  %v7300_v44 = vpop.f32.mrb[195].mxu0 }
0x198c   : > { %v7371_v48 = vmul.f32 %v7300_v44, %v6986_v13 }
0x198e   : > { %11438 = vmatprep.mubr.msk.f32.mxu1 %vm1758_vm4, %v7371_v48  ;;  %v11391_v32 = vpop.f32.mrb[196].mxu0 }
0x198f   : > { %11439 = vmatmul.mubr.msk.f32.gmra.mrb[178].mxu1 %vm1758_vm4, %v7372_v2  ;;  %v7374_v18 = vmul.f32 %v11391_v32, %v6989_v29  ;;  %v7310_v7 = vpop.f32.mrb[197].mxu0 }
0x1990   : > { %v7373_v19 = vmul.f32 %v7310_v7, %v6988_v24 }
0x1992   : > { %11441 = vmatprep.mubr.msk.f32.mxu1 %vm1758_vm4, %v7373_v19  ;;  %v11394_v62 = vpop.f32.mrb[198].mxu0 }
0x1993   : > { %11442 = vmatmul.mubr.msk.f32.gmra.mrb[180].mxu1 %vm1758_vm4, %v7374_v18  ;;  %v7376_v23 = vmul.f32 %v11394_v62, %v6991_v12  ;;  %v7320_v40 = vpop.f32.mrb[199].mxu0 }
0x1994   : > { %v7375_v60 = vmul.f32 %v7320_v40, %v6990_v39 }
0x1996   : > { %v11397_v49 = vpop.f32.mrb[200].mxu0  ;;  %11444 = vmatprep.mubr.msk.f32.mxu1 %vm1758_vm4, %v7375_v60 }
0x1997   : > { %v7378_v17 = vmul.f32 %v11397_v49, %v6993_v53  ;;  %v7330_v35 = vpop.f32.mrb[201].mxu0  ;;  %11445 = vmatmul.mubr.msk.f32.gmra.mrb[182].mxu1 %vm1758_vm4, %v7376_v23 }
0x1998   : > { %v7377_v45 = vmul.f32 %v7330_v35, %v6992_v21 }
0x199a   : > { %v11400_v51 = vpop.f32.mrb[202].mxu0  ;;  %11447 = vmatprep.mubr.msk.f32.mxu1 %vm1758_vm4, %v7377_v45 }
0x199b   : > { %v7380_v61 = vmul.f32 %v11400_v51, %v6995_v1  ;;  %v7340_v57 = vpop.f32.mrb[203].mxu0  ;;  %11448 = vmatmul.mubr.msk.f32.gmra.mrb[184].mxu1 %vm1758_vm4, %v7378_v17 }
0x199c   : > { %v7379_v34 = vmul.f32 %v7340_v57, %v6994_v6 }
0x199e   : > { %11450 = vmatprep.mubr.msk.f32.mxu1 %vm1758_vm4, %v7379_v34 }
0x199f   : > { %11451 = vmatmul.mubr.msk.f32.gmra.mrb[186].mxu1 %vm1758_vm4, %v7380_v61 }
0x1a36   : > { %v16142_v46 = vpop.f32.mrb[156].mxu1 }
0x1a37   : > { %v7715_v15 = vsel %vm1568_vm1, %v16142_v46, -inf  ;;  %v16146_v41 = vpop.f32.mrb[157].mxu1 }
0x1a38   : > { %7716 = vmax.xlane.f32.xlu1 %v7715_v15  ;;  %v7712_v5 = vsel %vm1568_vm1, %v16146_v41, -inf }
0x1a3a   : > { %v16148_v27 = vpop.f32.mrb[158].mxu1 }
0x1a3b   : > { %v16152_v26 = vpop.f32.mrb[159].mxu1  ;;  %v7721_v42 = vsel %vm1568_vm1, %v16148_v27, -inf }
0x1a3c   : > { %7713 = vmax.xlane.f32.xlu1 %v7712_v5  ;;  %v7718_v59 = vsel %vm1568_vm1, %v16152_v26, -inf }
0x1a3e   : > { %v16154_v3 = vpop.f32.mrb[160].mxu1 }
0x1a3f   : > { %v16158_v58 = vpop.f32.mrb[161].mxu1  ;;  %v7727_v8 = vsel %vm1568_vm1, %v16154_v3, -inf }
0x1a40   : > { %7722 = vmax.xlane.f32.xlu1 %v7721_v42  ;;  %v7724_v31 = vsel %vm1568_vm1, %v16158_v58, -inf }
0x1a42   : > { %v16160_v50 = vpop.f32.mrb[162].mxu1 }
0x1a43   : > { %v16162_v20 = vpop.f32.mrb[163].mxu1  ;;  %v7733_v56 = vsel %vm1568_vm1, %v16160_v50, -inf }
0x1a44   : > { %7719 = vmax.xlane.f32.xlu1 %v7718_v59  ;;  %v7730_v30 = vsel %vm1568_vm1, %v16162_v20, -inf }
0x1a45   : > { %7731 = vmax.xlane.f32.xlu0 %v7730_v30 }
0x1a46   : > { %v16168_v43 = vpop.f32.mrb[164].mxu1 }
0x1a47   : > { %v16172_v14 = vpop.f32.mrb[165].mxu1  ;;  %v7739_v9 = vsel %vm1568_vm1, %v16168_v43, -inf }
0x1a48   : > { %7728 = vmax.xlane.f32.xlu1 %v7727_v8  ;;  %v7736_v4 = vsel %vm1568_vm1, %v16172_v14, -inf }
0x1a4a   : > { %v16174_v52 = vpop.f32.mrb[166].mxu1 }
0x1a4b   : > { %v16178_v47 = vpop.f32.mrb[167].mxu1  ;;  %v7745_v44 = vsel %vm1568_vm1, %v16174_v52, -inf }
0x1a4c   : > { %7725 = vmax.xlane.f32.xlu1 %v7724_v31  ;;  %v7742_v32 = vsel %vm1568_vm1, %v16178_v47, -inf }
0x1a4e   : > { %v16180_v38 = vpop.f32.mrb[168].mxu1 }
0x1a4f   : > { %v7751_v10 = vsel %vm1568_vm1, %v16180_v38, -inf  ;;  %v16186_v36 = vpop.f32.mrb[169].mxu1 }
0x1a50   : > { %7734 = vmax.xlane.f32.xlu1 %v7733_v56  ;;  %7752 = vmax.xlane.f32.xlu0 %v7751_v10  ;;  %v7748_v12 = vsel %vm1568_vm1, %v16186_v36, -inf }
0x1a52   : > { %v16188_v25 = vpop.f32.mrb[170].mxu1 }
0x1a53   : > { %v7757_v11 = vsel %vm1568_vm1, %v16188_v25, -inf  ;;  %v16194_v55 = vpop.f32.mrb[171].mxu1 }
0x1a54   : > { %7740 = vmax.xlane.f32.xlu1 %v7739_v9  ;;  %7758 = vmax.xlane.f32.xlu0 %v7757_v11  ;;  %v7754_v16 = vsel %vm1568_vm1, %v16194_v55, -inf }
0x1a56   : > { %v16198_v54 = vpop.f32.mrb[172].mxu1 }
0x1a57   : > { %v16202_v13 = vpop.f32.mrb[173].mxu1 }
0x1a58   : > { %7737 = vmax.xlane.f32.xlu1 %v7736_v4  ;;  %7755 = vmax.xlane.f32.xlu0 %v7754_v16  ;;  %v7760_v22 = vsel %vm1568_vm1, %v16202_v13, -inf }
0x1a5a   : > { %v16206_v2 = vpop.f32.mrb[174].mxu1 }
0x1a5b   : > { %v16210_v48 = vpop.f32.mrb[175].mxu1  ;;  %v7769_v29 = vsel %vm1568_vm1, %v16206_v2, -inf }
0x1a5c   : > { %7746 = vmax.xlane.f32.xlu1 %v7745_v44  ;;  %7761 = vmax.xlane.f32.xlu0 %v7760_v22  ;;  %v7766_v7 = vsel %vm1568_vm1, %v16210_v48, -inf }
0x1a5e   : > { %v16214_v24 = vpop.f32.mrb[176].mxu1 }
0x1a5f   : > { %v16218_v18 = vpop.f32.mrb[177].mxu1  ;;  %v7775_v62 = vsel %vm1568_vm1, %v16214_v24, -inf }
0x1a60   : > { %7743 = vmax.xlane.f32.xlu1 %v7742_v32  ;;  %7770 = vmax.xlane.f32.xlu0 %v7769_v29  ;;  %v7772_v60 = vsel %vm1568_vm1, %v16218_v18, -inf }
0x1a62   : > { %v16222_v19 = vpop.f32.mrb[178].mxu1 }
0x1a63   : > { %v16226_v39 = vpop.f32.mrb[179].mxu1  ;;  %v7781_v49 = vsel %vm1568_vm1, %v16222_v19, -inf }
0x1a64   : > { %7749 = vmax.xlane.f32.xlu1 %v7748_v12  ;;  %7767 = vmax.xlane.f32.xlu0 %v7766_v7  ;;  %v7778_v45 = vsel %vm1568_vm1, %v16226_v39, -inf }
0x1a66   : > { %v16230_v23 = vpop.f32.mrb[180].mxu1 }
0x1a67   : > { %v16232_v40 = vpop.f32.mrb[181].mxu1  ;;  %v7787_v51 = vsel %vm1568_vm1, %v16230_v23, -inf }
0x1a68   : > { %7776 = vmax.xlane.f32.xlu0 %v7775_v62  ;;  %v7784_v61 = vsel %vm1568_vm1, %v16232_v40, -inf }
0x1a6a   : > { %v16236_v53 = vpop.f32.mrb[182].mxu1 }
0x1a6b   : > { %v16238_v21 = vpop.f32.mrb[183].mxu1  ;;  %v7793_v5 = vsel %vm1568_vm1, %v16236_v53, -inf }
0x1a6c   : > { %7773 = vmax.xlane.f32.xlu0 %v7772_v60  ;;  %v7790_v57 = vsel %vm1568_vm1, %v16238_v21, -inf }
0x1a6e   : > { %v16242_v17 = vpop.f32.mrb[184].mxu1 }
0x1a6f   : > { %v16244_v35 = vpop.f32.mrb[185].mxu1  ;;  %v7799_v42 = vsel %vm1568_vm1, %v16242_v17, -inf }
0x1a70   : > { %7782 = vmax.xlane.f32.xlu0 %v7781_v49  ;;  %v7796_v34 = vsel %vm1568_vm1, %v16244_v35, -inf }
0x1a72   : > { %v16248_v1 = vpop.f32.mrb[186].mxu1 }
0x1a73   : > { %v16250_v6 = vpop.f32.mrb[187].mxu1  ;;  %v7805_v59 = vsel %vm1568_vm1, %v16248_v1, -inf }
0x1a74   : > { %7779 = vmax.xlane.f32.xlu0 %v7778_v45  ;;  %v7802_v15 = vsel %vm1568_vm1, %v16250_v6, -inf }
0x1a75   : > { %12324 = vrot.lane.b32.xlu1 %v16039_v0, %s16766_s10  ;;  %v7763_v0 = vsel %vm1568_vm1, %v16198_v54, -inf  ;;  %s16912_s10 = smov %s16911_s7 }
0x1a78   : > { %7788 = vmax.xlane.f32.xlu0 %v7787_v51 }
0x1a7c   : > { %7785 = vmax.xlane.f32.xlu0 %v7784_v61 }
0x1a80   : > { %7791 = vmax.xlane.f32.xlu0 %v7790_v57 }
0x1a84   : > { %7797 = vmax.xlane.f32.xlu0 %v7796_v34 }
0x1a88   : > { %7803 = vmax.xlane.f32.xlu0 %v7802_v15 }
0x1a99   : > { %7764 = vmax.xlane.f32.xlu1 %v7763_v0 }
0x1a9d   : > { %7794 = vmax.xlane.f32.xlu1 %v7793_v5 }
0x1aa1   : > { %7800 = vmax.xlane.f32.xlu1 %v7799_v42 }
0x1aa5   : > { %7806 = vmax.xlane.f32.xlu1 %v7805_v59 }
0x1ac5   : > { %v7717_v30 = vpop.xlane.xlu1 %7716 }
0x1ac6   : > { %v7809_v8 = vsub.f32 %v16142_v46, %v7717_v30 }
0x1ac8   : > { %v7842_v31 = vmul.f32 1.442695, %v7809_v8 }
0x1ac9   : > { %v7714_v56 = vpop.xlane.xlu1 %7713 }
0x1aca   : > { %12624 = vpow2.f32 %v7842_v31  ;;  %v7808_v10 = vsub.f32 %v16146_v41, %v7714_v56 }
0x1acc   : > { %v7840_v9 = vmul.f32 1.442695, %v7808_v10 }
0x1acd   : > { %v7723_v11 = vpop.xlane.xlu1 %7722 }
0x1ace   : > { %12626 = vpow2.f32 %v7840_v9  ;;  %v7811_v16 = vsub.f32 %v16148_v27, %v7723_v11 }
0x1ad0   : > { %v7846_v4 = vmul.f32 1.442695, %v7811_v16 }
0x1ad1   : > { %v7720_v22 = vpop.xlane.xlu1 %7719 }
0x1ad2   : > { %12628 = vpow2.f32 %v7846_v4  ;;  %v7810_v44 = vsub.f32 %v16152_v26, %v7720_v22  ;;  %v7732_v7 = vpop.xlane.xlu0 %7731 }
0x1ad3   : > { %v7814_v27 = vsub.f32 %v16162_v20, %v7732_v7 }
0x1ad4   : > { %v16276_v29 = vpop.eup %12624  ;;  %v7844_v32 = vmul.f32 1.442695, %v7810_v44 }
0x1ad5   : > { %v7729_v46 = vpop.xlane.xlu1 %7728  ;;  %v7907_v12 = vsel %vm1568_vm1, %v16276_v29, 0.0  ;;  %v7852_v61 = vmul.f32 1.442695, %v7814_v27 }
0x1ad6   : > { %12630 = vpow2.f32 %v7844_v32  ;;  %v7813_v41 = vsub.f32 %v16154_v3, %v7729_v46  ;;  %7908 = vadd.xlane.f32.xlu1 %v7907_v12 }
0x1ad8   : > { %v12627_v62 = vpop.eup %12626  ;;  %v7850_v60 = vmul.f32 1.442695, %v7813_v41 }
0x1ad9   : > { %11457 = vmatprep.mubr.msk.f32.mxu0 %vm1568_vm1, %v12627_v62  ;;  %v7726_v49 = vpop.xlane.xlu1 %7725  ;;  %v7904_v26 = vsel %vm1568_vm1, %v12627_v62, 0.0 }
0x1ada   : > { %12632 = vpow2.f32 %v7850_v60  ;;  %v7812_v45 = vsub.f32 %v16158_v58, %v7726_v49  ;;  %7905 = vadd.xlane.f32.xlu0 %v7904_v26 }
0x1adc   : > { %v16285_v51 = vpop.eup %12628  ;;  %v7848_v57 = vmul.f32 1.442695, %v7812_v45 }
0x1add   : > { %v7735_v34 = vpop.xlane.xlu1 %7734  ;;  %v7753_v3 = vpop.xlane.xlu0 %7752  ;;  %v7913_v15 = vsel %vm1568_vm1, %v16285_v51, 0.0 }
0x1ade   : > { %12634 = vpow2.f32 %v7848_v57  ;;  %v7815_v20 = vsub.f32 %v16160_v50, %v7735_v34  ;;  %7914 = vadd.xlane.f32.xlu1 %v7913_v15  ;;  %v7821_v16 = vsub.f32 %v16180_v38, %v7753_v3 }
0x1adf   : > { %12636 = vpow2.f32 %v7852_v61 }
0x1ae0   : > { %v16290_v0 = vpop.eup %12630  ;;  %v7854_v5 = vmul.f32 1.442695, %v7815_v20 }
0x1ae1   : > { %v7741_v42 = vpop.xlane.xlu1 %7740  ;;  %v16292_v58 = vpop.xlane.xlu0 %7758  ;;  %v7910_v59 = vsel %vm1568_vm1, %v16290_v0, 0.0 }
0x1ae2   : > { %12638 = vpow2.f32 %v7854_v5  ;;  %v7817_v30 = vsub.f32 %v16168_v43, %v7741_v42  ;;  %7911 = vadd.xlane.f32.xlu0 %v7910_v59 }
0x1ae4   : > { %v16297_v8 = vpop.eup %12632  ;;  %v7858_v31 = vmul.f32 1.442695, %v7817_v30 }
0x1ae5   : > { %v7738_v56 = vpop.xlane.xlu1 %7737  ;;  %v16299_v50 = vpop.xlane.xlu0 %7755  ;;  %v7919_v10 = vsel %vm1568_vm1, %v16297_v8, 0.0 }
0x1ae6   : > { %12640 = vpow2.f32 %v7858_v31  ;;  %v7816_v9 = vsub.f32 %v16172_v14, %v7738_v56  ;;  %7920 = vadd.xlane.f32.xlu1 %v7919_v10  ;;  %v7866_v14 = vmul.f32 1.442695, %v7821_v16 }
0x1ae8   : > { %v16304_v11 = vpop.eup %12634  ;;  %v7856_v4 = vmul.f32 1.442695, %v7816_v9 }
0x1ae9   : > { %v7747_v43 = vpop.xlane.xlu1 %7746  ;;  %v7762_v22 = vpop.xlane.xlu0 %7761  ;;  %v7916_v44 = vsel %vm1568_vm1, %v16304_v11, 0.0 }
0x1aea   : > { %v16309_v32 = vpop.eup %12636  ;;  %12642 = vpow2.f32 %v7856_v4  ;;  %v7819_v7 = vsub.f32 %v16174_v52, %v7747_v43  ;;  %7917 = vadd.xlane.f32.xlu0 %v7916_v44  ;;  %v7824_v26 = vsub.f32 %v16202_v13, %v7762_v22 }
0x1aeb   : > { %v7922_v27 = vsel %vm1568_vm1, %v16309_v32, 0.0 }
0x1aec   : > { %v16312_v46 = vpop.eup %12638  ;;  %v7862_v12 = vmul.f32 1.442695, %v7819_v7 }
0x1aed   : > { %v7744_v41 = vpop.xlane.xlu1 %7743  ;;  %v16314_v62 = vpop.xlane.xlu0 %7770  ;;  %v7925_v38 = vsel %vm1568_vm1, %v16312_v46, 0.0 }
0x1aee   : > { %12644 = vpow2.f32 %v7862_v12  ;;  %v7818_v60 = vsub.f32 %v16178_v47, %v7744_v41  ;;  %7926 = vadd.xlane.f32.xlu1 %v7925_v38  ;;  %7923 = vadd.xlane.f32.xlu0 %v7922_v27  ;;  %v7872_v47 = vmul.f32 1.442695, %v7824_v26 }
0x1aef   : > { %12646 = vpow2.f32 %v7866_v14 }
0x1af0   : > { %v16321_v52 = vpop.eup %12640  ;;  %v7860_v49 = vmul.f32 1.442695, %v7818_v60 }
0x1af1   : > { %v7750_v45 = vpop.xlane.xlu1 %7749  ;;  %v7768_v61 = vpop.xlane.xlu0 %7767  ;;  %v7931_v57 = vsel %vm1568_vm1, %v16321_v52, 0.0 }
0x1af2   : > { %12648 = vpow2.f32 %v7860_v49  ;;  %v7820_v34 = vsub.f32 %v16186_v36, %v7750_v45  ;;  %7932 = vadd.xlane.f32.xlu1 %v7931_v57  ;;  %v7826_v20 = vsub.f32 %v16210_v48, %v7768_v61 }
0x1af4   : > { %v12643_v3 = vpop.eup %12642  ;;  %v7864_v15 = vmul.f32 1.442695, %v7820_v34  ;;  %v7876_v36 = vmul.f32 1.442695, %v7826_v20 }
0x1af5   : > { %v12325_v5 = vpop.permute.xlu1 %12324  ;;  %v16328_v42 = vpop.xlane.xlu0 %7776  ;;  %v7928_v59 = vsel %vm1568_vm1, %v12643_v3, 0.0 }
0x1af6   : > { %12650 = vpow2.f32 %v7864_v15  ;;  %v12327_v13 = vunpack.i.h.bf16 %v12325_v5  ;;  %v12326_v30 = vunpack.i.l.bf16 %v12325_v5  ;;  %7929 = vadd.xlane.f32.xlu0 %v7928_v59 }
0x1af7   : > { %12652 = vpow2.f32 %v7872_v47 }
0x1af8   : > { %v16331_v31 = vpop.eup %12644  ;;  %v11881_v56 = vpack.c.bf16 %v12327_v13, %v12326_v30  ;;  %12654 = vpow2.f32 %v7876_v36 }
0x1af9   : > { %v7774_v10 = vpop.xlane.xlu0 %7773  ;;  %v7937_v9 = vsel %vm1568_vm1, %v16331_v31, 0.0  ;;  %v16335_v16 = vpop.eup %12646 }
0x1afa   : > { %v7828_v48 = vsub.f32 %v16218_v18, %v7774_v10  ;;  %11882 = vmatprep.subr.bf16.mxu0 %v11881_v56  ;;  %7938 = vadd.xlane.f32.xlu1 %v7937_v9  ;;  %v7943_v44 = vsel %vm1568_vm1, %v16335_v16, 0.0 }
0x1afb   : > { %11884 = vmatpush3.bf16.msra.mxu0 %v11881_v56  ;;  %v7827_v56 = vsub.f32 %v16206_v2, %v16314_v62 }
0x1afc   : > { %v12649_v4 = vpop.eup %12648  ;;  %v7880_v43 = vmul.f32 1.442695, %v7828_v48  ;;  %v7829_v48 = vsub.f32 %v16214_v24, %v16328_v42 }
0x1afd   : > { %v16338_v22 = vpop.xlane.xlu0 %7782  ;;  %v7934_v7 = vsel %vm1568_vm1, %v12649_v4, 0.0 }
0x1afe   : > { %11458 = vmatmul.mubr.msk.f32.vlgmr.msra.gmra.mrb[204].mxu0 %vm1568_vm1, %v16276_v29  ;;  %7944 = vadd.xlane.f32.xlu1 %v7943_v44  ;;  %12656 = vpow2.f32 %v7880_v43  ;;  %v7822_v29 = vsub.f32 %v16194_v55, %v16299_v50  ;;  %v7882_v44 = vmul.f32 1.442695, %v7829_v48  ;;  %v7831_v2 = vsub.f32 %v16222_v19, %v16338_v22  ;;  %v12824_v48 = vld [vmem:[%s16908_s18 + $0x8] sm:$0xff] }
0x1aff   : > { %7935 = vadd.xlane.f32.xlu0 %v7934_v7  ;;  %11460 = vmatprep.mubr.msk.f32.mxu0 %vm1568_vm1, %v16290_v0 }
0x1b00   : > { %v12651_v18 = vpop.eup %12650  ;;  %v7886_v7 = vmul.f32 1.442695, %v7831_v2  ;;  %v12825_v2 = vld [vmem:[%s16908_s18] sm:$0xff] }
0x1b01   : > { %v7780_v14 = vpop.xlane.xlu0 %7779  ;;  %v7940_v12 = vsel %vm1568_vm1, %v12651_v18, 0.0  ;;  %v12653_v38 = vpop.eup %12652 }
0x1b02   : > { %v7830_v41 = vsub.f32 %v16226_v39, %v7780_v14  ;;  %11461 = vmatmul.mubr.msk.f32.gmra.mrb[206].mxu0 %vm1568_vm1, %v16285_v51  ;;  %v7952_v39 = vsel %vm1568_vm1, %v12653_v38, 0.0  ;;  %v16360_v60 = vpop.eup %12654  ;;  %v7823_v51 = vsub.f32 %v16188_v25, %v16292_v58 }
0x1b03   : > { %7941 = vadd.xlane.f32.xlu0 %v7940_v12  ;;  %11463 = vmatprep.mubr.msk.f32.mxu0 %vm1568_vm1, %v16304_v11  ;;  %v7868_v11 = vmul.f32 1.442695, %v7822_v29 }
0x1b04   : > { %v7884_v27 = vmul.f32 1.442695, %v7830_v41  ;;  %v7870_v26 = vmul.f32 1.442695, %v7823_v51 }
0x1b05   : > { %v16355_v0 = vpop.xlane.xlu0 %7788 }
0x1b06   : > { %12658 = vpow2.f32 %v7884_v27  ;;  %11464 = vmatmul.mubr.msk.f32.gmra.mrb[208].mxu0 %vm1568_vm1, %v16297_v8  ;;  %v7958_v8 = vsel %vm1568_vm1, %v16360_v60, 0.0 }
0x1b07   : > { %7953 = vadd.xlane.f32.xlu0 %v7952_v39  ;;  %11466 = vmatprep.mubr.msk.f32.mxu0 %vm1568_vm1, %v16309_v32  ;;  %12660 = vpow2.f32 %v7868_v11 }
0x1b08   : > { %v16371_v49 = vpop.eup %12656 }
0x1b09   : > { %v7786_v55 = vpop.xlane.xlu0 %7785 }
0x1b0a   : > { %v7832_v50 = vsub.f32 %v16232_v40, %v7786_v55  ;;  %11467 = vmatmul.mubr.msk.f32.gmra.mrb[210].mxu0 %vm1568_vm1, %v16312_v46  ;;  %v7964_v40 = vsel %vm1568_vm1, %v16371_v49, 0.0 }
0x1b0b   : > { %7959 = vadd.xlane.f32.xlu0 %v7958_v8  ;;  %11469 = vmatprep.mubr.msk.f32.mxu0 %vm1568_vm1, %v12643_v3 }
0x1b0c   : > { %v7888_v25 = vmul.f32 1.442695, %v7832_v50 }
0x1b0d   : > { %v7792_v58 = vpop.xlane.xlu0 %7791 }
0x1b0e   : > { %12662 = vpow2.f32 %v7888_v25  ;;  %v7834_v32 = vsub.f32 %v16238_v21, %v7792_v58  ;;  %11470 = vmatmul.mubr.msk.f32.gmra.mrb[212].mxu0 %vm1568_vm1, %v16321_v52 }
0x1b0f   : > { %12664 = vpow2.f32 %v7870_v26  ;;  %7965 = vadd.xlane.f32.xlu0 %v7964_v40  ;;  %11472 = vmatprep.mubr.msk.f32.mxu0 %vm1568_vm1, %v12649_v4 }
0x1b10   : > { %v16380_v46 = vpop.eup %12658  ;;  %v7892_v45 = vmul.f32 1.442695, %v7834_v32 }
0x1b11   : > { %v7798_v61 = vpop.xlane.xlu0 %7797  ;;  %v7970_v57 = vsel %vm1568_vm1, %v16380_v46, 0.0  ;;  %v12661_v3 = vpop.eup %12660 }
0x1b12   : > { %12666 = vpow2.f32 %v7892_v45  ;;  %v7836_v21 = vsub.f32 %v16244_v35, %v7798_v61  ;;  %11473 = vmatmul.mubr.msk.f32.gmra.mrb[214].mxu0 %vm1568_vm1, %v16331_v31  ;;  %v7946_v43 = vsel %vm1568_vm1, %v12661_v3, 0.0 }
0x1b13   : > { %7971 = vadd.xlane.f32.xlu0 %v7970_v57  ;;  %11475 = vmatprep.mubr.msk.f32.mxu0 %vm1568_vm1, %v12651_v18 }
0x1b14   : > { %v7896_v52 = vmul.f32 1.442695, %v7836_v21 }
0x1b15   : > { %v7804_v34 = vpop.xlane.xlu0 %7803 }
0x1b16   : > { %12668 = vpow2.f32 %v7896_v52  ;;  %v7838_v15 = vsub.f32 %v16250_v6, %v7804_v34  ;;  %11476 = vmatmul.mubr.msk.f32.gmra.mrb[216].mxu0 %vm1568_vm1, %v16335_v16  ;;  %v7878_v16 = vmul.f32 1.442695, %v7827_v56  ;;  %v8456_v34 = vld [vmem:[%s13863_s6 + $0x8] sm:$0xff] }
0x1b17   : > { %11478 = vmatprep.mubr.msk.f32.mxu0 %vm1568_vm1, %v12661_v3  ;;  %8523 = vmatprep.mubr.f32.mxu1 %v8456_v34  ;;  %v12831_v34 = vld [vmem:[%s16908_s18 + $0x30] sm:$0xff] }
0x1b18   : > { %v16392_v47 = vpop.eup %12662  ;;  %v7900_v35 = vmul.f32 1.442695, %v7838_v15 }
0x1b19   : > { %v16394_v20 = vpop.eup %12664  ;;  %v7976_v5 = vsel %vm1568_vm1, %v16392_v47, 0.0 }
0x1b1a   : > { %12670 = vpow2.f32 %v7900_v35  ;;  %11479 = vmatmul.mubr.msk.f32.gmra.mrb[218].mxu0 %vm1568_vm1, %v16394_v20  ;;  %7977 = vadd.xlane.f32.xlu0 %v7976_v5  ;;  %v7949_v25 = vsel %vm1568_vm1, %v16394_v20, 0.0 }
0x1b1b   : > { %11481 = vmatprep.mubr.msk.f32.mxu0 %vm1568_vm1, %v12653_v38 }
0x1b1c   : > { %v16401_v6 = vpop.eup %12666 }
0x1b1d   : > { %v7982_v59 = vsel %vm1568_vm1, %v16401_v6, 0.0 }
0x1b1e   : > { %7983 = vadd.xlane.f32.xlu0 %v7982_v59 }
0x1b20   : > { %v16405_v13 = vpop.eup %12668 }
0x1b21   : > { %v7988_v30 = vsel %vm1568_vm1, %v16405_v13, 0.0 }
0x1b22   : > { %7989 = vadd.xlane.f32.xlu0 %v7988_v30 }
0x1b24   : > { %v16409_v31 = vpop.eup %12670 }
0x1b25   : > { %v7994_v36 = vsel %vm1568_vm1, %v16409_v31, 0.0 }
0x1b26   : > { %v7765_v10 = vpop.xlane.xlu1 %7764  ;;  %7995 = vadd.xlane.f32.xlu0 %v7994_v36 }
0x1b27   : > { %v7825_v9 = vsub.f32 %v16198_v54, %v7765_v10  ;;  %v7833_v54 = vsub.f32 %v16230_v23, %v16355_v0 }
0x1b29   : > { %v7874_v4 = vmul.f32 1.442695, %v7825_v9  ;;  %v7890_v24 = vmul.f32 1.442695, %v7833_v54 }
0x1b2a   : > { %7947 = vadd.xlane.f32.xlu0 %v7946_v43  ;;  %v7795_v62 = vpop.xlane.xlu1 %7794 }
0x1b2b   : > { %12672 = vpow2.f32 %v7874_v4  ;;  %v7835_v42 = vsub.f32 %v16236_v53, %v7795_v62 }
0x1b2c   : > { %12674 = vpow2.f32 %v7878_v16 }
0x1b2d   : > { %12676 = vpow2.f32 %v7882_v44  ;;  %v7894_v19 = vmul.f32 1.442695, %v7835_v42  ;;  %v12826_v42 = vld [vmem:[%s16908_s18 + $0x18] sm:$0xff] }
0x1b2e   : > { %v7801_v18 = vpop.xlane.xlu1 %7800  ;;  %12678 = vpow2.f32 %v7886_v7 }
0x1b2f   : > { %12680 = vpow2.f32 %v7890_v24  ;;  %v7837_v22 = vsub.f32 %v16242_v17, %v7801_v18 }
0x1b30   : > { %12682 = vpow2.f32 %v7894_v19 }
0x1b31   : > { %v7898_v53 = vmul.f32 1.442695, %v7837_v22 }
0x1b32   : > { %v7807_v23 = vpop.xlane.xlu1 %7806 }
0x1b33   : > { %v7839_v27 = vsub.f32 %v16248_v1, %v7807_v23  ;;  %12684 = vpow2.f32 %v7898_v53 }
0x1b35   : > { %v12673_v14 = vpop.eup %12672  ;;  %v7902_v17 = vmul.f32 1.442695, %v7839_v27 }
0x1b36   : > { %11482 = vmatmul.mubr.msk.f32.gmra.mrb[220].mxu0 %vm1568_vm1, %v12673_v14  ;;  %v7955_v12 = vsel %vm1568_vm1, %v12673_v14, 0.0  ;;  %v12675_v41 = vpop.eup %12674 }
0x1b37   : > { %11484 = vmatprep.mubr.msk.f32.mxu0 %vm1568_vm1, %v16360_v60  ;;  %7956 = vadd.xlane.f32.xlu1 %v7955_v12  ;;  %v7961_v38 = vsel %vm1568_vm1, %v12675_v41, 0.0  ;;  %v12677_v29 = vpop.eup %12676  ;;  %12686 = vpow2.f32 %v7902_v17 }
0x1b38   : > { %v7967_v0 = vsel %vm1568_vm1, %v12677_v29, 0.0  ;;  %v12679_v39 = vpop.eup %12678 }
0x1b39   : > { %v7973_v60 = vsel %vm1568_vm1, %v12679_v39, 0.0  ;;  %v12681_v51 = vpop.eup %12680 }
0x1b3a   : > { %11485 = vmatmul.mubr.msk.f32.gmra.mrb[222].mxu0 %vm1568_vm1, %v12675_v41  ;;  %v7979_v1 = vsel %vm1568_vm1, %v12681_v51, 0.0  ;;  %v12683_v11 = vpop.eup %12682 }
0x1b3b   : > { %11487 = vmatprep.mubr.msk.f32.mxu0 %vm1568_vm1, %v16371_v49  ;;  %7962 = vadd.xlane.f32.xlu1 %v7961_v38  ;;  %v7985_v55 = vsel %vm1568_vm1, %v12683_v11, 0.0  ;;  %v12827_v38 = vld [vmem:[%s16908_s18 + $0x10] sm:$0xff] }
0x1b3d   : > { %v12685_v50 = vpop.eup %12684 }
0x1b3e   : > { %11488 = vmatmul.mubr.msk.f32.gmra.mrb[224].mxu0 %vm1568_vm1, %v12677_v29  ;;  %v7991_v8 = vsel %vm1568_vm1, %v12685_v50, 0.0 }
0x1b3f   : > { %11490 = vmatprep.mubr.msk.f32.mxu0 %vm1568_vm1, %v16380_v46  ;;  %7968 = vadd.xlane.f32.xlu1 %v7967_v0 }
0x1b41   : > { %v12687_v49 = vpop.eup %12686 }
0x1b42   : > { %11491 = vmatmul.mubr.msk.f32.gmra.mrb[226].mxu0 %vm1568_vm1, %v12679_v39  ;;  %v7997_v26 = vsel %vm1568_vm1, %v12687_v49, 0.0 }
0x1b43   : > { %11493 = vmatprep.mubr.msk.f32.mxu0 %vm1568_vm1, %v16392_v47  ;;  %7974 = vadd.xlane.f32.xlu1 %v7973_v60  ;;  %v12828_v60 = vld [vmem:[%s16908_s18 + $0x28] sm:$0xff] }
0x1b46   : > { %11494 = vmatmul.mubr.msk.f32.gmra.mrb[228].mxu0 %vm1568_vm1, %v12681_v51 }
0x1b47   : > { %11496 = vmatprep.mubr.msk.f32.mxu0 %vm1568_vm1, %v16401_v6  ;;  %7980 = vadd.xlane.f32.xlu1 %v7979_v1 }
0x1b4a   : > { %11497 = vmatmul.mubr.msk.f32.gmra.mrb[230].mxu0 %vm1568_vm1, %v12683_v11 }
0x1b4b   : > { %11499 = vmatprep.mubr.msk.f32.mxu0 %vm1568_vm1, %v16405_v13  ;;  %7986 = vadd.xlane.f32.xlu1 %v7985_v55 }
0x1b4e   : > { %11500 = vmatmul.mubr.msk.f32.gmra.mrb[232].mxu0 %vm1568_vm1, %v12685_v50  ;;  %v12829_v50 = vld [vmem:[%s16908_s18 + $0x20] sm:$0xff] }
0x1b4f   : > { %7992 = vadd.xlane.f32.xlu1 %v7991_v8  ;;  %11502 = vmatprep.mubr.msk.f32.mxu0 %vm1568_vm1, %v16409_v31 }
0x1b52   : > { %11503 = vmatmul.mubr.msk.f32.gmra.mrb[234].mxu0 %vm1568_vm1, %v12687_v49 }
0x1b53   : > { %7998 = vadd.xlane.f32.xlu1 %v7997_v26 }
0x1b57   : > { %7950 = vadd.xlane.f32.xlu1 %v7949_v25 }
0x1b63   : > { %v7909_v45 = vpop.xlane.xlu1 %7908 }
0x1b64   : > { %12688 = vrcp.f32 %v7909_v45 }
0x1b67   : > { %v7906_v58 = vpop.xlane.xlu0 %7905 }
0x1b68   : > { %12690 = vrcp.f32 %v7906_v58 }
0x1b6b   : > { %v7915_v57 = vpop.xlane.xlu1 %7914 }
0x1b6c   : > { %12692 = vrcp.f32 %v7915_v57 }
0x1b6e   : > { %v12689_v44 = vpop.eup %12688 }
0x1b6f   : > { %v7912_v32 = vpop.xlane.xlu0 %7911 }
0x1b70   : > { %12694 = vrcp.f32 %v7912_v32 }
0x1b72   : > { %v12691_v7 = vpop.eup %12690 }
0x1b73   : > { %v7921_v52 = vpop.xlane.xlu1 %7920 }
0x1b74   : > { %12696 = vrcp.f32 %v7921_v52 }
0x1b76   : > { %v12693_v19 = vpop.eup %12692 }
0x1b77   : > { %v7918_v40 = vpop.xlane.xlu0 %7917 }
0x1b78   : > { %12698 = vrcp.f32 %v7918_v40 }
0x1b7a   : > { %v12695_v53 = vpop.eup %12694 }
0x1b7b   : > { %v7924_v46 = vpop.xlane.xlu0 %7923  ;;  %v7927_v15 = vpop.xlane.xlu1 %7926 }
0x1b7c   : > { %12700 = vrcp.f32 %v7927_v15 }
0x1b7d   : > { %12702 = vrcp.f32 %v7924_v46  ;;  %v12830_v46 = vld [vmem:[%s16908_s18 + $0x38] sm:$0xff] }
0x1b7e   : > { %v12697_v11 = vpop.eup %12696 }
0x1b7f   : > { %v7933_v35 = vpop.xlane.xlu1 %7932 }
0x1b80   : > { %12704 = vrcp.f32 %v7933_v35 }
0x1b82   : > { %v12699_v49 = vpop.eup %12698 }
0x1b83   : > { %v7930_v61 = vpop.xlane.xlu0 %7929 }
0x1b84   : > { %12706 = vrcp.f32 %v7930_v61 }
0x1b86   : > { %v12701_v57 = vpop.eup %12700 }
0x1b87   : > { %v7939_v20 = vpop.xlane.xlu1 %7938  ;;  %v12703_v35 = vpop.eup %12702 }
0x1b88   : > { %12708 = vrcp.f32 %v7939_v20 }
0x1b8b   : > { %v16467_v6 = vpop.xlane.xlu1 %7944 }
0x1b8c   : > { %v16458_v21 = vpop.xlane.xlu0 %7935 }
0x1b8d   : > { %12710 = vrcp.f32 %v16458_v21 }
0x1b8e   : > { %12712 = vrcp.f32 %v16467_v6 }
0x1b90   : > { %v16461_v3 = vpop.xlane.xlu0 %7941 }
0x1b91   : > { %12714 = vrcp.f32 %v16461_v3 }
0x1b94   : > { %v16463_v47 = vpop.xlane.xlu0 %7953 }
0x1b98   : > { %v16465_v5 = vpop.xlane.xlu0 %7959 }
0x1b9c   : > { %v16469_v59 = vpop.xlane.xlu0 %7965 }
0x1ba0   : > { %v16473_v30 = vpop.xlane.xlu0 %7971 }
0x1ba7   : > { %v16477_v56 = vpop.xlane.xlu0 %7977 }
0x1bab   : > { %v16483_v9 = vpop.xlane.xlu0 %7983 }
0x1baf   : > { %v16494_v22 = vpop.xlane.xlu0 %7989 }
0x1bb3   : > { %v16513_v58 = vpop.xlane.xlu0 %7995 }
0x1bc4   : > { %v16471_v13 = vpop.xlane.xlu1 %7956 }
0x1bc8   : > { %v16475_v31 = vpop.xlane.xlu1 %7962 }
0x1bcc   : > { %v16479_v36 = vpop.xlane.xlu1 %7968 }
0x1bd0   : > { %v16481_v10 = vpop.xlane.xlu1 %7974 }
0x1bd1   : > { %v11459_v16 = vpop.f32.mrb[204].mxu0 }
0x1bd2   : > { %v8392_v4 = vmul.f32 %v12824_v48, %v11459_v16  ;;  %v8232_v43 = vpop.f32.mrb[205].mxu0 }
0x1bd3   : > { %v8391_v62 = vmul.f32 %v12825_v2, %v8232_v43  ;;  %v12705_v2 = vpop.eup %12704 }
0x1bd4   : > { %v16487_v54 = vmul.f32 %v12689_v44, %v8392_v4  ;;  %v16489_v18 = vpop.xlane.xlu1 %7980  ;;  %v12832_v4 = vld [vmem:[%s16908_s18 + $0x48] sm:$0xff] }
0x1bd5   : > { %v16491_v14 = vmul.f32 %v12691_v7, %v8391_v62  ;;  %v11462_v24 = vpop.f32.mrb[206].mxu0  ;;  %v7948_v62 = vpop.xlane.xlu0 %7947 }
0x1bd6   : > { %v8394_v12 = vmul.f32 %v12826_v42, %v11462_v24  ;;  %v8242_v41 = vpop.f32.mrb[207].mxu0  ;;  %v12833_v24 = vld [vmem:[%s16908_s18 + $0x40] sm:$0xff] }
0x1bd7   : > { %v11887_v23 = vpack.c.bf16 %v16487_v54, %v16491_v14  ;;  %v8393_v29 = vmul.f32 %v12827_v38, %v8242_v41  ;;  %v12834_v38 = vld [vmem:[%s16908_s18 + $0x58] sm:$0xff]  ;;  %v12847_v14 = vld [vmem:[%s16908_s18 + $0xb0] sm:$0xff] }
0x1bd8   : > { %v16499_v27 = vmul.f32 %v12693_v19, %v8394_v12  ;;  %v16501_v0 = vpop.xlane.xlu1 %7986  ;;  %v12707_v12 = vpop.eup %12706 }
0x1bd9   : > { %v16503_v39 = vmul.f32 %v12695_v53, %v8393_v29  ;;  %v11465_v17 = vpop.f32.mrb[208].mxu0 }
0x1bda   : > { %v8396_v51 = vmul.f32 %v12828_v60, %v11465_v17  ;;  %v8252_v1 = vpop.f32.mrb[209].mxu0  ;;  %v12709_v17 = vpop.eup %12708 }
0x1bdb   : > { %v11891_v55 = vpack.c.bf16 %v16499_v27, %v16503_v39  ;;  %v8395_v8 = vmul.f32 %v12829_v50, %v8252_v1  ;;  %v12849_v39 = vld [vmem:[%s16908_s18 + $0xc0] sm:$0xff] }
0x1bdc   : > { %v16509_v26 = vmul.f32 %v12697_v11, %v8396_v51  ;;  %v16511_v25 = vpop.xlane.xlu1 %7992  ;;  %v12835_v51 = vld [vmem:[%s16908_s18 + $0x50] sm:$0xff]  ;;  %v12711_v11 = vpop.eup %12710 }
0x1bdd   : > { %v16515_v32 = vmul.f32 %v12699_v49, %v8395_v8  ;;  %v11468_v40 = vpop.f32.mrb[210].mxu0 }
0x1bde   : > { %v8398_v45 = vmul.f32 %v12830_v46, %v11468_v40  ;;  %v8262_v61 = vpop.f32.mrb[211].mxu0  ;;  %v12836_v40 = vld [vmem:[%s16908_s18 + $0x68] sm:$0xff] }
0x1bdf   : > { %v11895_v52 = vpack.c.bf16 %v16509_v26, %v16515_v32  ;;  %v8397_v15 = vmul.f32 %v12831_v34, %v8262_v61  ;;  %v12713_v61 = vpop.eup %12712  ;;  %v12837_v34 = vld [vmem:[%s16908_s18 + $0x60] sm:$0xff]  ;;  %v12851_v32 = vld [vmem:[%s16908_s18 + $0xd0] sm:$0xff] }
0x1be0   : > { %v16522_v20 = vmul.f32 %v12701_v57, %v8398_v45  ;;  %v16524_v16 = vpop.xlane.xlu1 %7998 }
0x1be1   : > { %v16527_v48 = vmul.f32 %v12703_v35, %v8397_v15  ;;  %v11471_v21 = vpop.f32.mrb[212].mxu0  ;;  %v12715_v35 = vpop.eup %12714 }
0x1be2   : > { %v8400_v43 = vmul.f32 %v12832_v4, %v11471_v21  ;;  %v8272_v44 = vpop.f32.mrb[213].mxu0 }
0x1be3   : > { %v11899_v7 = vpack.c.bf16 %v16522_v20, %v16527_v48  ;;  %v8399_v42 = vmul.f32 %v12833_v24, %v8272_v44  ;;  %v12838_v44 = vld [vmem:[%s16908_s18 + $0x78] sm:$0xff]  ;;  %v12853_v48 = vld [vmem:[%s16908_s18 + $0xe0] sm:$0xff] }
0x1be4   : > { %v16534_v41 = vmul.f32 %v12705_v2, %v8400_v43  ;;  %v7951_v6 = vpop.xlane.xlu1 %7950 }
0x1be5   : > { %v16536_v19 = vmul.f32 %v12707_v12, %v8399_v42  ;;  %12716 = vrcp.f32 %v7951_v6  ;;  %v11474_v3 = vpop.f32.mrb[214].mxu0  ;;  %v12839_v12 = vld [vmem:[%s16908_s18 + $0x70] sm:$0xff] }
0x1be6   : > { %12718 = vrcp.f32 %v7948_v62  ;;  %v8402_v29 = vmul.f32 %v12834_v38, %v11474_v3  ;;  %v8282_v53 = vpop.f32.mrb[215].mxu0 }
0x1be7   : > { %v11903_v60 = vpack.c.bf16 %v16534_v41, %v16536_v19  ;;  %v8401_v1 = vmul.f32 %v12835_v51, %v8282_v53  ;;  %12720 = vrcp.f32 %v16471_v13  ;;  %v12840_v51 = vld [vmem:[%s16908_s18 + $0x88] sm:$0xff]  ;;  %v12855_v19 = vld [vmem:[%s16908_s18 + $0xf0] sm:$0xff] }
0x1be8   : > { %v16542_v50 = vmul.f32 %v12709_v17, %v8402_v29  ;;  %12722 = vrcp.f32 %v16463_v47 }
0x1be9   : > { %v16544_v8 = vmul.f32 %v12711_v11, %v8401_v1  ;;  %v11477_v49 = vpop.f32.mrb[216].mxu0  ;;  %12724 = vrcp.f32 %v16475_v31 }
0x1bea   : > { %v8404_v46 = vmul.f32 %v12836_v40, %v11477_v49  ;;  %v8292_v45 = vpop.f32.mrb[217].mxu0  ;;  %12726 = vrcp.f32 %v16465_v5  ;;  %v12841_v40 = vld [vmem:[%s16908_s18 + $0x80] sm:$0xff]  ;;  %v12842_v5 = vld [vmem:[%s16908_s18 + $0x98] sm:$0xff] }
0x1beb   : > { %v11907_v57 = vpack.c.bf16 %v16542_v50, %v16544_v8  ;;  %v8403_v15 = vmul.f32 %v12837_v34, %v8292_v45  ;;  %12728 = vrcp.f32 %v16479_v36  ;;  %v12843_v34 = vld [vmem:[%s16908_s18 + $0x90] sm:$0xff] }
0x1bec   : > { %v16550_v21 = vmul.f32 %v12713_v61, %v8404_v46  ;;  %12730 = vrcp.f32 %v16469_v59 }
0x1bed   : > { %v16552_v4 = vmul.f32 %v12715_v35, %v8403_v15  ;;  %v11480_v43 = vpop.f32.mrb[218].mxu0  ;;  %12732 = vrcp.f32 %v16481_v10  ;;  %v12844_v10 = vld [vmem:[%s16908_s18 + $0xa8] sm:$0xff] }
0x1bee   : > { %v8406_v2 = vmul.f32 %v12838_v44, %v11480_v43  ;;  %v8302_v62 = vpop.f32.mrb[219].mxu0  ;;  %12734 = vrcp.f32 %v16473_v30 }
0x1bef   : > { %v12717_v24 = vpop.eup %12716  ;;  %v11911_v42 = vpack.c.bf16 %v16550_v21, %v16552_v4  ;;  %v8405_v6 = vmul.f32 %v12839_v12, %v8302_v62  ;;  %12736 = vrcp.f32 %v16489_v18 }
0x1bf0   : > { %v12719_v3 = vpop.eup %12718  ;;  %v16558_v38 = vmul.f32 %v12717_v24, %v8406_v2  ;;  %12738 = vrcp.f32 %v16477_v56  ;;  %v12846_v56 = vld [vmem:[%s16908_s18 + $0xb8] sm:$0xff] }
0x1bf1   : > { %v16560_v29 = vmul.f32 %v12719_v3, %v8405_v6  ;;  %v12721_v49 = vpop.eup %12720  ;;  %v12845_v6 = vld [vmem:[%s16908_s18 + $0xa0] sm:$0xff]  ;;  %12740 = vrcp.f32 %v16501_v0 }
0x1bf2   : > { %v12723_v13 = vpop.eup %12722  ;;  %12742 = vrcp.f32 %v16483_v9  ;;  %v12848_v9 = vld [vmem:[%s16908_s18 + $0xc8] sm:$0xff] }
0x1bf3   : > { %v11915_v53 = vpack.c.bf16 %v16558_v38, %v16560_v29  ;;  %v12725_v59 = vpop.eup %12724  ;;  %12744 = vrcp.f32 %v16511_v25 }
0x1bf4   : > { %v12727_v43 = vpop.eup %12726  ;;  %12746 = vrcp.f32 %v16494_v22  ;;  %v12850_v22 = vld [vmem:[%s16908_s18 + $0xd8] sm:$0xff] }
0x1bf5   : > { %v12729_v12 = vpop.eup %12728  ;;  %12748 = vrcp.f32 %v16524_v16 }
0x1bf6   : > { %12750 = vrcp.f32 %v16513_v58 }
0x1c09   : > { %v11483_v17 = vpop.f32.mrb[220].mxu0 }
0x1c0a   : > { %v8408_v1 = vmul.f32 %v12840_v51, %v11483_v17  ;;  %v8312_v11 = vpop.f32.mrb[221].mxu0  ;;  %v12731_v51 = vpop.eup %12730 }
0x1c0b   : > { %v8407_v46 = vmul.f32 %v12841_v40, %v8312_v11  ;;  %v12733_v54 = vpop.eup %12732 }
0x1c0c   : > { %v8440_v45 = vmul.f32 %v12721_v49, %v8408_v1 }
0x1c0d   : > { %v8439_v47 = vmul.f32 %v12723_v13, %v8407_v46  ;;  %v11486_v31 = vpop.f32.mrb[222].mxu0  ;;  %v12735_v13 = vpop.eup %12734 }
0x1c0e   : > { %v8410_v36 = vmul.f32 %v12842_v5, %v11486_v31  ;;  %v8322_v61 = vpop.f32.mrb[223].mxu0  ;;  %v12737_v27 = vpop.eup %12736 }
0x1c0f   : > { %v8409_v15 = vmul.f32 %v12843_v34, %v8322_v61  ;;  %v11885_v35 = vpack.c.bf16 %v8440_v45, %v8439_v47  ;;  %v12739_v61 = vpop.eup %12738 }
0x1c10   : > { %v8442_v44 = vmul.f32 %v12725_v59, %v8410_v36  ;;  %v12741_v26 = vpop.eup %12740 }
0x1c11   : > { %v8441_v2 = vmul.f32 %v12727_v43, %v8409_v15  ;;  %v11489_v62 = vpop.f32.mrb[224].mxu0  ;;  %11886 = vmatprep.subr.bf16.mxu1 %v11885_v35 }
0x1c12   : > { %v8412_v30 = vmul.f32 %v12844_v10, %v11489_v62  ;;  %v8332_v24 = vpop.f32.mrb[225].mxu0  ;;  %11888 = vmatpush3.bf16.msra.mxu1 %v11887_v23  ;;  %v12852_v10 = vld [vmem:[%s16908_s18 + $0xe8] sm:$0xff] }
0x1c13   : > { %v8411_v3 = vmul.f32 %v12845_v6, %v8332_v24  ;;  %v11889_v17 = vpack.c.bf16 %v8442_v44, %v8441_v2  ;;  %v12743_v44 = vpop.eup %12742 }
0x1c14   : > { %v8444_v18 = vmul.f32 %v12729_v12, %v8412_v30  ;;  %v12745_v20 = vpop.eup %12744 }
0x1c15   : > { %v8443_v1 = vmul.f32 %v12731_v51, %v8411_v3  ;;  %v11492_v11 = vpop.f32.mrb[226].mxu0  ;;  %11890 = vmatprep.subr.bf16.mxu1 %v11889_v17  ;;  %v12747_v12 = vpop.eup %12746  ;;  %v12854_v51 = vld [vmem:[%s16908_s18 + $0xf8] sm:$0xff] }
0x1c16   : > { %v8414_v49 = vmul.f32 %v12846_v56, %v11492_v11  ;;  %v8342_v40 = vpop.f32.mrb[227].mxu0  ;;  %11892 = vmatpush3.bf16.msra.mxu1 %v11891_v55  ;;  %v12749_v41 = vpop.eup %12748 }
0x1c17   : > { %v8413_v23 = vmul.f32 %v12847_v14, %v8342_v40  ;;  %v11893_v46 = vpack.c.bf16 %v8444_v18, %v8443_v1  ;;  %v12751_v56 = vpop.eup %12750  ;;  %v8534_v40 = vld [vmem:[%s16910_s22] sm:$0xff] }
0x1c18   : > { %v8446_v0 = vmul.f32 %v12733_v54, %v8414_v49  ;;  %v8535_v54 = vld [vmem:[%s16910_s22 + $0x8] sm:$0xff] }
0x1c19   : > { %v8445_v45 = vmul.f32 %v12735_v13, %v8413_v23  ;;  %v11495_v47 = vpop.f32.mrb[228].mxu0  ;;  %11894 = vmatprep.subr.bf16.mxu1 %v11893_v46  ;;  %v11917_v8 = vpack.c.bf16 %v8535_v54, %v8534_v40  ;;  %v8458_v23 = vld [vmem:[%s13863_s6 + $0x18] sm:$0xff]  ;;  %v8457_v46 = vld [vmem:[%s13863_s6 + $0x10] sm:$0xff] }
0x1c1a   : > { %v8416_v31 = vmul.f32 %v12848_v9, %v11495_v47  ;;  %v8352_v5 = vpop.f32.mrb[229].mxu0  ;;  %11896 = vmatpush3.bf16.msra.mxu1 %v11895_v52  ;;  %v8536_v13 = vld [vmem:[%s16910_s22 + $0x10] sm:$0xff] }
0x1c1b   : > { %v8415_v55 = vmul.f32 %v12849_v39, %v8352_v5  ;;  %v11897_v36 = vpack.c.bf16 %v8446_v0, %v8445_v45  ;;  %v8537_v0 = vld [vmem:[%s16910_s22 + $0x18] sm:$0xff] }
0x1c1c   : > { %v8448_v25 = vmul.f32 %v12737_v27, %v8416_v31  ;;  %v11921_v45 = vpack.c.bf16 %v8537_v0, %v8536_v13  ;;  %v8774_v13 = vld [vmem:[%s16912_s10 + $0x40] sm:$0xff]  ;;  %v8775_v0 = vld [vmem:[%s16912_s10 + $0x48] sm:$0xff] }
0x1c1d   : > { %v8447_v59 = vmul.f32 %v12739_v61, %v8415_v55  ;;  %v11498_v34 = vpop.f32.mrb[230].mxu0  ;;  %11898 = vmatprep.subr.bf16.mxu1 %v11897_v36 }
0x1c1e   : > { %v8418_v15 = vmul.f32 %v12850_v22, %v11498_v34  ;;  %v8362_v35 = vpop.f32.mrb[231].mxu0  ;;  %11900 = vmatpush3.bf16.msra.mxu1 %v11899_v7 }
0x1c1f   : > { %v8417_v52 = vmul.f32 %v12851_v32, %v8362_v35  ;;  %v11901_v43 = vpack.c.bf16 %v8448_v25, %v8447_v59 }
0x1c20   : > { %v8450_v16 = vmul.f32 %v12741_v26, %v8418_v15 }
0x1c21   : > { %v8449_v2 = vmul.f32 %v12743_v44, %v8417_v52  ;;  %v11501_v62 = vpop.f32.mrb[232].mxu0  ;;  %11902 = vmatprep.subr.bf16.mxu1 %v11901_v43  ;;  %v8672_v52 = vld [vmem:[#allocation31] sm:$0xff]  ;;  %v8673_v43 = vld [vmem:[#allocation31 + $0x8] sm:$0xff] }
0x1c22   : > { %v8420_v58 = vmul.f32 %v12852_v10, %v11501_v62  ;;  %v8372_v30 = vpop.f32.mrb[233].mxu0  ;;  %11904 = vmatpush3.bf16.msra.mxu1 %v11903_v60  ;;  %v11925_v44 = vpack.c.bf16 %v8673_v43, %v8672_v52  ;;  %v8766_v10 = vld [vmem:[%s16911_s7] sm:$0xff]  ;;  %v9953_v52 = vld [vmem:[%s16848_s2 + $0x268] sm:$0xff]  ;;  %s16913_s7 = smov 64  }
0x1c23   : > { %v8419_v7 = vmul.f32 %v12853_v48, %v8372_v30  ;;  %v11905_v24 = vpack.c.bf16 %v8450_v16, %v8449_v2  ;;  %v8674_v16 = vld [vmem:[#allocation31 + $0x10] sm:$0xff]  ;;  %v8675_v2 = vld [vmem:[#allocation31 + $0x18] sm:$0xff] }
0x1c24   : > { %v8452_v6 = vmul.f32 %v12745_v20, %v8420_v58  ;;  %v11929_v62 = vpack.c.bf16 %v8675_v2, %v8674_v16  ;;  %v8767_v58 = vld [vmem:[%s16912_s10 + $0x8] sm:$0xff]  ;;  %v9955_v16 = vld [vmem:[%s16848_s2 + $0x278] sm:$0xff]  ;;  %v9956_v2 = vld [vmem:[%s16848_s2 + $0x280] sm:$0xff] }
0x1c25   : > { %v8451_v3 = vmul.f32 %v12747_v12, %v8419_v7  ;;  %v11504_v17 = vpop.f32.mrb[234].mxu0  ;;  %11906 = vmatprep.subr.bf16.mxu1 %v11905_v24  ;;  %v11933_v30 = vpack.c.bf16 %v8767_v58, %v8766_v10  ;;  %v9947_v58 = vld [vmem:[#allocation34] ss:$0 sm:$0xff] }
0x1c26   : > { %v8422_v18 = vmul.f32 %v12854_v51, %v11504_v17  ;;  %v8382_v1 = vpop.f32.mrb[235].mxu0  ;;  %11908 = vmatpush3.bf16.msra.mxu1 %v11907_v57  ;;  %v8455_v57 = vld [vmem:[%s13863_s6] sm:$0xff] }
0x1c27   : > { %v8421_v60 = vmul.f32 %v12855_v19, %v8382_v1  ;;  %v11909_v11 = vpack.c.bf16 %v8452_v6, %v8451_v3  ;;  %v9942_v17 = vld [vmem:[#allocation28] ss:$0 sm:$0xff] }
0x1c28   : > { %v8454_v49 = vmul.f32 %v12749_v41, %v8422_v18  ;;  %v9943_v41 = vld [vmem:[#allocation30] ss:$0 sm:$0xff] }
0x1c29   : > { %v8453_v14 = vmul.f32 %v12751_v56, %v8421_v60  ;;  %11910 = vmatprep.subr.bf16.mxu1 %v11909_v11  ;;  %v8768_v11 = vld [vmem:[%s16912_s10 + $0x10] sm:$0xff]  ;;  %v8769_v56 = vld [vmem:[%s16912_s10 + $0x18] sm:$0xff] }
0x1c2a   : > { %11912 = vmatpush3.bf16.msra.mxu1 %v11911_v42  ;;  %v11937_v54 = vpack.c.bf16 %v8769_v56, %v8768_v11 }
0x1c2b   : > { %v11913_v50 = vpack.c.bf16 %v8454_v49, %v8453_v14  ;;  %v8770_v14 = vld [vmem:[%s16912_s10 + $0x20] sm:$0xff] }
0x1c2d   : > { %11914 = vmatprep.subr.bf16.mxu1 %v11913_v50  ;;  %v8771_v50 = vld [vmem:[%s16912_s10 + $0x28] sm:$0xff] }
0x1c2e   : > { %11916 = vmatpush3.bf16.msra.mxu1 %v11915_v53  ;;  %v9939_v53 = vld [vmem:[#allocation27] ss:$0 sm:$0xff] }
0x1c2f   : > { %11918 = vmatprep.subr.bf16.mxu1 %v11917_v8 }
0x1c31   : > { %8524 = vmatmul.mubr.f32.vlgmr.msra.gmra.mrb[188].mxu1 %v8455_v57  ;;  %v8772_v57 = vld [vmem:[%s16912_s10 + $0x30] sm:$0xff] }
0x1c32   : > { %8528 = vmatprep.mubr.f32.mxu1 %v8458_v23  ;;  %11920 = vmatpush3.bf16.msra.mxu1 %v11917_v8  ;;  %v11941_v8 = vpack.c.bf16 %v8771_v50, %v8770_v14  ;;  %v8773_v23 = vld [vmem:[%s16912_s10 + $0x38] sm:$0xff]  ;;  %v9021_v50 = vld [vmem:[%s13868_s12] sm:$0xff] }
0x1c33   : > { %11922 = vmatprep.subr.bf16.mxu1 %v11921_v45 }
0x1c35   : > { %8529 = vmatmul.mubr.f32.gmra.mrb[190].mxu1 %v8457_v46  ;;  %v11945_v46 = vpack.c.bf16 %v8773_v23, %v8772_v57  ;;  %v9023_v23 = vld [vmem:[%s13868_s12 + $0x10] sm:$0xff] }
0x1c36   : > { %11924 = vmatpush3.bf16.msra.mxu1 %v11921_v45  ;;  %v11949_v45 = vpack.c.bf16 %v8775_v0, %v8774_v13 }
0x1c37   : > { %11926 = vmatprep.subr.bf16.mxu1 %v11925_v44 }
0x1d04   : > { %v10582_v21 = vpop.f32.mrb[188].mxu1 }
0x1d05   : > { %v10583_v4 = vpop.f32.mrb[189].mxu1 }
0x1d06   : > { %v10584_v42 = vadd.f32 %v10583_v4, %v10582_v21  ;;  %v8776_v21 = vld [vmem:[%s16912_s10 + $0x50] sm:$0xff]  ;;  %v8777_v4 = vld [vmem:[%s16912_s10 + $0x58] sm:$0xff] }
0x1d08   : > { %v10585_v47 = vpop.f32.mrb[190].mxu1  ;;  %11513 = vmatprep.mubr.msk.f32.mxu1 %vm1758_vm4, %v10584_v42  ;;  %v11953_v42 = vpack.c.bf16 %v8777_v4, %v8776_v21 }
0x1d09   : > { %v10586_v38 = vpop.f32.mrb[191].mxu1 }
0x1d0a   : > { %v10587_v29 = vadd.f32 %v10586_v38, %v10585_v47  ;;  %v8778_v47 = vld [vmem:[%s16912_s10 + $0x60] sm:$0xff]  ;;  %v8779_v38 = vld [vmem:[%s16912_s10 + $0x68] sm:$0xff] }
0x1d0c   : > { %11514 = vmatmul.mubr.msk.f32.vlgmr.msra.gmra.mrb[192].mxu1 %vm1758_vm4, %v10587_v29  ;;  %v11957_v29 = vpack.c.bf16 %v8779_v38, %v8778_v47 }
0x1d0d   : > { %11928 = vmatpush3.bf16.msra.mxu1 %v11925_v44  ;;  %v9954_v44 = vld [vmem:[%s16848_s2 + $0x270] sm:$0xff] }
0x1d0e   : > { %11930 = vmatprep.subr.bf16.mxu1 %v11929_v62 }
0x1d11   : > { %11932 = vmatpush3.bf16.msra.mxu1 %v11929_v62  ;;  %v9957_v62 = vld [vmem:[%s16848_s2 + $0x288] sm:$0xff] }
0x1d12   : > { %11934 = vmatprep.subr.bf16.mxu1 %v11933_v30  ;;  %v11981_v10 = vpack.c.bf16 %v9957_v62, %v9956_v2 }
0x1ddf   : > { %v11515_v9 = vpop.f32.mrb[192].mxu1 }
0x1de0   : > { %v8623_v31 = vadd.f32 %v11515_v9, %v9939_v53  ;;  %v8617_v5 = vpop.f32.mrb[193].mxu1  ;;  %v8781_v9 = vld [vmem:[%s16912_s10 + $0x78] sm:$0xff] }
0x1de1   : > { %v8618_v27 = vadd.f32 %v9939_v53, %v8617_v5  ;;  %v8780_v53 = vld [vmem:[%s16912_s10 + $0x70] sm:$0xff]  ;;  %v9944_v5 = vld [vmem:[#allocation33] ss:$0 sm:$0xff] }
0x1de2   : > { %v16630_v39 = vadd.f32 %v8623_v31, %v16020_v37  ;;  %v11961_v31 = vpack.c.bf16 %v8781_v9, %v8780_v53  ;;  %v9963_v53 = vld [vmem:[#allocation6 + $0x6] ss:$0 sm:$0xff] }
0x1de3   : > { %v16633_v55 = vadd.f32 %v8618_v27, %v16022_v63 }
0x1de4   : > { %v8633_v36 = vsel %vm1758_vm4, %v16630_v39, 0.0 }
0x1de5   : > { %8634 = vadd.xlane.f32.xlu1 %v8633_v36  ;;  %v8630_v61 = vsel %vm1758_vm4, %v16633_v55, 0.0 }
0x1de6   : > { %8631 = vadd.xlane.f32.xlu0 %v8630_v61 }
0x1e72   : > { %v8635_v25 = vpop.xlane.xlu1 %8634 }
0x1e73   : > { %v8637_v59 = vmul.f32 0.03125, %v8635_v25  ;;  %v8632_v34 = vpop.xlane.xlu0 %8631 }
0x1e74   : > { %v8636_v22 = vmul.f32 0.03125, %v8632_v34 }
0x1e75   : > { %v8639_v15 = vsub.f32 %v16630_v39, %v8637_v59 }
0x1e76   : > { %v8638_v37 = vsub.f32 %v16633_v55, %v8636_v22  ;;  %v9948_v22 = vld [vmem:[%s16848_s2 + $0x240] sm:$0xff] }
0x1e77   : > { %v8641_v35 = vmul.f32 %v8639_v15, %v8639_v15 }
0x1e78   : > { %v8640_v63 = vmul.f32 %v8638_v37, %v8638_v37 }
0x1e79   : > { %v8645_v26 = vsel %vm1758_vm4, %v8641_v35, 0.0 }
0x1e7a   : > { %8646 = vadd.xlane.f32.xlu1 %v8645_v26  ;;  %v8642_v32 = vsel %vm1758_vm4, %v8640_v63, 0.0  ;;  %v9951_v63 = vld [vmem:[%s16848_s2 + $0x258] sm:$0xff] }
0x1e7b   : > { %8643 = vadd.xlane.f32.xlu0 %v8642_v32  ;;  %v9952_v32 = vld [vmem:[%s16848_s2 + $0x260] sm:$0xff] }
0x1e7c   : > { %v11973_v43 = vpack.c.bf16 %v9953_v52, %v9952_v32 }
0x1f07   : > { %v8647_v20 = vpop.xlane.xlu1 %8646 }
0x1f08   : > { %v8649_v48 = vmul.f32 0.03125, %v8647_v20  ;;  %v8644_v7 = vpop.xlane.xlu0 %8643  ;;  %v9959_v20 = vld [vmem:[%s16848_s2 + $0x298] sm:$0xff] }
0x1f09   : > { %v8648_v24 = vmul.f32 0.03125, %v8644_v7 }
0x1f0a   : > { %v8651_v12 = vadd.f32 1e-06, %v8649_v48 }
0x1f0b   : > { %v8650_v6 = vadd.f32 1e-06, %v8648_v24 }
0x1f0c   : > { %12752 = vrsqrt.f32 %v8651_v12 }
0x1f0d   : > { %12754 = vrsqrt.f32 %v8650_v6 }
0x1f16   : > { %v12753_v3 = vpop.eup %12752 }
0x1f17   : > { %v12755_v51 = vpop.eup %12754  ;;  %v8655_v18 = vmul.f32 %v12753_v3, %v8639_v15  ;;  %v9949_v15 = vld [vmem:[%s16848_s2 + $0x248] sm:$0xff] }
0x1f18   : > { %v8654_v1 = vmul.f32 %v12755_v51, %v8638_v37  ;;  %v9950_v37 = vld [vmem:[%s16848_s2 + $0x250] sm:$0xff]  ;;  %v11965_v35 = vpack.c.bf16 %v9949_v15, %v9948_v22 }
0x1f19   : > { %v8663_v19 = vmul.f32 %v9942_v17, %v8655_v18  ;;  %v11969_v26 = vpack.c.bf16 %v9951_v63, %v9950_v37 }
0x1f1a   : > { %v8662_v60 = vmul.f32 %v9942_v17, %v8654_v1  ;;  %11966 = vmatprep.subr.bf16.mxu0 %v11965_v35 }
0x1f1b   : > { %v8671_v40 = vadd.f32 %v9943_v41, %v8663_v19  ;;  %11968 = vmatpush3.bf16.msra.mxu0 %v11965_v35 }
0x1f1c   : > { %v8670_v49 = vadd.f32 %v9943_v41, %v8662_v60  ;;  %11970 = vmatprep.subr.bf16.mxu0 %v11969_v26 }
0x1f1e   : > { %11524 = vmatprep.mubr.msk.f32.mxu1 %vm1758_vm4, %v8670_v49 }
0x1f1f   : > { %11525 = vmatmul.mubr.msk.f32.vlgmr.msra.gmra.mrb[194].mxu1 %vm1758_vm4, %v8671_v40  ;;  %11972 = vmatpush3.bf16.msra.mxu0 %v11969_v26 }
0x1f20   : > { %11936 = vmatpush3.bf16.msra.mxu1 %v11933_v30  ;;  %11974 = vmatprep.subr.bf16.mxu0 %v11973_v43  ;;  %v9958_v30 = vld [vmem:[%s16848_s2 + $0x290] sm:$0xff] }
0x1f21   : > { %11938 = vmatprep.subr.bf16.mxu1 %v11937_v54  ;;  %v11985_v48 = vpack.c.bf16 %v9959_v20, %v9958_v30 }
0x1f23   : > { %11976 = vmatpush3.bf16.msra.mxu0 %v11973_v43 }
0x1f24   : > { %11940 = vmatpush3.bf16.msra.mxu1 %v11937_v54 }
0x1f25   : > { %11942 = vmatprep.subr.bf16.mxu1 %v11941_v8 }
0x1f28   : > { %11944 = vmatpush3.bf16.msra.mxu1 %v11941_v8  ;;  %v9022_v8 = vld [vmem:[%s13868_s12 + $0x8] sm:$0xff] }
0x1f29   : > { %11946 = vmatprep.subr.bf16.mxu1 %v11945_v46  ;;  %v11990_v57 = vpack.c.bf16 %v9022_v8, %v9021_v50 }
0x1f2c   : > { %11948 = vmatpush3.bf16.msra.mxu1 %v11945_v46  ;;  %v9024_v46 = vld [vmem:[%s13868_s12 + $0x18] sm:$0xff] }
0x1f2d   : > { %11950 = vmatprep.subr.bf16.mxu1 %v11949_v45  ;;  %v11993_v13 = vpack.c.bf16 %v9024_v46, %v9023_v23 }
0x1f30   : > { %11952 = vmatpush3.bf16.msra.mxu1 %v11949_v45 }
0x1f31   : > { %11954 = vmatprep.subr.bf16.mxu1 %v11953_v42 }
0x1f34   : > { %11956 = vmatpush3.bf16.msra.mxu1 %v11953_v42  ;;  %v9962_v42 = vld [vmem:[#allocation4 + $0x6] ss:$0 sm:$0xff] }
0x1f35   : > { %11958 = vmatprep.subr.bf16.mxu1 %v11957_v29 }
0x1f38   : > { %11960 = vmatpush3.bf16.msra.mxu1 %v11957_v29 }
0x1f39   : > { %11962 = vmatprep.subr.bf16.mxu1 %v11961_v31 }
0x1f3c   : > { %11964 = vmatpush3.bf16.msra.mxu1 %v11961_v31  ;;  %v9964_v31 = vld [vmem:[#allocation7 + $0x6] ss:$0 sm:$0xff] }
0x1f3d   : > { %11989 = vmatprep.subr.bf16.mxu1 %v16897_v33 }
0x1ff2   : > { %v11526_v27 = vpop.f32.mrb[194].mxu1 }
0x1ff3   : > { %v8761_v36 = vadd.f32 %v11526_v27, %v9944_v5  ;;  %v8755_v61 = vpop.f32.mrb[195].mxu1  ;;  %v9965_v27 = vld [vmem:[#allocation37] ss:$0 sm:$0xff] }
0x1ff4   : > { %v8756_v25 = vadd.f32 %v9944_v5, %v8755_v61 }
0x1ff5   : > { %v8765_v34 = vmax.f32 %v8761_v36, 0.0 }
0x1ff6   : > { %v8764_v59 = vmax.f32 %v8756_v25, 0.0 }
0x1ff8   : > { %11559 = vmatprep.mubr.f32.mxu1 %v8764_v59 }
0x1ff9   : > { %11560 = vmatmul.mubr.f32.vlgmr.msra.gmra.mrb[196].mxu1 %v8765_v34 }
0x1ffa   : > { %11597 = vmatprep.mubr.msk.f32.mxu1 %vm13660_vm0, %v16898_v28  ;;  %v11977_v28 = vpack.c.bf16 %v9955_v16, %v9954_v44  ;;  %11991 = vmatpush3.bf16.msra.mxu1 %v11990_v57 }
0x1ffb   : > { %11992 = vmatprep.subr.bf16.mxu1 %v16897_v33 }
0x1ffc   : > { %11978 = vmatprep.subr.bf16.mxu0 %v11977_v28 }
0x1ffd   : > { %11980 = vmatpush3.bf16.msra.mxu0 %v11977_v28 }
0x1ffe   : > { %11982 = vmatprep.subr.bf16.mxu0 %v11981_v10  ;;  %11994 = vmatpush3.bf16.msra.mxu1 %v11993_v13 }
0x2001   : > { %11984 = vmatpush3.bf16.msra.mxu0 %v11981_v10 }
0x2002   : > { %11986 = vmatprep.subr.bf16.mxu0 %v11985_v48 }
0x2005   : > { %11988 = vmatpush3.bf16.msra.mxu0 %v11985_v48 }
0x20cc   : > { %v11561_v7 = vpop.f32.mrb[196].mxu1 }
0x20cd   : > { %v8861_v24 = vadd.f32 %v11561_v7, %v9947_v58  ;;  %v8855_v12 = vpop.f32.mrb[197].mxu1 }
0x20ce   : > { %v8856_v6 = vadd.f32 %v9947_v58, %v8855_v12 }
0x20cf   : > { %v8865_v3 = vadd.f32 %v8861_v24, %v16630_v39 }
0x20d0   : > { %v8864_v17 = vadd.f32 %v8856_v6, %v16633_v55 }
0x20d1   : > { %v8869_v51 = vrot.slane %v8865_v3, 3  ;;  %v8878_v18 = vrot.slane %v8865_v3, 6 }
0x20d2   : > { %v8868_v1 = vrot.slane %v8864_v17, 3  ;;  %v8877_v41 = vrot.slane %v8864_v17, 6 }
0x20d3   : > { %8873 = vrot.lane.b32.xlu1 %v8869_v51, %s13662_s9 }
0x20d4   : > { %v8870_v19 = vsel %vm6300_vm11, %v8868_v1, %v8869_v51  ;;  %v8879_v60 = vsel %vm2917_vm9, %v8877_v41, %v8878_v18 }
0x20d5   : > { %8871 = vrot.lane.b32.xlu0 %v8870_v19, %s13662_s9  ;;  %s9486_s9 = sshll.u32 %s16916_s11, 2 }
0x20d7   : > { %8880 = vrot.lane.b32.xlu1 %v8879_v60, %s16913_s7 }
0x20db   : > { %8882 = vrot.lane.b32.xlu1 %v8878_v18, %s16913_s7  ;;  %s1553_s7 = scalar_lea.vmem %s13878_s21, %s9486_s9 }
0x2145   : > { %v8874_v39 = vpop.permute.xlu1 %8873 }
0x2146   : > { %v8887_v40 = vsel %vm1758_vm4, %v8865_v3, %v8874_v39 }
0x2147   : > { %v8872_v55 = vpop.permute.xlu0 %8871 }
0x2148   : > { %v8886_v11 = vsel %vm1758_vm4, %v8864_v17, %v8872_v55 }
0x2149   : > { %v8881_v56 = vpop.permute.xlu1 %8880 }
0x214a   : > { %v8888_v49 = vsel %vm1764_vm5, %v8886_v11, %v8881_v56 }
0x214b   : > { %11586 = vmatprep.mubr.msk.f32.mxu0 %vm1789_vm6, %v8888_v49 }
0x214d   : > { %v8883_v54 = vpop.permute.xlu1 %8882 }
0x214e   : > { %v8889_v14 = vsel %vm1764_vm5, %v8887_v40, %v8883_v54 }
0x214f   : > { %11587 = vmatmul.mubr.msk.f32.vlgmr.msra.gmra.mrb[236].mxu0 %vm1789_vm6, %v8889_v14 }
0x2222   : > { %v11588_v0 = vpop.f32.mrb[236].mxu0 }
0x2223   : > { %v8975_v45 = vpop.f32.mrb[237].mxu0  ;;  %v8988_v4 = vrot.slane %v11588_v0, 6 }
0x2224   : > { %v8985_v21 = vrot.slane %v8975_v45, 3 }
0x2226   : > { %v8991_v47 = vsel %vm8990_vm12, %v8975_v45, %v8985_v21 }
0x2227   : > { %v8992_v38 = vsel %vm2917_vm9, %v8991_v47, %v8988_v4 }
0x2228   : > { %v9001_v29 = vadd.f32 %v9962_v42, %v8992_v38 }
0x222a   : > { %v9002_v9 = vmax.f32 %v9001_v29, 0.0 }
0x222c   : > { %v9011_v33 = vmul.f32 %v9963_v53, %v9002_v9 }
0x222e   : > { %v9020_v5 = vadd.f32 %v9964_v31, %v9011_v33 }
0x2230   : > { %11598 = vmatmul.mubr.msk.f32.vlgmr.msra.gmra.mrb[198].mxu1 %vm1758_vm4, %v9020_v5 }
0x2303   : > { %v9101_v36 = vpop.f32.mrb[198].mxu1 }
0x2304   : > { %v9102_v61 = vadd.f32 %v9965_v27, %v9101_v36  ;;  %v11599_v25 = vpop.f32.mrb[199].mxu1 }
0x2306   : > { %9106 = vst.msk [vmem:[%s1553_s7] sm:$0x7] %vm9105_vm13, %v9102_v61 }
0x2307 PF: > { %s16914_s0 = sld [smem:[#allocation81_spill]] }
0x230d   : > { %s106_s7 = sadd.s32 1, %s16914_s0  }
0x230e   : > { %p103_p2 = scmp.ge.s32.totalorder %s106_s7, 4  }
0x2310   :  { %105 = sbr.rel (!%p103_p2) target bundleno = 88 (0x58), region = 376 }
0x2317   :  { %9126 = vsyncpa [#allocation3], 1 }
0x2318   :  { %9128 = vsyncpa [#allocation3 + $0x1], 1 }
0x2319   :  { %9129 = vsyncpa [#allocation5], 1 }
0x231a   :  { %9130 = vsyncpa [#allocation8], 1 }
0x231b   :  { %9131 = vsyncpa [#allocation11], 1 }
0x231c   :  { %9132 = vsyncpa [#allocation14], 1 }
0x231d   :  { %9133 = vsyncpa [#allocation17], 1 }
0x231e   :  { %9134 = vsyncpa [#allocation20], 1 }
0x231f   :  { %9135 = vsyncpa [#allocation23], 1 }
0x2320   :  { %9136 = vsyncpa [#allocation26], 1 }
0x2321   :  { %9137 = vsyncpa [#allocation29], 1 }
0x2322   :  { %9138 = vsyncpa [#allocation32], 1 }
0x2323   :  { %9139 = vsyncpa [#allocation35], 1 }
0x2324   :  { %9140 = vsyncpa [#allocation38], 1 }

</bundles_post_ra>
